<compile_context>
chip_gen: v7x
topology: tpu7x:2x2x1
jax: 0.10.0
libtpu: 0.0.40
codegen_flags: <defaults>
</compile_context>

<pallas_src>
import functools

import jax
import jax.numpy as jnp
from jax.experimental import pallas as pl
from jax.experimental.pallas import tpu as pltpu


_NEG_BIG = -1.0e30                      # finite "-inf" for masked log_softmax
_VMEM_LIMIT_BYTES = 48 * 1024 * 1024    # safe on v7x (64 MiB) and v5e/v6e


# ------------------------------ shared epilogue ------------------------------
def _epilogue(h, apply_relu, apply_log_softmax, num_valid):
    """bias already added; optional ReLU or lane-masked log_softmax (f32)."""
    if apply_relu:
        h = jnp.maximum(h, 0.0)
    if apply_log_softmax:
        # Padded class lanes (>= num_valid) carry zero logits from zero-padded
        # weights; mask them out of the normalization.
        lane = jax.lax.broadcasted_iota(jnp.int32, h.shape, 1)
        valid = lane < num_valid
        h = jnp.where(valid, h, _NEG_BIG)
        m = jnp.max(h, axis=-1, keepdims=True)
        z = h - m
        lse = jnp.log(jnp.sum(jnp.exp(z), axis=-1, keepdims=True))
        h = jnp.where(valid, z - lse, 0.0)
    return h


# -------------------------------- kernels ------------------------------------
def transform_kernel(x_ref, w_ref, o_ref):
    """T = X @ W, single contraction step (feature dims are small), bf16 out."""
    o_ref[...] = jnp.dot(x_ref[...], w_ref[...],
                         preferred_element_type=jnp.float32).astype(o_ref.dtype)


def aggregate_kernel(a_ref, t_ref, bias_ref, o_ref, acc_ref, *,
                     tk, apply_relu, apply_log_softmax, num_valid):
    """O = act(A @ T + b).  T is fully VMEM-resident (constant block index);
    the contraction over nodes is tiled along the grid's last axis."""
    k = pl.program_id(1)

    @pl.when(k == 0)
    def _():
        acc_ref[...] = jnp.zeros_like(acc_ref)

    start = pl.multiple_of(k * tk, tk)
    acc_ref[...] += jnp.dot(a_ref[...], t_ref[pl.ds(start, tk), :],
                            preferred_element_type=jnp.float32)

    @pl.when(k == pl.num_programs(1) - 1)
    def _():
        h = acc_ref[...] + bias_ref[...]                 # (tm, n) + (1, n), f32
        h = _epilogue(h, apply_relu, apply_log_softmax, num_valid)
        o_ref[...] = h.astype(o_ref.dtype)


def aggregate_transform_kernel(a_ref, x_ref, w_ref, bias_ref, o_ref, acc_ref, *,
                               tk, apply_relu, apply_log_softmax, num_valid):
    """O = act((A @ X) @ W + b) fully fused (used when f_in <= f_out).
    X and W are VMEM-resident; the (tm, f_in) aggregation accumulator is
    multiplied by the small W only once, at the finalize step."""
    k = pl.program_id(1)

    @pl.when(k == 0)
    def _():
        acc_ref[...] = jnp.zeros_like(acc_ref)

    start = pl.multiple_of(k * tk, tk)
    acc_ref[...] += jnp.dot(a_ref[...], x_ref[pl.ds(start, tk), :],
                            preferred_element_type=jnp.float32)

    @pl.when(k == pl.num_programs(1) - 1)
    def _():
        h = jnp.dot(acc_ref[...].astype(w_ref.dtype), w_ref[...],
                    preferred_element_type=jnp.float32) + bias_ref[...]
        h = _epilogue(h, apply_relu, apply_log_softmax, num_valid)
        o_ref[...] = h.astype(o_ref.dtype)


# ------------------------------ pallas wrappers -------------------------------
def _pick_row_tile(m):
    for c in (512, 256, 128):
        if m % c == 0:
            return c
    return m


def _pick_k_tile(k):
    # Whole contraction in one step when it fits comfortably; otherwise a
    # large tile (1536 divides the padded Amazon-Computers node count 13824).
    if k <= 2048:
        return k
    for c in (1536, 1024, 512, 256, 128):
        if k % c == 0:
            return c
    return k


def pallas_transform(x, w):
    """T = X @ W.  x: (M, K) bf16, w: (K, N) bf16 -> (M, N) bf16."""
    m, k = x.shape
    k2, n = w.shape
    assert k == k2, (x.shape, w.shape)
    tm = _pick_row_tile(m)
    return pl.pallas_call(
        transform_kernel,
        out_shape=jax.ShapeDtypeStruct((m, n), jnp.bfloat16),
        grid=(m // tm,),
        in_specs=[
            pl.BlockSpec((tm, k), lambda i: (i, 0)),
            pl.BlockSpec((k, n), lambda i: (0, 0)),       # W resident in VMEM
        ],
        out_specs=pl.BlockSpec((tm, n), lambda i: (i, 0)),
        compiler_params=pltpu.CompilerParams(
            dimension_semantics=("parallel",),
            vmem_limit_bytes=_VMEM_LIMIT_BYTES),
    )(x, w)


def pallas_aggregate(a, t, bias, *, relu, log_softmax, num_valid, out_dtype):
    """O = act(A @ T + b).  a: (M, K) bf16 adjacency tiles, t: (K, N) bf16
    resident, bias: (1, N) f32."""
    m, kn = a.shape
    kn2, n = t.shape
    assert kn == kn2, (a.shape, t.shape)
    tm = _pick_row_tile(m)
    tk = _pick_k_tile(kn)
    kernel = functools.partial(
        aggregate_kernel, tk=tk, apply_relu=relu,
        apply_log_softmax=log_softmax, num_valid=int(num_valid))
    return pl.pallas_call(
        kernel,
        out_shape=jax.ShapeDtypeStruct((m, n), out_dtype),
        grid=(m // tm, kn // tk),
        in_specs=[
            pl.BlockSpec((tm, tk), lambda i, kk: (i, kk)),
            pl.BlockSpec((kn, n), lambda i, kk: (0, 0)),   # T resident in VMEM
            pl.BlockSpec((1, n), lambda i, kk: (0, 0)),
        ],
        out_specs=pl.BlockSpec((tm, n), lambda i, kk: (i, 0)),
        scratch_shapes=[pltpu.VMEM((tm, n), jnp.float32)],
        compiler_params=pltpu.CompilerParams(
            dimension_semantics=("parallel", "arbitrary"),
            vmem_limit_bytes=_VMEM_LIMIT_BYTES),
    )(a, t, bias)


def pallas_aggregate_transform(a, x, w, bias, *, relu, log_softmax, num_valid,
                               out_dtype):
    """O = act((A @ X) @ W + b) fused.  a: (M, K) bf16, x: (K, Fin) bf16
    resident, w: (Fin, Fout) bf16 resident, bias: (1, Fout) f32."""
    m, kn = a.shape
    kn2, f_in = x.shape
    f_in2, f_out = w.shape
    assert kn == kn2 and f_in == f_in2, (a.shape, x.shape, w.shape)
    tm = _pick_row_tile(m)
    tk = _pick_k_tile(kn)
    kernel = functools.partial(
        aggregate_transform_kernel, tk=tk, apply_relu=relu,
        apply_log_softmax=log_softmax, num_valid=int(num_valid))
    return pl.pallas_call(
        kernel,
        out_shape=jax.ShapeDtypeStruct((m, f_out), out_dtype),
        grid=(m // tm, kn // tk),
        in_specs=[
            pl.BlockSpec((tm, tk), lambda i, kk: (i, kk)),
            pl.BlockSpec((kn, f_in), lambda i, kk: (0, 0)),   # X resident
            pl.BlockSpec((f_in, f_out), lambda i, kk: (0, 0)),  # W resident
            pl.BlockSpec((1, f_out), lambda i, kk: (0, 0)),
        ],
        out_specs=pl.BlockSpec((tm, f_out), lambda i, kk: (i, 0)),
        scratch_shapes=[pltpu.VMEM((tm, f_in), jnp.float32)],
        compiler_params=pltpu.CompilerParams(
            dimension_semantics=("parallel", "arbitrary"),
            vmem_limit_bytes=_VMEM_LIMIT_BYTES),
    )(a, x, w, bias)


# ----------------------------- plain-JAX glue --------------------------------
def _round_up(v, m):
    return ((v + m - 1) // m) * m


def _pad_to(x, shape):
    pads = [(0, s - d) for d, s in zip(x.shape, shape)]
    return jnp.pad(x, pads)


def build_normalized_adjacency(edge_index, num_nodes):
    """Dense D^{-1/2} (A + I) D^{-1/2}  (GCNConv default normalization), f32."""
    src, dst = edge_index[0], edge_index[1]
    adj = jnp.zeros((num_nodes, num_nodes), jnp.float32)
    adj = adj.at[dst, src].set(1.0)
    adj = jnp.maximum(adj, adj.T)                        # undirected graph
    adj = adj + jnp.eye(num_nodes, dtype=jnp.float32)    # add self loops
    deg = jnp.sum(adj, axis=1)
    d_inv_sqrt = 1.0 / jnp.sqrt(jnp.maximum(deg, 1e-12))
    return d_inv_sqrt[:, None] * adj * d_inv_sqrt[None, :]


def init_params(key, dims):
    """Glorot-uniform weights, zero bias, deterministic from `key`."""
    params = []
    for f_in, f_out in zip(dims[:-1], dims[1:]):
        key, sub = jax.random.split(key)
        limit = jnp.sqrt(6.0 / (f_in + f_out))
        w = jax.random.uniform(sub, (f_in, f_out), jnp.float32, -limit, limit)
        b = jnp.zeros((f_out,), jnp.float32)
        params.append((w, b))
    return params


def net_forward(x, a_hat_bf16, params, *, num_classes):
    """Mirrors Net.forward: 5x (GCNConv + ReLU) then GCNConv + log_softmax.

    a_hat_bf16 must already be bf16 (cast once by the caller); intermediate
    activations are kept in bf16, f32 only for the final log-probs.
    """
    n = x.shape[0]
    n_pad = _round_up(n, 128)
    f_pad = _round_up(x.shape[1], 128)

    a_p = _pad_to(a_hat_bf16, (n_pad, n_pad))
    h = _pad_to(x, (n_pad, f_pad)).astype(jnp.bfloat16)

    n_layers = len(params)
    for li, (w, b) in enumerate(params):
        is_last = (li == n_layers - 1)
        f_in, f_out = w.shape
        f_in_pad = _round_up(f_in, 128)
        f_out_pad = _round_up(f_out, 128)
        w_p = _pad_to(w, (f_in_pad, f_out_pad)).astype(jnp.bfloat16)
        b_p = _pad_to(b, (f_out_pad,)).reshape(1, f_out_pad).astype(jnp.float32)
        out_dtype = jnp.float32 if is_last else jnp.bfloat16

        if f_in <= f_out:
            # (A @ X) @ W fully fused: aggregate on the narrow feature dim,
            # apply the tiny resident W at finalize (no HBM intermediate).
            h = pallas_aggregate_transform(
                a_p, h, w_p, b_p,
                relu=not is_last, log_softmax=is_last,
                num_valid=f_out, out_dtype=out_dtype)
        else:
            # A @ (X @ W): transform to the narrow dim first; T stays
            # VMEM-resident inside the aggregation kernel.
            t = pallas_transform(h, w_p)
            h = pallas_aggregate(
                a_p, t, b_p,
                relu=not is_last, log_softmax=is_last,
                num_valid=f_out, out_dtype=out_dtype)
    return h[:n, :num_classes]


def net_forward_reference(x, a_hat_f32, params):
    """Pure-JAX f32 reference of the same forward pass."""
    h = x
    for li, (w, b) in enumerate(params):
        h = a_hat_f32 @ (h @ w) + b
        if li < len(params) - 1:
            h = jax.nn.relu(h)
    return jax.nn.log_softmax(h, axis=-1)


# --------------------------------- main --------------------------------------
if __name__ == "__main__":
    # Small synthetic stand-in for the Amazon-Computers graph.
    num_nodes = 256          # Amazon Computers has 13752 nodes; keep small
    num_features = 96        # dataset.num_node_features stand-in
    num_classes = 10         # Amazon Computers has 10 classes
    num_edges = 1024

    # hidden_size_list from Net.__init__: [640, 512, 384, 256, 128]
    hidden = 640
    hidden_list = [hidden]
    for _ in range(4):
        hidden -= 128
        hidden_list.append(hidden)
    dims = [num_features] + hidden_list + [num_classes]

    key = jax.random.PRNGKey(0)
    k_x, k_e, k_p = jax.random.split(key, 3)

    x = jax.random.normal(k_x, (num_nodes, num_features), jnp.float32)
    edge_index = jax.random.randint(k_e, (2, num_edges), 0, num_nodes,
                                    dtype=jnp.int32)

    a_hat = build_normalized_adjacency(edge_index, num_nodes)
    a_hat_bf16 = a_hat.astype(jnp.bfloat16)      # cast the big operand ONCE
    params = init_params(k_p, dims)

    fwd = jax.jit(functools.partial(net_forward, num_classes=num_classes))
    out = fwd(x, a_hat_bf16, params)
    out = jax.block_until_ready(out)

    assert out.shape == (num_nodes, num_classes)
    # log_softmax rows should (approximately) exp-sum to 1
    row_sums = jnp.sum(jnp.exp(out), axis=1)
    assert bool(jnp.all(jnp.abs(row_sums - 1.0) < 1e-3))
    # loose structural check against an f32 reference (bf16 MXU operands drift a bit)
    ref = net_forward_reference(x, a_hat, params)
    assert bool(jnp.max(jnp.abs(out - ref)) < 1.0)

    print("KERNEL_OK")
</pallas_src>

<mosaic_0001>
module attributes {stable_mosaic.version = 11 : i64} {
  func.func @transform_kernel(%arg0: i32, %arg1: memref<256x640xbf16, #tpu.memory_space<vmem>>, %arg2: memref<640x512xbf16, #tpu.memory_space<vmem>>, %arg3: memref<256x512xbf16, #tpu.memory_space<vmem>>) attributes {dimension_semantics = [#tpu.dimension_semantics<parallel>], iteration_bounds = array<i64: 1>, scalar_prefetch = 0 : i64, scratch_operands = 0 : i64, tpu.core_type = #tpu.core_type<tc>, window_params = [{transform_indices = @transform_0, window_bounds = array<i64: 256, 640>}, {pipeline_mode = #tpu.pipeline_mode<synchronous>, transform_indices = @transform_1, window_bounds = array<i64: 640, 512>}, {transform_indices = @transform_2, window_bounds = array<i64: 256, 512>}]} {
    %c0 = arith.constant 0 : index
    %c0_0 = arith.constant 0 : index
    %0 = vector.load %arg1[%c0, %c0_0] : memref<256x640xbf16, #tpu.memory_space<vmem>>, vector<256x640xbf16>
    %c0_1 = arith.constant 0 : index
    %c0_2 = arith.constant 0 : index
    %1 = vector.load %arg2[%c0_1, %c0_2] : memref<640x512xbf16, #tpu.memory_space<vmem>>, vector<640x512xbf16>
    %cst = arith.constant dense<0.000000e+00> : vector<256x512xf32>
    %2 = tpu.matmul %0, %1, %cst {dimension_numbers = #tpu.dot_dimension_numbers<[1], [0], [0], [1], [0, 0, 1, 1], [], []>} : vector<256x640xbf16>, vector<640x512xbf16>, vector<256x512xf32> -> vector<256x512xf32>
    %3 = arith.truncf %2 : vector<256x512xf32> to vector<256x512xbf16>
    %c0_3 = arith.constant 0 : index
    %c0_4 = arith.constant 0 : index
    %4 = vector.load %arg3[%c0_3, %c0_4] : memref<256x512xbf16, #tpu.memory_space<vmem>>, vector<256x512xbf16>
    tpu.vector_store %arg3[%c0_3, %c0_4], %3 {strides = array<i32>} : memref<256x512xbf16, #tpu.memory_space<vmem>>, vector<256x512xbf16>,
    return
  }
  func.func @transform_0(%arg0: i32) -> (i32, i32) {
    %c0_i32 = arith.constant 0 : i32
    %c0_i32_0 = arith.constant 0 : i32
    return %arg0, %c0_i32 : i32, i32
  }
  func.func @transform_1(%arg0: i32) -> (i32, i32) {
    %c0_i32 = arith.constant 0 : i32
    %c0_i32_0 = arith.constant 0 : i32
    %c0_i32_1 = arith.constant 0 : i32
    return %c0_i32, %c0_i32_0 : i32, i32
  }
  func.func @transform_2(%arg0: i32) -> (i32, i32) {
    %c0_i32 = arith.constant 0 : i32
    %c0_i32_0 = arith.constant 0 : i32
    return %arg0, %c0_i32 : i32, i32
  }
}

module attributes {stable_mosaic.version = 11 : i64} {
  func.func @aggregate_transform_kernel(%arg0: i32, %arg1: i32, %arg2: memref<256x256xbf16, #tpu.memory_space<vmem>>, %arg3: memref<256x128xbf16, #tpu.memory_space<vmem>>, %arg4: memref<128x640xbf16, #tpu.memory_space<vmem>>, %arg5: memref<1x640xf32, #tpu.memory_space<vmem>>, %arg6: memref<256x640xbf16, #tpu.memory_space<vmem>>, %arg7: memref<256x128xf32, #tpu.memory_space<vmem>>) attributes {dimension_semantics = [#tpu.dimension_semantics<parallel>, #tpu.dimension_semantics<arbitrary>], iteration_bounds = array<i64: 1, 1>, scalar_prefetch = 0 : i64, scratch_operands = 1 : i64, tpu.core_type = #tpu.core_type<tc>, window_params = [{transform_indices = @transform_0, window_bounds = array<i64: 256, 256>}, {pipeline_mode = #tpu.pipeline_mode<synchronous>, transform_indices = @transform_1, window_bounds = array<i64: 256, 128>}, {pipeline_mode = #tpu.pipeline_mode<synchronous>, transform_indices = @transform_2, window_bounds = array<i64: 128, 640>}, {pipeline_mode = #tpu.pipeline_mode<synchronous>, transform_indices = @transform_3, window_bounds = array<i64: 1, 640>}, {transform_indices = @transform_4, window_bounds = array<i64: 256, 640>}]} {
    %c0_i32 = arith.constant 0 : i32
    %0 = arith.cmpi eq, %arg1, %c0_i32 : i32
    %1 = arith.extui %0 : i1 to i32
    %c0_i32_0 = arith.constant 0 : i32
    %2 = arith.cmpi ne, %1, %c0_i32_0 : i32
    scf.if %2 {
      %cst_9 = arith.constant 0.000000e+00 : f32
      %15 = vector.broadcast %cst_9 : f32 to vector<256x128xf32>
      %c0_10 = arith.constant 0 : index
      %c0_11 = arith.constant 0 : index
      %16 = vector.load %arg7[%c0_10, %c0_11] : memref<256x128xf32, #tpu.memory_space<vmem>>, vector<256x128xf32>
      tpu.vector_store %arg7[%c0_10, %c0_11], %15 {strides = array<i32>} : memref<256x128xf32, #tpu.memory_space<vmem>>, vector<256x128xf32>,
    } else {
    }
    %c256_i32 = arith.constant 256 : i32
    %3 = arith.muli %arg1, %c256_i32 : i32
    %4 = tpu.assume_multiple %3, 256 : i32
    %c0 = arith.constant 0 : index
    %c0_1 = arith.constant 0 : index
    %5 = vector.load %arg7[%c0, %c0_1] : memref<256x128xf32, #tpu.memory_space<vmem>>, vector<256x128xf32>
    %c0_2 = arith.constant 0 : index
    %c0_3 = arith.constant 0 : index
    %6 = vector.load %arg2[%c0_2, %c0_3] : memref<256x256xbf16, #tpu.memory_space<vmem>>, vector<256x256xbf16>
    %7 = arith.index_cast %4 : i32 to index
    %c0_4 = arith.constant 0 : index
    %8 = vector.load %arg3[%7, %c0_4] : memref<256x128xbf16, #tpu.memory_space<vmem>>, vector<256x128xbf16>
    %cst = arith.constant dense<0.000000e+00> : vector<256x128xf32>
    %9 = tpu.matmul %6, %8, %cst {dimension_numbers = #tpu.dot_dimension_numbers<[1], [0], [0], [1], [0, 0, 1, 1], [], []>} : vector<256x256xbf16>, vector<256x128xbf16>, vector<256x128xf32> -> vector<256x128xf32>
    %10 = arith.addf %5, %9 : vector<256x128xf32>
    %c0_5 = arith.constant 0 : index
    %c0_6 = arith.constant 0 : index
    %11 = vector.load %arg7[%c0_5, %c0_6] : memref<256x128xf32, #tpu.memory_space<vmem>>, vector<256x128xf32>
    tpu.vector_store %arg7[%c0_5, %c0_6], %10 {strides = array<i32>} : memref<256x128xf32, #tpu.memory_space<vmem>>, vector<256x128xf32>,
    %c0_i32_7 = arith.constant 0 : i32
    %12 = arith.cmpi eq, %arg1, %c0_i32_7 : i32
    %13 = arith.extui %12 : i1 to i32
    %c0_i32_8 = arith.constant 0 : i32
    %14 = arith.cmpi ne, %13, %c0_i32_8 : i32
    scf.if %14 {
      %c0_9 = arith.constant 0 : index
      %c0_10 = arith.constant 0 : index
      %15 = vector.load %arg7[%c0_9, %c0_10] : memref<256x128xf32, #tpu.memory_space<vmem>>, vector<256x128xf32>
      %16 = arith.truncf %15 : vector<256x128xf32> to vector<256x128xbf16>
      %c0_11 = arith.constant 0 : index
      %c0_12 = arith.constant 0 : index
      %17 = vector.load %arg4[%c0_11, %c0_12] : memref<128x640xbf16, #tpu.memory_space<vmem>>, vector<128x640xbf16>
      %cst_13 = arith.constant dense<0.000000e+00> : vector<256x640xf32>
      %18 = tpu.matmul %16, %17, %cst_13 {dimension_numbers = #tpu.dot_dimension_numbers<[1], [0], [0], [1], [0, 0, 1, 1], [], []>} : vector<256x128xbf16>, vector<128x640xbf16>, vector<256x640xf32> -> vector<256x640xf32>
      %c0_14 = arith.constant 0 : index
      %c0_15 = arith.constant 0 : index
      %19 = vector.load %arg5[%c0_14, %c0_15] : memref<1x640xf32, #tpu.memory_space<vmem>>, vector<1x640xf32>
      %20 = vector.broadcast %19 : vector<1x640xf32> to vector<256x640xf32>
      %21 = arith.addf %18, %20 : vector<256x640xf32>
      %cst_16 = arith.constant 0.000000e+00 : f32
      %22 = vector.broadcast %cst_16 : f32 to vector<256x640xf32>
      %23 = arith.maximumf %21, %22 : vector<256x640xf32>
      %24 = arith.truncf %23 : vector<256x640xf32> to vector<256x640xbf16>
      %c0_17 = arith.constant 0 : index
      %c0_18 = arith.constant 0 : index
      %25 = vector.load %arg6[%c0_17, %c0_18] : memref<256x640xbf16, #tpu.memory_space<vmem>>, vector<256x640xbf16>
      tpu.vector_store %arg6[%c0_17, %c0_18], %24 {strides = array<i32>} : memref<256x640xbf16, #tpu.memory_space<vmem>>, vector<256x640xbf16>,
    } else {
    }
    return
  }
  func.func @transform_0(%arg0: i32, %arg1: i32) -> (i32, i32) {
    %c0_i32 = arith.constant 0 : i32
    return %arg0, %arg1 : i32, i32
  }
  func.func @transform_1(%arg0: i32, %arg1: i32) -> (i32, i32) {
    %c0_i32 = arith.constant 0 : i32
    %c0_i32_0 = arith.constant 0 : i32
    %c0_i32_1 = arith.constant 0 : i32
    return %c0_i32, %c0_i32_0 : i32, i32
  }
  func.func @transform_2(%arg0: i32, %arg1: i32) -> (i32, i32) {
    %c0_i32 = arith.constant 0 : i32
    %c0_i32_0 = arith.constant 0 : i32
    %c0_i32_1 = arith.constant 0 : i32
    return %c0_i32, %c0_i32_0 : i32, i32
  }
  func.func @transform_3(%arg0: i32, %arg1: i32) -> (i32, i32) {
    %c0_i32 = arith.constant 0 : i32
    %c0_i32_0 = arith.constant 0 : i32
    %c0_i32_1 = arith.constant 0 : i32
    return %c0_i32, %c0_i32_0 : i32, i32
  }
  func.func @transform_4(%arg0: i32, %arg1: i32) -> (i32, i32) {
    %c0_i32 = arith.constant 0 : i32
    %c0_i32_0 = arith.constant 0 : i32
    return %arg0, %c0_i32 : i32, i32
  }
}

module attributes {stable_mosaic.version = 11 : i64} {
  func.func @aggregate_kernel(%arg0: i32, %arg1: i32, %arg2: memref<256x256xbf16, #tpu.memory_space<vmem>>, %arg3: memref<256x512xbf16, #tpu.memory_space<vmem>>, %arg4: memref<1x512xf32, #tpu.memory_space<vmem>>, %arg5: memref<256x512xbf16, #tpu.memory_space<vmem>>, %arg6: memref<256x512xf32, #tpu.memory_space<vmem>>) attributes {dimension_semantics = [#tpu.dimension_semantics<parallel>, #tpu.dimension_semantics<arbitrary>], iteration_bounds = array<i64: 1, 1>, scalar_prefetch = 0 : i64, scratch_operands = 1 : i64, tpu.core_type = #tpu.core_type<tc>, window_params = [{transform_indices = @transform_0, window_bounds = array<i64: 256, 256>}, {pipeline_mode = #tpu.pipeline_mode<synchronous>, transform_indices = @transform_1, window_bounds = array<i64: 256, 512>}, {pipeline_mode = #tpu.pipeline_mode<synchronous>, transform_indices = @transform_2, window_bounds = array<i64: 1, 512>}, {transform_indices = @transform_3, window_bounds = array<i64: 256, 512>}]} {
    %c0_i32 = arith.constant 0 : i32
    %0 = arith.cmpi eq, %arg1, %c0_i32 : i32
    %1 = arith.extui %0 : i1 to i32
    %c0_i32_0 = arith.constant 0 : i32
    %2 = arith.cmpi ne, %1, %c0_i32_0 : i32
    scf.if %2 {
      %cst_9 = arith.constant 0.000000e+00 : f32
      %15 = vector.broadcast %cst_9 : f32 to vector<256x512xf32>
      %c0_10 = arith.constant 0 : index
      %c0_11 = arith.constant 0 : index
      %16 = vector.load %arg6[%c0_10, %c0_11] : memref<256x512xf32, #tpu.memory_space<vmem>>, vector<256x512xf32>
      tpu.vector_store %arg6[%c0_10, %c0_11], %15 {strides = array<i32>} : memref<256x512xf32, #tpu.memory_space<vmem>>, vector<256x512xf32>,
    } else {
    }
    %c256_i32 = arith.constant 256 : i32
    %3 = arith.muli %arg1, %c256_i32 : i32
    %4 = tpu.assume_multiple %3, 256 : i32
    %c0 = arith.constant 0 : index
    %c0_1 = arith.constant 0 : index
    %5 = vector.load %arg6[%c0, %c0_1] : memref<256x512xf32, #tpu.memory_space<vmem>>, vector<256x512xf32>
    %c0_2 = arith.constant 0 : index
    %c0_3 = arith.constant 0 : index
    %6 = vector.load %arg2[%c0_2, %c0_3] : memref<256x256xbf16, #tpu.memory_space<vmem>>, vector<256x256xbf16>
    %7 = arith.index_cast %4 : i32 to index
    %c0_4 = arith.constant 0 : index
    %8 = vector.load %arg3[%7, %c0_4] : memref<256x512xbf16, #tpu.memory_space<vmem>>, vector<256x512xbf16>
    %cst = arith.constant dense<0.000000e+00> : vector<256x512xf32>
    %9 = tpu.matmul %6, %8, %cst {dimension_numbers = #tpu.dot_dimension_numbers<[1], [0], [0], [1], [0, 0, 1, 1], [], []>} : vector<256x256xbf16>, vector<256x512xbf16>, vector<256x512xf32> -> vector<256x512xf32>
    %10 = arith.addf %5, %9 : vector<256x512xf32>
    %c0_5 = arith.constant 0 : index
    %c0_6 = arith.constant 0 : index
    %11 = vector.load %arg6[%c0_5, %c0_6] : memref<256x512xf32, #tpu.memory_space<vmem>>, vector<256x512xf32>
    tpu.vector_store %arg6[%c0_5, %c0_6], %10 {strides = array<i32>} : memref<256x512xf32, #tpu.memory_space<vmem>>, vector<256x512xf32>,
    %c0_i32_7 = arith.constant 0 : i32
    %12 = arith.cmpi eq, %arg1, %c0_i32_7 : i32
    %13 = arith.extui %12 : i1 to i32
    %c0_i32_8 = arith.constant 0 : i32
    %14 = arith.cmpi ne, %13, %c0_i32_8 : i32
    scf.if %14 {
      %c0_9 = arith.constant 0 : index
      %c0_10 = arith.constant 0 : index
      %15 = vector.load %arg6[%c0_9, %c0_10] : memref<256x512xf32, #tpu.memory_space<vmem>>, vector<256x512xf32>
      %c0_11 = arith.constant 0 : index
      %c0_12 = arith.constant 0 : index
      %16 = vector.load %arg4[%c0_11, %c0_12] : memref<1x512xf32, #tpu.memory_space<vmem>>, vector<1x512xf32>
      %17 = vector.broadcast %16 : vector<1x512xf32> to vector<256x512xf32>
      %18 = arith.addf %15, %17 : vector<256x512xf32>
      %cst_13 = arith.constant 0.000000e+00 : f32
      %19 = vector.broadcast %cst_13 : f32 to vector<256x512xf32>
      %20 = arith.maximumf %18, %19 : vector<256x512xf32>
      %21 = arith.truncf %20 : vector<256x512xf32> to vector<256x512xbf16>
      %c0_14 = arith.constant 0 : index
      %c0_15 = arith.constant 0 : index
      %22 = vector.load %arg5[%c0_14, %c0_15] : memref<256x512xbf16, #tpu.memory_space<vmem>>, vector<256x512xbf16>
      tpu.vector_store %arg5[%c0_14, %c0_15], %21 {strides = array<i32>} : memref<256x512xbf16, #tpu.memory_space<vmem>>, vector<256x512xbf16>,
    } else {
    }
    return
  }
  func.func @transform_0(%arg0: i32, %arg1: i32) -> (i32, i32) {
    %c0_i32 = arith.constant 0 : i32
    return %arg0, %arg1 : i32, i32
  }
  func.func @transform_1(%arg0: i32, %arg1: i32) -> (i32, i32) {
    %c0_i32 = arith.constant 0 : i32
    %c0_i32_0 = arith.constant 0 : i32
    %c0_i32_1 = arith.constant 0 : i32
    return %c0_i32, %c0_i32_0 : i32, i32
  }
  func.func @transform_2(%arg0: i32, %arg1: i32) -> (i32, i32) {
    %c0_i32 = arith.constant 0 : i32
    %c0_i32_0 = arith.constant 0 : i32
    %c0_i32_1 = arith.constant 0 : i32
    return %c0_i32, %c0_i32_0 : i32, i32
  }
  func.func @transform_3(%arg0: i32, %arg1: i32) -> (i32, i32) {
    %c0_i32 = arith.constant 0 : i32
    %c0_i32_0 = arith.constant 0 : i32
    return %arg0, %c0_i32 : i32, i32
  }
}

module attributes {stable_mosaic.version = 11 : i64} {
  func.func @transform_kernel(%arg0: i32, %arg1: memref<256x512xbf16, #tpu.memory_space<vmem>>, %arg2: memref<512x384xbf16, #tpu.memory_space<vmem>>, %arg3: memref<256x384xbf16, #tpu.memory_space<vmem>>) attributes {dimension_semantics = [#tpu.dimension_semantics<parallel>], iteration_bounds = array<i64: 1>, scalar_prefetch = 0 : i64, scratch_operands = 0 : i64, tpu.core_type = #tpu.core_type<tc>, window_params = [{transform_indices = @transform_0, window_bounds = array<i64: 256, 512>}, {pipeline_mode = #tpu.pipeline_mode<synchronous>, transform_indices = @transform_1, window_bounds = array<i64: 512, 384>}, {transform_indices = @transform_2, window_bounds = array<i64: 256, 384>}]} {
    %c0 = arith.constant 0 : index
    %c0_0 = arith.constant 0 : index
    %0 = vector.load %arg1[%c0, %c0_0] : memref<256x512xbf16, #tpu.memory_space<vmem>>, vector<256x512xbf16>
    %c0_1 = arith.constant 0 : index
    %c0_2 = arith.constant 0 : index
    %1 = vector.load %arg2[%c0_1, %c0_2] : memref<512x384xbf16, #tpu.memory_space<vmem>>, vector<512x384xbf16>
    %cst = arith.constant dense<0.000000e+00> : vector<256x384xf32>
    %2 = tpu.matmul %0, %1, %cst {dimension_numbers = #tpu.dot_dimension_numbers<[1], [0], [0], [1], [0, 0, 1, 1], [], []>} : vector<256x512xbf16>, vector<512x384xbf16>, vector<256x384xf32> -> vector<256x384xf32>
    %3 = arith.truncf %2 : vector<256x384xf32> to vector<256x384xbf16>
    %c0_3 = arith.constant 0 : index
    %c0_4 = arith.constant 0 : index
    %4 = vector.load %arg3[%c0_3, %c0_4] : memref<256x384xbf16, #tpu.memory_space<vmem>>, vector<256x384xbf16>
    tpu.vector_store %arg3[%c0_3, %c0_4], %3 {strides = array<i32>} : memref<256x384xbf16, #tpu.memory_space<vmem>>, vector<256x384xbf16>,
    return
  }
  func.func @transform_0(%arg0: i32) -> (i32, i32) {
    %c0_i32 = arith.constant 0 : i32
    %c0_i32_0 = arith.constant 0 : i32
    return %arg0, %c0_i32 : i32, i32
  }
  func.func @transform_1(%arg0: i32) -> (i32, i32) {
    %c0_i32 = arith.constant 0 : i32
    %c0_i32_0 = arith.constant 0 : i32
    %c0_i32_1 = arith.constant 0 : i32
    return %c0_i32, %c0_i32_0 : i32, i32
  }
  func.func @transform_2(%arg0: i32) -> (i32, i32) {
    %c0_i32 = arith.constant 0 : i32
    %c0_i32_0 = arith.constant 0 : i32
    return %arg0, %c0_i32 : i32, i32
  }
}

module attributes {stable_mosaic.version = 11 : i64} {
  func.func @aggregate_kernel(%arg0: i32, %arg1: i32, %arg2: memref<256x256xbf16, #tpu.memory_space<vmem>>, %arg3: memref<256x384xbf16, #tpu.memory_space<vmem>>, %arg4: memref<1x384xf32, #tpu.memory_space<vmem>>, %arg5: memref<256x384xbf16, #tpu.memory_space<vmem>>, %arg6: memref<256x384xf32, #tpu.memory_space<vmem>>) attributes {dimension_semantics = [#tpu.dimension_semantics<parallel>, #tpu.dimension_semantics<arbitrary>], iteration_bounds = array<i64: 1, 1>, scalar_prefetch = 0 : i64, scratch_operands = 1 : i64, tpu.core_type = #tpu.core_type<tc>, window_params = [{transform_indices = @transform_0, window_bounds = array<i64: 256, 256>}, {pipeline_mode = #tpu.pipeline_mode<synchronous>, transform_indices = @transform_1, window_bounds = array<i64: 256, 384>}, {pipeline_mode = #tpu.pipeline_mode<synchronous>, transform_indices = @transform_2, window_bounds = array<i64: 1, 384>}, {transform_indices = @transform_3, window_bounds = array<i64: 256, 384>}]} {
    %c0_i32 = arith.constant 0 : i32
    %0 = arith.cmpi eq, %arg1, %c0_i32 : i32
    %1 = arith.extui %0 : i1 to i32
    %c0_i32_0 = arith.constant 0 : i32
    %2 = arith.cmpi ne, %1, %c0_i32_0 : i32
    scf.if %2 {
      %cst_9 = arith.constant 0.000000e+00 : f32
      %15 = vector.broadcast %cst_9 : f32 to vector<256x384xf32>
      %c0_10 = arith.constant 0 : index
      %c0_11 = arith.constant 0 : index
      %16 = vector.load %arg6[%c0_10, %c0_11] : memref<256x384xf32, #tpu.memory_space<vmem>>, vector<256x384xf32>
      tpu.vector_store %arg6[%c0_10, %c0_11], %15 {strides = array<i32>} : memref<256x384xf32, #tpu.memory_space<vmem>>, vector<256x384xf32>,
    } else {
    }
    %c256_i32 = arith.constant 256 : i32
    %3 = arith.muli %arg1, %c256_i32 : i32
    %4 = tpu.assume_multiple %3, 256 : i32
    %c0 = arith.constant 0 : index
    %c0_1 = arith.constant 0 : index
    %5 = vector.load %arg6[%c0, %c0_1] : memref<256x384xf32, #tpu.memory_space<vmem>>, vector<256x384xf32>
    %c0_2 = arith.constant 0 : index
    %c0_3 = arith.constant 0 : index
    %6 = vector.load %arg2[%c0_2, %c0_3] : memref<256x256xbf16, #tpu.memory_space<vmem>>, vector<256x256xbf16>
    %7 = arith.index_cast %4 : i32 to index
    %c0_4 = arith.constant 0 : index
    %8 = vector.load %arg3[%7, %c0_4] : memref<256x384xbf16, #tpu.memory_space<vmem>>, vector<256x384xbf16>
    %cst = arith.constant dense<0.000000e+00> : vector<256x384xf32>
    %9 = tpu.matmul %6, %8, %cst {dimension_numbers = #tpu.dot_dimension_numbers<[1], [0], [0], [1], [0, 0, 1, 1], [], []>} : vector<256x256xbf16>, vector<256x384xbf16>, vector<256x384xf32> -> vector<256x384xf32>
    %10 = arith.addf %5, %9 : vector<256x384xf32>
    %c0_5 = arith.constant 0 : index
    %c0_6 = arith.constant 0 : index
    %11 = vector.load %arg6[%c0_5, %c0_6] : memref<256x384xf32, #tpu.memory_space<vmem>>, vector<256x384xf32>
    tpu.vector_store %arg6[%c0_5, %c0_6], %10 {strides = array<i32>} : memref<256x384xf32, #tpu.memory_space<vmem>>, vector<256x384xf32>,
    %c0_i32_7 = arith.constant 0 : i32
    %12 = arith.cmpi eq, %arg1, %c0_i32_7 : i32
    %13 = arith.extui %12 : i1 to i32
    %c0_i32_8 = arith.constant 0 : i32
    %14 = arith.cmpi ne, %13, %c0_i32_8 : i32
    scf.if %14 {
      %c0_9 = arith.constant 0 : index
      %c0_10 = arith.constant 0 : index
      %15 = vector.load %arg6[%c0_9, %c0_10] : memref<256x384xf32, #tpu.memory_space<vmem>>, vector<256x384xf32>
      %c0_11 = arith.constant 0 : index
      %c0_12 = arith.constant 0 : index
      %16 = vector.load %arg4[%c0_11, %c0_12] : memref<1x384xf32, #tpu.memory_space<vmem>>, vector<1x384xf32>
      %17 = vector.broadcast %16 : vector<1x384xf32> to vector<256x384xf32>
      %18 = arith.addf %15, %17 : vector<256x384xf32>
      %cst_13 = arith.constant 0.000000e+00 : f32
      %19 = vector.broadcast %cst_13 : f32 to vector<256x384xf32>
      %20 = arith.maximumf %18, %19 : vector<256x384xf32>
      %21 = arith.truncf %20 : vector<256x384xf32> to vector<256x384xbf16>
      %c0_14 = arith.constant 0 : index
      %c0_15 = arith.constant 0 : index
      %22 = vector.load %arg5[%c0_14, %c0_15] : memref<256x384xbf16, #tpu.memory_space<vmem>>, vector<256x384xbf16>
      tpu.vector_store %arg5[%c0_14, %c0_15], %21 {strides = array<i32>} : memref<256x384xbf16, #tpu.memory_space<vmem>>, vector<256x384xbf16>,
    } else {
    }
    return
  }
  func.func @transform_0(%arg0: i32, %arg1: i32) -> (i32, i32) {
    %c0_i32 = arith.constant 0 : i32
    return %arg0, %arg1 : i32, i32
  }
  func.func @transform_1(%arg0: i32, %arg1: i32) -> (i32, i32) {
    %c0_i32 = arith.constant 0 : i32
    %c0_i32_0 = arith.constant 0 : i32
    %c0_i32_1 = arith.constant 0 : i32
    return %c0_i32, %c0_i32_0 : i32, i32
  }
  func.func @transform_2(%arg0: i32, %arg1: i32) -> (i32, i32) {
    %c0_i32 = arith.constant 0 : i32
    %c0_i32_0 = arith.constant 0 : i32
    %c0_i32_1 = arith.constant 0 : i32
    return %c0_i32, %c0_i32_0 : i32, i32
  }
  func.func @transform_3(%arg0: i32, %arg1: i32) -> (i32, i32) {
    %c0_i32 = arith.constant 0 : i32
    %c0_i32_0 = arith.constant 0 : i32
    return %arg0, %c0_i32 : i32, i32
  }
}

module attributes {stable_mosaic.version = 11 : i64} {
  func.func @transform_kernel(%arg0: i32, %arg1: memref<256x384xbf16, #tpu.memory_space<vmem>>, %arg2: memref<384x256xbf16, #tpu.memory_space<vmem>>, %arg3: memref<256x256xbf16, #tpu.memory_space<vmem>>) attributes {dimension_semantics = [#tpu.dimension_semantics<parallel>], iteration_bounds = array<i64: 1>, scalar_prefetch = 0 : i64, scratch_operands = 0 : i64, tpu.core_type = #tpu.core_type<tc>, window_params = [{transform_indices = @transform_0, window_bounds = array<i64: 256, 384>}, {pipeline_mode = #tpu.pipeline_mode<synchronous>, transform_indices = @transform_1, window_bounds = array<i64: 384, 256>}, {transform_indices = @transform_2, window_bounds = array<i64: 256, 256>}]} {
    %c0 = arith.constant 0 : index
    %c0_0 = arith.constant 0 : index
    %0 = vector.load %arg1[%c0, %c0_0] : memref<256x384xbf16, #tpu.memory_space<vmem>>, vector<256x384xbf16>
    %c0_1 = arith.constant 0 : index
    %c0_2 = arith.constant 0 : index
    %1 = vector.load %arg2[%c0_1, %c0_2] : memref<384x256xbf16, #tpu.memory_space<vmem>>, vector<384x256xbf16>
    %cst = arith.constant dense<0.000000e+00> : vector<256x256xf32>
    %2 = tpu.matmul %0, %1, %cst {dimension_numbers = #tpu.dot_dimension_numbers<[1], [0], [0], [1], [0, 0, 1, 1], [], []>} : vector<256x384xbf16>, vector<384x256xbf16>, vector<256x256xf32> -> vector<256x256xf32>
    %3 = arith.truncf %2 : vector<256x256xf32> to vector<256x256xbf16>
    %c0_3 = arith.constant 0 : index
    %c0_4 = arith.constant 0 : index
    %4 = vector.load %arg3[%c0_3, %c0_4] : memref<256x256xbf16, #tpu.memory_space<vmem>>, vector<256x256xbf16>
    tpu.vector_store %arg3[%c0_3, %c0_4], %3 {strides = array<i32>} : memref<256x256xbf16, #tpu.memory_space<vmem>>, vector<256x256xbf16>,
    return
  }
  func.func @transform_0(%arg0: i32) -> (i32, i32) {
    %c0_i32 = arith.constant 0 : i32
    %c0_i32_0 = arith.constant 0 : i32
    return %arg0, %c0_i32 : i32, i32
  }
  func.func @transform_1(%arg0: i32) -> (i32, i32) {
    %c0_i32 = arith.constant 0 : i32
    %c0_i32_0 = arith.constant 0 : i32
    %c0_i32_1 = arith.constant 0 : i32
    return %c0_i32, %c0_i32_0 : i32, i32
  }
  func.func @transform_2(%arg0: i32) -> (i32, i32) {
    %c0_i32 = arith.constant 0 : i32
    %c0_i32_0 = arith.constant 0 : i32
    return %arg0, %c0_i32 : i32, i32
  }
}

module attributes {stable_mosaic.version = 11 : i64} {
  func.func @aggregate_kernel(%arg0: i32, %arg1: i32, %arg2: memref<256x256xbf16, #tpu.memory_space<vmem>>, %arg3: memref<256x256xbf16, #tpu.memory_space<vmem>>, %arg4: memref<1x256xf32, #tpu.memory_space<vmem>>, %arg5: memref<256x256xbf16, #tpu.memory_space<vmem>>, %arg6: memref<256x256xf32, #tpu.memory_space<vmem>>) attributes {dimension_semantics = [#tpu.dimension_semantics<parallel>, #tpu.dimension_semantics<arbitrary>], iteration_bounds = array<i64: 1, 1>, scalar_prefetch = 0 : i64, scratch_operands = 1 : i64, tpu.core_type = #tpu.core_type<tc>, window_params = [{transform_indices = @transform_0, window_bounds = array<i64: 256, 256>}, {pipeline_mode = #tpu.pipeline_mode<synchronous>, transform_indices = @transform_1, window_bounds = array<i64: 256, 256>}, {pipeline_mode = #tpu.pipeline_mode<synchronous>, transform_indices = @transform_2, window_bounds = array<i64: 1, 256>}, {transform_indices = @transform_3, window_bounds = array<i64: 256, 256>}]} {
    %c0_i32 = arith.constant 0 : i32
    %0 = arith.cmpi eq, %arg1, %c0_i32 : i32
    %1 = arith.extui %0 : i1 to i32
    %c0_i32_0 = arith.constant 0 : i32
    %2 = arith.cmpi ne, %1, %c0_i32_0 : i32
    scf.if %2 {
      %cst_9 = arith.constant 0.000000e+00 : f32
      %15 = vector.broadcast %cst_9 : f32 to vector<256x256xf32>
      %c0_10 = arith.constant 0 : index
      %c0_11 = arith.constant 0 : index
      %16 = vector.load %arg6[%c0_10, %c0_11] : memref<256x256xf32, #tpu.memory_space<vmem>>, vector<256x256xf32>
      tpu.vector_store %arg6[%c0_10, %c0_11], %15 {strides = array<i32>} : memref<256x256xf32, #tpu.memory_space<vmem>>, vector<256x256xf32>,
    } else {
    }
    %c256_i32 = arith.constant 256 : i32
    %3 = arith.muli %arg1, %c256_i32 : i32
    %4 = tpu.assume_multiple %3, 256 : i32
    %c0 = arith.constant 0 : index
    %c0_1 = arith.constant 0 : index
    %5 = vector.load %arg6[%c0, %c0_1] : memref<256x256xf32, #tpu.memory_space<vmem>>, vector<256x256xf32>
    %c0_2 = arith.constant 0 : index
    %c0_3 = arith.constant 0 : index
    %6 = vector.load %arg2[%c0_2, %c0_3] : memref<256x256xbf16, #tpu.memory_space<vmem>>, vector<256x256xbf16>
    %7 = arith.index_cast %4 : i32 to index
    %c0_4 = arith.constant 0 : index
    %8 = vector.load %arg3[%7, %c0_4] : memref<256x256xbf16, #tpu.memory_space<vmem>>, vector<256x256xbf16>
    %cst = arith.constant dense<0.000000e+00> : vector<256x256xf32>
    %9 = tpu.matmul %6, %8, %cst {dimension_numbers = #tpu.dot_dimension_numbers<[1], [0], [0], [1], [0, 0, 1, 1], [], []>} : vector<256x256xbf16>, vector<256x256xbf16>, vector<256x256xf32> -> vector<256x256xf32>
    %10 = arith.addf %5, %9 : vector<256x256xf32>
    %c0_5 = arith.constant 0 : index
    %c0_6 = arith.constant 0 : index
    %11 = vector.load %arg6[%c0_5, %c0_6] : memref<256x256xf32, #tpu.memory_space<vmem>>, vector<256x256xf32>
    tpu.vector_store %arg6[%c0_5, %c0_6], %10 {strides = array<i32>} : memref<256x256xf32, #tpu.memory_space<vmem>>, vector<256x256xf32>,
    %c0_i32_7 = arith.constant 0 : i32
    %12 = arith.cmpi eq, %arg1, %c0_i32_7 : i32
    %13 = arith.extui %12 : i1 to i32
    %c0_i32_8 = arith.constant 0 : i32
    %14 = arith.cmpi ne, %13, %c0_i32_8 : i32
    scf.if %14 {
      %c0_9 = arith.constant 0 : index
      %c0_10 = arith.constant 0 : index
      %15 = vector.load %arg6[%c0_9, %c0_10] : memref<256x256xf32, #tpu.memory_space<vmem>>, vector<256x256xf32>
      %c0_11 = arith.constant 0 : index
      %c0_12 = arith.constant 0 : index
      %16 = vector.load %arg4[%c0_11, %c0_12] : memref<1x256xf32, #tpu.memory_space<vmem>>, vector<1x256xf32>
      %17 = vector.broadcast %16 : vector<1x256xf32> to vector<256x256xf32>
      %18 = arith.addf %15, %17 : vector<256x256xf32>
      %cst_13 = arith.constant 0.000000e+00 : f32
      %19 = vector.broadcast %cst_13 : f32 to vector<256x256xf32>
      %20 = arith.maximumf %18, %19 : vector<256x256xf32>
      %21 = arith.truncf %20 : vector<256x256xf32> to vector<256x256xbf16>
      %c0_14 = arith.constant 0 : index
      %c0_15 = arith.constant 0 : index
      %22 = vector.load %arg5[%c0_14, %c0_15] : memref<256x256xbf16, #tpu.memory_space<vmem>>, vector<256x256xbf16>
      tpu.vector_store %arg5[%c0_14, %c0_15], %21 {strides = array<i32>} : memref<256x256xbf16, #tpu.memory_space<vmem>>, vector<256x256xbf16>,
    } else {
    }
    return
  }
  func.func @transform_0(%arg0: i32, %arg1: i32) -> (i32, i32) {
    %c0_i32 = arith.constant 0 : i32
    return %arg0, %arg1 : i32, i32
  }
  func.func @transform_1(%arg0: i32, %arg1: i32) -> (i32, i32) {
    %c0_i32 = arith.constant 0 : i32
    %c0_i32_0 = arith.constant 0 : i32
    %c0_i32_1 = arith.constant 0 : i32
    return %c0_i32, %c0_i32_0 : i32, i32
  }
  func.func @transform_2(%arg0: i32, %arg1: i32) -> (i32, i32) {
    %c0_i32 = arith.constant 0 : i32
    %c0_i32_0 = arith.constant 0 : i32
    %c0_i32_1 = arith.constant 0 : i32
    return %c0_i32, %c0_i32_0 : i32, i32
  }
  func.func @transform_3(%arg0: i32, %arg1: i32) -> (i32, i32) {
    %c0_i32 = arith.constant 0 : i32
    %c0_i32_0 = arith.constant 0 : i32
    return %arg0, %c0_i32 : i32, i32
  }
}

module attributes {stable_mosaic.version = 11 : i64} {
  func.func @transform_kernel(%arg0: i32, %arg1: memref<256x256xbf16, #tpu.memory_space<vmem>>, %arg2: memref<256x128xbf16, #tpu.memory_space<vmem>>, %arg3: memref<256x128xbf16, #tpu.memory_space<vmem>>) attributes {dimension_semantics = [#tpu.dimension_semantics<parallel>], iteration_bounds = array<i64: 1>, scalar_prefetch = 0 : i64, scratch_operands = 0 : i64, tpu.core_type = #tpu.core_type<tc>, window_params = [{transform_indices = @transform_0, window_bounds = array<i64: 256, 256>}, {pipeline_mode = #tpu.pipeline_mode<synchronous>, transform_indices = @transform_1, window_bounds = array<i64: 256, 128>}, {transform_indices = @transform_2, window_bounds = array<i64: 256, 128>}]} {
    %c0 = arith.constant 0 : index
    %c0_0 = arith.constant 0 : index
    %0 = vector.load %arg1[%c0, %c0_0] : memref<256x256xbf16, #tpu.memory_space<vmem>>, vector<256x256xbf16>
    %c0_1 = arith.constant 0 : index
    %c0_2 = arith.constant 0 : index
    %1 = vector.load %arg2[%c0_1, %c0_2] : memref<256x128xbf16, #tpu.memory_space<vmem>>, vector<256x128xbf16>
    %cst = arith.constant dense<0.000000e+00> : vector<256x128xf32>
    %2 = tpu.matmul %0, %1, %cst {dimension_numbers = #tpu.dot_dimension_numbers<[1], [0], [0], [1], [0, 0, 1, 1], [], []>} : vector<256x256xbf16>, vector<256x128xbf16>, vector<256x128xf32> -> vector<256x128xf32>
    %3 = arith.truncf %2 : vector<256x128xf32> to vector<256x128xbf16>
    %c0_3 = arith.constant 0 : index
    %c0_4 = arith.constant 0 : index
    %4 = vector.load %arg3[%c0_3, %c0_4] : memref<256x128xbf16, #tpu.memory_space<vmem>>, vector<256x128xbf16>
    tpu.vector_store %arg3[%c0_3, %c0_4], %3 {strides = array<i32>} : memref<256x128xbf16, #tpu.memory_space<vmem>>, vector<256x128xbf16>,
    return
  }
  func.func @transform_0(%arg0: i32) -> (i32, i32) {
    %c0_i32 = arith.constant 0 : i32
    %c0_i32_0 = arith.constant 0 : i32
    return %arg0, %c0_i32 : i32, i32
  }
  func.func @transform_1(%arg0: i32) -> (i32, i32) {
    %c0_i32 = arith.constant 0 : i32
    %c0_i32_0 = arith.constant 0 : i32
    %c0_i32_1 = arith.constant 0 : i32
    return %c0_i32, %c0_i32_0 : i32, i32
  }
  func.func @transform_2(%arg0: i32) -> (i32, i32) {
    %c0_i32 = arith.constant 0 : i32
    %c0_i32_0 = arith.constant 0 : i32
    return %arg0, %c0_i32 : i32, i32
  }
}

module attributes {stable_mosaic.version = 11 : i64} {
  func.func @aggregate_kernel(%arg0: i32, %arg1: i32, %arg2: memref<256x256xbf16, #tpu.memory_space<vmem>>, %arg3: memref<256x128xbf16, #tpu.memory_space<vmem>>, %arg4: memref<1x128xf32, #tpu.memory_space<vmem>>, %arg5: memref<256x128xbf16, #tpu.memory_space<vmem>>, %arg6: memref<256x128xf32, #tpu.memory_space<vmem>>) attributes {dimension_semantics = [#tpu.dimension_semantics<parallel>, #tpu.dimension_semantics<arbitrary>], iteration_bounds = array<i64: 1, 1>, scalar_prefetch = 0 : i64, scratch_operands = 1 : i64, tpu.core_type = #tpu.core_type<tc>, window_params = [{transform_indices = @transform_0, window_bounds = array<i64: 256, 256>}, {pipeline_mode = #tpu.pipeline_mode<synchronous>, transform_indices = @transform_1, window_bounds = array<i64: 256, 128>}, {pipeline_mode = #tpu.pipeline_mode<synchronous>, transform_indices = @transform_2, window_bounds = array<i64: 1, 128>}, {transform_indices = @transform_3, window_bounds = array<i64: 256, 128>}]} {
    %c0_i32 = arith.constant 0 : i32
    %0 = arith.cmpi eq, %arg1, %c0_i32 : i32
    %1 = arith.extui %0 : i1 to i32
    %c0_i32_0 = arith.constant 0 : i32
    %2 = arith.cmpi ne, %1, %c0_i32_0 : i32
    scf.if %2 {
      %cst_9 = arith.constant 0.000000e+00 : f32
      %15 = vector.broadcast %cst_9 : f32 to vector<256x128xf32>
      %c0_10 = arith.constant 0 : index
      %c0_11 = arith.constant 0 : index
      %16 = vector.load %arg6[%c0_10, %c0_11] : memref<256x128xf32, #tpu.memory_space<vmem>>, vector<256x128xf32>
      tpu.vector_store %arg6[%c0_10, %c0_11], %15 {strides = array<i32>} : memref<256x128xf32, #tpu.memory_space<vmem>>, vector<256x128xf32>,
    } else {
    }
    %c256_i32 = arith.constant 256 : i32
    %3 = arith.muli %arg1, %c256_i32 : i32
    %4 = tpu.assume_multiple %3, 256 : i32
    %c0 = arith.constant 0 : index
    %c0_1 = arith.constant 0 : index
    %5 = vector.load %arg6[%c0, %c0_1] : memref<256x128xf32, #tpu.memory_space<vmem>>, vector<256x128xf32>
    %c0_2 = arith.constant 0 : index
    %c0_3 = arith.constant 0 : index
    %6 = vector.load %arg2[%c0_2, %c0_3] : memref<256x256xbf16, #tpu.memory_space<vmem>>, vector<256x256xbf16>
    %7 = arith.index_cast %4 : i32 to index
    %c0_4 = arith.constant 0 : index
    %8 = vector.load %arg3[%7, %c0_4] : memref<256x128xbf16, #tpu.memory_space<vmem>>, vector<256x128xbf16>
    %cst = arith.constant dense<0.000000e+00> : vector<256x128xf32>
    %9 = tpu.matmul %6, %8, %cst {dimension_numbers = #tpu.dot_dimension_numbers<[1], [0], [0], [1], [0, 0, 1, 1], [], []>} : vector<256x256xbf16>, vector<256x128xbf16>, vector<256x128xf32> -> vector<256x128xf32>
    %10 = arith.addf %5, %9 : vector<256x128xf32>
    %c0_5 = arith.constant 0 : index
    %c0_6 = arith.constant 0 : index
    %11 = vector.load %arg6[%c0_5, %c0_6] : memref<256x128xf32, #tpu.memory_space<vmem>>, vector<256x128xf32>
    tpu.vector_store %arg6[%c0_5, %c0_6], %10 {strides = array<i32>} : memref<256x128xf32, #tpu.memory_space<vmem>>, vector<256x128xf32>,
    %c0_i32_7 = arith.constant 0 : i32
    %12 = arith.cmpi eq, %arg1, %c0_i32_7 : i32
    %13 = arith.extui %12 : i1 to i32
    %c0_i32_8 = arith.constant 0 : i32
    %14 = arith.cmpi ne, %13, %c0_i32_8 : i32
    scf.if %14 {
      %c0_9 = arith.constant 0 : index
      %c0_10 = arith.constant 0 : index
      %15 = vector.load %arg6[%c0_9, %c0_10] : memref<256x128xf32, #tpu.memory_space<vmem>>, vector<256x128xf32>
      %c0_11 = arith.constant 0 : index
      %c0_12 = arith.constant 0 : index
      %16 = vector.load %arg4[%c0_11, %c0_12] : memref<1x128xf32, #tpu.memory_space<vmem>>, vector<1x128xf32>
      %17 = vector.broadcast %16 : vector<1x128xf32> to vector<256x128xf32>
      %18 = arith.addf %15, %17 : vector<256x128xf32>
      %cst_13 = arith.constant 0.000000e+00 : f32
      %19 = vector.broadcast %cst_13 : f32 to vector<256x128xf32>
      %20 = arith.maximumf %18, %19 : vector<256x128xf32>
      %21 = arith.truncf %20 : vector<256x128xf32> to vector<256x128xbf16>
      %c0_14 = arith.constant 0 : index
      %c0_15 = arith.constant 0 : index
      %22 = vector.load %arg5[%c0_14, %c0_15] : memref<256x128xbf16, #tpu.memory_space<vmem>>, vector<256x128xbf16>
      tpu.vector_store %arg5[%c0_14, %c0_15], %21 {strides = array<i32>} : memref<256x128xbf16, #tpu.memory_space<vmem>>, vector<256x128xbf16>,
    } else {
    }
    return
  }
  func.func @transform_0(%arg0: i32, %arg1: i32) -> (i32, i32) {
    %c0_i32 = arith.constant 0 : i32
    return %arg0, %arg1 : i32, i32
  }
  func.func @transform_1(%arg0: i32, %arg1: i32) -> (i32, i32) {
    %c0_i32 = arith.constant 0 : i32
    %c0_i32_0 = arith.constant 0 : i32
    %c0_i32_1 = arith.constant 0 : i32
    return %c0_i32, %c0_i32_0 : i32, i32
  }
  func.func @transform_2(%arg0: i32, %arg1: i32) -> (i32, i32) {
    %c0_i32 = arith.constant 0 : i32
    %c0_i32_0 = arith.constant 0 : i32
    %c0_i32_1 = arith.constant 0 : i32
    return %c0_i32, %c0_i32_0 : i32, i32
  }
  func.func @transform_3(%arg0: i32, %arg1: i32) -> (i32, i32) {
    %c0_i32 = arith.constant 0 : i32
    %c0_i32_0 = arith.constant 0 : i32
    return %arg0, %c0_i32 : i32, i32
  }
}

module attributes {stable_mosaic.version = 11 : i64} {
  func.func @transform_kernel(%arg0: i32, %arg1: memref<256x128xbf16, #tpu.memory_space<vmem>>, %arg2: memref<128x128xbf16, #tpu.memory_space<vmem>>, %arg3: memref<256x128xbf16, #tpu.memory_space<vmem>>) attributes {dimension_semantics = [#tpu.dimension_semantics<parallel>], iteration_bounds = array<i64: 1>, scalar_prefetch = 0 : i64, scratch_operands = 0 : i64, tpu.core_type = #tpu.core_type<tc>, window_params = [{transform_indices = @transform_0, window_bounds = array<i64: 256, 128>}, {pipeline_mode = #tpu.pipeline_mode<synchronous>, transform_indices = @transform_1, window_bounds = array<i64: 128, 128>}, {transform_indices = @transform_2, window_bounds = array<i64: 256, 128>}]} {
    %c0 = arith.constant 0 : index
    %c0_0 = arith.constant 0 : index
    %0 = vector.load %arg1[%c0, %c0_0] : memref<256x128xbf16, #tpu.memory_space<vmem>>, vector<256x128xbf16>
    %c0_1 = arith.constant 0 : index
    %c0_2 = arith.constant 0 : index
    %1 = vector.load %arg2[%c0_1, %c0_2] : memref<128x128xbf16, #tpu.memory_space<vmem>>, vector<128x128xbf16>
    %cst = arith.constant dense<0.000000e+00> : vector<256x128xf32>
    %2 = tpu.matmul %0, %1, %cst {dimension_numbers = #tpu.dot_dimension_numbers<[1], [0], [0], [1], [0, 0, 1, 1], [], []>} : vector<256x128xbf16>, vector<128x128xbf16>, vector<256x128xf32> -> vector<256x128xf32>
    %3 = arith.truncf %2 : vector<256x128xf32> to vector<256x128xbf16>
    %c0_3 = arith.constant 0 : index
    %c0_4 = arith.constant 0 : index
    %4 = vector.load %arg3[%c0_3, %c0_4] : memref<256x128xbf16, #tpu.memory_space<vmem>>, vector<256x128xbf16>
    tpu.vector_store %arg3[%c0_3, %c0_4], %3 {strides = array<i32>} : memref<256x128xbf16, #tpu.memory_space<vmem>>, vector<256x128xbf16>,
    return
  }
  func.func @transform_0(%arg0: i32) -> (i32, i32) {
    %c0_i32 = arith.constant 0 : i32
    %c0_i32_0 = arith.constant 0 : i32
    return %arg0, %c0_i32 : i32, i32
  }
  func.func @transform_1(%arg0: i32) -> (i32, i32) {
    %c0_i32 = arith.constant 0 : i32
    %c0_i32_0 = arith.constant 0 : i32
    %c0_i32_1 = arith.constant 0 : i32
    return %c0_i32, %c0_i32_0 : i32, i32
  }
  func.func @transform_2(%arg0: i32) -> (i32, i32) {
    %c0_i32 = arith.constant 0 : i32
    %c0_i32_0 = arith.constant 0 : i32
    return %arg0, %c0_i32 : i32, i32
  }
}

module attributes {stable_mosaic.version = 11 : i64} {
  func.func @aggregate_kernel(%arg0: i32, %arg1: i32, %arg2: memref<256x256xbf16, #tpu.memory_space<vmem>>, %arg3: memref<256x128xbf16, #tpu.memory_space<vmem>>, %arg4: memref<1x128xf32, #tpu.memory_space<vmem>>, %arg5: memref<256x128xf32, #tpu.memory_space<vmem>>, %arg6: memref<256x128xf32, #tpu.memory_space<vmem>>) attributes {dimension_semantics = [#tpu.dimension_semantics<parallel>, #tpu.dimension_semantics<arbitrary>], iteration_bounds = array<i64: 1, 1>, scalar_prefetch = 0 : i64, scratch_operands = 1 : i64, tpu.core_type = #tpu.core_type<tc>, window_params = [{transform_indices = @transform_0, window_bounds = array<i64: 256, 256>}, {pipeline_mode = #tpu.pipeline_mode<synchronous>, transform_indices = @transform_1, window_bounds = array<i64: 256, 128>}, {pipeline_mode = #tpu.pipeline_mode<synchronous>, transform_indices = @transform_2, window_bounds = array<i64: 1, 128>}, {transform_indices = @transform_3, window_bounds = array<i64: 256, 128>}]} {
    %c0_i32 = arith.constant 0 : i32
    %0 = arith.cmpi eq, %arg1, %c0_i32 : i32
    %1 = arith.extui %0 : i1 to i32
    %c0_i32_0 = arith.constant 0 : i32
    %2 = arith.cmpi ne, %1, %c0_i32_0 : i32
    scf.if %2 {
      %cst_9 = arith.constant 0.000000e+00 : f32
      %15 = vector.broadcast %cst_9 : f32 to vector<256x128xf32>
      %c0_10 = arith.constant 0 : index
      %c0_11 = arith.constant 0 : index
      %16 = vector.load %arg6[%c0_10, %c0_11] : memref<256x128xf32, #tpu.memory_space<vmem>>, vector<256x128xf32>
      tpu.vector_store %arg6[%c0_10, %c0_11], %15 {strides = array<i32>} : memref<256x128xf32, #tpu.memory_space<vmem>>, vector<256x128xf32>,
    } else {
    }
    %c256_i32 = arith.constant 256 : i32
    %3 = arith.muli %arg1, %c256_i32 : i32
    %4 = tpu.assume_multiple %3, 256 : i32
    %c0 = arith.constant 0 : index
    %c0_1 = arith.constant 0 : index
    %5 = vector.load %arg6[%c0, %c0_1] : memref<256x128xf32, #tpu.memory_space<vmem>>, vector<256x128xf32>
    %c0_2 = arith.constant 0 : index
    %c0_3 = arith.constant 0 : index
    %6 = vector.load %arg2[%c0_2, %c0_3] : memref<256x256xbf16, #tpu.memory_space<vmem>>, vector<256x256xbf16>
    %7 = arith.index_cast %4 : i32 to index
    %c0_4 = arith.constant 0 : index
    %8 = vector.load %arg3[%7, %c0_4] : memref<256x128xbf16, #tpu.memory_space<vmem>>, vector<256x128xbf16>
    %cst = arith.constant dense<0.000000e+00> : vector<256x128xf32>
    %9 = tpu.matmul %6, %8, %cst {dimension_numbers = #tpu.dot_dimension_numbers<[1], [0], [0], [1], [0, 0, 1, 1], [], []>} : vector<256x256xbf16>, vector<256x128xbf16>, vector<256x128xf32> -> vector<256x128xf32>
    %10 = arith.addf %5, %9 : vector<256x128xf32>
    %c0_5 = arith.constant 0 : index
    %c0_6 = arith.constant 0 : index
    %11 = vector.load %arg6[%c0_5, %c0_6] : memref<256x128xf32, #tpu.memory_space<vmem>>, vector<256x128xf32>
    tpu.vector_store %arg6[%c0_5, %c0_6], %10 {strides = array<i32>} : memref<256x128xf32, #tpu.memory_space<vmem>>, vector<256x128xf32>,
    %c0_i32_7 = arith.constant 0 : i32
    %12 = arith.cmpi eq, %arg1, %c0_i32_7 : i32
    %13 = arith.extui %12 : i1 to i32
    %c0_i32_8 = arith.constant 0 : i32
    %14 = arith.cmpi ne, %13, %c0_i32_8 : i32
    scf.if %14 {
      %c0_9 = arith.constant 0 : index
      %c0_10 = arith.constant 0 : index
      %15 = vector.load %arg6[%c0_9, %c0_10] : memref<256x128xf32, #tpu.memory_space<vmem>>, vector<256x128xf32>
      %c0_11 = arith.constant 0 : index
      %c0_12 = arith.constant 0 : index
      %16 = vector.load %arg4[%c0_11, %c0_12] : memref<1x128xf32, #tpu.memory_space<vmem>>, vector<1x128xf32>
      %17 = vector.broadcast %16 : vector<1x128xf32> to vector<256x128xf32>
      %18 = arith.addf %15, %17 : vector<256x128xf32>
      %19 = tpu.iota {dimensions = array<i32: 1>} : vector<256x128xi32>
      %c10_i32 = arith.constant 10 : i32
      %20 = vector.broadcast %c10_i32 : i32 to vector<256x128xi32>
      %21 = arith.cmpi slt, %19, %20 : vector<256x128xi32>
      %cst_13 = arith.constant -1.000000e+30 : f32
      %22 = vector.broadcast %cst_13 : f32 to vector<256x128xf32>
      %23 = arith.select %21, %18, %22 : vector<256x128xi1>, vector<256x128xf32>
      %cst_14 = arith.constant dense<0xFF800000> : vector<256xf32>
      %24 = vector.multi_reduction <maximumf>, %23, %cst_14 [1] : vector<256x128xf32> to vector<256xf32>
      %25 = vector.shape_cast %24 : vector<256xf32> to vector<256x1xf32>
      %26 = vector.broadcast %25 : vector<256x1xf32> to vector<256x128xf32>
      %27 = arith.subf %23, %26 : vector<256x128xf32>
      %28 = math.exp %27 : vector<256x128xf32>
      %cst_15 = arith.constant dense<0.000000e+00> : vector<256xf32>
      %29 = vector.multi_reduction <add>, %28, %cst_15 [1] : vector<256x128xf32> to vector<256xf32>
      %30 = vector.shape_cast %29 : vector<256xf32> to vector<256x1xf32>
      %31 = math.log %30 : vector<256x1xf32>
      %32 = vector.broadcast %31 : vector<256x1xf32> to vector<256x128xf32>
      %33 = arith.subf %27, %32 : vector<256x128xf32>
      %cst_16 = arith.constant 0.000000e+00 : f32
      %34 = vector.broadcast %cst_16 : f32 to vector<256x128xf32>
      %35 = arith.select %21, %33, %34 : vector<256x128xi1>, vector<256x128xf32>
      %c0_17 = arith.constant 0 : index
      %c0_18 = arith.constant 0 : index
      %36 = vector.load %arg5[%c0_17, %c0_18] : memref<256x128xf32, #tpu.memory_space<vmem>>, vector<256x128xf32>
      tpu.vector_store %arg5[%c0_17, %c0_18], %35 {strides = array<i32>} : memref<256x128xf32, #tpu.memory_space<vmem>>, vector<256x128xf32>,
    } else {
    }
    return
  }
  func.func @transform_0(%arg0: i32, %arg1: i32) -> (i32, i32) {
    %c0_i32 = arith.constant 0 : i32
    return %arg0, %arg1 : i32, i32
  }
  func.func @transform_1(%arg0: i32, %arg1: i32) -> (i32, i32) {
    %c0_i32 = arith.constant 0 : i32
    %c0_i32_0 = arith.constant 0 : i32
    %c0_i32_1 = arith.constant 0 : i32
    return %c0_i32, %c0_i32_0 : i32, i32
  }
  func.func @transform_2(%arg0: i32, %arg1: i32) -> (i32, i32) {
    %c0_i32 = arith.constant 0 : i32
    %c0_i32_0 = arith.constant 0 : i32
    %c0_i32_1 = arith.constant 0 : i32
    return %c0_i32, %c0_i32_0 : i32, i32
  }
  func.func @transform_3(%arg0: i32, %arg1: i32) -> (i32, i32) {
    %c0_i32 = arith.constant 0 : i32
    %c0_i32_0 = arith.constant 0 : i32
    return %arg0, %c0_i32 : i32, i32
  }
}

</mosaic_0001>

<bundles_post_ra>
// kernel: net_forward.11
= control target key start
LH: loop header
LB: loop body
LE: loop exit
PB: predicated region body
PF: predicated region fallthrough
CT: control target
= control target key end

     0   :  { %9 = vsyncpa [#allocation4], 0  ;;  %s2934_s15 = smov [#allocation3]   ;;  %s3710_s0 = inlined_call_operand.hbm [shape: bf16[256,256], index: 0, kind: input, shape index: {}]   ;;  %s3711_s1 = inlined_call_operand.vmem [shape: bf16[256,128], index: 1, kind: input, shape index: {}]   ;;  %s3712_s2 = inlined_call_operand.vmem [shape: bf16[128,640], index: 2, kind: input, shape index: {}]   ;;  %s3713_s3 = inlined_call_operand.vmem [shape: f32[1,640], index: 3, kind: input, shape index: {}]   ;;  %s3714_s4 = inlined_call_operand.vmem [shape: bf16[256,640], index: 4, kind: output, shape index: {}]  }
   0x1   :  { %s15_s16 = sshll.u32 %s2934_s15, 4  ;;  %s2910_s19 = scalar_lea.hbm %s3710_s0, 4096  ;;  %s16_s16 = int_to_ptr.vmem [resolvable:$true] %s15_s16 }
   0x2   :  { %p2911_p0 = scmp.ne.s32.totalorder %s3710_s0, %s2910_s19  ;;  %p2914_p1 = scmp.lt.u32.totalorder %s2910_s19, %s3710_s0 }
   0x4   :  { %p2916_p2 = pnand %p2914_p1, %p2911_p0 }
   0x6   :  { %2919 = shalt.err (!%p2916_p2)
}
   0x7   :  { %s2920_s24 = scalar_lea.vmem %s16_s16, 4096  ;;  %p2925_p4 = scmp.lt.s32.totalorder %s16_s16, %s16_s16 }
   0x8   :  { %p2921_p3 = scmp.ne.s32.totalorder %s16_s16, %s2920_s24  ;;  %p2926_p5 = scmp.lt.s32.totalorder %s2920_s24, %s2920_s24 }
   0xa   :  { %p2927_p6 = por %p2926_p5, %p2925_p4 }
   0xc   :  { %p2928_p7 = pnand %p2927_p6, %p2921_p3 }
   0xe   :  { %2931 = shalt.err (!%p2928_p7)
}
   0xf   :  { %s2935_s25 = smov 128   ;;  %s2936_s26 = smov 8  }
  0x10   :  { %21 = dma.hbm_to_vmem [thread:$0]  %s3710_s0, 4096, %s16_s16, [#allocation4], %s2935_s25, %s2935_s25, %s2936_s26  }
  0x11   :  { %2932 = dma.done.wait [#allocation4], 4096  }
  0x12   :  { %2933 = vsyncadd [#allocation4], 4294963200  ;;  %v2790_v0 = vld [vmem:[%s3711_s1 + $0x40] sm:$0xff]   ;;  %v2792_v2 = vld [vmem:[%s3711_s1 + $0x48] sm:$0xff]  }
  0x13   :  { %v2791_v1 = vld [vmem:[%s3711_s1] sm:$0xff]   ;;  %2586 = vmatprep.subr.bf16.mxu0 %v2790_v0  ;;  %2770 = vmatprep.subr.bf16.mxu1 %v2790_v0  ;;  %v2793_v3 = vld [vmem:[%s3711_s1 + $0x8] sm:$0xff]   ;;  %v2794_v4 = vld [vmem:[%s3711_s1 + $0x50] sm:$0xff]  }
  0x14   :  { %2587 = vmatpush3.bf16.msra.mxu0 %v2791_v1  ;;  %2778 = vmatpush3.bf16.msra.mxu1 %v2791_v1  ;;  %v2795_v5 = vld [vmem:[%s3711_s1 + $0x10] sm:$0xff]   ;;  %v2796_v6 = vld [vmem:[%s3711_s1 + $0x58] sm:$0xff]   ;;  %v2798_v8 = vld [vmem:[%s3711_s1 + $0x60] sm:$0xff]  }
  0x15   :  { %2588 = vmatprep.subr.bf16.mxu0 %v2792_v2  ;;  %2771 = vmatprep.subr.bf16.mxu1 %v2792_v2  ;;  %v2797_v7 = vld [vmem:[%s3711_s1 + $0x18] sm:$0xff]   ;;  %v2799_v9 = vld [vmem:[%s3711_s1 + $0x20] sm:$0xff]   ;;  %v2800_v10 = vld [vmem:[%s3711_s1 + $0x68] sm:$0xff]  }
  0x16   :  { %v2808_v11 = vld [vmem:[#allocation3 + $0x4] ss:$8 sps:$4 sm:$0xff]   ;;  %v2802_v13 = vld [vmem:[%s3711_s1 + $0x70] sm:$0xff]   ;;  %v2804_v15 = vld [vmem:[%s3711_s1 + $0x78] sm:$0xff]  }
  0x17   :  { %v2801_v12 = vld [vmem:[%s3711_s1 + $0x28] sm:$0xff]   ;;  %457 = vmatprep.mubr.bf16.mxu0 %v2808_v11  ;;  %v2803_v14 = vld [vmem:[%s3711_s1 + $0x30] sm:$0xff]   ;;  %v2805_v16 = vld [vmem:[%s3711_s1 + $0x38] sm:$0xff]  }
  0x18   :  { %2589 = vmatpush3.bf16.msra.mxu0 %v2793_v3  ;;  %2779 = vmatpush3.bf16.msra.mxu1 %v2793_v3  ;;  %v2806_v17 = vld [vmem:[#allocation3] ss:$8 sps:$4 sm:$0xff]   ;;  %v2809_v18 = vld [vmem:[#allocation3 + $0x14] ss:$8 sps:$4 sm:$0xff]   ;;  %v2844_v20 = vld [vmem:[#allocation3 + $0xc4] ss:$8 sps:$4 sm:$0xff]  }
  0x19   :  { %2590 = vmatprep.subr.bf16.mxu0 %v2794_v4  ;;  %2772 = vmatprep.subr.bf16.mxu1 %v2794_v4  ;;  %v2842_v19 = vld [vmem:[#allocation3 + $0xc0] ss:$8 sps:$4 sm:$0xff]   ;;  %v2845_v21 = vld [vmem:[#allocation3 + $0xd4] ss:$8 sps:$4 sm:$0xff]   ;;  %v2811_v22 = vld [vmem:[#allocation3 + $0x10] ss:$8 sps:$4 sm:$0xff]  }
  0x1a   :  { %553 = vmatprep.mubr.bf16.mxu1 %v2844_v20  ;;  %v2812_v23 = vld [vmem:[#allocation3 + $0x24] ss:$8 sps:$4 sm:$0xff]   ;;  %v2847_v24 = vld [vmem:[#allocation3 + $0xd0] ss:$8 sps:$4 sm:$0xff]   ;;  %v2854_v25 = vld [vmem:[%s3712_s2] ss:$20 sps:$4 sm:$0xff]  }
  0x1b   :  { %v2856_v26 = vld [vmem:[%s3712_s2 + $0x4] ss:$20 sps:$4 sm:$0xff]   ;;  %v2857_v28 = vld [vmem:[%s3712_s2 + $0x8] ss:$20 sps:$4 sm:$0xff]   ;;  %v2859_v29 = vld [vmem:[%s3712_s2 + $0xc] ss:$20 sps:$4 sm:$0xff]  }
  0x1c   :  { %2591 = vmatpush3.bf16.msra.mxu0 %v2795_v5  ;;  %2780 = vmatpush3.bf16.msra.mxu1 %v2795_v5  ;;  %v2848_v27 = vld [vmem:[#allocation3 + $0xe4] ss:$8 sps:$4 sm:$0xff]   ;;  %v2860_v30 = vld [vmem:[%s3712_s2 + $0x28] ss:$20 sps:$4 sm:$0xff]   ;;  %v2875_v46 = vld [vmem:[%s3712_s2 + $0x80] ss:$20 sps:$4 sm:$0xff]  }
  0x1d   :  { %2592 = vmatprep.subr.bf16.mxu0 %v2796_v6  ;;  %2773 = vmatprep.subr.bf16.mxu1 %v2796_v6  ;;  %v2862_v31 = vld [vmem:[%s3712_s2 + $0x2c] ss:$20 sps:$4 sm:$0xff]   ;;  %v2865_v32 = vld [vmem:[%s3712_s2 + $0x34] ss:$20 sps:$4 sm:$0xff]   ;;  %v2863_v33 = vld [vmem:[%s3712_s2 + $0x30] ss:$20 sps:$4 sm:$0xff]  }
  0x1e   :  { %v2868_v34 = vld [vmem:[%s3712_s2 + $0x54] ss:$20 sps:$4 sm:$0xff]   ;;  %v2866_v36 = vld [vmem:[%s3712_s2 + $0x50] ss:$20 sps:$4 sm:$0xff]   ;;  %v2869_v42 = vld [vmem:[%s3712_s2 + $0x58] ss:$20 sps:$4 sm:$0xff]  }
  0x1f   :  { %v2814_v35 = vld [vmem:[#allocation3 + $0x20] ss:$8 sps:$4 sm:$0xff]   ;;  %v2815_v37 = vld [vmem:[#allocation3 + $0x34] ss:$8 sps:$4 sm:$0xff]   ;;  %v2877_v43 = vld [vmem:[%s3712_s2 + $0x84] ss:$20 sps:$4 sm:$0xff]  }
  0x20   :  { %2593 = vmatpush3.bf16.msra.mxu0 %v2797_v7  ;;  %2781 = vmatpush3.bf16.msra.mxu1 %v2797_v7  ;;  %v2871_v38 = vld [vmem:[%s3712_s2 + $0x5c] ss:$20 sps:$4 sm:$0xff]   ;;  %v2850_v39 = vld [vmem:[#allocation3 + $0xe0] ss:$8 sps:$4 sm:$0xff]   ;;  %v2872_v44 = vld [vmem:[%s3712_s2 + $0x78] ss:$20 sps:$4 sm:$0xff]  }
  0x21   :  { %2594 = vmatprep.subr.bf16.mxu0 %v2798_v8  ;;  %2774 = vmatprep.subr.bf16.mxu1 %v2798_v8  ;;  %v2874_v40 = vld [vmem:[%s3712_s2 + $0x7c] ss:$20 sps:$4 sm:$0xff]   ;;  %v2880_v45 = vld [vmem:[%s3712_s2 + $0xa4] ss:$20 sps:$4 sm:$0xff]   ;;  %v2878_v47 = vld [vmem:[%s3712_s2 + $0xa0] ss:$20 sps:$4 sm:$0xff]  }
  0x22   :  { %v2851_v41 = vld [vmem:[#allocation3 + $0xf4] ss:$8 sps:$4 sm:$0xff]   ;;  %v2817_v48 = vld [vmem:[#allocation3 + $0x30] ss:$8 sps:$4 sm:$0xff]   ;;  %v2883_v49 = vld [vmem:[%s3712_s2 + $0xac] ss:$20 sps:$4 sm:$0xff]  }
  0x23   :  { %v2818_v50 = vld [vmem:[#allocation3 + $0x44] ss:$8 sps:$4 sm:$0xff]   ;;  %v2881_v51 = vld [vmem:[%s3712_s2 + $0xa8] ss:$20 sps:$4 sm:$0xff]   ;;  %v2853_v52 = vld [vmem:[#allocation3 + $0xf0] ss:$8 sps:$4 sm:$0xff]  }
  0x24   :  { %2595 = vmatpush3.bf16.msra.mxu0 %v2799_v9  ;;  %2782 = vmatpush3.bf16.msra.mxu1 %v2799_v9  ;;  %v2886_v53 = vld [vmem:[%s3712_s2 + $0xcc] ss:$20 sps:$4 sm:$0xff]   ;;  %v2889_v54 = vld [vmem:[%s3712_s2 + $0xd4] ss:$20 sps:$4 sm:$0xff]   ;;  %v2887_v57 = vld [vmem:[%s3712_s2 + $0xd0] ss:$20 sps:$4 sm:$0xff]  }
  0x25   :  { %2596 = vmatprep.subr.bf16.mxu0 %v2800_v10  ;;  %2775 = vmatprep.subr.bf16.mxu1 %v2800_v10  ;;  %v2884_v55 = vld [vmem:[%s3712_s2 + $0xc8] ss:$20 sps:$4 sm:$0xff]   ;;  %v2890_v58 = vld [vmem:[%s3712_s2 + $0xf0] ss:$20 sps:$4 sm:$0xff]   ;;  %v2893_v10 = vld [vmem:[%s3712_s2 + $0xf8] ss:$20 sps:$4 sm:$0xff]  }
  0x26   :  { %v2892_v56 = vld [vmem:[%s3712_s2 + $0xf4] ss:$20 sps:$4 sm:$0xff]   ;;  %v2823_v61 = vld [vmem:[#allocation3 + $0x50] ss:$8 sps:$4 sm:$0xff]   ;;  %v2824_v62 = vld [vmem:[#allocation3 + $0x64] ss:$8 sps:$4 sm:$0xff]  }
  0x27   :  { %v2820_v59 = vld [vmem:[#allocation3 + $0x40] ss:$8 sps:$4 sm:$0xff]   ;;  %v2821_v60 = vld [vmem:[#allocation3 + $0x54] ss:$8 sps:$4 sm:$0xff]   ;;  %v2829_v1 = vld [vmem:[#allocation3 + $0x70] ss:$8 sps:$4 sm:$0xff]  }
  0x28   :  { %2597 = vmatpush3.bf16.msra.mxu0 %v2801_v12  ;;  %2783 = vmatpush3.bf16.msra.mxu1 %v2801_v12  ;;  %v2826_v63 = vld [vmem:[#allocation3 + $0x60] ss:$8 sps:$4 sm:$0xff]   ;;  %v2827_v0 = vld [vmem:[#allocation3 + $0x74] ss:$8 sps:$4 sm:$0xff]   ;;  %v2830_v2 = vld [vmem:[#allocation3 + $0x84] ss:$8 sps:$4 sm:$0xff]  }
  0x29   :  { %2598 = vmatprep.subr.bf16.mxu0 %v2802_v13  ;;  %2776 = vmatprep.subr.bf16.mxu1 %v2802_v13  ;;  %v2832_v3 = vld [vmem:[#allocation3 + $0x80] ss:$8 sps:$4 sm:$0xff]   ;;  %v2833_v4 = vld [vmem:[#allocation3 + $0x94] ss:$8 sps:$4 sm:$0xff]   ;;  %v2835_v5 = vld [vmem:[#allocation3 + $0x90] ss:$8 sps:$4 sm:$0xff]  }
  0x2a   :  { %v2836_v6 = vld [vmem:[#allocation3 + $0xa4] ss:$8 sps:$4 sm:$0xff]   ;;  %v2838_v7 = vld [vmem:[#allocation3 + $0xa0] ss:$8 sps:$4 sm:$0xff]   ;;  %v2839_v8 = vld [vmem:[#allocation3 + $0xb4] ss:$8 sps:$4 sm:$0xff]  }
  0x2b   :  { %v2895_v9 = vld [vmem:[%s3712_s2 + $0xfc] ss:$20 sps:$4 sm:$0xff]   ;;  %v2901_v13 = vld [vmem:[%s3712_s2 + $0x124] ss:$20 sps:$4 sm:$0xff]  }
  0x2c   :  { %2599 = vmatpush3.bf16.msra.mxu0 %v2803_v14  ;;  %2784 = vmatpush3.bf16.msra.mxu1 %v2803_v14  ;;  %v2841_v11 = vld [vmem:[#allocation3 + $0xb0] ss:$8 sps:$4 sm:$0xff]  }
  0x2d   :  { %2600 = vmatprep.subr.bf16.mxu0 %v2804_v15  ;;  %2777 = vmatprep.subr.bf16.mxu1 %v2804_v15  ;;  %v2898_v12 = vld [vmem:[%s3712_s2 + $0x11c] ss:$20 sps:$4 sm:$0xff]   ;;  %v2896_v14 = vld [vmem:[%s3712_s2 + $0x118] ss:$20 sps:$4 sm:$0xff]   ;;  %v2899_v15 = vld [vmem:[%s3712_s2 + $0x120] ss:$20 sps:$4 sm:$0xff]  }
  0x30   :  { %2601 = vmatpush3.bf16.msra.mxu0 %v2805_v16  ;;  %2785 = vmatpush3.bf16.msra.mxu1 %v2805_v16  ;;  %v2902_v16 = vld [vmem:[%s3712_s2 + $0x10] ss:$20 sps:$4 sm:$0xff]  }
  0x31   :  { %984 = vmatprep.subr.bf16.mxu1 %v2856_v26  ;;  %1177 = vmatprep.subr.bf16.mxu0 %v2859_v29 }
  0x33   :  { %458 = vmatmul.mubr.bf16.vlgmr.msra.gmra.mrb[0].mxu0 %v2806_v17  ;;  %554 = vmatmul.mubr.bf16.vlgmr.msra.gmra.mrb[0].mxu1 %v2842_v19  ;;  %v2937_v17 = vmov 0  }
  0x34   :  { %465 = vmatprep.mubr.bf16.mxu0 %v2809_v18  ;;  %561 = vmatprep.mubr.bf16.mxu1 %v2845_v21 }
  0x35   :  { %985 = vmatpush1.bf16.msra.mxu1 %v2854_v25  ;;  %1178 = vmatpush1.bf16.msra.mxu0 %v2857_v28 }
  0x36   :  { %986 = vmatprep.subr.bf16.mxu1 %v2862_v31  ;;  %1179 = vmatprep.subr.bf16.mxu0 %v2865_v32 }
  0x39   :  { %987 = vmatpush1.bf16.msra.mxu1 %v2860_v30  ;;  %1180 = vmatpush1.bf16.msra.mxu0 %v2863_v33  ;;  %v2903_v30 = vld [vmem:[%s3712_s2 + $0x38] ss:$20 sps:$4 sm:$0xff]  }
  0x3a   :  { %988 = vmatprep.subr.bf16.mxu1 %v2868_v34  ;;  %1181 = vmatprep.subr.bf16.mxu0 %v2871_v38 }
  0x3b   :  { %466 = vmatmul.mubr.bf16.gmra.mrb[4].mxu0 %v2811_v22  ;;  %562 = vmatmul.mubr.bf16.gmra.mrb[4].mxu1 %v2847_v24 }
  0x3c   :  { %473 = vmatprep.mubr.bf16.mxu0 %v2812_v23  ;;  %569 = vmatprep.mubr.bf16.mxu1 %v2848_v27 }
  0x3d   :  { %989 = vmatpush1.bf16.msra.mxu1 %v2866_v36  ;;  %1182 = vmatpush1.bf16.msra.mxu0 %v2869_v42 }
  0x3e   :  { %990 = vmatprep.subr.bf16.mxu1 %v2874_v40  ;;  %1183 = vmatprep.subr.bf16.mxu0 %v2877_v43 }
  0x41   :  { %991 = vmatpush1.bf16.msra.mxu1 %v2872_v44  ;;  %1184 = vmatpush1.bf16.msra.mxu0 %v2875_v46 }
  0x42   :  { %992 = vmatprep.subr.bf16.mxu1 %v2880_v45  ;;  %1185 = vmatprep.subr.bf16.mxu0 %v2883_v49 }
  0x43   :  { %474 = vmatmul.mubr.bf16.gmra.mrb[8].mxu0 %v2814_v35  ;;  %570 = vmatmul.mubr.bf16.gmra.mrb[8].mxu1 %v2850_v39 }
  0x44   :  { %481 = vmatprep.mubr.bf16.mxu0 %v2815_v37  ;;  %577 = vmatprep.mubr.bf16.mxu1 %v2851_v41  ;;  %v2904_v37 = vld [vmem:[%s3712_s2 + $0x60] ss:$20 sps:$4 sm:$0xff]  }
  0x45   :  { %993 = vmatpush1.bf16.msra.mxu1 %v2878_v47  ;;  %1186 = vmatpush1.bf16.msra.mxu0 %v2881_v51  ;;  %v2905_v47 = vld [vmem:[%s3712_s2 + $0x88] ss:$20 sps:$4 sm:$0xff]  }
  0x46   :  { %994 = vmatprep.subr.bf16.mxu1 %v2886_v53  ;;  %1187 = vmatprep.subr.bf16.mxu0 %v2889_v54 }
  0x49   :  { %995 = vmatpush1.bf16.msra.mxu1 %v2884_v55  ;;  %1188 = vmatpush1.bf16.msra.mxu0 %v2887_v57  ;;  %v2906_v55 = vld [vmem:[%s3712_s2 + $0xb0] ss:$20 sps:$4 sm:$0xff]  }
  0x4a   :  { %996 = vmatprep.subr.bf16.mxu1 %v2892_v56  ;;  %1189 = vmatprep.subr.bf16.mxu0 %v2895_v9 }
  0x4b   :  { %482 = vmatmul.mubr.bf16.gmra.mrb[12].mxu0 %v2817_v48  ;;  %578 = vmatmul.mubr.bf16.gmra.mrb[12].mxu1 %v2853_v52 }
  0x4c   :  { %489 = vmatprep.mubr.bf16.mxu0 %v2818_v50  ;;  %1016 = vmatprep.mubr.bf16.mxu1 %v2937_v17 }
  0x4d   :  { %997 = vmatpush1.bf16.msra.mxu1 %v2890_v58  ;;  %1190 = vmatpush1.bf16.msra.mxu0 %v2893_v10 }
  0x4e   :  { %998 = vmatprep.subr.bf16.mxu1 %v2898_v12  ;;  %1191 = vmatprep.subr.bf16.mxu0 %v2901_v13 }
  0x51   :  { %999 = vmatpush1.bf16.msra.mxu1 %v2896_v14  ;;  %1192 = vmatpush1.bf16.msra.mxu0 %v2899_v15  ;;  %v2909_v15 = vld [vmem:[%s3712_s2 + $0x128] ss:$20 sps:$4 sm:$0xff]  }
  0x52   :  { %2722 = vmatprep.subr.bf16.mxu1 %v2902_v16 }
  0x53   :  { %490 = vmatmul.mubr.bf16.gmra.mrb[16].mxu0 %v2820_v59 }
  0x54   :  { %497 = vmatprep.mubr.bf16.mxu0 %v2821_v60 }
  0x5b   :  { %498 = vmatmul.mubr.bf16.gmra.mrb[20].mxu0 %v2823_v61 }
  0x5c   :  { %505 = vmatprep.mubr.bf16.mxu0 %v2824_v62 }
  0x63   :  { %506 = vmatmul.mubr.bf16.gmra.mrb[24].mxu0 %v2826_v63  ;;  %v2907_v63 = vld [vmem:[%s3712_s2 + $0xd8] ss:$20 sps:$4 sm:$0xff]  }
  0x64   :  { %513 = vmatprep.mubr.bf16.mxu0 %v2827_v0 }
  0x6b   :  { %514 = vmatmul.mubr.bf16.gmra.mrb[28].mxu0 %v2829_v1 }
  0x6c   :  { %521 = vmatprep.mubr.bf16.mxu0 %v2830_v2 }
  0x73   :  { %522 = vmatmul.mubr.bf16.gmra.mrb[32].mxu0 %v2832_v3 }
  0x74   :  { %529 = vmatprep.mubr.bf16.mxu0 %v2833_v4 }
  0x7b   :  { %530 = vmatmul.mubr.bf16.gmra.mrb[36].mxu0 %v2835_v5 }
  0x7c   :  { %537 = vmatprep.mubr.bf16.mxu0 %v2836_v6 }
  0x83   :  { %538 = vmatmul.mubr.bf16.gmra.mrb[40].mxu0 %v2838_v7  ;;  %v2908_v7 = vld [vmem:[%s3712_s2 + $0x100] ss:$20 sps:$4 sm:$0xff]  }
  0x84   :  { %545 = vmatprep.mubr.bf16.mxu0 %v2839_v8 }
  0x8b   :  { %546 = vmatmul.mubr.bf16.gmra.mrb[44].mxu0 %v2841_v11 }
  0x8c   :  { %1209 = vmatprep.mubr.bf16.mxu0 %v2937_v17 }
 0x106   :  { %v2602_v18 = vpop.f32.mrb[0].mxu0  ;;  %v2674_v22 = vpop.f32.mrb[0].mxu1 }
 0x107   :  { %v2603_v19 = vpop.f32.mrb[1].mxu0  ;;  %v2675_v24 = vpop.f32.mrb[1].mxu1 }
 0x108   :  { %v2604_v20 = vadd.f32 %v2603_v19, %v2602_v18  ;;  %v2605_v21 = vpop.f32.mrb[2].mxu0  ;;  %v2676_v26 = vadd.f32 %v2675_v24, %v2674_v22  ;;  %v2677_v27 = vpop.f32.mrb[2].mxu1 }
 0x109   :  { %v2606_v23 = vpop.f32.mrb[3].mxu0  ;;  %v2678_v28 = vpop.f32.mrb[3].mxu1 }
 0x10a   :  { %v2607_v25 = vadd.f32 %v2606_v23, %v2605_v21  ;;  %v2679_v31 = vadd.f32 %v2678_v28, %v2677_v27 }
 0x10c   :  { %v3124_v29 = vpack.c.bf16 %v2607_v25, %v2604_v20  ;;  %v3131_v33 = vpack.c.bf16 %v2679_v31, %v2676_v26 }
 0x10e   :  { %v2608_v32 = vpop.f32.mrb[4].mxu0  ;;  %1017 = vmatmul.mubr.bf16.vlgmr.msra.gmra.mrb[16].mxu1 %v3124_v29  ;;  %1210 = vmatmul.mubr.bf16.vlgmr.msra.gmra.mrb[48].mxu0 %v3124_v29  ;;  %v2680_v38 = vpop.f32.mrb[4].mxu1 }
 0x10f   :  { %2723 = vmatpush3.bf16.msra.mxu1 %v2902_v16  ;;  %v2609_v34 = vpop.f32.mrb[5].mxu0  ;;  %1026 = vmatprep.mubr.bf16.mxu1 %v2937_v17  ;;  %v2681_v40 = vpop.f32.mrb[5].mxu1 }
 0x110   :  { %v2610_v35 = vadd.f32 %v2609_v34, %v2608_v32  ;;  %v2611_v36 = vpop.f32.mrb[6].mxu0  ;;  %1219 = vmatprep.mubr.bf16.mxu0 %v2937_v17  ;;  %2724 = vmatprep.subr.bf16.mxu1 %v2903_v30  ;;  %v2682_v42 = vadd.f32 %v2681_v40, %v2680_v38  ;;  %v2683_v43 = vpop.f32.mrb[6].mxu1 }
 0x111   :  { %v2612_v39 = vpop.f32.mrb[7].mxu0  ;;  %v2684_v44 = vpop.f32.mrb[7].mxu1 }
 0x112   :  { %v2613_v41 = vadd.f32 %v2612_v39, %v2611_v36  ;;  %v2685_v46 = vadd.f32 %v2684_v44, %v2683_v43 }
 0x113   :  { %2725 = vmatpush3.bf16.msra.mxu1 %v2903_v30 }
 0x114   :  { %v3138_v45 = vpack.c.bf16 %v2613_v41, %v2610_v35  ;;  %2726 = vmatprep.subr.bf16.mxu1 %v2904_v37  ;;  %v3145_v49 = vpack.c.bf16 %v2685_v46, %v2682_v42 }
 0x116   :  { %v2614_v48 = vpop.f32.mrb[8].mxu0  ;;  %1027 = vmatmul.mubr.bf16.gmra.mrb[20].mxu1 %v3138_v45  ;;  %1220 = vmatmul.mubr.bf16.gmra.mrb[52].mxu0 %v3138_v45  ;;  %v2686_v53 = vpop.f32.mrb[8].mxu1 }
 0x117   :  { %v2615_v50 = vpop.f32.mrb[9].mxu0  ;;  %1036 = vmatprep.mubr.bf16.mxu1 %v2937_v17  ;;  %1229 = vmatprep.mubr.bf16.mxu0 %v2937_v17  ;;  %v2687_v56 = vpop.f32.mrb[9].mxu1 }
 0x118   :  { %v2616_v51 = vadd.f32 %v2615_v50, %v2614_v48  ;;  %v2617_v52 = vpop.f32.mrb[10].mxu0  ;;  %2727 = vmatpush3.bf16.msra.mxu1 %v2904_v37  ;;  %v2688_v58 = vadd.f32 %v2687_v56, %v2686_v53  ;;  %v2689_v59 = vpop.f32.mrb[10].mxu1 }
 0x119   :  { %v2618_v54 = vpop.f32.mrb[11].mxu0  ;;  %2728 = vmatprep.subr.bf16.mxu1 %v2905_v47  ;;  %v2690_v60 = vpop.f32.mrb[11].mxu1 }
 0x11a   :  { %v2619_v57 = vadd.f32 %v2618_v54, %v2617_v52  ;;  %v2691_v62 = vadd.f32 %v2690_v60, %v2689_v59 }
 0x11c   :  { %v3152_v61 = vpack.c.bf16 %v2619_v57, %v2616_v51  ;;  %2729 = vmatpush3.bf16.msra.mxu1 %v2905_v47  ;;  %v3159_v1 = vpack.c.bf16 %v2691_v62, %v2688_v58 }
 0x11d   :  { %2730 = vmatprep.subr.bf16.mxu1 %v2906_v55 }
 0x11e   :  { %v2620_v0 = vpop.f32.mrb[12].mxu0  ;;  %1037 = vmatmul.mubr.bf16.gmra.mrb[24].mxu1 %v3152_v61  ;;  %1230 = vmatmul.mubr.bf16.gmra.mrb[56].mxu0 %v3152_v61  ;;  %v2692_v5 = vpop.f32.mrb[12].mxu1 }
 0x11f   :  { %v2621_v2 = vpop.f32.mrb[13].mxu0  ;;  %1046 = vmatprep.mubr.bf16.mxu1 %v2937_v17  ;;  %1239 = vmatprep.mubr.bf16.mxu0 %v2937_v17  ;;  %v2693_v8 = vpop.f32.mrb[13].mxu1 }
 0x120   :  { %v2622_v3 = vadd.f32 %v2621_v2, %v2620_v0  ;;  %v2623_v4 = vpop.f32.mrb[14].mxu0  ;;  %2731 = vmatpush3.bf16.msra.mxu1 %v2906_v55  ;;  %v2694_v10 = vadd.f32 %v2693_v8, %v2692_v5  ;;  %v2695_v11 = vpop.f32.mrb[14].mxu1 }
 0x121   :  { %v2624_v6 = vpop.f32.mrb[15].mxu0  ;;  %2732 = vmatprep.subr.bf16.mxu1 %v2907_v63  ;;  %v2696_v12 = vpop.f32.mrb[15].mxu1 }
 0x122   :  { %v2625_v9 = vadd.f32 %v2624_v6, %v2623_v4  ;;  %v2697_v14 = vadd.f32 %v2696_v12, %v2695_v11 }
 0x124   :  { %v3166_v13 = vpack.c.bf16 %v2625_v9, %v2622_v3  ;;  %2733 = vmatpush3.bf16.msra.mxu1 %v2907_v63  ;;  %v3173_v18 = vpack.c.bf16 %v2697_v14, %v2694_v10 }
 0x125   :  { %2734 = vmatprep.subr.bf16.mxu1 %v2908_v7 }
 0x126   :  { %v2626_v16 = vpop.f32.mrb[16].mxu0  ;;  %1047 = vmatmul.mubr.bf16.gmra.mrb[28].mxu1 %v3166_v13  ;;  %1240 = vmatmul.mubr.bf16.gmra.mrb[60].mxu0 %v3166_v13 }
 0x127   :  { %v2627_v19 = vpop.f32.mrb[17].mxu0  ;;  %1056 = vmatprep.mubr.bf16.mxu1 %v2937_v17  ;;  %1249 = vmatprep.mubr.bf16.mxu0 %v2937_v17 }
 0x128   :  { %v2628_v20 = vadd.f32 %v2627_v19, %v2626_v16  ;;  %v2629_v21 = vpop.f32.mrb[18].mxu0  ;;  %2735 = vmatpush3.bf16.msra.mxu1 %v2908_v7 }
 0x129   :  { %v2630_v22 = vpop.f32.mrb[19].mxu0  ;;  %2736 = vmatprep.subr.bf16.mxu1 %v2909_v15 }
 0x12a   :  { %v2631_v23 = vadd.f32 %v2630_v22, %v2629_v21 }
 0x12c   :  { %v3177_v24 = vpack.c.bf16 %v2631_v23, %v2628_v20  ;;  %2737 = vmatpush3.bf16.msra.mxu1 %v2909_v15 }
 0x12e   :  { %v2632_v25 = vpop.f32.mrb[20].mxu0  ;;  %1057 = vmatmul.mubr.bf16.gmra.mrb[32].mxu1 %v3177_v24  ;;  %1250 = vmatmul.mubr.bf16.gmra.mrb[64].mxu0 %v3177_v24 }
 0x12f   :  { %v2633_v26 = vpop.f32.mrb[21].mxu0  ;;  %1066 = vmatprep.mubr.bf16.mxu1 %v2937_v17  ;;  %1259 = vmatprep.mubr.bf16.mxu0 %v2937_v17 }
 0x130   :  { %v2634_v27 = vadd.f32 %v2633_v26, %v2632_v25  ;;  %v2635_v28 = vpop.f32.mrb[22].mxu0 }
 0x131   :  { %v2636_v30 = vpop.f32.mrb[23].mxu0 }
 0x132   :  { %v2637_v31 = vadd.f32 %v2636_v30, %v2635_v28 }
 0x134   :  { %v3183_v32 = vpack.c.bf16 %v2637_v31, %v2634_v27 }
 0x136   :  { %v2638_v34 = vpop.f32.mrb[24].mxu0  ;;  %1067 = vmatmul.mubr.bf16.gmra.mrb[36].mxu1 %v3183_v32  ;;  %1260 = vmatmul.mubr.bf16.gmra.mrb[68].mxu0 %v3183_v32 }
 0x137   :  { %v2639_v35 = vpop.f32.mrb[25].mxu0  ;;  %1076 = vmatprep.mubr.bf16.mxu1 %v2937_v17  ;;  %1269 = vmatprep.mubr.bf16.mxu0 %v2937_v17 }
 0x138   :  { %v2640_v36 = vadd.f32 %v2639_v35, %v2638_v34  ;;  %v2641_v37 = vpop.f32.mrb[26].mxu0 }
 0x139   :  { %v2642_v38 = vpop.f32.mrb[27].mxu0 }
 0x13a   :  { %v2643_v39 = vadd.f32 %v2642_v38, %v2641_v37 }
 0x13c   :  { %v3189_v40 = vpack.c.bf16 %v2643_v39, %v2640_v36 }
 0x13e   :  { %v2644_v41 = vpop.f32.mrb[28].mxu0  ;;  %1077 = vmatmul.mubr.bf16.gmra.mrb[40].mxu1 %v3189_v40  ;;  %1270 = vmatmul.mubr.bf16.gmra.mrb[72].mxu0 %v3189_v40 }
 0x13f   :  { %v2645_v42 = vpop.f32.mrb[29].mxu0  ;;  %1086 = vmatprep.mubr.bf16.mxu1 %v2937_v17  ;;  %1279 = vmatprep.mubr.bf16.mxu0 %v2937_v17 }
 0x140   :  { %v2646_v43 = vadd.f32 %v2645_v42, %v2644_v41  ;;  %v2647_v44 = vpop.f32.mrb[30].mxu0 }
 0x141   :  { %v2648_v46 = vpop.f32.mrb[31].mxu0 }
 0x142   :  { %v2649_v47 = vadd.f32 %v2648_v46, %v2647_v44 }
 0x144   :  { %v3195_v48 = vpack.c.bf16 %v2649_v47, %v2646_v43 }
 0x146   :  { %v2650_v50 = vpop.f32.mrb[32].mxu0  ;;  %1087 = vmatmul.mubr.bf16.gmra.mrb[44].mxu1 %v3195_v48  ;;  %1280 = vmatmul.mubr.bf16.gmra.mrb[76].mxu0 %v3195_v48 }
 0x147   :  { %v2651_v51 = vpop.f32.mrb[33].mxu0  ;;  %1096 = vmatprep.mubr.bf16.mxu1 %v2937_v17  ;;  %1289 = vmatprep.mubr.bf16.mxu0 %v2937_v17 }
 0x148   :  { %v2652_v52 = vadd.f32 %v2651_v51, %v2650_v50  ;;  %v2653_v53 = vpop.f32.mrb[34].mxu0 }
 0x149   :  { %v2654_v54 = vpop.f32.mrb[35].mxu0 }
 0x14a   :  { %v2655_v55 = vadd.f32 %v2654_v54, %v2653_v53 }
 0x14c   :  { %v693_v56 = vpack.c.bf16 %v2655_v55, %v2652_v52 }
 0x14e   :  { %v2656_v57 = vpop.f32.mrb[36].mxu0  ;;  %1097 = vmatmul.mubr.bf16.gmra.mrb[48].mxu1 %v693_v56  ;;  %1290 = vmatmul.mubr.bf16.gmra.mrb[80].mxu0 %v693_v56 }
 0x14f   :  { %v2657_v58 = vpop.f32.mrb[37].mxu0  ;;  %1106 = vmatprep.mubr.bf16.mxu1 %v2937_v17  ;;  %1299 = vmatprep.mubr.bf16.mxu0 %v2937_v17 }
 0x150   :  { %v2658_v59 = vadd.f32 %v2657_v58, %v2656_v57  ;;  %v2659_v60 = vpop.f32.mrb[38].mxu0 }
 0x151   :  { %v2660_v62 = vpop.f32.mrb[39].mxu0 }
 0x152   :  { %v2661_v63 = vadd.f32 %v2660_v62, %v2659_v60 }
 0x154   :  { %v694_v0 = vpack.c.bf16 %v2661_v63, %v2658_v59 }
 0x156   :  { %v2662_v2 = vpop.f32.mrb[40].mxu0  ;;  %1107 = vmatmul.mubr.bf16.gmra.mrb[52].mxu1 %v694_v0  ;;  %1300 = vmatmul.mubr.bf16.gmra.mrb[84].mxu0 %v694_v0 }
 0x157   :  { %v2663_v3 = vpop.f32.mrb[41].mxu0  ;;  %1116 = vmatprep.mubr.bf16.mxu1 %v2937_v17  ;;  %1309 = vmatprep.mubr.bf16.mxu0 %v2937_v17 }
 0x158   :  { %v2664_v4 = vadd.f32 %v2663_v3, %v2662_v2  ;;  %v2665_v5 = vpop.f32.mrb[42].mxu0 }
 0x159   :  { %v2666_v6 = vpop.f32.mrb[43].mxu0 }
 0x15a   :  { %v2667_v7 = vadd.f32 %v2666_v6, %v2665_v5 }
 0x15c   :  { %v695_v8 = vpack.c.bf16 %v2667_v7, %v2664_v4 }
 0x15e   :  { %v2668_v9 = vpop.f32.mrb[44].mxu0  ;;  %1117 = vmatmul.mubr.bf16.gmra.mrb[56].mxu1 %v695_v8  ;;  %1310 = vmatmul.mubr.bf16.gmra.mrb[88].mxu0 %v695_v8 }
 0x15f   :  { %v2669_v10 = vpop.f32.mrb[45].mxu0  ;;  %1126 = vmatprep.mubr.bf16.mxu1 %v2937_v17  ;;  %1319 = vmatprep.mubr.bf16.mxu0 %v2937_v17 }
 0x160   :  { %v2670_v11 = vadd.f32 %v2669_v10, %v2668_v9  ;;  %v2671_v12 = vpop.f32.mrb[46].mxu0 }
 0x161   :  { %v2672_v14 = vpop.f32.mrb[47].mxu0 }
 0x162   :  { %v2673_v15 = vadd.f32 %v2672_v14, %v2671_v12 }
 0x164   :  { %v696_v16 = vpack.c.bf16 %v2673_v15, %v2670_v11 }
 0x166   :  { %1127 = vmatmul.mubr.bf16.gmra.mrb[60].mxu1 %v696_v16  ;;  %1320 = vmatmul.mubr.bf16.gmra.mrb[92].mxu0 %v696_v16 }
 0x167   :  { %1136 = vmatprep.mubr.bf16.mxu1 %v2937_v17  ;;  %1329 = vmatprep.mubr.bf16.mxu0 %v2937_v17 }
 0x16e   :  { %1137 = vmatmul.mubr.bf16.gmra.mrb[64].mxu1 %v3131_v33  ;;  %1330 = vmatmul.mubr.bf16.gmra.mrb[96].mxu0 %v3131_v33 }
 0x16f   :  { %1146 = vmatprep.mubr.bf16.mxu1 %v2937_v17  ;;  %1339 = vmatprep.mubr.bf16.mxu0 %v2937_v17 }
 0x176   :  { %1147 = vmatmul.mubr.bf16.gmra.mrb[68].mxu1 %v3145_v49  ;;  %1340 = vmatmul.mubr.bf16.gmra.mrb[100].mxu0 %v3145_v49 }
 0x177   :  { %1156 = vmatprep.mubr.bf16.mxu1 %v2937_v17  ;;  %1349 = vmatprep.mubr.bf16.mxu0 %v2937_v17 }
 0x17e   :  { %1157 = vmatmul.mubr.bf16.gmra.mrb[72].mxu1 %v3159_v1  ;;  %1350 = vmatmul.mubr.bf16.gmra.mrb[104].mxu0 %v3159_v1 }
 0x17f   :  { %1166 = vmatprep.mubr.bf16.mxu1 %v2937_v17  ;;  %1359 = vmatprep.mubr.bf16.mxu0 %v2937_v17  ;;  %v751_v17 = vlaneseq }
 0x186   :  { %1167 = vmatmul.mubr.bf16.gmra.mrb[76].mxu1 %v3173_v18  ;;  %1360 = vmatmul.mubr.bf16.gmra.mrb[108].mxu0 %v3173_v18 }
 0x187   :  { %2738 = vmatprep.mubr.bf16.mxu1 %v3124_v29  ;;  %v3235_v29 = vshrl.u32 %v751_v17, 7 }
 0x18e   :  { %2739 = vmatmul.mubr.bf16.vlgmr.msra.gmra.mrb[80].mxu1 %v3138_v45  ;;  %v753_v45 = vsub.s32 0, %v3235_v29 }
 0x18f   :  { %2742 = vmatprep.mubr.bf16.mxu1 %v3152_v61  ;;  %v761_v61 = vsub.s32 2, %v3235_v29 }
 0x196   :  { %2743 = vmatmul.mubr.bf16.gmra.mrb[84].mxu1 %v3166_v13  ;;  %v3242_v13 = vld [vmem:[%s3713_s3] sm:$0x1f] }
 0x197   :  { %2746 = vmatprep.mubr.bf16.mxu1 %v3177_v24 }
 0x19e   :  { %2747 = vmatmul.mubr.bf16.gmra.mrb[88].mxu1 %v3183_v32 }
 0x19f   :  { %2750 = vmatprep.mubr.bf16.mxu1 %v3189_v40 }
 0x1a6   :  { %2751 = vmatmul.mubr.bf16.gmra.mrb[92].mxu1 %v3195_v48 }
 0x1a7   :  { %2754 = vmatprep.mubr.bf16.mxu1 %v693_v56 }
 0x1ae   :  { %2755 = vmatmul.mubr.bf16.gmra.mrb[96].mxu1 %v694_v0 }
 0x1af   :  { %2758 = vmatprep.mubr.bf16.mxu1 %v695_v8 }
 0x1b6   :  { %2759 = vmatmul.mubr.bf16.gmra.mrb[100].mxu1 %v696_v16 }
 0x1b7   :  { %2762 = vmatprep.mubr.bf16.mxu1 %v3131_v33  ;;  %v757_v33 = vsub.s32 1, %v3235_v29 }
 0x1b9   :  { %v3253_v19 = vrot.slane %v3242_v13, %v757_v33 }
 0x1be   :  { %2763 = vmatmul.mubr.bf16.gmra.mrb[104].mxu1 %v3145_v49  ;;  %v765_v49 = vsub.s32 3, %v3235_v29 }
 0x1bf   :  { %2766 = vmatprep.mubr.bf16.mxu1 %v3159_v1  ;;  %v3247_v1 = vrot.slane %v3242_v13, %v753_v45 }
 0x1c0   :  { %v3256_v20 = vrot.slane %v3242_v13, %v765_v49 }
 0x1c6   :  { %2767 = vmatmul.mubr.bf16.gmra.mrb[108].mxu1 %v3173_v18  ;;  %v3250_v18 = vrot.slane %v3242_v13, %v761_v61 }
 0x1e1   :  { %v1018_v21 = vpop.f32.mrb[16].mxu1  ;;  %v1211_v22 = vpop.f32.mrb[48].mxu0 }
 0x1e2   :  { %v1019_v23 = vadd.f32 %v1018_v21, %v3247_v1  ;;  %v1212_v24 = vadd.f32 %v1211_v22, %v3250_v18  ;;  %v1020_v25 = vpop.f32.mrb[17].mxu1  ;;  %v1213_v26 = vpop.f32.mrb[49].mxu0 }
 0x1e3   :  { %v1021_v27 = vadd.f32 %v1020_v25, %v3253_v19  ;;  %v1214_v28 = vadd.f32 %v1213_v26, %v3256_v20  ;;  %v1022_v30 = vpop.f32.mrb[18].mxu1  ;;  %v1215_v31 = vpop.f32.mrb[50].mxu0 }
 0x1e4   :  { %v1531_v32 = vmax.f32 %v1019_v23, 0.0  ;;  %v1533_v34 = vmax.f32 %v1212_v24, 0.0  ;;  %v1023_v35 = vadd.f32 %v1022_v30, %v3247_v1  ;;  %v1216_v36 = vadd.f32 %v1215_v31, %v3250_v18  ;;  %v1024_v37 = vpop.f32.mrb[19].mxu1  ;;  %v1217_v38 = vpop.f32.mrb[51].mxu0 }
 0x1e5   :  { %v1532_v39 = vmax.f32 %v1021_v27, 0.0  ;;  %v1534_v40 = vmax.f32 %v1214_v28, 0.0  ;;  %v1025_v41 = vadd.f32 %v1024_v37, %v3253_v19  ;;  %v1218_v42 = vadd.f32 %v1217_v38, %v3256_v20 }
 0x1e6   :  { %v1536_v43 = vmax.f32 %v1023_v35, 0.0  ;;  %v1538_v44 = vmax.f32 %v1216_v36, 0.0 }
 0x1e7   :  { %v2490_v46 = vpack.c.bf16 %v1532_v39, %v1531_v32  ;;  %v2491_v47 = vpack.c.bf16 %v1534_v40, %v1533_v34  ;;  %v1537_v48 = vmax.f32 %v1025_v41, 0.0  ;;  %v1539_v50 = vmax.f32 %v1218_v42, 0.0 }
 0x1e9   :  { %2203 = vst [vmem:[%s3714_s4] sm:$0xff] %v2490_v46  ;;  %2204 = vst [vmem:[%s3714_s4 + $0x8] sm:$0xff] %v2491_v47  ;;  %v2493_v51 = vpack.c.bf16 %v1537_v48, %v1536_v43  ;;  %v2494_v52 = vpack.c.bf16 %v1539_v50, %v1538_v44  ;;  %v1028_v53 = vpop.f32.mrb[20].mxu1  ;;  %v1221_v54 = vpop.f32.mrb[52].mxu0 }
 0x1ea   :  { %v1029_v55 = vadd.f32 %v1028_v53, %v3247_v1  ;;  %v1222_v56 = vadd.f32 %v1221_v54, %v3250_v18  ;;  %v1030_v57 = vpop.f32.mrb[21].mxu1  ;;  %v1223_v58 = vpop.f32.mrb[53].mxu0 }
 0x1eb   :  { %2206 = vst [vmem:[%s3714_s4 + $0x14] sm:$0xff] %v2493_v51  ;;  %2207 = vst [vmem:[%s3714_s4 + $0x1c] sm:$0xff] %v2494_v52  ;;  %v1031_v59 = vadd.f32 %v1030_v57, %v3253_v19  ;;  %v1224_v60 = vadd.f32 %v1223_v58, %v3256_v20  ;;  %v1032_v62 = vpop.f32.mrb[22].mxu1  ;;  %v1225_v63 = vpop.f32.mrb[54].mxu0 }
 0x1ec   :  { %v1541_v0 = vmax.f32 %v1029_v55, 0.0  ;;  %v1543_v2 = vmax.f32 %v1222_v56, 0.0  ;;  %v1033_v3 = vadd.f32 %v1032_v62, %v3247_v1  ;;  %v1226_v4 = vadd.f32 %v1225_v63, %v3250_v18  ;;  %v1034_v5 = vpop.f32.mrb[23].mxu1  ;;  %v1227_v6 = vpop.f32.mrb[55].mxu0 }
 0x1ed   :  { %v1542_v7 = vmax.f32 %v1031_v59, 0.0  ;;  %v1544_v8 = vmax.f32 %v1224_v60, 0.0  ;;  %v1035_v9 = vadd.f32 %v1034_v5, %v3253_v19  ;;  %v1228_v10 = vadd.f32 %v1227_v6, %v3256_v20 }
 0x1ee   :  { %v1546_v11 = vmax.f32 %v1033_v3, 0.0  ;;  %v1548_v12 = vmax.f32 %v1226_v4, 0.0 }
 0x1ef   :  { %v2496_v14 = vpack.c.bf16 %v1542_v7, %v1541_v0  ;;  %v2497_v15 = vpack.c.bf16 %v1544_v8, %v1543_v2  ;;  %v1547_v16 = vmax.f32 %v1035_v9, 0.0  ;;  %v1549_v17 = vmax.f32 %v1228_v10, 0.0 }
 0x1f1   :  { %2209 = vst [vmem:[%s3714_s4 + $0x28] sm:$0xff] %v2496_v14  ;;  %2210 = vst [vmem:[%s3714_s4 + $0x30] sm:$0xff] %v2497_v15  ;;  %v2499_v45 = vpack.c.bf16 %v1547_v16, %v1546_v11  ;;  %v2500_v61 = vpack.c.bf16 %v1549_v17, %v1548_v12  ;;  %v1038_v33 = vpop.f32.mrb[24].mxu1  ;;  %v1231_v49 = vpop.f32.mrb[56].mxu0 }
 0x1f2   :  { %v1039_v21 = vadd.f32 %v1038_v33, %v3247_v1  ;;  %v1232_v22 = vadd.f32 %v1231_v49, %v3250_v18  ;;  %v1040_v23 = vpop.f32.mrb[25].mxu1  ;;  %v1233_v24 = vpop.f32.mrb[57].mxu0 }
 0x1f3   :  { %2212 = vst [vmem:[%s3714_s4 + $0x3c] sm:$0xff] %v2499_v45  ;;  %2213 = vst [vmem:[%s3714_s4 + $0x44] sm:$0xff] %v2500_v61  ;;  %v1041_v25 = vadd.f32 %v1040_v23, %v3253_v19  ;;  %v1234_v26 = vadd.f32 %v1233_v24, %v3256_v20  ;;  %v1042_v27 = vpop.f32.mrb[26].mxu1  ;;  %v1235_v28 = vpop.f32.mrb[58].mxu0 }
 0x1f4   :  { %v1551_v30 = vmax.f32 %v1039_v21, 0.0  ;;  %v1553_v31 = vmax.f32 %v1232_v22, 0.0  ;;  %v1043_v32 = vadd.f32 %v1042_v27, %v3247_v1  ;;  %v1236_v34 = vadd.f32 %v1235_v28, %v3250_v18  ;;  %v1044_v35 = vpop.f32.mrb[27].mxu1  ;;  %v1237_v36 = vpop.f32.mrb[59].mxu0 }
 0x1f5   :  { %v1552_v37 = vmax.f32 %v1041_v25, 0.0  ;;  %v1554_v38 = vmax.f32 %v1234_v26, 0.0  ;;  %v1045_v39 = vadd.f32 %v1044_v35, %v3253_v19  ;;  %v1238_v40 = vadd.f32 %v1237_v36, %v3256_v20 }
 0x1f6   :  { %v1556_v41 = vmax.f32 %v1043_v32, 0.0  ;;  %v1558_v42 = vmax.f32 %v1236_v34, 0.0 }
 0x1f7   :  { %v2502_v43 = vpack.c.bf16 %v1552_v37, %v1551_v30  ;;  %v2503_v44 = vpack.c.bf16 %v1554_v38, %v1553_v31  ;;  %v1557_v46 = vmax.f32 %v1045_v39, 0.0  ;;  %v1559_v47 = vmax.f32 %v1238_v40, 0.0 }
 0x1f9   :  { %2215 = vst [vmem:[%s3714_s4 + $0x50] sm:$0xff] %v2502_v43  ;;  %2216 = vst [vmem:[%s3714_s4 + $0x58] sm:$0xff] %v2503_v44  ;;  %v2505_v48 = vpack.c.bf16 %v1557_v46, %v1556_v41  ;;  %v2506_v50 = vpack.c.bf16 %v1559_v47, %v1558_v42  ;;  %v1048_v51 = vpop.f32.mrb[28].mxu1  ;;  %v1241_v52 = vpop.f32.mrb[60].mxu0 }
 0x1fa   :  { %v1049_v53 = vadd.f32 %v1048_v51, %v3247_v1  ;;  %v1242_v54 = vadd.f32 %v1241_v52, %v3250_v18  ;;  %v1050_v55 = vpop.f32.mrb[29].mxu1  ;;  %v1243_v56 = vpop.f32.mrb[61].mxu0 }
 0x1fb   :  { %2218 = vst [vmem:[%s3714_s4 + $0x64] sm:$0xff] %v2505_v48  ;;  %2219 = vst [vmem:[%s3714_s4 + $0x6c] sm:$0xff] %v2506_v50  ;;  %v1051_v57 = vadd.f32 %v1050_v55, %v3253_v19  ;;  %v1244_v58 = vadd.f32 %v1243_v56, %v3256_v20  ;;  %v1052_v59 = vpop.f32.mrb[30].mxu1  ;;  %v1245_v60 = vpop.f32.mrb[62].mxu0 }
 0x1fc   :  { %v1561_v62 = vmax.f32 %v1049_v53, 0.0  ;;  %v1563_v63 = vmax.f32 %v1242_v54, 0.0  ;;  %v1053_v0 = vadd.f32 %v1052_v59, %v3247_v1  ;;  %v1246_v2 = vadd.f32 %v1245_v60, %v3250_v18  ;;  %v1054_v3 = vpop.f32.mrb[31].mxu1  ;;  %v1247_v4 = vpop.f32.mrb[63].mxu0 }
 0x1fd   :  { %v1562_v5 = vmax.f32 %v1051_v57, 0.0  ;;  %v1564_v6 = vmax.f32 %v1244_v58, 0.0  ;;  %v1055_v7 = vadd.f32 %v1054_v3, %v3253_v19  ;;  %v1248_v8 = vadd.f32 %v1247_v4, %v3256_v20 }
 0x1fe   :  { %v1566_v9 = vmax.f32 %v1053_v0, 0.0  ;;  %v1568_v10 = vmax.f32 %v1246_v2, 0.0 }
 0x1ff   :  { %v2508_v11 = vpack.c.bf16 %v1562_v5, %v1561_v62  ;;  %v2509_v12 = vpack.c.bf16 %v1564_v6, %v1563_v63  ;;  %v1567_v14 = vmax.f32 %v1055_v7, 0.0  ;;  %v1569_v15 = vmax.f32 %v1248_v8, 0.0 }
 0x201   :  { %2221 = vst [vmem:[%s3714_s4 + $0x78] sm:$0xff] %v2508_v11  ;;  %2222 = vst [vmem:[%s3714_s4 + $0x80] sm:$0xff] %v2509_v12  ;;  %v2511_v16 = vpack.c.bf16 %v1567_v14, %v1566_v9  ;;  %v2512_v17 = vpack.c.bf16 %v1569_v15, %v1568_v10  ;;  %v1058_v45 = vpop.f32.mrb[32].mxu1  ;;  %v1251_v61 = vpop.f32.mrb[64].mxu0 }
 0x202   :  { %v1059_v33 = vadd.f32 %v1058_v45, %v3247_v1  ;;  %v1252_v49 = vadd.f32 %v1251_v61, %v3250_v18  ;;  %v1060_v21 = vpop.f32.mrb[33].mxu1  ;;  %v1253_v22 = vpop.f32.mrb[65].mxu0 }
 0x203   :  { %2224 = vst [vmem:[%s3714_s4 + $0x8c] sm:$0xff] %v2511_v16  ;;  %2225 = vst [vmem:[%s3714_s4 + $0x94] sm:$0xff] %v2512_v17  ;;  %v1061_v23 = vadd.f32 %v1060_v21, %v3253_v19  ;;  %v1254_v24 = vadd.f32 %v1253_v22, %v3256_v20  ;;  %v1062_v25 = vpop.f32.mrb[34].mxu1  ;;  %v1255_v26 = vpop.f32.mrb[66].mxu0 }
 0x204   :  { %v1571_v27 = vmax.f32 %v1059_v33, 0.0  ;;  %v1573_v28 = vmax.f32 %v1252_v49, 0.0  ;;  %v1063_v30 = vadd.f32 %v1062_v25, %v3247_v1  ;;  %v1256_v31 = vadd.f32 %v1255_v26, %v3250_v18  ;;  %v1064_v32 = vpop.f32.mrb[35].mxu1  ;;  %v1257_v34 = vpop.f32.mrb[67].mxu0 }
 0x205   :  { %v1572_v35 = vmax.f32 %v1061_v23, 0.0  ;;  %v1574_v36 = vmax.f32 %v1254_v24, 0.0  ;;  %v1065_v37 = vadd.f32 %v1064_v32, %v3253_v19  ;;  %v1258_v38 = vadd.f32 %v1257_v34, %v3256_v20 }
 0x206   :  { %v1576_v39 = vmax.f32 %v1063_v30, 0.0  ;;  %v1578_v40 = vmax.f32 %v1256_v31, 0.0 }
 0x207   :  { %v2514_v41 = vpack.c.bf16 %v1572_v35, %v1571_v27  ;;  %v2515_v42 = vpack.c.bf16 %v1574_v36, %v1573_v28  ;;  %v1577_v43 = vmax.f32 %v1065_v37, 0.0  ;;  %v1579_v44 = vmax.f32 %v1258_v38, 0.0 }
 0x209   :  { %2227 = vst [vmem:[%s3714_s4 + $0xa0] sm:$0xff] %v2514_v41  ;;  %2228 = vst [vmem:[%s3714_s4 + $0xa8] sm:$0xff] %v2515_v42  ;;  %v2517_v46 = vpack.c.bf16 %v1577_v43, %v1576_v39  ;;  %v2518_v47 = vpack.c.bf16 %v1579_v44, %v1578_v40  ;;  %v1068_v48 = vpop.f32.mrb[36].mxu1  ;;  %v1261_v50 = vpop.f32.mrb[68].mxu0 }
 0x20a   :  { %v1069_v51 = vadd.f32 %v1068_v48, %v3247_v1  ;;  %v1262_v52 = vadd.f32 %v1261_v50, %v3250_v18  ;;  %v1070_v53 = vpop.f32.mrb[37].mxu1  ;;  %v1263_v54 = vpop.f32.mrb[69].mxu0 }
 0x20b   :  { %2230 = vst [vmem:[%s3714_s4 + $0xb4] sm:$0xff] %v2517_v46  ;;  %2231 = vst [vmem:[%s3714_s4 + $0xbc] sm:$0xff] %v2518_v47  ;;  %v1071_v55 = vadd.f32 %v1070_v53, %v3253_v19  ;;  %v1264_v56 = vadd.f32 %v1263_v54, %v3256_v20  ;;  %v1072_v57 = vpop.f32.mrb[38].mxu1  ;;  %v1265_v58 = vpop.f32.mrb[70].mxu0 }
 0x20c   :  { %v1581_v59 = vmax.f32 %v1069_v51, 0.0  ;;  %v1583_v60 = vmax.f32 %v1262_v52, 0.0  ;;  %v1073_v62 = vadd.f32 %v1072_v57, %v3247_v1  ;;  %v1266_v63 = vadd.f32 %v1265_v58, %v3250_v18  ;;  %v1074_v0 = vpop.f32.mrb[39].mxu1  ;;  %v1267_v2 = vpop.f32.mrb[71].mxu0 }
 0x20d   :  { %v1582_v3 = vmax.f32 %v1071_v55, 0.0  ;;  %v1584_v4 = vmax.f32 %v1264_v56, 0.0  ;;  %v1075_v5 = vadd.f32 %v1074_v0, %v3253_v19  ;;  %v1268_v6 = vadd.f32 %v1267_v2, %v3256_v20 }
 0x20e   :  { %v1586_v7 = vmax.f32 %v1073_v62, 0.0  ;;  %v1588_v8 = vmax.f32 %v1266_v63, 0.0 }
 0x20f   :  { %v2520_v9 = vpack.c.bf16 %v1582_v3, %v1581_v59  ;;  %v2521_v10 = vpack.c.bf16 %v1584_v4, %v1583_v60  ;;  %v1587_v11 = vmax.f32 %v1075_v5, 0.0  ;;  %v1589_v12 = vmax.f32 %v1268_v6, 0.0 }
 0x211   :  { %2233 = vst [vmem:[%s3714_s4 + $0xc8] sm:$0xff] %v2520_v9  ;;  %2234 = vst [vmem:[%s3714_s4 + $0xd0] sm:$0xff] %v2521_v10  ;;  %v2523_v14 = vpack.c.bf16 %v1587_v11, %v1586_v7  ;;  %v2524_v15 = vpack.c.bf16 %v1589_v12, %v1588_v8  ;;  %v1078_v16 = vpop.f32.mrb[40].mxu1  ;;  %v1271_v17 = vpop.f32.mrb[72].mxu0 }
 0x212   :  { %v1079_v45 = vadd.f32 %v1078_v16, %v3247_v1  ;;  %v1272_v61 = vadd.f32 %v1271_v17, %v3250_v18  ;;  %v1080_v33 = vpop.f32.mrb[41].mxu1  ;;  %v1273_v49 = vpop.f32.mrb[73].mxu0 }
 0x213   :  { %2236 = vst [vmem:[%s3714_s4 + $0xdc] sm:$0xff] %v2523_v14  ;;  %2237 = vst [vmem:[%s3714_s4 + $0xe4] sm:$0xff] %v2524_v15  ;;  %v1081_v21 = vadd.f32 %v1080_v33, %v3253_v19  ;;  %v1274_v22 = vadd.f32 %v1273_v49, %v3256_v20  ;;  %v1082_v23 = vpop.f32.mrb[42].mxu1  ;;  %v1275_v24 = vpop.f32.mrb[74].mxu0 }
 0x214   :  { %v1591_v25 = vmax.f32 %v1079_v45, 0.0  ;;  %v1593_v26 = vmax.f32 %v1272_v61, 0.0  ;;  %v1083_v27 = vadd.f32 %v1082_v23, %v3247_v1  ;;  %v1276_v28 = vadd.f32 %v1275_v24, %v3250_v18  ;;  %v1084_v30 = vpop.f32.mrb[43].mxu1  ;;  %v1277_v31 = vpop.f32.mrb[75].mxu0 }
 0x215   :  { %v1592_v32 = vmax.f32 %v1081_v21, 0.0  ;;  %v1594_v34 = vmax.f32 %v1274_v22, 0.0  ;;  %v1085_v35 = vadd.f32 %v1084_v30, %v3253_v19  ;;  %v1278_v36 = vadd.f32 %v1277_v31, %v3256_v20 }
 0x216   :  { %v1596_v37 = vmax.f32 %v1083_v27, 0.0  ;;  %v1598_v38 = vmax.f32 %v1276_v28, 0.0 }
 0x217   :  { %v2526_v39 = vpack.c.bf16 %v1592_v32, %v1591_v25  ;;  %v2527_v40 = vpack.c.bf16 %v1594_v34, %v1593_v26  ;;  %v1597_v41 = vmax.f32 %v1085_v35, 0.0  ;;  %v1599_v42 = vmax.f32 %v1278_v36, 0.0 }
 0x219   :  { %2239 = vst [vmem:[%s3714_s4 + $0xf0] sm:$0xff] %v2526_v39  ;;  %2240 = vst [vmem:[%s3714_s4 + $0xf8] sm:$0xff] %v2527_v40  ;;  %v2529_v43 = vpack.c.bf16 %v1597_v41, %v1596_v37  ;;  %v2530_v44 = vpack.c.bf16 %v1599_v42, %v1598_v38  ;;  %v1088_v46 = vpop.f32.mrb[44].mxu1  ;;  %v1281_v47 = vpop.f32.mrb[76].mxu0 }
 0x21a   :  { %v1089_v48 = vadd.f32 %v1088_v46, %v3247_v1  ;;  %v1282_v50 = vadd.f32 %v1281_v47, %v3250_v18  ;;  %v1090_v51 = vpop.f32.mrb[45].mxu1  ;;  %v1283_v52 = vpop.f32.mrb[77].mxu0 }
 0x21b   :  { %2242 = vst [vmem:[%s3714_s4 + $0x104] sm:$0xff] %v2529_v43  ;;  %2243 = vst [vmem:[%s3714_s4 + $0x10c] sm:$0xff] %v2530_v44  ;;  %v1091_v53 = vadd.f32 %v1090_v51, %v3253_v19  ;;  %v1284_v54 = vadd.f32 %v1283_v52, %v3256_v20  ;;  %v1092_v55 = vpop.f32.mrb[46].mxu1  ;;  %v1285_v56 = vpop.f32.mrb[78].mxu0 }
 0x21c   :  { %v1601_v57 = vmax.f32 %v1089_v48, 0.0  ;;  %v1603_v58 = vmax.f32 %v1282_v50, 0.0  ;;  %v1093_v59 = vadd.f32 %v1092_v55, %v3247_v1  ;;  %v1286_v60 = vadd.f32 %v1285_v56, %v3250_v18  ;;  %v1094_v62 = vpop.f32.mrb[47].mxu1  ;;  %v1287_v63 = vpop.f32.mrb[79].mxu0 }
 0x21d   :  { %v1602_v0 = vmax.f32 %v1091_v53, 0.0  ;;  %v1604_v2 = vmax.f32 %v1284_v54, 0.0  ;;  %v1095_v3 = vadd.f32 %v1094_v62, %v3253_v19  ;;  %v1288_v4 = vadd.f32 %v1287_v63, %v3256_v20 }
 0x21e   :  { %v1606_v5 = vmax.f32 %v1093_v59, 0.0  ;;  %v1608_v6 = vmax.f32 %v1286_v60, 0.0 }
 0x21f   :  { %v2532_v7 = vpack.c.bf16 %v1602_v0, %v1601_v57  ;;  %v2533_v8 = vpack.c.bf16 %v1604_v2, %v1603_v58  ;;  %v1607_v9 = vmax.f32 %v1095_v3, 0.0  ;;  %v1609_v10 = vmax.f32 %v1288_v4, 0.0 }
 0x221   :  { %2245 = vst [vmem:[%s3714_s4 + $0x118] sm:$0xff] %v2532_v7  ;;  %2246 = vst [vmem:[%s3714_s4 + $0x120] sm:$0xff] %v2533_v8  ;;  %v2535_v11 = vpack.c.bf16 %v1607_v9, %v1606_v5  ;;  %v2536_v12 = vpack.c.bf16 %v1609_v10, %v1608_v6  ;;  %v1098_v14 = vpop.f32.mrb[48].mxu1  ;;  %v1291_v15 = vpop.f32.mrb[80].mxu0 }
 0x222   :  { %v1099_v16 = vadd.f32 %v1098_v14, %v3247_v1  ;;  %v1292_v17 = vadd.f32 %v1291_v15, %v3250_v18  ;;  %v1100_v45 = vpop.f32.mrb[49].mxu1  ;;  %v1293_v61 = vpop.f32.mrb[81].mxu0 }
 0x223   :  { %2248 = vst [vmem:[%s3714_s4 + $0x12c] sm:$0xff] %v2535_v11  ;;  %2249 = vst [vmem:[%s3714_s4 + $0x134] sm:$0xff] %v2536_v12  ;;  %v1101_v33 = vadd.f32 %v1100_v45, %v3253_v19  ;;  %v1294_v49 = vadd.f32 %v1293_v61, %v3256_v20  ;;  %v1102_v21 = vpop.f32.mrb[50].mxu1  ;;  %v1295_v22 = vpop.f32.mrb[82].mxu0 }
 0x224   :  { %v1611_v23 = vmax.f32 %v1099_v16, 0.0  ;;  %v1613_v24 = vmax.f32 %v1292_v17, 0.0  ;;  %v1103_v25 = vadd.f32 %v1102_v21, %v3247_v1  ;;  %v1296_v26 = vadd.f32 %v1295_v22, %v3250_v18  ;;  %v1104_v27 = vpop.f32.mrb[51].mxu1  ;;  %v1297_v28 = vpop.f32.mrb[83].mxu0 }
 0x225   :  { %v1612_v30 = vmax.f32 %v1101_v33, 0.0  ;;  %v1614_v31 = vmax.f32 %v1294_v49, 0.0  ;;  %v1105_v32 = vadd.f32 %v1104_v27, %v3253_v19  ;;  %v1298_v34 = vadd.f32 %v1297_v28, %v3256_v20 }
 0x226   :  { %v1616_v35 = vmax.f32 %v1103_v25, 0.0  ;;  %v1618_v36 = vmax.f32 %v1296_v26, 0.0 }
 0x227   :  { %v2538_v37 = vpack.c.bf16 %v1612_v30, %v1611_v23  ;;  %v2539_v38 = vpack.c.bf16 %v1614_v31, %v1613_v24  ;;  %v1617_v39 = vmax.f32 %v1105_v32, 0.0  ;;  %v1619_v40 = vmax.f32 %v1298_v34, 0.0 }
 0x229   :  { %2251 = vst [vmem:[%s3714_s4 + $0x140] sm:$0xff] %v2538_v37  ;;  %2252 = vst [vmem:[%s3714_s4 + $0x148] sm:$0xff] %v2539_v38  ;;  %v2541_v41 = vpack.c.bf16 %v1617_v39, %v1616_v35  ;;  %v2542_v42 = vpack.c.bf16 %v1619_v40, %v1618_v36  ;;  %v1108_v43 = vpop.f32.mrb[52].mxu1  ;;  %v1301_v44 = vpop.f32.mrb[84].mxu0 }
 0x22a   :  { %v1109_v46 = vadd.f32 %v1108_v43, %v3247_v1  ;;  %v1302_v47 = vadd.f32 %v1301_v44, %v3250_v18  ;;  %v1110_v48 = vpop.f32.mrb[53].mxu1  ;;  %v1303_v50 = vpop.f32.mrb[85].mxu0 }
 0x22b   :  { %2254 = vst [vmem:[%s3714_s4 + $0x154] sm:$0xff] %v2541_v41  ;;  %2255 = vst [vmem:[%s3714_s4 + $0x15c] sm:$0xff] %v2542_v42  ;;  %v1111_v51 = vadd.f32 %v1110_v48, %v3253_v19  ;;  %v1304_v52 = vadd.f32 %v1303_v50, %v3256_v20  ;;  %v1112_v53 = vpop.f32.mrb[54].mxu1  ;;  %v1305_v54 = vpop.f32.mrb[86].mxu0 }
 0x22c   :  { %v1621_v55 = vmax.f32 %v1109_v46, 0.0  ;;  %v1623_v56 = vmax.f32 %v1302_v47, 0.0  ;;  %v1113_v57 = vadd.f32 %v1112_v53, %v3247_v1  ;;  %v1306_v58 = vadd.f32 %v1305_v54, %v3250_v18  ;;  %v1114_v59 = vpop.f32.mrb[55].mxu1  ;;  %v1307_v60 = vpop.f32.mrb[87].mxu0 }
 0x22d   :  { %v1622_v62 = vmax.f32 %v1111_v51, 0.0  ;;  %v1624_v63 = vmax.f32 %v1304_v52, 0.0  ;;  %v1115_v0 = vadd.f32 %v1114_v59, %v3253_v19  ;;  %v1308_v2 = vadd.f32 %v1307_v60, %v3256_v20 }
 0x22e   :  { %v1626_v3 = vmax.f32 %v1113_v57, 0.0  ;;  %v1628_v4 = vmax.f32 %v1306_v58, 0.0 }
 0x22f   :  { %v2544_v5 = vpack.c.bf16 %v1622_v62, %v1621_v55  ;;  %v2545_v6 = vpack.c.bf16 %v1624_v63, %v1623_v56  ;;  %v1627_v7 = vmax.f32 %v1115_v0, 0.0  ;;  %v1629_v8 = vmax.f32 %v1308_v2, 0.0 }
 0x231   :  { %2257 = vst [vmem:[%s3714_s4 + $0x168] sm:$0xff] %v2544_v5  ;;  %2258 = vst [vmem:[%s3714_s4 + $0x170] sm:$0xff] %v2545_v6  ;;  %v2547_v9 = vpack.c.bf16 %v1627_v7, %v1626_v3  ;;  %v2548_v10 = vpack.c.bf16 %v1629_v8, %v1628_v4  ;;  %v1118_v11 = vpop.f32.mrb[56].mxu1  ;;  %v1311_v12 = vpop.f32.mrb[88].mxu0 }
 0x232   :  { %v1119_v14 = vadd.f32 %v1118_v11, %v3247_v1  ;;  %v1312_v15 = vadd.f32 %v1311_v12, %v3250_v18  ;;  %v1120_v16 = vpop.f32.mrb[57].mxu1  ;;  %v1313_v17 = vpop.f32.mrb[89].mxu0 }
 0x233   :  { %2260 = vst [vmem:[%s3714_s4 + $0x17c] sm:$0xff] %v2547_v9  ;;  %2261 = vst [vmem:[%s3714_s4 + $0x184] sm:$0xff] %v2548_v10  ;;  %v1121_v45 = vadd.f32 %v1120_v16, %v3253_v19  ;;  %v1314_v61 = vadd.f32 %v1313_v17, %v3256_v20  ;;  %v1122_v33 = vpop.f32.mrb[58].mxu1  ;;  %v1315_v49 = vpop.f32.mrb[90].mxu0 }
 0x234   :  { %v1631_v21 = vmax.f32 %v1119_v14, 0.0  ;;  %v1633_v22 = vmax.f32 %v1312_v15, 0.0  ;;  %v1123_v23 = vadd.f32 %v1122_v33, %v3247_v1  ;;  %v1316_v24 = vadd.f32 %v1315_v49, %v3250_v18  ;;  %v1124_v25 = vpop.f32.mrb[59].mxu1  ;;  %v1317_v26 = vpop.f32.mrb[91].mxu0 }
 0x235   :  { %v1632_v27 = vmax.f32 %v1121_v45, 0.0  ;;  %v1634_v28 = vmax.f32 %v1314_v61, 0.0  ;;  %v1125_v30 = vadd.f32 %v1124_v25, %v3253_v19  ;;  %v1318_v31 = vadd.f32 %v1317_v26, %v3256_v20 }
 0x236   :  { %v1636_v32 = vmax.f32 %v1123_v23, 0.0  ;;  %v1638_v34 = vmax.f32 %v1316_v24, 0.0 }
 0x237   :  { %v2550_v35 = vpack.c.bf16 %v1632_v27, %v1631_v21  ;;  %v2551_v36 = vpack.c.bf16 %v1634_v28, %v1633_v22  ;;  %v1637_v37 = vmax.f32 %v1125_v30, 0.0  ;;  %v1639_v38 = vmax.f32 %v1318_v31, 0.0 }
 0x239   :  { %2263 = vst [vmem:[%s3714_s4 + $0x190] sm:$0xff] %v2550_v35  ;;  %2264 = vst [vmem:[%s3714_s4 + $0x198] sm:$0xff] %v2551_v36  ;;  %v2553_v39 = vpack.c.bf16 %v1637_v37, %v1636_v32  ;;  %v2554_v40 = vpack.c.bf16 %v1639_v38, %v1638_v34  ;;  %v1128_v41 = vpop.f32.mrb[60].mxu1  ;;  %v1321_v42 = vpop.f32.mrb[92].mxu0 }
 0x23a   :  { %v1129_v43 = vadd.f32 %v1128_v41, %v3247_v1  ;;  %v1322_v44 = vadd.f32 %v1321_v42, %v3250_v18  ;;  %v1130_v46 = vpop.f32.mrb[61].mxu1  ;;  %v1323_v47 = vpop.f32.mrb[93].mxu0 }
 0x23b   :  { %2266 = vst [vmem:[%s3714_s4 + $0x1a4] sm:$0xff] %v2553_v39  ;;  %2267 = vst [vmem:[%s3714_s4 + $0x1ac] sm:$0xff] %v2554_v40  ;;  %v1131_v48 = vadd.f32 %v1130_v46, %v3253_v19  ;;  %v1324_v50 = vadd.f32 %v1323_v47, %v3256_v20  ;;  %v1132_v51 = vpop.f32.mrb[62].mxu1  ;;  %v1325_v52 = vpop.f32.mrb[94].mxu0 }
 0x23c   :  { %v1641_v53 = vmax.f32 %v1129_v43, 0.0  ;;  %v1643_v54 = vmax.f32 %v1322_v44, 0.0  ;;  %v1133_v55 = vadd.f32 %v1132_v51, %v3247_v1  ;;  %v1326_v56 = vadd.f32 %v1325_v52, %v3250_v18  ;;  %v1134_v57 = vpop.f32.mrb[63].mxu1  ;;  %v1327_v58 = vpop.f32.mrb[95].mxu0 }
 0x23d   :  { %v1642_v59 = vmax.f32 %v1131_v48, 0.0  ;;  %v1644_v60 = vmax.f32 %v1324_v50, 0.0  ;;  %v1135_v62 = vadd.f32 %v1134_v57, %v3253_v19  ;;  %v1328_v63 = vadd.f32 %v1327_v58, %v3256_v20 }
 0x23e   :  { %v1646_v0 = vmax.f32 %v1133_v55, 0.0  ;;  %v1648_v2 = vmax.f32 %v1326_v56, 0.0 }
 0x23f   :  { %v2556_v3 = vpack.c.bf16 %v1642_v59, %v1641_v53  ;;  %v2557_v4 = vpack.c.bf16 %v1644_v60, %v1643_v54  ;;  %v1647_v5 = vmax.f32 %v1135_v62, 0.0  ;;  %v1649_v6 = vmax.f32 %v1328_v63, 0.0 }
 0x241   :  { %2269 = vst [vmem:[%s3714_s4 + $0x1b8] sm:$0xff] %v2556_v3  ;;  %2270 = vst [vmem:[%s3714_s4 + $0x1c0] sm:$0xff] %v2557_v4  ;;  %v2559_v7 = vpack.c.bf16 %v1647_v5, %v1646_v0  ;;  %v2560_v8 = vpack.c.bf16 %v1649_v6, %v1648_v2  ;;  %v1138_v9 = vpop.f32.mrb[64].mxu1  ;;  %v1331_v10 = vpop.f32.mrb[96].mxu0 }
 0x242   :  { %v1139_v11 = vadd.f32 %v1138_v9, %v3247_v1  ;;  %v1332_v12 = vadd.f32 %v1331_v10, %v3250_v18  ;;  %v1140_v14 = vpop.f32.mrb[65].mxu1  ;;  %v1333_v15 = vpop.f32.mrb[97].mxu0 }
 0x243   :  { %2272 = vst [vmem:[%s3714_s4 + $0x1cc] sm:$0xff] %v2559_v7  ;;  %2273 = vst [vmem:[%s3714_s4 + $0x1d4] sm:$0xff] %v2560_v8  ;;  %v1141_v16 = vadd.f32 %v1140_v14, %v3253_v19  ;;  %v1334_v17 = vadd.f32 %v1333_v15, %v3256_v20  ;;  %v1142_v45 = vpop.f32.mrb[66].mxu1  ;;  %v1335_v61 = vpop.f32.mrb[98].mxu0 }
 0x244   :  { %v1651_v33 = vmax.f32 %v1139_v11, 0.0  ;;  %v1653_v49 = vmax.f32 %v1332_v12, 0.0  ;;  %v1143_v21 = vadd.f32 %v1142_v45, %v3247_v1  ;;  %v1336_v22 = vadd.f32 %v1335_v61, %v3250_v18  ;;  %v1144_v23 = vpop.f32.mrb[67].mxu1  ;;  %v1337_v24 = vpop.f32.mrb[99].mxu0 }
 0x245   :  { %v1652_v25 = vmax.f32 %v1141_v16, 0.0  ;;  %v1654_v26 = vmax.f32 %v1334_v17, 0.0  ;;  %v1145_v27 = vadd.f32 %v1144_v23, %v3253_v19  ;;  %v1338_v28 = vadd.f32 %v1337_v24, %v3256_v20 }
 0x246   :  { %v1656_v30 = vmax.f32 %v1143_v21, 0.0  ;;  %v1658_v31 = vmax.f32 %v1336_v22, 0.0 }
 0x247   :  { %v2562_v32 = vpack.c.bf16 %v1652_v25, %v1651_v33  ;;  %v2563_v34 = vpack.c.bf16 %v1654_v26, %v1653_v49  ;;  %v1657_v35 = vmax.f32 %v1145_v27, 0.0  ;;  %v1659_v36 = vmax.f32 %v1338_v28, 0.0 }
 0x249   :  { %2275 = vst [vmem:[%s3714_s4 + $0x1e0] sm:$0xff] %v2562_v32  ;;  %2276 = vst [vmem:[%s3714_s4 + $0x1e8] sm:$0xff] %v2563_v34  ;;  %v2565_v37 = vpack.c.bf16 %v1657_v35, %v1656_v30  ;;  %v2566_v38 = vpack.c.bf16 %v1659_v36, %v1658_v31  ;;  %v1148_v39 = vpop.f32.mrb[68].mxu1  ;;  %v1341_v40 = vpop.f32.mrb[100].mxu0 }
 0x24a   :  { %v1149_v41 = vadd.f32 %v1148_v39, %v3247_v1  ;;  %v1342_v42 = vadd.f32 %v1341_v40, %v3250_v18  ;;  %v1150_v43 = vpop.f32.mrb[69].mxu1  ;;  %v1343_v44 = vpop.f32.mrb[101].mxu0 }
 0x24b   :  { %2278 = vst [vmem:[%s3714_s4 + $0x1f4] sm:$0xff] %v2565_v37  ;;  %2279 = vst [vmem:[%s3714_s4 + $0x1fc] sm:$0xff] %v2566_v38  ;;  %v1151_v46 = vadd.f32 %v1150_v43, %v3253_v19  ;;  %v1344_v47 = vadd.f32 %v1343_v44, %v3256_v20  ;;  %v1152_v48 = vpop.f32.mrb[70].mxu1  ;;  %v1345_v50 = vpop.f32.mrb[102].mxu0  ;;  %v769_v43 = vsub.s32 4, %v3235_v29 }
 0x24c   :  { %v1661_v51 = vmax.f32 %v1149_v41, 0.0  ;;  %v1663_v52 = vmax.f32 %v1342_v42, 0.0  ;;  %v1153_v53 = vadd.f32 %v1152_v48, %v3247_v1  ;;  %v1346_v54 = vadd.f32 %v1345_v50, %v3250_v18  ;;  %v1154_v55 = vpop.f32.mrb[71].mxu1  ;;  %v1347_v56 = vpop.f32.mrb[103].mxu0 }
 0x24d   :  { %v1662_v57 = vmax.f32 %v1151_v46, 0.0  ;;  %v1664_v58 = vmax.f32 %v1344_v47, 0.0  ;;  %v1155_v59 = vadd.f32 %v1154_v55, %v3253_v19  ;;  %v1348_v60 = vadd.f32 %v1347_v56, %v3256_v20 }
 0x24e   :  { %v1666_v62 = vmax.f32 %v1153_v53, 0.0  ;;  %v1668_v63 = vmax.f32 %v1346_v54, 0.0 }
 0x24f   :  { %v2568_v0 = vpack.c.bf16 %v1662_v57, %v1661_v51  ;;  %v2569_v2 = vpack.c.bf16 %v1664_v58, %v1663_v52  ;;  %v1667_v3 = vmax.f32 %v1155_v59, 0.0  ;;  %v1669_v4 = vmax.f32 %v1348_v60, 0.0 }
 0x251   :  { %2281 = vst [vmem:[%s3714_s4 + $0x208] sm:$0xff] %v2568_v0  ;;  %2282 = vst [vmem:[%s3714_s4 + $0x210] sm:$0xff] %v2569_v2  ;;  %v2571_v5 = vpack.c.bf16 %v1667_v3, %v1666_v62  ;;  %v2572_v6 = vpack.c.bf16 %v1669_v4, %v1668_v63  ;;  %v1158_v7 = vpop.f32.mrb[72].mxu1  ;;  %v1351_v8 = vpop.f32.mrb[104].mxu0  ;;  %v3568_v62 = vrot.slane %v3242_v13, %v769_v43 }
 0x252   :  { %v1159_v9 = vadd.f32 %v1158_v7, %v3247_v1  ;;  %v1352_v10 = vadd.f32 %v1351_v8, %v3250_v18  ;;  %v1160_v11 = vpop.f32.mrb[73].mxu1  ;;  %v1353_v12 = vpop.f32.mrb[105].mxu0 }
 0x253   :  { %2284 = vst [vmem:[%s3714_s4 + $0x21c] sm:$0xff] %v2571_v5  ;;  %2285 = vst [vmem:[%s3714_s4 + $0x224] sm:$0xff] %v2572_v6  ;;  %v1161_v14 = vadd.f32 %v1160_v11, %v3253_v19  ;;  %v1354_v15 = vadd.f32 %v1353_v12, %v3256_v20  ;;  %v1162_v16 = vpop.f32.mrb[74].mxu1  ;;  %v1355_v17 = vpop.f32.mrb[106].mxu0 }
 0x254   :  { %v1671_v45 = vmax.f32 %v1159_v9, 0.0  ;;  %v1673_v61 = vmax.f32 %v1352_v10, 0.0  ;;  %v1163_v33 = vadd.f32 %v1162_v16, %v3247_v1  ;;  %v1356_v49 = vadd.f32 %v1355_v17, %v3250_v18  ;;  %v1164_v21 = vpop.f32.mrb[75].mxu1  ;;  %v1357_v22 = vpop.f32.mrb[107].mxu0 }
 0x255   :  { %v1672_v23 = vmax.f32 %v1161_v14, 0.0  ;;  %v1674_v24 = vmax.f32 %v1354_v15, 0.0  ;;  %v1165_v25 = vadd.f32 %v1164_v21, %v3253_v19  ;;  %v1358_v26 = vadd.f32 %v1357_v22, %v3256_v20 }
 0x256   :  { %v1676_v27 = vmax.f32 %v1163_v33, 0.0  ;;  %v1678_v28 = vmax.f32 %v1356_v49, 0.0 }
 0x257   :  { %v2574_v30 = vpack.c.bf16 %v1672_v23, %v1671_v45  ;;  %v2575_v31 = vpack.c.bf16 %v1674_v24, %v1673_v61  ;;  %v1677_v32 = vmax.f32 %v1165_v25, 0.0  ;;  %v1679_v34 = vmax.f32 %v1358_v26, 0.0 }
 0x259   :  { %2287 = vst [vmem:[%s3714_s4 + $0x230] sm:$0xff] %v2574_v30  ;;  %2288 = vst [vmem:[%s3714_s4 + $0x238] sm:$0xff] %v2575_v31  ;;  %v2577_v35 = vpack.c.bf16 %v1677_v32, %v1676_v27  ;;  %v2578_v36 = vpack.c.bf16 %v1679_v34, %v1678_v28  ;;  %v1168_v37 = vpop.f32.mrb[76].mxu1  ;;  %v1361_v38 = vpop.f32.mrb[108].mxu0 }
 0x25a   :  { %v1169_v39 = vadd.f32 %v1168_v37, %v3247_v1  ;;  %v1362_v40 = vadd.f32 %v1361_v38, %v3250_v18  ;;  %v1170_v41 = vpop.f32.mrb[77].mxu1  ;;  %v1363_v42 = vpop.f32.mrb[109].mxu0 }
 0x25b   :  { %2290 = vst [vmem:[%s3714_s4 + $0x244] sm:$0xff] %v2577_v35  ;;  %2291 = vst [vmem:[%s3714_s4 + $0x24c] sm:$0xff] %v2578_v36  ;;  %v1171_v44 = vadd.f32 %v1170_v41, %v3253_v19  ;;  %v1364_v46 = vadd.f32 %v1363_v42, %v3256_v20  ;;  %v1172_v47 = vpop.f32.mrb[78].mxu1  ;;  %v1365_v48 = vpop.f32.mrb[110].mxu0 }
 0x25c   :  { %v1681_v50 = vmax.f32 %v1169_v39, 0.0  ;;  %v1683_v51 = vmax.f32 %v1362_v40, 0.0  ;;  %v1173_v52 = vadd.f32 %v1172_v47, %v3247_v1  ;;  %v1366_v29 = vadd.f32 %v1365_v48, %v3250_v18  ;;  %v1174_v53 = vpop.f32.mrb[79].mxu1  ;;  %v1367_v54 = vpop.f32.mrb[111].mxu0 }
 0x25d   :  { %v1682_v55 = vmax.f32 %v1171_v44, 0.0  ;;  %v1684_v56 = vmax.f32 %v1364_v46, 0.0  ;;  %v1175_v57 = vadd.f32 %v1174_v53, %v3253_v19  ;;  %v1368_v58 = vadd.f32 %v1367_v54, %v3256_v20 }
 0x25e   :  { %v1686_v59 = vmax.f32 %v1173_v52, 0.0  ;;  %v1688_v60 = vmax.f32 %v1366_v29, 0.0 }
 0x25f   :  { %v2580_v63 = vpack.c.bf16 %v1682_v55, %v1681_v50  ;;  %v2581_v0 = vpack.c.bf16 %v1684_v56, %v1683_v51  ;;  %v1687_v2 = vmax.f32 %v1175_v57, 0.0  ;;  %v1689_v3 = vmax.f32 %v1368_v58, 0.0 }
 0x261   :  { %2293 = vst [vmem:[%s3714_s4 + $0x258] sm:$0xff] %v2580_v63  ;;  %2294 = vst [vmem:[%s3714_s4 + $0x260] sm:$0xff] %v2581_v0  ;;  %v2583_v1 = vpack.c.bf16 %v1687_v2, %v1686_v59  ;;  %v2584_v18 = vpack.c.bf16 %v1689_v3, %v1688_v60  ;;  %v2740_v19 = vpop.f32.mrb[80].mxu1 }
 0x262   :  { %v1413_v20 = vadd.f32 %v2740_v19, %v3568_v62  ;;  %v1404_v4 = vpop.f32.mrb[81].mxu1 }
 0x263   :  { %2296 = vst [vmem:[%s3714_s4 + $0x26c] sm:$0xff] %v2583_v1  ;;  %2297 = vst [vmem:[%s3714_s4 + $0x274] sm:$0xff] %v2584_v18  ;;  %v1405_v13 = vadd.f32 %v1404_v4, %v3568_v62  ;;  %v2741_v5 = vpop.f32.mrb[82].mxu1 }
 0x264   :  { %v1545_v6 = vmax.f32 %v1413_v20, 0.0  ;;  %v1416_v7 = vadd.f32 %v2741_v5, %v3568_v62  ;;  %v1407_v8 = vpop.f32.mrb[83].mxu1 }
 0x265   :  { %v1535_v9 = vmax.f32 %v1405_v13, 0.0  ;;  %v1408_v10 = vadd.f32 %v1407_v8, %v3568_v62 }
 0x266   :  { %v2498_v11 = vpack.c.bf16 %v1545_v6, %v1545_v6  ;;  %v1550_v12 = vmax.f32 %v1416_v7, 0.0 }
 0x267   :  { %v2492_v14 = vpack.c.bf16 %v1535_v9, %v1535_v9  ;;  %v1540_v15 = vmax.f32 %v1408_v10, 0.0 }
 0x268   :  { %2211 = vst [vmem:[%s3714_s4 + $0x38] sm:$0xf] %v2498_v11  ;;  %v2501_v16 = vpack.c.bf16 %v1550_v12, %v1550_v12 }
 0x269   :  { %2205 = vst [vmem:[%s3714_s4 + $0x10] sm:$0xf] %v2492_v14  ;;  %v2495_v17 = vpack.c.bf16 %v1540_v15, %v1540_v15  ;;  %v2744_v45 = vpop.f32.mrb[84].mxu1 }
 0x26a   :  { %2214 = vst [vmem:[%s3714_s4 + $0x4c] sm:$0xf] %v2501_v16  ;;  %v1429_v61 = vadd.f32 %v2744_v45, %v3568_v62  ;;  %v1420_v33 = vpop.f32.mrb[85].mxu1 }
 0x26b   :  { %2208 = vst [vmem:[%s3714_s4 + $0x24] sm:$0xf] %v2495_v17  ;;  %v1421_v49 = vadd.f32 %v1420_v33, %v3568_v62  ;;  %v2745_v21 = vpop.f32.mrb[86].mxu1 }
 0x26c   :  { %v1565_v22 = vmax.f32 %v1429_v61, 0.0  ;;  %v1432_v23 = vadd.f32 %v2745_v21, %v3568_v62  ;;  %v1423_v24 = vpop.f32.mrb[87].mxu1 }
 0x26d   :  { %v1555_v25 = vmax.f32 %v1421_v49, 0.0  ;;  %v1424_v26 = vadd.f32 %v1423_v24, %v3568_v62 }
 0x26e   :  { %v2510_v27 = vpack.c.bf16 %v1565_v22, %v1565_v22  ;;  %v1570_v28 = vmax.f32 %v1432_v23, 0.0 }
 0x26f   :  { %v2504_v30 = vpack.c.bf16 %v1555_v25, %v1555_v25  ;;  %v1560_v31 = vmax.f32 %v1424_v26, 0.0 }
 0x270   :  { %2223 = vst [vmem:[%s3714_s4 + $0x88] sm:$0xf] %v2510_v27  ;;  %v2513_v32 = vpack.c.bf16 %v1570_v28, %v1570_v28 }
 0x271   :  { %2217 = vst [vmem:[%s3714_s4 + $0x60] sm:$0xf] %v2504_v30  ;;  %v2507_v34 = vpack.c.bf16 %v1560_v31, %v1560_v31  ;;  %v2748_v35 = vpop.f32.mrb[88].mxu1 }
 0x272   :  { %2226 = vst [vmem:[%s3714_s4 + $0x9c] sm:$0xf] %v2513_v32  ;;  %v1445_v36 = vadd.f32 %v2748_v35, %v3568_v62  ;;  %v1436_v37 = vpop.f32.mrb[89].mxu1 }
 0x273   :  { %2220 = vst [vmem:[%s3714_s4 + $0x74] sm:$0xf] %v2507_v34  ;;  %v1437_v38 = vadd.f32 %v1436_v37, %v3568_v62  ;;  %v2749_v39 = vpop.f32.mrb[90].mxu1 }
 0x274   :  { %v1585_v40 = vmax.f32 %v1445_v36, 0.0  ;;  %v1448_v41 = vadd.f32 %v2749_v39, %v3568_v62  ;;  %v1439_v42 = vpop.f32.mrb[91].mxu1 }
 0x275   :  { %v1575_v43 = vmax.f32 %v1437_v38, 0.0  ;;  %v1440_v44 = vadd.f32 %v1439_v42, %v3568_v62 }
 0x276   :  { %v2522_v46 = vpack.c.bf16 %v1585_v40, %v1585_v40  ;;  %v1590_v47 = vmax.f32 %v1448_v41, 0.0 }
 0x277   :  { %v2516_v48 = vpack.c.bf16 %v1575_v43, %v1575_v43  ;;  %v1580_v50 = vmax.f32 %v1440_v44, 0.0 }
 0x278   :  { %2235 = vst [vmem:[%s3714_s4 + $0xd8] sm:$0xf] %v2522_v46  ;;  %v2525_v51 = vpack.c.bf16 %v1590_v47, %v1590_v47 }
 0x279   :  { %2229 = vst [vmem:[%s3714_s4 + $0xb0] sm:$0xf] %v2516_v48  ;;  %v2519_v52 = vpack.c.bf16 %v1580_v50, %v1580_v50  ;;  %v2752_v29 = vpop.f32.mrb[92].mxu1 }
 0x27a   :  { %2238 = vst [vmem:[%s3714_s4 + $0xec] sm:$0xf] %v2525_v51  ;;  %v1461_v53 = vadd.f32 %v2752_v29, %v3568_v62  ;;  %v1452_v54 = vpop.f32.mrb[93].mxu1 }
 0x27b   :  { %2232 = vst [vmem:[%s3714_s4 + $0xc4] sm:$0xf] %v2519_v52  ;;  %v1453_v55 = vadd.f32 %v1452_v54, %v3568_v62  ;;  %v2753_v56 = vpop.f32.mrb[94].mxu1 }
 0x27c   :  { %v1605_v57 = vmax.f32 %v1461_v53, 0.0  ;;  %v1464_v58 = vadd.f32 %v2753_v56, %v3568_v62  ;;  %v1455_v59 = vpop.f32.mrb[95].mxu1 }
 0x27d   :  { %v1595_v60 = vmax.f32 %v1453_v55, 0.0  ;;  %v1456_v63 = vadd.f32 %v1455_v59, %v3568_v62 }
 0x27e   :  { %v2534_v0 = vpack.c.bf16 %v1605_v57, %v1605_v57  ;;  %v1610_v2 = vmax.f32 %v1464_v58, 0.0 }
 0x27f   :  { %v2528_v3 = vpack.c.bf16 %v1595_v60, %v1595_v60  ;;  %v1600_v1 = vmax.f32 %v1456_v63, 0.0 }
 0x280   :  { %2247 = vst [vmem:[%s3714_s4 + $0x128] sm:$0xf] %v2534_v0  ;;  %v2537_v18 = vpack.c.bf16 %v1610_v2, %v1610_v2 }
 0x281   :  { %2241 = vst [vmem:[%s3714_s4 + $0x100] sm:$0xf] %v2528_v3  ;;  %v2531_v19 = vpack.c.bf16 %v1600_v1, %v1600_v1  ;;  %v2756_v20 = vpop.f32.mrb[96].mxu1 }
 0x282   :  { %2250 = vst [vmem:[%s3714_s4 + $0x13c] sm:$0xf] %v2537_v18  ;;  %v1477_v4 = vadd.f32 %v2756_v20, %v3568_v62  ;;  %v1468_v13 = vpop.f32.mrb[97].mxu1 }
 0x283   :  { %2244 = vst [vmem:[%s3714_s4 + $0x114] sm:$0xf] %v2531_v19  ;;  %v1469_v5 = vadd.f32 %v1468_v13, %v3568_v62  ;;  %v2757_v6 = vpop.f32.mrb[98].mxu1 }
 0x284   :  { %v1625_v7 = vmax.f32 %v1477_v4, 0.0  ;;  %v1480_v8 = vadd.f32 %v2757_v6, %v3568_v62  ;;  %v1471_v9 = vpop.f32.mrb[99].mxu1 }
 0x285   :  { %v1615_v10 = vmax.f32 %v1469_v5, 0.0  ;;  %v1472_v11 = vadd.f32 %v1471_v9, %v3568_v62 }
 0x286   :  { %v2546_v12 = vpack.c.bf16 %v1625_v7, %v1625_v7  ;;  %v1630_v14 = vmax.f32 %v1480_v8, 0.0 }
 0x287   :  { %v2540_v15 = vpack.c.bf16 %v1615_v10, %v1615_v10  ;;  %v1620_v16 = vmax.f32 %v1472_v11, 0.0 }
 0x288   :  { %2259 = vst [vmem:[%s3714_s4 + $0x178] sm:$0xf] %v2546_v12  ;;  %v2549_v17 = vpack.c.bf16 %v1630_v14, %v1630_v14 }
 0x289   :  { %2253 = vst [vmem:[%s3714_s4 + $0x150] sm:$0xf] %v2540_v15  ;;  %v2543_v45 = vpack.c.bf16 %v1620_v16, %v1620_v16  ;;  %v2760_v61 = vpop.f32.mrb[100].mxu1 }
 0x28a   :  { %2262 = vst [vmem:[%s3714_s4 + $0x18c] sm:$0xf] %v2549_v17  ;;  %v1493_v33 = vadd.f32 %v2760_v61, %v3568_v62  ;;  %v1484_v49 = vpop.f32.mrb[101].mxu1 }
 0x28b   :  { %2256 = vst [vmem:[%s3714_s4 + $0x164] sm:$0xf] %v2543_v45  ;;  %v1485_v21 = vadd.f32 %v1484_v49, %v3568_v62  ;;  %v2761_v22 = vpop.f32.mrb[102].mxu1 }
 0x28c   :  { %v1645_v23 = vmax.f32 %v1493_v33, 0.0  ;;  %v1496_v24 = vadd.f32 %v2761_v22, %v3568_v62  ;;  %v1487_v25 = vpop.f32.mrb[103].mxu1 }
 0x28d   :  { %v1635_v26 = vmax.f32 %v1485_v21, 0.0  ;;  %v1488_v27 = vadd.f32 %v1487_v25, %v3568_v62 }
 0x28e   :  { %v2558_v28 = vpack.c.bf16 %v1645_v23, %v1645_v23  ;;  %v1650_v30 = vmax.f32 %v1496_v24, 0.0 }
 0x28f   :  { %v2552_v31 = vpack.c.bf16 %v1635_v26, %v1635_v26  ;;  %v1640_v32 = vmax.f32 %v1488_v27, 0.0 }
 0x290   :  { %2271 = vst [vmem:[%s3714_s4 + $0x1c8] sm:$0xf] %v2558_v28  ;;  %v2561_v34 = vpack.c.bf16 %v1650_v30, %v1650_v30 }
 0x291   :  { %2265 = vst [vmem:[%s3714_s4 + $0x1a0] sm:$0xf] %v2552_v31  ;;  %v2555_v35 = vpack.c.bf16 %v1640_v32, %v1640_v32  ;;  %v2764_v36 = vpop.f32.mrb[104].mxu1 }
 0x292   :  { %2274 = vst [vmem:[%s3714_s4 + $0x1dc] sm:$0xf] %v2561_v34  ;;  %v1509_v37 = vadd.f32 %v2764_v36, %v3568_v62  ;;  %v1500_v38 = vpop.f32.mrb[105].mxu1 }
 0x293   :  { %2268 = vst [vmem:[%s3714_s4 + $0x1b4] sm:$0xf] %v2555_v35  ;;  %v1501_v39 = vadd.f32 %v1500_v38, %v3568_v62  ;;  %v2765_v40 = vpop.f32.mrb[106].mxu1 }
 0x294   :  { %v1665_v41 = vmax.f32 %v1509_v37, 0.0  ;;  %v1512_v42 = vadd.f32 %v2765_v40, %v3568_v62  ;;  %v1503_v43 = vpop.f32.mrb[107].mxu1 }
 0x295   :  { %v1655_v44 = vmax.f32 %v1501_v39, 0.0  ;;  %v1504_v46 = vadd.f32 %v1503_v43, %v3568_v62 }
 0x296   :  { %v2570_v47 = vpack.c.bf16 %v1665_v41, %v1665_v41  ;;  %v1670_v48 = vmax.f32 %v1512_v42, 0.0 }
 0x297   :  { %v2564_v50 = vpack.c.bf16 %v1655_v44, %v1655_v44  ;;  %v1660_v51 = vmax.f32 %v1504_v46, 0.0 }
 0x298   :  { %2283 = vst [vmem:[%s3714_s4 + $0x218] sm:$0xf] %v2570_v47  ;;  %v2573_v52 = vpack.c.bf16 %v1670_v48, %v1670_v48 }
 0x299   :  { %2277 = vst [vmem:[%s3714_s4 + $0x1f0] sm:$0xf] %v2564_v50  ;;  %v2567_v29 = vpack.c.bf16 %v1660_v51, %v1660_v51  ;;  %v2768_v53 = vpop.f32.mrb[108].mxu1 }
 0x29a   :  { %2286 = vst [vmem:[%s3714_s4 + $0x22c] sm:$0xf] %v2573_v52  ;;  %v1525_v54 = vadd.f32 %v2768_v53, %v3568_v62  ;;  %v1516_v55 = vpop.f32.mrb[109].mxu1 }
 0x29b   :  { %2280 = vst [vmem:[%s3714_s4 + $0x204] sm:$0xf] %v2567_v29  ;;  %v1517_v56 = vadd.f32 %v1516_v55, %v3568_v62  ;;  %v2769_v57 = vpop.f32.mrb[110].mxu1 }
 0x29c   :  { %v1685_v58 = vmax.f32 %v1525_v54, 0.0  ;;  %v1528_v59 = vadd.f32 %v2769_v57, %v3568_v62  ;;  %v1519_v60 = vpop.f32.mrb[111].mxu1 }
 0x29d   :  { %v1675_v63 = vmax.f32 %v1517_v56, 0.0  ;;  %v1520_v0 = vadd.f32 %v1519_v60, %v3568_v62 }
 0x29e   :  { %v2582_v2 = vpack.c.bf16 %v1685_v58, %v1685_v58  ;;  %v1690_v3 = vmax.f32 %v1528_v59, 0.0 }
 0x29f   :  { %v2576_v1 = vpack.c.bf16 %v1675_v63, %v1675_v63  ;;  %v1680_v18 = vmax.f32 %v1520_v0, 0.0 }
 0x2a0   :  { %2295 = vst [vmem:[%s3714_s4 + $0x268] sm:$0xf] %v2582_v2  ;;  %v2585_v19 = vpack.c.bf16 %v1690_v3, %v1690_v3 }
 0x2a1   :  { %2289 = vst [vmem:[%s3714_s4 + $0x240] sm:$0xf] %v2576_v1  ;;  %v2579_v20 = vpack.c.bf16 %v1680_v18, %v1680_v18 }
 0x2a2   :  { %2298 = vst [vmem:[%s3714_s4 + $0x27c] sm:$0xf] %v2585_v19 }
 0x2a3   :  { %2292 = vst [vmem:[%s3714_s4 + $0x254] sm:$0xf] %v2579_v20 }
 0x2a4   :  { %2303 = vsyncpa [#allocation4], 1 }

// kernel: net_forward.12
= control target key start
LH: loop header
LB: loop body
LE: loop exit
PB: predicated region body
PF: predicated region fallthrough
CT: control target
= control target key end

     0   :  { %s5031_s1 = inlined_call_operand.vmem [shape: bf16[640,512], index: 1, kind: input, shape index: {}]   ;;  %s5032_s0 = inlined_call_operand.vmem [shape: bf16[256,640], index: 0, kind: input, shape index: {}]   ;;  %s5033_s2 = inlined_call_operand.vmem [shape: bf16[256,512], index: 2, kind: output, shape index: {}]  }
   0x1   :  { %v3719_v0 = vld [vmem:[%s5031_s1 + $0x4] ss:$16 sps:$4 sm:$0xff]   ;;  %v3721_v1 = vld [vmem:[%s5031_s1 + $0xc] ss:$16 sps:$4 sm:$0xff]   ;;  %v3723_v2 = vld [vmem:[%s5031_s1] ss:$16 sps:$4 sm:$0xff]  }
   0x2   :  { %1484 = vmatprep.subr.bf16.mxu0 %v3719_v0  ;;  %v3724_v3 = vld [vmem:[%s5031_s1 + $0x8] ss:$16 sps:$4 sm:$0xff]   ;;  %2063 = vmatprep.subr.bf16.mxu1 %v3721_v1  ;;  %v3725_v4 = vld [vmem:[%s5031_s1 + $0x24] ss:$16 sps:$4 sm:$0xff]   ;;  %v3727_v5 = vld [vmem:[%s5031_s1 + $0x2c] ss:$16 sps:$4 sm:$0xff]  }
   0x3   :  { %1485 = vmatpush1.bf16.msra.mxu0 %v3723_v2  ;;  %2064 = vmatpush1.bf16.msra.mxu1 %v3724_v3  ;;  %v3729_v6 = vld [vmem:[%s5031_s1 + $0x20] ss:$16 sps:$4 sm:$0xff]   ;;  %v3730_v7 = vld [vmem:[%s5031_s1 + $0x28] ss:$16 sps:$4 sm:$0xff]   ;;  %v3731_v8 = vld [vmem:[%s5031_s1 + $0x44] ss:$16 sps:$4 sm:$0xff]  }
   0x4   :  { %1486 = vmatprep.subr.bf16.mxu0 %v3725_v4  ;;  %2065 = vmatprep.subr.bf16.mxu1 %v3727_v5  ;;  %v3733_v9 = vld [vmem:[%s5031_s1 + $0x4c] ss:$16 sps:$4 sm:$0xff]   ;;  %v3735_v10 = vld [vmem:[%s5031_s1 + $0x40] ss:$16 sps:$4 sm:$0xff]   ;;  %v3736_v11 = vld [vmem:[%s5031_s1 + $0x48] ss:$16 sps:$4 sm:$0xff]  }
   0x5   :  { %v3737_v12 = vld [vmem:[%s5031_s1 + $0x64] ss:$16 sps:$4 sm:$0xff]   ;;  %v3739_v13 = vld [vmem:[%s5031_s1 + $0x6c] ss:$16 sps:$4 sm:$0xff]   ;;  %v3741_v14 = vld [vmem:[%s5031_s1 + $0x60] ss:$16 sps:$4 sm:$0xff]  }
   0x6   :  { %v3742_v15 = vld [vmem:[%s5031_s1 + $0x68] ss:$16 sps:$4 sm:$0xff]   ;;  %v3743_v16 = vld [vmem:[%s5031_s1 + $0x84] ss:$16 sps:$4 sm:$0xff]   ;;  %v3745_v17 = vld [vmem:[%s5031_s1 + $0x8c] ss:$16 sps:$4 sm:$0xff]  }
   0x7   :  { %1487 = vmatpush1.bf16.msra.mxu0 %v3729_v6  ;;  %2066 = vmatpush1.bf16.msra.mxu1 %v3730_v7  ;;  %v3747_v18 = vld [vmem:[%s5031_s1 + $0x80] ss:$16 sps:$4 sm:$0xff]   ;;  %v3748_v19 = vld [vmem:[%s5031_s1 + $0x88] ss:$16 sps:$4 sm:$0xff]   ;;  %v3749_v20 = vld [vmem:[%s5031_s1 + $0xa4] ss:$16 sps:$4 sm:$0xff]  }
   0x8   :  { %1488 = vmatprep.subr.bf16.mxu0 %v3731_v8  ;;  %2067 = vmatprep.subr.bf16.mxu1 %v3733_v9  ;;  %v3751_v21 = vld [vmem:[%s5031_s1 + $0xac] ss:$16 sps:$4 sm:$0xff]   ;;  %v3753_v22 = vld [vmem:[%s5031_s1 + $0xa0] ss:$16 sps:$4 sm:$0xff]   ;;  %v3754_v23 = vld [vmem:[%s5031_s1 + $0xa8] ss:$16 sps:$4 sm:$0xff]  }
   0x9   :  { %v3755_v24 = vld [vmem:[%s5031_s1 + $0xc4] ss:$16 sps:$4 sm:$0xff]   ;;  %v3757_v25 = vld [vmem:[%s5031_s1 + $0xcc] ss:$16 sps:$4 sm:$0xff]   ;;  %v3759_v26 = vld [vmem:[%s5031_s1 + $0xc0] ss:$16 sps:$4 sm:$0xff]  }
   0xa   :  { %v3760_v27 = vld [vmem:[%s5031_s1 + $0xc8] ss:$16 sps:$4 sm:$0xff]   ;;  %v3761_v28 = vld [vmem:[%s5031_s1 + $0xe4] ss:$16 sps:$4 sm:$0xff]   ;;  %v3763_v29 = vld [vmem:[%s5031_s1 + $0xec] ss:$16 sps:$4 sm:$0xff]  }
   0xb   :  { %1489 = vmatpush1.bf16.msra.mxu0 %v3735_v10  ;;  %2068 = vmatpush1.bf16.msra.mxu1 %v3736_v11  ;;  %v3765_v30 = vld [vmem:[%s5031_s1 + $0xe0] ss:$16 sps:$4 sm:$0xff]   ;;  %v3766_v31 = vld [vmem:[%s5031_s1 + $0xe8] ss:$16 sps:$4 sm:$0xff]   ;;  %v3767_v32 = vld [vmem:[%s5031_s1 + $0x104] ss:$16 sps:$4 sm:$0xff]  }
   0xc   :  { %1490 = vmatprep.subr.bf16.mxu0 %v3737_v12  ;;  %2069 = vmatprep.subr.bf16.mxu1 %v3739_v13  ;;  %v3769_v33 = vld [vmem:[%s5031_s1 + $0x10c] ss:$16 sps:$4 sm:$0xff]   ;;  %v3771_v34 = vld [vmem:[%s5031_s1 + $0x100] ss:$16 sps:$4 sm:$0xff]   ;;  %v3772_v35 = vld [vmem:[%s5031_s1 + $0x108] ss:$16 sps:$4 sm:$0xff]  }
   0xd   :  { %v3773_v36 = vld [vmem:[%s5031_s1 + $0x124] ss:$16 sps:$4 sm:$0xff]   ;;  %v3775_v37 = vld [vmem:[%s5031_s1 + $0x12c] ss:$16 sps:$4 sm:$0xff]   ;;  %v3777_v38 = vld [vmem:[%s5031_s1 + $0x120] ss:$16 sps:$4 sm:$0xff]  }
   0xe   :  { %v3778_v39 = vld [vmem:[%s5031_s1 + $0x128] ss:$16 sps:$4 sm:$0xff]   ;;  %v3779_v40 = vld [vmem:[%s5031_s1 + $0x144] ss:$16 sps:$4 sm:$0xff]   ;;  %v3781_v41 = vld [vmem:[%s5031_s1 + $0x14c] ss:$16 sps:$4 sm:$0xff]  }
   0xf   :  { %1491 = vmatpush1.bf16.msra.mxu0 %v3741_v14  ;;  %2070 = vmatpush1.bf16.msra.mxu1 %v3742_v15  ;;  %v3783_v42 = vld [vmem:[%s5031_s1 + $0x140] ss:$16 sps:$4 sm:$0xff]   ;;  %v3784_v43 = vld [vmem:[%s5031_s1 + $0x148] ss:$16 sps:$4 sm:$0xff]   ;;  %v3785_v44 = vld [vmem:[%s5031_s1 + $0x164] ss:$16 sps:$4 sm:$0xff]  }
  0x10   :  { %1492 = vmatprep.subr.bf16.mxu0 %v3743_v16  ;;  %2071 = vmatprep.subr.bf16.mxu1 %v3745_v17  ;;  %v3787_v45 = vld [vmem:[%s5031_s1 + $0x16c] ss:$16 sps:$4 sm:$0xff]   ;;  %v3789_v46 = vld [vmem:[%s5031_s1 + $0x160] ss:$16 sps:$4 sm:$0xff]   ;;  %v3790_v47 = vld [vmem:[%s5031_s1 + $0x168] ss:$16 sps:$4 sm:$0xff]  }
  0x11   :  { %v3817_v48 = vld [vmem:[%s5032_s0 + $0x4] ss:$20 sps:$4 sm:$0xff]   ;;  %v3793_v50 = vld [vmem:[%s5031_s1 + $0x18c] ss:$16 sps:$4 sm:$0xff]   ;;  %v3795_v51 = vld [vmem:[%s5031_s1 + $0x180] ss:$16 sps:$4 sm:$0xff]  }
  0x12   :  { %v3791_v49 = vld [vmem:[%s5031_s1 + $0x184] ss:$16 sps:$4 sm:$0xff]   ;;  %1516 = vmatprep.mubr.bf16.mxu0 %v3817_v48  ;;  %2095 = vmatprep.mubr.bf16.mxu1 %v3817_v48  ;;  %v3796_v52 = vld [vmem:[%s5031_s1 + $0x188] ss:$16 sps:$4 sm:$0xff]   ;;  %v3799_v54 = vld [vmem:[%s5031_s1 + $0x1ac] ss:$16 sps:$4 sm:$0xff]  }
  0x13   :  { %1493 = vmatpush1.bf16.msra.mxu0 %v3747_v18  ;;  %2072 = vmatpush1.bf16.msra.mxu1 %v3748_v19  ;;  %v3797_v53 = vld [vmem:[%s5031_s1 + $0x1a4] ss:$16 sps:$4 sm:$0xff]   ;;  %v3801_v55 = vld [vmem:[%s5031_s1 + $0x1a0] ss:$16 sps:$4 sm:$0xff]   ;;  %v3802_v56 = vld [vmem:[%s5031_s1 + $0x1a8] ss:$16 sps:$4 sm:$0xff]  }
  0x14   :  { %1494 = vmatprep.subr.bf16.mxu0 %v3749_v20  ;;  %2073 = vmatprep.subr.bf16.mxu1 %v3751_v21  ;;  %v3803_v57 = vld [vmem:[%s5031_s1 + $0x1c4] ss:$16 sps:$4 sm:$0xff]   ;;  %v3805_v58 = vld [vmem:[%s5031_s1 + $0x1cc] ss:$16 sps:$4 sm:$0xff]   ;;  %v3807_v59 = vld [vmem:[%s5031_s1 + $0x1c0] ss:$16 sps:$4 sm:$0xff]  }
  0x15   :  { %v3808_v60 = vld [vmem:[%s5031_s1 + $0x1c8] ss:$16 sps:$4 sm:$0xff]   ;;  %v3809_v61 = vld [vmem:[%s5031_s1 + $0x1e4] ss:$16 sps:$4 sm:$0xff]   ;;  %v3811_v62 = vld [vmem:[%s5031_s1 + $0x1ec] ss:$16 sps:$4 sm:$0xff]  }
  0x16   :  { %v3813_v63 = vld [vmem:[%s5031_s1 + $0x1e0] ss:$16 sps:$4 sm:$0xff]   ;;  %v3814_v0 = vld [vmem:[%s5031_s1 + $0x1e8] ss:$16 sps:$4 sm:$0xff]   ;;  %v3820_v1 = vld [vmem:[%s5031_s1 + $0x204] ss:$16 sps:$4 sm:$0xff]  }
  0x17   :  { %1495 = vmatpush1.bf16.msra.mxu0 %v3753_v22  ;;  %2074 = vmatpush1.bf16.msra.mxu1 %v3754_v23  ;;  %v3823_v2 = vld [vmem:[%s5031_s1 + $0x20c] ss:$16 sps:$4 sm:$0xff]   ;;  %v3815_v3 = vld [vmem:[%s5032_s0] ss:$20 sps:$4 sm:$0xff]   ;;  %v3821_v5 = vld [vmem:[%s5031_s1 + $0x208] ss:$16 sps:$4 sm:$0xff]  }
  0x18   :  { %1496 = vmatprep.subr.bf16.mxu0 %v3755_v24  ;;  %2075 = vmatprep.subr.bf16.mxu1 %v3757_v25  ;;  %v3818_v4 = vld [vmem:[%s5031_s1 + $0x200] ss:$16 sps:$4 sm:$0xff]   ;;  %v3829_v7 = vld [vmem:[%s5031_s1 + $0x224] ss:$16 sps:$4 sm:$0xff]   ;;  %v3832_v8 = vld [vmem:[%s5031_s1 + $0x22c] ss:$16 sps:$4 sm:$0xff]  }
  0x19   :  { %v3824_v6 = vld [vmem:[%s5032_s0 + $0x2c] ss:$20 sps:$4 sm:$0xff]   ;;  %v3830_v10 = vld [vmem:[%s5031_s1 + $0x228] ss:$16 sps:$4 sm:$0xff]   ;;  %v3838_v11 = vld [vmem:[%s5031_s1 + $0x244] ss:$16 sps:$4 sm:$0xff]  }
  0x1a   :  { %v3827_v9 = vld [vmem:[%s5031_s1 + $0x220] ss:$16 sps:$4 sm:$0xff]   ;;  %v3841_v12 = vld [vmem:[%s5031_s1 + $0x24c] ss:$16 sps:$4 sm:$0xff]   ;;  %v3833_v14 = vld [vmem:[%s5032_s0 + $0x54] ss:$20 sps:$4 sm:$0xff]  }
  0x1b   :  { %1497 = vmatpush1.bf16.msra.mxu0 %v3759_v26  ;;  %2076 = vmatpush1.bf16.msra.mxu1 %v3760_v27  ;;  %v3826_v13 = vld [vmem:[%s5032_s0 + $0x28] ss:$20 sps:$4 sm:$0xff]   ;;  %v3836_v15 = vld [vmem:[%s5031_s1 + $0x240] ss:$16 sps:$4 sm:$0xff]   ;;  %v3847_v17 = vld [vmem:[%s5031_s1 + $0x264] ss:$16 sps:$4 sm:$0xff]  }
  0x1c   :  { %1498 = vmatprep.subr.bf16.mxu0 %v3761_v28  ;;  %2077 = vmatprep.subr.bf16.mxu1 %v3763_v29  ;;  %v3839_v16 = vld [vmem:[%s5031_s1 + $0x248] ss:$16 sps:$4 sm:$0xff]   ;;  %v3850_v18 = vld [vmem:[%s5031_s1 + $0x26c] ss:$16 sps:$4 sm:$0xff]   ;;  %v3845_v19 = vld [vmem:[%s5031_s1 + $0x260] ss:$16 sps:$4 sm:$0xff]  }
  0x1d   :  { %v3848_v20 = vld [vmem:[%s5031_s1 + $0x268] ss:$16 sps:$4 sm:$0xff]   ;;  %v3856_v21 = vld [vmem:[%s5031_s1 + $0x284] ss:$16 sps:$4 sm:$0xff]   ;;  %v3859_v22 = vld [vmem:[%s5031_s1 + $0x28c] ss:$16 sps:$4 sm:$0xff]  }
  0x1e   :  { %v3835_v23 = vld [vmem:[%s5032_s0 + $0x50] ss:$20 sps:$4 sm:$0xff]   ;;  %v3857_v26 = vld [vmem:[%s5031_s1 + $0x288] ss:$16 sps:$4 sm:$0xff]   ;;  %v3868_v28 = vld [vmem:[%s5031_s1 + $0x2ac] ss:$16 sps:$4 sm:$0xff]  }
  0x1f   :  { %1499 = vmatpush1.bf16.msra.mxu0 %v3765_v30  ;;  %2078 = vmatpush1.bf16.msra.mxu1 %v3766_v31  ;;  %v3842_v24 = vld [vmem:[%s5032_s0 + $0x7c] ss:$20 sps:$4 sm:$0xff]   ;;  %v3865_v27 = vld [vmem:[%s5031_s1 + $0x2a4] ss:$16 sps:$4 sm:$0xff]   ;;  %v3866_v30 = vld [vmem:[%s5031_s1 + $0x2a8] ss:$16 sps:$4 sm:$0xff]  }
  0x20   :  { %1500 = vmatprep.subr.bf16.mxu0 %v3767_v32  ;;  %2079 = vmatprep.subr.bf16.mxu1 %v3769_v33  ;;  %v3854_v25 = vld [vmem:[%s5031_s1 + $0x280] ss:$16 sps:$4 sm:$0xff]   ;;  %v3874_v31 = vld [vmem:[%s5031_s1 + $0x2c4] ss:$16 sps:$4 sm:$0xff]   ;;  %v3877_v32 = vld [vmem:[%s5031_s1 + $0x2cc] ss:$16 sps:$4 sm:$0xff]  }
  0x21   :  { %v3863_v29 = vld [vmem:[%s5031_s1 + $0x2a0] ss:$16 sps:$4 sm:$0xff]   ;;  %v3844_v33 = vld [vmem:[%s5032_s0 + $0x78] ss:$20 sps:$4 sm:$0xff]  }
  0x22   :  { %v3904_v48 = vld [vmem:[%s5031_s1 + $0x32c] ss:$16 sps:$4 sm:$0xff]  }
  0x23   :  { %1501 = vmatpush1.bf16.msra.mxu0 %v3771_v34  ;;  %2080 = vmatpush1.bf16.msra.mxu1 %v3772_v35  ;;  %v3851_v34 = vld [vmem:[%s5032_s0 + $0xa4] ss:$20 sps:$4 sm:$0xff]   ;;  %v3872_v35 = vld [vmem:[%s5031_s1 + $0x2c0] ss:$16 sps:$4 sm:$0xff]  }
  0x24   :  { %1502 = vmatprep.subr.bf16.mxu0 %v3773_v36  ;;  %2081 = vmatprep.subr.bf16.mxu1 %v3775_v37  ;;  %v3875_v36 = vld [vmem:[%s5031_s1 + $0x2c8] ss:$16 sps:$4 sm:$0xff]   ;;  %v3883_v37 = vld [vmem:[%s5031_s1 + $0x2e4] ss:$16 sps:$4 sm:$0xff]  }
  0x27   :  { %1503 = vmatpush1.bf16.msra.mxu0 %v3777_v38  ;;  %2082 = vmatpush1.bf16.msra.mxu1 %v3778_v39  ;;  %v3886_v38 = vld [vmem:[%s5031_s1 + $0x2ec] ss:$16 sps:$4 sm:$0xff]   ;;  %v3881_v39 = vld [vmem:[%s5031_s1 + $0x2e0] ss:$16 sps:$4 sm:$0xff]  }
  0x28   :  { %1504 = vmatprep.subr.bf16.mxu0 %v3779_v40  ;;  %2083 = vmatprep.subr.bf16.mxu1 %v3781_v41  ;;  %v3884_v40 = vld [vmem:[%s5031_s1 + $0x2e8] ss:$16 sps:$4 sm:$0xff]   ;;  %v3892_v41 = vld [vmem:[%s5031_s1 + $0x304] ss:$16 sps:$4 sm:$0xff]  }
  0x2b   :  { %1505 = vmatpush1.bf16.msra.mxu0 %v3783_v42  ;;  %2084 = vmatpush1.bf16.msra.mxu1 %v3784_v43  ;;  %v3895_v42 = vld [vmem:[%s5031_s1 + $0x30c] ss:$16 sps:$4 sm:$0xff]   ;;  %v3853_v43 = vld [vmem:[%s5032_s0 + $0xa0] ss:$20 sps:$4 sm:$0xff]  }
  0x2c   :  { %1506 = vmatprep.subr.bf16.mxu0 %v3785_v44  ;;  %2085 = vmatprep.subr.bf16.mxu1 %v3787_v45  ;;  %v3860_v44 = vld [vmem:[%s5032_s0 + $0xcc] ss:$20 sps:$4 sm:$0xff]  }
  0x2d   :  { %v3890_v45 = vld [vmem:[%s5031_s1 + $0x300] ss:$16 sps:$4 sm:$0xff]  }
  0x2f   :  { %1507 = vmatpush1.bf16.msra.mxu0 %v3789_v46  ;;  %2086 = vmatpush1.bf16.msra.mxu1 %v3790_v47  ;;  %v3893_v46 = vld [vmem:[%s5031_s1 + $0x308] ss:$16 sps:$4 sm:$0xff]   ;;  %v3901_v47 = vld [vmem:[%s5031_s1 + $0x324] ss:$16 sps:$4 sm:$0xff]  }
  0x30   :  { %1508 = vmatprep.subr.bf16.mxu0 %v3791_v49  ;;  %2087 = vmatprep.subr.bf16.mxu1 %v3793_v50  ;;  %v3899_v49 = vld [vmem:[%s5031_s1 + $0x320] ss:$16 sps:$4 sm:$0xff]   ;;  %v3902_v50 = vld [vmem:[%s5031_s1 + $0x328] ss:$16 sps:$4 sm:$0xff]  }
  0x33   :  { %1509 = vmatpush1.bf16.msra.mxu0 %v3795_v51  ;;  %2088 = vmatpush1.bf16.msra.mxu1 %v3796_v52  ;;  %v3910_v51 = vld [vmem:[%s5031_s1 + $0x344] ss:$16 sps:$4 sm:$0xff]   ;;  %v3913_v52 = vld [vmem:[%s5031_s1 + $0x34c] ss:$16 sps:$4 sm:$0xff]  }
  0x34   :  { %1510 = vmatprep.subr.bf16.mxu0 %v3797_v53  ;;  %2089 = vmatprep.subr.bf16.mxu1 %v3799_v54  ;;  %v3862_v53 = vld [vmem:[%s5032_s0 + $0xc8] ss:$20 sps:$4 sm:$0xff]  }
  0x35   :  { %v3869_v54 = vld [vmem:[%s5032_s0 + $0xf4] ss:$20 sps:$4 sm:$0xff]  }
  0x37   :  { %1511 = vmatpush1.bf16.msra.mxu0 %v3801_v55  ;;  %2090 = vmatpush1.bf16.msra.mxu1 %v3802_v56  ;;  %v3908_v55 = vld [vmem:[%s5031_s1 + $0x340] ss:$16 sps:$4 sm:$0xff]   ;;  %v3911_v56 = vld [vmem:[%s5031_s1 + $0x348] ss:$16 sps:$4 sm:$0xff]  }
  0x38   :  { %1512 = vmatprep.subr.bf16.mxu0 %v3803_v57  ;;  %2091 = vmatprep.subr.bf16.mxu1 %v3805_v58  ;;  %v3919_v57 = vld [vmem:[%s5031_s1 + $0x364] ss:$16 sps:$4 sm:$0xff]   ;;  %v3922_v58 = vld [vmem:[%s5031_s1 + $0x36c] ss:$16 sps:$4 sm:$0xff]  }
  0x3b   :  { %1513 = vmatpush1.bf16.msra.mxu0 %v3807_v59  ;;  %2092 = vmatpush1.bf16.msra.mxu1 %v3808_v60  ;;  %v3917_v59 = vld [vmem:[%s5031_s1 + $0x360] ss:$16 sps:$4 sm:$0xff]   ;;  %v3920_v60 = vld [vmem:[%s5031_s1 + $0x368] ss:$16 sps:$4 sm:$0xff]  }
  0x3c   :  { %1514 = vmatprep.subr.bf16.mxu0 %v3809_v61  ;;  %2093 = vmatprep.subr.bf16.mxu1 %v3811_v62  ;;  %v3928_v61 = vld [vmem:[%s5031_s1 + $0x384] ss:$16 sps:$4 sm:$0xff]   ;;  %v3931_v62 = vld [vmem:[%s5031_s1 + $0x38c] ss:$16 sps:$4 sm:$0xff]  }
  0x3f   :  { %1515 = vmatpush1.bf16.msra.mxu0 %v3813_v63  ;;  %2094 = vmatpush1.bf16.msra.mxu1 %v3814_v0  ;;  %v3871_v63 = vld [vmem:[%s5032_s0 + $0xf0] ss:$20 sps:$4 sm:$0xff]  }
  0x40   :  { %1677 = vmatprep.subr.bf16.mxu0 %v3820_v1  ;;  %2256 = vmatprep.subr.bf16.mxu1 %v3823_v2  ;;  %v3878_v0 = vld [vmem:[%s5032_s0 + $0x11c] ss:$20 sps:$4 sm:$0xff]   ;;  %v3929_v2 = vld [vmem:[%s5031_s1 + $0x388] ss:$16 sps:$4 sm:$0xff]  }
  0x41   :  { %v3926_v1 = vld [vmem:[%s5031_s1 + $0x380] ss:$16 sps:$4 sm:$0xff]  }
  0x42   :  { %1517 = vmatmul.mubr.bf16.vlgmr.msra.gmra.mrb[0].mxu0 %v3815_v3  ;;  %2096 = vmatmul.mubr.bf16.vlgmr.msra.gmra.mrb[0].mxu1 %v3815_v3  ;;  %v3937_v3 = vld [vmem:[%s5031_s1 + $0x3a4] ss:$16 sps:$4 sm:$0xff]  }
  0x43   :  { %1678 = vmatpush1.bf16.msra.mxu0 %v3818_v4  ;;  %2257 = vmatpush1.bf16.msra.mxu1 %v3821_v5  ;;  %v3940_v4 = vld [vmem:[%s5031_s1 + $0x3ac] ss:$16 sps:$4 sm:$0xff]   ;;  %v3935_v5 = vld [vmem:[%s5031_s1 + $0x3a0] ss:$16 sps:$4 sm:$0xff]  }
  0x44   :  { %1526 = vmatprep.mubr.bf16.mxu0 %v3824_v6  ;;  %2105 = vmatprep.mubr.bf16.mxu1 %v3824_v6  ;;  %v3938_v6 = vld [vmem:[%s5031_s1 + $0x3a8] ss:$16 sps:$4 sm:$0xff]  }
  0x45   :  { %1679 = vmatprep.subr.bf16.mxu0 %v3829_v7  ;;  %2258 = vmatprep.subr.bf16.mxu1 %v3832_v8  ;;  %v3946_v7 = vld [vmem:[%s5031_s1 + $0x3c4] ss:$16 sps:$4 sm:$0xff]   ;;  %v3949_v8 = vld [vmem:[%s5031_s1 + $0x3cc] ss:$16 sps:$4 sm:$0xff]  }
  0x47   :  { %1680 = vmatpush1.bf16.msra.mxu0 %v3827_v9  ;;  %2259 = vmatpush1.bf16.msra.mxu1 %v3830_v10  ;;  %v3880_v9 = vld [vmem:[%s5032_s0 + $0x118] ss:$20 sps:$4 sm:$0xff]  }
  0x48   :  { %1681 = vmatprep.subr.bf16.mxu0 %v3838_v11  ;;  %2260 = vmatprep.subr.bf16.mxu1 %v3841_v12  ;;  %v3887_v10 = vld [vmem:[%s5032_s0 + $0x144] ss:$20 sps:$4 sm:$0xff]   ;;  %v3944_v11 = vld [vmem:[%s5031_s1 + $0x3c0] ss:$16 sps:$4 sm:$0xff]  }
  0x49   :  { %v3947_v12 = vld [vmem:[%s5031_s1 + $0x3c8] ss:$16 sps:$4 sm:$0xff]  }
  0x4a   :  { %1527 = vmatmul.mubr.bf16.gmra.mrb[4].mxu0 %v3826_v13  ;;  %2106 = vmatmul.mubr.bf16.gmra.mrb[4].mxu1 %v3826_v13  ;;  %v3955_v13 = vld [vmem:[%s5031_s1 + $0x3e4] ss:$16 sps:$4 sm:$0xff]  }
  0x4b   :  { %1536 = vmatprep.mubr.bf16.mxu0 %v3833_v14  ;;  %2115 = vmatprep.mubr.bf16.mxu1 %v3833_v14  ;;  %v3958_v14 = vld [vmem:[%s5031_s1 + $0x3ec] ss:$16 sps:$4 sm:$0xff]  }
  0x4c   :  { %1682 = vmatpush1.bf16.msra.mxu0 %v3836_v15  ;;  %2261 = vmatpush1.bf16.msra.mxu1 %v3839_v16  ;;  %v3953_v15 = vld [vmem:[%s5031_s1 + $0x3e0] ss:$16 sps:$4 sm:$0xff]   ;;  %v3956_v16 = vld [vmem:[%s5031_s1 + $0x3e8] ss:$16 sps:$4 sm:$0xff]  }
  0x4d   :  { %1683 = vmatprep.subr.bf16.mxu0 %v3847_v17  ;;  %2262 = vmatprep.subr.bf16.mxu1 %v3850_v18  ;;  %v3964_v17 = vld [vmem:[%s5031_s1 + $0x404] ss:$16 sps:$4 sm:$0xff]   ;;  %v3967_v18 = vld [vmem:[%s5031_s1 + $0x40c] ss:$16 sps:$4 sm:$0xff]  }
  0x50   :  { %1684 = vmatpush1.bf16.msra.mxu0 %v3845_v19  ;;  %2263 = vmatpush1.bf16.msra.mxu1 %v3848_v20  ;;  %v3889_v19 = vld [vmem:[%s5032_s0 + $0x140] ss:$20 sps:$4 sm:$0xff]  }
  0x51   :  { %1685 = vmatprep.subr.bf16.mxu0 %v3856_v21  ;;  %2264 = vmatprep.subr.bf16.mxu1 %v3859_v22  ;;  %v3896_v20 = vld [vmem:[%s5032_s0 + $0x16c] ss:$20 sps:$4 sm:$0xff]   ;;  %v3898_v21 = vld [vmem:[%s5032_s0 + $0x168] ss:$20 sps:$4 sm:$0xff]  }
  0x52   :  { %1537 = vmatmul.mubr.bf16.gmra.mrb[8].mxu0 %v3835_v23  ;;  %2116 = vmatmul.mubr.bf16.gmra.mrb[8].mxu1 %v3835_v23  ;;  %v3905_v22 = vld [vmem:[%s5032_s0 + $0x194] ss:$20 sps:$4 sm:$0xff]   ;;  %v3907_v23 = vld [vmem:[%s5032_s0 + $0x190] ss:$20 sps:$4 sm:$0xff]  }
  0x53   :  { %1546 = vmatprep.mubr.bf16.mxu0 %v3842_v24  ;;  %2125 = vmatprep.mubr.bf16.mxu1 %v3842_v24  ;;  %v3914_v24 = vld [vmem:[%s5032_s0 + $0x1bc] ss:$20 sps:$4 sm:$0xff]  }
  0x54   :  { %1686 = vmatpush1.bf16.msra.mxu0 %v3854_v25  ;;  %2265 = vmatpush1.bf16.msra.mxu1 %v3857_v26  ;;  %v3916_v25 = vld [vmem:[%s5032_s0 + $0x1b8] ss:$20 sps:$4 sm:$0xff]  }
  0x55   :  { %1687 = vmatprep.subr.bf16.mxu0 %v3865_v27  ;;  %2266 = vmatprep.subr.bf16.mxu1 %v3868_v28  ;;  %v3923_v26 = vld [vmem:[%s5032_s0 + $0x1e4] ss:$20 sps:$4 sm:$0xff]   ;;  %v3925_v27 = vld [vmem:[%s5032_s0 + $0x1e0] ss:$20 sps:$4 sm:$0xff]  }
  0x56   :  { %v3932_v28 = vld [vmem:[%s5032_s0 + $0x20c] ss:$20 sps:$4 sm:$0xff]  }
  0x58   :  { %1688 = vmatpush1.bf16.msra.mxu0 %v3863_v29  ;;  %2267 = vmatpush1.bf16.msra.mxu1 %v3866_v30  ;;  %v3934_v29 = vld [vmem:[%s5032_s0 + $0x208] ss:$20 sps:$4 sm:$0xff]  }
  0x59   :  { %1689 = vmatprep.subr.bf16.mxu0 %v3874_v31  ;;  %2268 = vmatprep.subr.bf16.mxu1 %v3877_v32  ;;  %v3941_v30 = vld [vmem:[%s5032_s0 + $0x234] ss:$20 sps:$4 sm:$0xff]   ;;  %v3943_v31 = vld [vmem:[%s5032_s0 + $0x230] ss:$20 sps:$4 sm:$0xff]  }
  0x5a   :  { %1547 = vmatmul.mubr.bf16.gmra.mrb[12].mxu0 %v3844_v33  ;;  %2126 = vmatmul.mubr.bf16.gmra.mrb[12].mxu1 %v3844_v33  ;;  %v3950_v32 = vld [vmem:[%s5032_s0 + $0x25c] ss:$20 sps:$4 sm:$0xff]   ;;  %v3952_v33 = vld [vmem:[%s5032_s0 + $0x258] ss:$20 sps:$4 sm:$0xff]  }
  0x5b   :  { %1556 = vmatprep.mubr.bf16.mxu0 %v3851_v34  ;;  %2135 = vmatprep.mubr.bf16.mxu1 %v3851_v34  ;;  %v3961_v34 = vld [vmem:[%s5032_s0 + $0xc] ss:$20 sps:$4 sm:$0xff]  }
  0x5c   :  { %1690 = vmatpush1.bf16.msra.mxu0 %v3872_v35  ;;  %2269 = vmatpush1.bf16.msra.mxu1 %v3875_v36  ;;  %v3959_v35 = vld [vmem:[%s5032_s0 + $0x8] ss:$20 sps:$4 sm:$0xff]   ;;  %v3962_v36 = vld [vmem:[%s5031_s1 + $0x400] ss:$16 sps:$4 sm:$0xff]  }
  0x5d   :  { %1691 = vmatprep.subr.bf16.mxu0 %v3883_v37  ;;  %2270 = vmatprep.subr.bf16.mxu1 %v3886_v38  ;;  %v3965_v37 = vld [vmem:[%s5031_s1 + $0x408] ss:$16 sps:$4 sm:$0xff]  }
  0x5e   :  { %v3968_v38 = vld [vmem:[%s5032_s0 + $0x34] ss:$20 sps:$4 sm:$0xff]  }
  0x60   :  { %1692 = vmatpush1.bf16.msra.mxu0 %v3881_v39  ;;  %2271 = vmatpush1.bf16.msra.mxu1 %v3884_v40  ;;  %v3976_v39 = vld [vmem:[%s5031_s1 + $0x424] ss:$16 sps:$4 sm:$0xff]   ;;  %v3979_v40 = vld [vmem:[%s5031_s1 + $0x42c] ss:$16 sps:$4 sm:$0xff]  }
  0x61   :  { %1693 = vmatprep.subr.bf16.mxu0 %v3892_v41  ;;  %2272 = vmatprep.subr.bf16.mxu1 %v3895_v42  ;;  %v3974_v41 = vld [vmem:[%s5031_s1 + $0x420] ss:$16 sps:$4 sm:$0xff]   ;;  %v3977_v42 = vld [vmem:[%s5031_s1 + $0x428] ss:$16 sps:$4 sm:$0xff]  }
  0x62   :  { %1557 = vmatmul.mubr.bf16.gmra.mrb[16].mxu0 %v3853_v43  ;;  %2136 = vmatmul.mubr.bf16.gmra.mrb[16].mxu1 %v3853_v43  ;;  %v3988_v43 = vld [vmem:[%s5031_s1 + $0x444] ss:$16 sps:$4 sm:$0xff]  }
  0x63   :  { %1566 = vmatprep.mubr.bf16.mxu0 %v3860_v44  ;;  %2145 = vmatprep.mubr.bf16.mxu1 %v3860_v44  ;;  %v3991_v44 = vld [vmem:[%s5031_s1 + $0x44c] ss:$16 sps:$4 sm:$0xff]  }
  0x64   :  { %1694 = vmatpush1.bf16.msra.mxu0 %v3890_v45  ;;  %2273 = vmatpush1.bf16.msra.mxu1 %v3893_v46  ;;  %v3970_v45 = vld [vmem:[%s5032_s0 + $0x30] ss:$20 sps:$4 sm:$0xff]  }
  0x65   :  { %1695 = vmatprep.subr.bf16.mxu0 %v3901_v47  ;;  %2274 = vmatprep.subr.bf16.mxu1 %v3904_v48  ;;  %v3971_v46 = vld [vmem:[%s5032_s0 + $0x5c] ss:$20 sps:$4 sm:$0xff]   ;;  %v3989_v48 = vld [vmem:[%s5031_s1 + $0x448] ss:$16 sps:$4 sm:$0xff]  }
  0x66   :  { %v3986_v47 = vld [vmem:[%s5031_s1 + $0x440] ss:$16 sps:$4 sm:$0xff]  }
  0x68   :  { %1696 = vmatpush1.bf16.msra.mxu0 %v3899_v49  ;;  %2275 = vmatpush1.bf16.msra.mxu1 %v3902_v50  ;;  %v4000_v49 = vld [vmem:[%s5031_s1 + $0x464] ss:$16 sps:$4 sm:$0xff]   ;;  %v4003_v50 = vld [vmem:[%s5031_s1 + $0x46c] ss:$16 sps:$4 sm:$0xff]  }
  0x69   :  { %1697 = vmatprep.subr.bf16.mxu0 %v3910_v51  ;;  %2276 = vmatprep.subr.bf16.mxu1 %v3913_v52  ;;  %v3998_v51 = vld [vmem:[%s5031_s1 + $0x460] ss:$16 sps:$4 sm:$0xff]   ;;  %v4001_v52 = vld [vmem:[%s5031_s1 + $0x468] ss:$16 sps:$4 sm:$0xff]  }
  0x6a   :  { %1567 = vmatmul.mubr.bf16.gmra.mrb[20].mxu0 %v3862_v53  ;;  %2146 = vmatmul.mubr.bf16.gmra.mrb[20].mxu1 %v3862_v53  ;;  %v4012_v53 = vld [vmem:[%s5031_s1 + $0x484] ss:$16 sps:$4 sm:$0xff]  }
  0x6b   :  { %1576 = vmatprep.mubr.bf16.mxu0 %v3869_v54  ;;  %2155 = vmatprep.mubr.bf16.mxu1 %v3869_v54  ;;  %v4015_v54 = vld [vmem:[%s5031_s1 + $0x48c] ss:$16 sps:$4 sm:$0xff]  }
  0x6c   :  { %1698 = vmatpush1.bf16.msra.mxu0 %v3908_v55  ;;  %2277 = vmatpush1.bf16.msra.mxu1 %v3911_v56  ;;  %v3973_v55 = vld [vmem:[%s5032_s0 + $0x58] ss:$20 sps:$4 sm:$0xff]  }
  0x6d   :  { %1699 = vmatprep.subr.bf16.mxu0 %v3919_v57  ;;  %2278 = vmatprep.subr.bf16.mxu1 %v3922_v58  ;;  %v3980_v56 = vld [vmem:[%s5032_s0 + $0x84] ss:$20 sps:$4 sm:$0xff]   ;;  %v4010_v57 = vld [vmem:[%s5031_s1 + $0x480] ss:$16 sps:$4 sm:$0xff]  }
  0x6e   :  { %v4013_v58 = vld [vmem:[%s5031_s1 + $0x488] ss:$16 sps:$4 sm:$0xff]  }
  0x70   :  { %1700 = vmatpush1.bf16.msra.mxu0 %v3917_v59  ;;  %2279 = vmatpush1.bf16.msra.mxu1 %v3920_v60  ;;  %v4024_v59 = vld [vmem:[%s5031_s1 + $0x4a4] ss:$16 sps:$4 sm:$0xff]   ;;  %v4027_v60 = vld [vmem:[%s5031_s1 + $0x4ac] ss:$16 sps:$4 sm:$0xff]  }
  0x71   :  { %1701 = vmatprep.subr.bf16.mxu0 %v3928_v61  ;;  %2280 = vmatprep.subr.bf16.mxu1 %v3931_v62  ;;  %v4022_v61 = vld [vmem:[%s5031_s1 + $0x4a0] ss:$16 sps:$4 sm:$0xff]   ;;  %v4025_v62 = vld [vmem:[%s5031_s1 + $0x4a8] ss:$16 sps:$4 sm:$0xff]  }
  0x72   :  { %1577 = vmatmul.mubr.bf16.gmra.mrb[24].mxu0 %v3871_v63  ;;  %2156 = vmatmul.mubr.bf16.gmra.mrb[24].mxu1 %v3871_v63  ;;  %v4036_v63 = vld [vmem:[%s5031_s1 + $0x4c4] ss:$16 sps:$4 sm:$0xff]  }
  0x73   :  { %1586 = vmatprep.mubr.bf16.mxu0 %v3878_v0  ;;  %2165 = vmatprep.mubr.bf16.mxu1 %v3878_v0  ;;  %v4039_v0 = vld [vmem:[%s5031_s1 + $0x4cc] ss:$16 sps:$4 sm:$0xff]  }
  0x74   :  { %1702 = vmatpush1.bf16.msra.mxu0 %v3926_v1  ;;  %2281 = vmatpush1.bf16.msra.mxu1 %v3929_v2  ;;  %v3982_v1 = vld [vmem:[%s5032_s0 + $0x80] ss:$20 sps:$4 sm:$0xff]  }
  0x75   :  { %1703 = vmatprep.subr.bf16.mxu0 %v3937_v3  ;;  %2282 = vmatprep.subr.bf16.mxu1 %v3940_v4  ;;  %v3983_v2 = vld [vmem:[%s5032_s0 + $0xac] ss:$20 sps:$4 sm:$0xff]   ;;  %v4037_v4 = vld [vmem:[%s5031_s1 + $0x4c8] ss:$16 sps:$4 sm:$0xff]  }
  0x76   :  { %v4034_v3 = vld [vmem:[%s5031_s1 + $0x4c0] ss:$16 sps:$4 sm:$0xff]  }
  0x78   :  { %1704 = vmatpush1.bf16.msra.mxu0 %v3935_v5  ;;  %2283 = vmatpush1.bf16.msra.mxu1 %v3938_v6  ;;  %v4048_v5 = vld [vmem:[%s5031_s1 + $0x4e4] ss:$16 sps:$4 sm:$0xff]   ;;  %v4051_v6 = vld [vmem:[%s5031_s1 + $0x4ec] ss:$16 sps:$4 sm:$0xff]  }
  0x79   :  { %1705 = vmatprep.subr.bf16.mxu0 %v3946_v7  ;;  %2284 = vmatprep.subr.bf16.mxu1 %v3949_v8  ;;  %v4046_v7 = vld [vmem:[%s5031_s1 + $0x4e0] ss:$16 sps:$4 sm:$0xff]   ;;  %v4049_v8 = vld [vmem:[%s5031_s1 + $0x4e8] ss:$16 sps:$4 sm:$0xff]  }
  0x7a   :  { %1587 = vmatmul.mubr.bf16.gmra.mrb[28].mxu0 %v3880_v9  ;;  %2166 = vmatmul.mubr.bf16.gmra.mrb[28].mxu1 %v3880_v9  ;;  %v3985_v9 = vld [vmem:[%s5032_s0 + $0xa8] ss:$20 sps:$4 sm:$0xff]  }
  0x7b   :  { %1596 = vmatprep.mubr.bf16.mxu0 %v3887_v10  ;;  %2175 = vmatprep.mubr.bf16.mxu1 %v3887_v10  ;;  %v3992_v10 = vld [vmem:[%s5032_s0 + $0xd4] ss:$20 sps:$4 sm:$0xff]  }
  0x7c   :  { %1706 = vmatpush1.bf16.msra.mxu0 %v3944_v11  ;;  %2285 = vmatpush1.bf16.msra.mxu1 %v3947_v12  ;;  %v3994_v11 = vld [vmem:[%s5032_s0 + $0xd0] ss:$20 sps:$4 sm:$0xff]  }
  0x7d   :  { %1707 = vmatprep.subr.bf16.mxu0 %v3955_v13  ;;  %2286 = vmatprep.subr.bf16.mxu1 %v3958_v14  ;;  %v3995_v12 = vld [vmem:[%s5032_s0 + $0xfc] ss:$20 sps:$4 sm:$0xff]   ;;  %v3997_v13 = vld [vmem:[%s5032_s0 + $0xf8] ss:$20 sps:$4 sm:$0xff]  }
  0x7e   :  { %v4004_v14 = vld [vmem:[%s5032_s0 + $0x124] ss:$20 sps:$4 sm:$0xff]  }
  0x80   :  { %1708 = vmatpush1.bf16.msra.mxu0 %v3953_v15  ;;  %2287 = vmatpush1.bf16.msra.mxu1 %v3956_v16  ;;  %v4006_v15 = vld [vmem:[%s5032_s0 + $0x120] ss:$20 sps:$4 sm:$0xff]  }
  0x81   :  { %1870 = vmatprep.subr.bf16.mxu0 %v3964_v17  ;;  %2449 = vmatprep.subr.bf16.mxu1 %v3967_v18  ;;  %v4007_v16 = vld [vmem:[%s5032_s0 + $0x14c] ss:$20 sps:$4 sm:$0xff]   ;;  %v4009_v17 = vld [vmem:[%s5032_s0 + $0x148] ss:$20 sps:$4 sm:$0xff]  }
  0x82   :  { %1597 = vmatmul.mubr.bf16.gmra.mrb[32].mxu0 %v3889_v19  ;;  %2176 = vmatmul.mubr.bf16.gmra.mrb[32].mxu1 %v3889_v19  ;;  %v4016_v18 = vld [vmem:[%s5032_s0 + $0x174] ss:$20 sps:$4 sm:$0xff]   ;;  %v4018_v19 = vld [vmem:[%s5032_s0 + $0x170] ss:$20 sps:$4 sm:$0xff]  }
  0x83   :  { %1606 = vmatprep.mubr.bf16.mxu0 %v3896_v20  ;;  %2185 = vmatprep.mubr.bf16.mxu1 %v3896_v20  ;;  %v4019_v20 = vld [vmem:[%s5032_s0 + $0x19c] ss:$20 sps:$4 sm:$0xff]  }
  0x8a   :  { %1607 = vmatmul.mubr.bf16.gmra.mrb[36].mxu0 %v3898_v21  ;;  %2186 = vmatmul.mubr.bf16.gmra.mrb[36].mxu1 %v3898_v21  ;;  %v4021_v21 = vld [vmem:[%s5032_s0 + $0x198] ss:$20 sps:$4 sm:$0xff]  }
  0x8b   :  { %1616 = vmatprep.mubr.bf16.mxu0 %v3905_v22  ;;  %2195 = vmatprep.mubr.bf16.mxu1 %v3905_v22  ;;  %v4028_v22 = vld [vmem:[%s5032_s0 + $0x1c4] ss:$20 sps:$4 sm:$0xff]  }
  0x92   :  { %1617 = vmatmul.mubr.bf16.gmra.mrb[40].mxu0 %v3907_v23  ;;  %2196 = vmatmul.mubr.bf16.gmra.mrb[40].mxu1 %v3907_v23  ;;  %v4030_v23 = vld [vmem:[%s5032_s0 + $0x1c0] ss:$20 sps:$4 sm:$0xff]  }
  0x93   :  { %1626 = vmatprep.mubr.bf16.mxu0 %v3914_v24  ;;  %2205 = vmatprep.mubr.bf16.mxu1 %v3914_v24  ;;  %v4031_v24 = vld [vmem:[%s5032_s0 + $0x1ec] ss:$20 sps:$4 sm:$0xff]  }
  0x9a   :  { %1627 = vmatmul.mubr.bf16.gmra.mrb[44].mxu0 %v3916_v25  ;;  %2206 = vmatmul.mubr.bf16.gmra.mrb[44].mxu1 %v3916_v25  ;;  %v4033_v25 = vld [vmem:[%s5032_s0 + $0x1e8] ss:$20 sps:$4 sm:$0xff]  }
  0x9b   :  { %1636 = vmatprep.mubr.bf16.mxu0 %v3923_v26  ;;  %2215 = vmatprep.mubr.bf16.mxu1 %v3923_v26  ;;  %v4040_v26 = vld [vmem:[%s5032_s0 + $0x214] ss:$20 sps:$4 sm:$0xff]  }
  0xa2   :  { %1637 = vmatmul.mubr.bf16.gmra.mrb[48].mxu0 %v3925_v27  ;;  %2216 = vmatmul.mubr.bf16.gmra.mrb[48].mxu1 %v3925_v27  ;;  %v4042_v27 = vld [vmem:[%s5032_s0 + $0x210] ss:$20 sps:$4 sm:$0xff]  }
  0xa3   :  { %1646 = vmatprep.mubr.bf16.mxu0 %v3932_v28  ;;  %2225 = vmatprep.mubr.bf16.mxu1 %v3932_v28  ;;  %v4043_v28 = vld [vmem:[%s5032_s0 + $0x23c] ss:$20 sps:$4 sm:$0xff]  }
  0xaa   :  { %1647 = vmatmul.mubr.bf16.gmra.mrb[52].mxu0 %v3934_v29  ;;  %2226 = vmatmul.mubr.bf16.gmra.mrb[52].mxu1 %v3934_v29  ;;  %v4045_v29 = vld [vmem:[%s5032_s0 + $0x238] ss:$20 sps:$4 sm:$0xff]  }
  0xab   :  { %1656 = vmatprep.mubr.bf16.mxu0 %v3941_v30  ;;  %2235 = vmatprep.mubr.bf16.mxu1 %v3941_v30  ;;  %v4052_v30 = vld [vmem:[%s5032_s0 + $0x264] ss:$20 sps:$4 sm:$0xff]  }
  0xb2   :  { %1657 = vmatmul.mubr.bf16.gmra.mrb[56].mxu0 %v3943_v31  ;;  %2236 = vmatmul.mubr.bf16.gmra.mrb[56].mxu1 %v3943_v31  ;;  %v4054_v31 = vld [vmem:[%s5032_s0 + $0x260] ss:$20 sps:$4 sm:$0xff]  }
  0xb3   :  { %1666 = vmatprep.mubr.bf16.mxu0 %v3950_v32  ;;  %2245 = vmatprep.mubr.bf16.mxu1 %v3950_v32  ;;  %v4071_v32 = vmov 0  }
  0xba   :  { %1667 = vmatmul.mubr.bf16.gmra.mrb[60].mxu0 %v3952_v33  ;;  %2246 = vmatmul.mubr.bf16.gmra.mrb[60].mxu1 %v3952_v33  ;;  %v4055_v33 = vld [vmem:[%s5032_s0 + $0x10] ss:$20 sps:$4 sm:$0xff]  }
  0xbb   :  { %1709 = vmatprep.mubr.bf16.mxu0 %v3961_v34  ;;  %2288 = vmatprep.mubr.bf16.mxu1 %v3961_v34  ;;  %v4056_v34 = vld [vmem:[%s5032_s0 + $0x38] ss:$20 sps:$4 sm:$0xff]  }
  0xc2   :  { %1710 = vmatmul.mubr.bf16.vlgmr.msra.gmra.mrb[0].mxu0 %v3959_v35  ;;  %2289 = vmatmul.mubr.bf16.vlgmr.msra.gmra.mrb[0].mxu1 %v3959_v35  ;;  %v4057_v35 = vld [vmem:[%s5032_s0 + $0x60] ss:$20 sps:$4 sm:$0xff]  }
  0xc3   :  { %1871 = vmatpush1.bf16.msra.mxu0 %v3962_v36  ;;  %2450 = vmatpush1.bf16.msra.mxu1 %v3965_v37  ;;  %v4058_v36 = vld [vmem:[%s5032_s0 + $0x88] ss:$20 sps:$4 sm:$0xff]   ;;  %v4059_v37 = vld [vmem:[%s5032_s0 + $0xb0] ss:$20 sps:$4 sm:$0xff]  }
  0xc4   :  { %1719 = vmatprep.mubr.bf16.mxu0 %v3968_v38  ;;  %2298 = vmatprep.mubr.bf16.mxu1 %v3968_v38  ;;  %v4060_v38 = vld [vmem:[%s5032_s0 + $0xd8] ss:$20 sps:$4 sm:$0xff]  }
  0xc5   :  { %1872 = vmatprep.subr.bf16.mxu0 %v3976_v39  ;;  %2451 = vmatprep.subr.bf16.mxu1 %v3979_v40  ;;  %v4061_v39 = vld [vmem:[%s5032_s0 + $0x100] ss:$20 sps:$4 sm:$0xff]   ;;  %v4062_v40 = vld [vmem:[%s5032_s0 + $0x128] ss:$20 sps:$4 sm:$0xff]  }
  0xc7   :  { %1873 = vmatpush1.bf16.msra.mxu0 %v3974_v41  ;;  %2452 = vmatpush1.bf16.msra.mxu1 %v3977_v42  ;;  %v4063_v41 = vld [vmem:[%s5032_s0 + $0x150] ss:$20 sps:$4 sm:$0xff]   ;;  %v4064_v42 = vld [vmem:[%s5032_s0 + $0x178] ss:$20 sps:$4 sm:$0xff]  }
  0xc8   :  { %1874 = vmatprep.subr.bf16.mxu0 %v3988_v43  ;;  %2453 = vmatprep.subr.bf16.mxu1 %v3991_v44  ;;  %v4065_v43 = vld [vmem:[%s5032_s0 + $0x1a0] ss:$20 sps:$4 sm:$0xff]   ;;  %v4066_v44 = vld [vmem:[%s5032_s0 + $0x1c8] ss:$20 sps:$4 sm:$0xff]  }
  0xca   :  { %1720 = vmatmul.mubr.bf16.gmra.mrb[4].mxu0 %v3970_v45  ;;  %2299 = vmatmul.mubr.bf16.gmra.mrb[4].mxu1 %v3970_v45  ;;  %v4067_v45 = vld [vmem:[%s5032_s0 + $0x1f0] ss:$20 sps:$4 sm:$0xff]  }
  0xcb   :  { %1729 = vmatprep.mubr.bf16.mxu0 %v3971_v46  ;;  %2308 = vmatprep.mubr.bf16.mxu1 %v3971_v46  ;;  %v4068_v46 = vld [vmem:[%s5032_s0 + $0x218] ss:$20 sps:$4 sm:$0xff]  }
  0xcc   :  { %1875 = vmatpush1.bf16.msra.mxu0 %v3986_v47  ;;  %2454 = vmatpush1.bf16.msra.mxu1 %v3989_v48  ;;  %v4069_v47 = vld [vmem:[%s5032_s0 + $0x240] ss:$20 sps:$4 sm:$0xff]   ;;  %v4070_v48 = vld [vmem:[%s5032_s0 + $0x268] ss:$20 sps:$4 sm:$0xff]  }
  0xcd   :  { %1876 = vmatprep.subr.bf16.mxu0 %v4000_v49  ;;  %2455 = vmatprep.subr.bf16.mxu1 %v4003_v50 }
  0xd0   :  { %1877 = vmatpush1.bf16.msra.mxu0 %v3998_v51  ;;  %2456 = vmatpush1.bf16.msra.mxu1 %v4001_v52 }
  0xd1   :  { %1878 = vmatprep.subr.bf16.mxu0 %v4012_v53  ;;  %2457 = vmatprep.subr.bf16.mxu1 %v4015_v54 }
  0xd2   :  { %1730 = vmatmul.mubr.bf16.gmra.mrb[8].mxu0 %v3973_v55  ;;  %2309 = vmatmul.mubr.bf16.gmra.mrb[8].mxu1 %v3973_v55 }
  0xd3   :  { %1739 = vmatprep.mubr.bf16.mxu0 %v3980_v56  ;;  %2318 = vmatprep.mubr.bf16.mxu1 %v3980_v56 }
  0xd4   :  { %1879 = vmatpush1.bf16.msra.mxu0 %v4010_v57  ;;  %2458 = vmatpush1.bf16.msra.mxu1 %v4013_v58 }
  0xd5   :  { %1880 = vmatprep.subr.bf16.mxu0 %v4024_v59  ;;  %2459 = vmatprep.subr.bf16.mxu1 %v4027_v60 }
  0xd8   :  { %1881 = vmatpush1.bf16.msra.mxu0 %v4022_v61  ;;  %2460 = vmatpush1.bf16.msra.mxu1 %v4025_v62 }
  0xd9   :  { %1882 = vmatprep.subr.bf16.mxu0 %v4036_v63  ;;  %2461 = vmatprep.subr.bf16.mxu1 %v4039_v0 }
  0xda   :  { %1740 = vmatmul.mubr.bf16.gmra.mrb[12].mxu0 %v3982_v1  ;;  %2319 = vmatmul.mubr.bf16.gmra.mrb[12].mxu1 %v3982_v1 }
  0xdb   :  { %1749 = vmatprep.mubr.bf16.mxu0 %v3983_v2  ;;  %2328 = vmatprep.mubr.bf16.mxu1 %v3983_v2 }
  0xdc   :  { %1883 = vmatpush1.bf16.msra.mxu0 %v4034_v3  ;;  %2462 = vmatpush1.bf16.msra.mxu1 %v4037_v4 }
  0xdd   :  { %1884 = vmatprep.subr.bf16.mxu0 %v4048_v5  ;;  %2463 = vmatprep.subr.bf16.mxu1 %v4051_v6 }
  0xe0   :  { %1885 = vmatpush1.bf16.msra.mxu0 %v4046_v7  ;;  %2464 = vmatpush1.bf16.msra.mxu1 %v4049_v8 }
  0xe2   :  { %1750 = vmatmul.mubr.bf16.gmra.mrb[16].mxu0 %v3985_v9  ;;  %2329 = vmatmul.mubr.bf16.gmra.mrb[16].mxu1 %v3985_v9 }
  0xe3   :  { %1759 = vmatprep.mubr.bf16.mxu0 %v3992_v10  ;;  %2338 = vmatprep.mubr.bf16.mxu1 %v3992_v10 }
  0xea   :  { %1760 = vmatmul.mubr.bf16.gmra.mrb[20].mxu0 %v3994_v11  ;;  %2339 = vmatmul.mubr.bf16.gmra.mrb[20].mxu1 %v3994_v11 }
  0xeb   :  { %1769 = vmatprep.mubr.bf16.mxu0 %v3995_v12  ;;  %2348 = vmatprep.mubr.bf16.mxu1 %v3995_v12 }
  0xf2   :  { %1770 = vmatmul.mubr.bf16.gmra.mrb[24].mxu0 %v3997_v13  ;;  %2349 = vmatmul.mubr.bf16.gmra.mrb[24].mxu1 %v3997_v13 }
  0xf3   :  { %1779 = vmatprep.mubr.bf16.mxu0 %v4004_v14  ;;  %2358 = vmatprep.mubr.bf16.mxu1 %v4004_v14 }
  0xfa   :  { %1780 = vmatmul.mubr.bf16.gmra.mrb[28].mxu0 %v4006_v15  ;;  %2359 = vmatmul.mubr.bf16.gmra.mrb[28].mxu1 %v4006_v15 }
  0xfb   :  { %1789 = vmatprep.mubr.bf16.mxu0 %v4007_v16  ;;  %2368 = vmatprep.mubr.bf16.mxu1 %v4007_v16 }
 0x102   :  { %1790 = vmatmul.mubr.bf16.gmra.mrb[32].mxu0 %v4009_v17  ;;  %2369 = vmatmul.mubr.bf16.gmra.mrb[32].mxu1 %v4009_v17 }
 0x103   :  { %1799 = vmatprep.mubr.bf16.mxu0 %v4016_v18  ;;  %2378 = vmatprep.mubr.bf16.mxu1 %v4016_v18 }
 0x10a   :  { %1800 = vmatmul.mubr.bf16.gmra.mrb[36].mxu0 %v4018_v19  ;;  %2379 = vmatmul.mubr.bf16.gmra.mrb[36].mxu1 %v4018_v19 }
 0x10b   :  { %1809 = vmatprep.mubr.bf16.mxu0 %v4019_v20  ;;  %2388 = vmatprep.mubr.bf16.mxu1 %v4019_v20 }
 0x112   :  { %1810 = vmatmul.mubr.bf16.gmra.mrb[40].mxu0 %v4021_v21  ;;  %2389 = vmatmul.mubr.bf16.gmra.mrb[40].mxu1 %v4021_v21 }
 0x113   :  { %1819 = vmatprep.mubr.bf16.mxu0 %v4028_v22  ;;  %2398 = vmatprep.mubr.bf16.mxu1 %v4028_v22 }
 0x11a   :  { %1820 = vmatmul.mubr.bf16.gmra.mrb[44].mxu0 %v4030_v23  ;;  %2399 = vmatmul.mubr.bf16.gmra.mrb[44].mxu1 %v4030_v23 }
 0x11b   :  { %1829 = vmatprep.mubr.bf16.mxu0 %v4031_v24  ;;  %2408 = vmatprep.mubr.bf16.mxu1 %v4031_v24 }
 0x122   :  { %1830 = vmatmul.mubr.bf16.gmra.mrb[48].mxu0 %v4033_v25  ;;  %2409 = vmatmul.mubr.bf16.gmra.mrb[48].mxu1 %v4033_v25 }
 0x123   :  { %1839 = vmatprep.mubr.bf16.mxu0 %v4040_v26  ;;  %2418 = vmatprep.mubr.bf16.mxu1 %v4040_v26 }
 0x12a   :  { %1840 = vmatmul.mubr.bf16.gmra.mrb[52].mxu0 %v4042_v27  ;;  %2419 = vmatmul.mubr.bf16.gmra.mrb[52].mxu1 %v4042_v27 }
 0x12b   :  { %1849 = vmatprep.mubr.bf16.mxu0 %v4043_v28  ;;  %2428 = vmatprep.mubr.bf16.mxu1 %v4043_v28 }
 0x132   :  { %1850 = vmatmul.mubr.bf16.gmra.mrb[56].mxu0 %v4045_v29  ;;  %2429 = vmatmul.mubr.bf16.gmra.mrb[56].mxu1 %v4045_v29 }
 0x133   :  { %1859 = vmatprep.mubr.bf16.mxu0 %v4052_v30  ;;  %2438 = vmatprep.mubr.bf16.mxu1 %v4052_v30 }
 0x13a   :  { %1860 = vmatmul.mubr.bf16.gmra.mrb[60].mxu0 %v4054_v31  ;;  %2439 = vmatmul.mubr.bf16.gmra.mrb[60].mxu1 %v4054_v31 }
 0x13b   :  { %1902 = vmatprep.mubr.bf16.mxu0 %v4071_v32  ;;  %2481 = vmatprep.mubr.bf16.mxu1 %v4071_v32 }
 0x142   :  { %1903 = vmatmul.mubr.bf16.vlgmr.msra.gmra.mrb[0].mxu0 %v4055_v33  ;;  %2482 = vmatmul.mubr.bf16.vlgmr.msra.gmra.mrb[0].mxu1 %v4055_v33 }
 0x143   :  { %1912 = vmatprep.mubr.bf16.mxu0 %v4071_v32  ;;  %2491 = vmatprep.mubr.bf16.mxu1 %v4071_v32 }
 0x14a   :  { %1913 = vmatmul.mubr.bf16.gmra.mrb[4].mxu0 %v4056_v34  ;;  %2492 = vmatmul.mubr.bf16.gmra.mrb[4].mxu1 %v4056_v34 }
 0x14b   :  { %1922 = vmatprep.mubr.bf16.mxu0 %v4071_v32  ;;  %2501 = vmatprep.mubr.bf16.mxu1 %v4071_v32 }
 0x152   :  { %1923 = vmatmul.mubr.bf16.gmra.mrb[8].mxu0 %v4057_v35  ;;  %2502 = vmatmul.mubr.bf16.gmra.mrb[8].mxu1 %v4057_v35 }
 0x153   :  { %1932 = vmatprep.mubr.bf16.mxu0 %v4071_v32  ;;  %2511 = vmatprep.mubr.bf16.mxu1 %v4071_v32 }
 0x15a   :  { %1933 = vmatmul.mubr.bf16.gmra.mrb[12].mxu0 %v4058_v36  ;;  %2512 = vmatmul.mubr.bf16.gmra.mrb[12].mxu1 %v4058_v36 }
 0x15b   :  { %1942 = vmatprep.mubr.bf16.mxu0 %v4071_v32  ;;  %2521 = vmatprep.mubr.bf16.mxu1 %v4071_v32 }
 0x162   :  { %1943 = vmatmul.mubr.bf16.gmra.mrb[16].mxu0 %v4059_v37  ;;  %2522 = vmatmul.mubr.bf16.gmra.mrb[16].mxu1 %v4059_v37 }
 0x163   :  { %1952 = vmatprep.mubr.bf16.mxu0 %v4071_v32  ;;  %2531 = vmatprep.mubr.bf16.mxu1 %v4071_v32 }
 0x16a   :  { %1953 = vmatmul.mubr.bf16.gmra.mrb[20].mxu0 %v4060_v38  ;;  %2532 = vmatmul.mubr.bf16.gmra.mrb[20].mxu1 %v4060_v38 }
 0x16b   :  { %1962 = vmatprep.mubr.bf16.mxu0 %v4071_v32  ;;  %2541 = vmatprep.mubr.bf16.mxu1 %v4071_v32 }
 0x172   :  { %1963 = vmatmul.mubr.bf16.gmra.mrb[24].mxu0 %v4061_v39  ;;  %2542 = vmatmul.mubr.bf16.gmra.mrb[24].mxu1 %v4061_v39 }
 0x173   :  { %1972 = vmatprep.mubr.bf16.mxu0 %v4071_v32  ;;  %2551 = vmatprep.mubr.bf16.mxu1 %v4071_v32 }
 0x17a   :  { %1973 = vmatmul.mubr.bf16.gmra.mrb[28].mxu0 %v4062_v40  ;;  %2552 = vmatmul.mubr.bf16.gmra.mrb[28].mxu1 %v4062_v40 }
 0x17b   :  { %1982 = vmatprep.mubr.bf16.mxu0 %v4071_v32  ;;  %2561 = vmatprep.mubr.bf16.mxu1 %v4071_v32 }
 0x182   :  { %1983 = vmatmul.mubr.bf16.gmra.mrb[32].mxu0 %v4063_v41  ;;  %2562 = vmatmul.mubr.bf16.gmra.mrb[32].mxu1 %v4063_v41 }
 0x183   :  { %1992 = vmatprep.mubr.bf16.mxu0 %v4071_v32  ;;  %2571 = vmatprep.mubr.bf16.mxu1 %v4071_v32 }
 0x18a   :  { %1993 = vmatmul.mubr.bf16.gmra.mrb[36].mxu0 %v4064_v42  ;;  %2572 = vmatmul.mubr.bf16.gmra.mrb[36].mxu1 %v4064_v42 }
 0x18b   :  { %2002 = vmatprep.mubr.bf16.mxu0 %v4071_v32  ;;  %2581 = vmatprep.mubr.bf16.mxu1 %v4071_v32 }
 0x192   :  { %2003 = vmatmul.mubr.bf16.gmra.mrb[40].mxu0 %v4065_v43  ;;  %2582 = vmatmul.mubr.bf16.gmra.mrb[40].mxu1 %v4065_v43 }
 0x193   :  { %2012 = vmatprep.mubr.bf16.mxu0 %v4071_v32  ;;  %2591 = vmatprep.mubr.bf16.mxu1 %v4071_v32 }
 0x19a   :  { %2013 = vmatmul.mubr.bf16.gmra.mrb[44].mxu0 %v4066_v44  ;;  %2592 = vmatmul.mubr.bf16.gmra.mrb[44].mxu1 %v4066_v44 }
 0x19b   :  { %2022 = vmatprep.mubr.bf16.mxu0 %v4071_v32  ;;  %2601 = vmatprep.mubr.bf16.mxu1 %v4071_v32 }
 0x1a2   :  { %2023 = vmatmul.mubr.bf16.gmra.mrb[48].mxu0 %v4067_v45  ;;  %2602 = vmatmul.mubr.bf16.gmra.mrb[48].mxu1 %v4067_v45 }
 0x1a3   :  { %2032 = vmatprep.mubr.bf16.mxu0 %v4071_v32  ;;  %2611 = vmatprep.mubr.bf16.mxu1 %v4071_v32 }
 0x1aa   :  { %2033 = vmatmul.mubr.bf16.gmra.mrb[52].mxu0 %v4068_v46  ;;  %2612 = vmatmul.mubr.bf16.gmra.mrb[52].mxu1 %v4068_v46 }
 0x1ab   :  { %2042 = vmatprep.mubr.bf16.mxu0 %v4071_v32  ;;  %2621 = vmatprep.mubr.bf16.mxu1 %v4071_v32 }
 0x1b2   :  { %2043 = vmatmul.mubr.bf16.gmra.mrb[56].mxu0 %v4069_v47  ;;  %2622 = vmatmul.mubr.bf16.gmra.mrb[56].mxu1 %v4069_v47 }
 0x1b3   :  { %2052 = vmatprep.mubr.bf16.mxu0 %v4071_v32  ;;  %2631 = vmatprep.mubr.bf16.mxu1 %v4071_v32 }
 0x1ba   :  { %2053 = vmatmul.mubr.bf16.gmra.mrb[60].mxu0 %v4070_v48  ;;  %2632 = vmatmul.mubr.bf16.gmra.mrb[60].mxu1 %v4070_v48 }
 0x215   :  { %v1904_v49 = vpop.f32.mrb[0].mxu0  ;;  %v2483_v50 = vpop.f32.mrb[0].mxu1 }
 0x216   :  { %v1906_v51 = vpop.f32.mrb[1].mxu0  ;;  %v2485_v52 = vpop.f32.mrb[1].mxu1 }
 0x217   :  { %v3398_v53 = vpack.c.bf16 %v1906_v51, %v1904_v49  ;;  %v3399_v54 = vpack.c.bf16 %v2485_v52, %v2483_v50  ;;  %v1908_v55 = vpop.f32.mrb[2].mxu0  ;;  %v2487_v56 = vpop.f32.mrb[2].mxu1 }
 0x218   :  { %v1910_v57 = vpop.f32.mrb[3].mxu0  ;;  %v2489_v58 = vpop.f32.mrb[3].mxu1 }
 0x219   :  { %3026 = vst [vmem:[%s5033_s2] sm:$0xff] %v3398_v53  ;;  %3027 = vst [vmem:[%s5033_s2 + $0x8] sm:$0xff] %v3399_v54  ;;  %v3400_v59 = vpack.c.bf16 %v1910_v57, %v1908_v55  ;;  %v3401_v60 = vpack.c.bf16 %v2489_v58, %v2487_v56 }
 0x21b   :  { %3028 = vst [vmem:[%s5033_s2 + $0x10] sm:$0xff] %v3400_v59  ;;  %3029 = vst [vmem:[%s5033_s2 + $0x18] sm:$0xff] %v3401_v60 }
 0x21d   :  { %v1914_v61 = vpop.f32.mrb[4].mxu0  ;;  %v2493_v62 = vpop.f32.mrb[4].mxu1 }
 0x21e   :  { %v1916_v63 = vpop.f32.mrb[5].mxu0  ;;  %v2495_v0 = vpop.f32.mrb[5].mxu1 }
 0x21f   :  { %v3402_v1 = vpack.c.bf16 %v1916_v63, %v1914_v61  ;;  %v3403_v2 = vpack.c.bf16 %v2495_v0, %v2493_v62  ;;  %v1918_v3 = vpop.f32.mrb[6].mxu0  ;;  %v2497_v4 = vpop.f32.mrb[6].mxu1 }
 0x220   :  { %v1920_v5 = vpop.f32.mrb[7].mxu0  ;;  %v2499_v6 = vpop.f32.mrb[7].mxu1 }
 0x221   :  { %3030 = vst [vmem:[%s5033_s2 + $0x20] sm:$0xff] %v3402_v1  ;;  %3031 = vst [vmem:[%s5033_s2 + $0x28] sm:$0xff] %v3403_v2  ;;  %v3404_v7 = vpack.c.bf16 %v1920_v5, %v1918_v3  ;;  %v3405_v8 = vpack.c.bf16 %v2499_v6, %v2497_v4 }
 0x223   :  { %3032 = vst [vmem:[%s5033_s2 + $0x30] sm:$0xff] %v3404_v7  ;;  %3033 = vst [vmem:[%s5033_s2 + $0x38] sm:$0xff] %v3405_v8 }
 0x225   :  { %v1924_v9 = vpop.f32.mrb[8].mxu0  ;;  %v2503_v10 = vpop.f32.mrb[8].mxu1 }
 0x226   :  { %v1926_v11 = vpop.f32.mrb[9].mxu0  ;;  %v2505_v12 = vpop.f32.mrb[9].mxu1 }
 0x227   :  { %v3406_v13 = vpack.c.bf16 %v1926_v11, %v1924_v9  ;;  %v3407_v14 = vpack.c.bf16 %v2505_v12, %v2503_v10  ;;  %v1928_v15 = vpop.f32.mrb[10].mxu0  ;;  %v2507_v16 = vpop.f32.mrb[10].mxu1 }
 0x228   :  { %v1930_v17 = vpop.f32.mrb[11].mxu0  ;;  %v2509_v18 = vpop.f32.mrb[11].mxu1 }
 0x229   :  { %3034 = vst [vmem:[%s5033_s2 + $0x40] sm:$0xff] %v3406_v13  ;;  %3035 = vst [vmem:[%s5033_s2 + $0x48] sm:$0xff] %v3407_v14  ;;  %v3408_v19 = vpack.c.bf16 %v1930_v17, %v1928_v15  ;;  %v3409_v20 = vpack.c.bf16 %v2509_v18, %v2507_v16 }
 0x22b   :  { %3036 = vst [vmem:[%s5033_s2 + $0x50] sm:$0xff] %v3408_v19  ;;  %3037 = vst [vmem:[%s5033_s2 + $0x58] sm:$0xff] %v3409_v20 }
 0x22d   :  { %v1934_v21 = vpop.f32.mrb[12].mxu0  ;;  %v2513_v22 = vpop.f32.mrb[12].mxu1 }
 0x22e   :  { %v1936_v23 = vpop.f32.mrb[13].mxu0  ;;  %v2515_v24 = vpop.f32.mrb[13].mxu1 }
 0x22f   :  { %v3410_v25 = vpack.c.bf16 %v1936_v23, %v1934_v21  ;;  %v3411_v26 = vpack.c.bf16 %v2515_v24, %v2513_v22  ;;  %v1938_v27 = vpop.f32.mrb[14].mxu0  ;;  %v2517_v28 = vpop.f32.mrb[14].mxu1 }
 0x230   :  { %v1940_v29 = vpop.f32.mrb[15].mxu0  ;;  %v2519_v30 = vpop.f32.mrb[15].mxu1 }
 0x231   :  { %3038 = vst [vmem:[%s5033_s2 + $0x60] sm:$0xff] %v3410_v25  ;;  %3039 = vst [vmem:[%s5033_s2 + $0x68] sm:$0xff] %v3411_v26  ;;  %v3412_v31 = vpack.c.bf16 %v1940_v29, %v1938_v27  ;;  %v3413_v32 = vpack.c.bf16 %v2519_v30, %v2517_v28 }
 0x233   :  { %3040 = vst [vmem:[%s5033_s2 + $0x70] sm:$0xff] %v3412_v31  ;;  %3041 = vst [vmem:[%s5033_s2 + $0x78] sm:$0xff] %v3413_v32 }
 0x235   :  { %v1944_v33 = vpop.f32.mrb[16].mxu0  ;;  %v2523_v34 = vpop.f32.mrb[16].mxu1 }
 0x236   :  { %v1946_v35 = vpop.f32.mrb[17].mxu0  ;;  %v2525_v36 = vpop.f32.mrb[17].mxu1 }
 0x237   :  { %v3414_v37 = vpack.c.bf16 %v1946_v35, %v1944_v33  ;;  %v3415_v38 = vpack.c.bf16 %v2525_v36, %v2523_v34  ;;  %v1948_v39 = vpop.f32.mrb[18].mxu0  ;;  %v2527_v40 = vpop.f32.mrb[18].mxu1 }
 0x238   :  { %v1950_v41 = vpop.f32.mrb[19].mxu0  ;;  %v2529_v42 = vpop.f32.mrb[19].mxu1 }
 0x239   :  { %3042 = vst [vmem:[%s5033_s2 + $0x80] sm:$0xff] %v3414_v37  ;;  %3043 = vst [vmem:[%s5033_s2 + $0x88] sm:$0xff] %v3415_v38  ;;  %v3416_v43 = vpack.c.bf16 %v1950_v41, %v1948_v39  ;;  %v3417_v44 = vpack.c.bf16 %v2529_v42, %v2527_v40 }
 0x23b   :  { %3044 = vst [vmem:[%s5033_s2 + $0x90] sm:$0xff] %v3416_v43  ;;  %3045 = vst [vmem:[%s5033_s2 + $0x98] sm:$0xff] %v3417_v44 }
 0x23d   :  { %v1954_v45 = vpop.f32.mrb[20].mxu0  ;;  %v2533_v46 = vpop.f32.mrb[20].mxu1 }
 0x23e   :  { %v1956_v47 = vpop.f32.mrb[21].mxu0  ;;  %v2535_v48 = vpop.f32.mrb[21].mxu1 }
 0x23f   :  { %v3418_v49 = vpack.c.bf16 %v1956_v47, %v1954_v45  ;;  %v3419_v50 = vpack.c.bf16 %v2535_v48, %v2533_v46  ;;  %v1958_v51 = vpop.f32.mrb[22].mxu0  ;;  %v2537_v52 = vpop.f32.mrb[22].mxu1 }
 0x240   :  { %v1960_v53 = vpop.f32.mrb[23].mxu0  ;;  %v2539_v54 = vpop.f32.mrb[23].mxu1 }
 0x241   :  { %3046 = vst [vmem:[%s5033_s2 + $0xa0] sm:$0xff] %v3418_v49  ;;  %3047 = vst [vmem:[%s5033_s2 + $0xa8] sm:$0xff] %v3419_v50  ;;  %v3420_v55 = vpack.c.bf16 %v1960_v53, %v1958_v51  ;;  %v3421_v56 = vpack.c.bf16 %v2539_v54, %v2537_v52 }
 0x243   :  { %3048 = vst [vmem:[%s5033_s2 + $0xb0] sm:$0xff] %v3420_v55  ;;  %3049 = vst [vmem:[%s5033_s2 + $0xb8] sm:$0xff] %v3421_v56 }
 0x245   :  { %v1964_v57 = vpop.f32.mrb[24].mxu0  ;;  %v2543_v58 = vpop.f32.mrb[24].mxu1 }
 0x246   :  { %v1966_v59 = vpop.f32.mrb[25].mxu0  ;;  %v2545_v60 = vpop.f32.mrb[25].mxu1 }
 0x247   :  { %v3422_v61 = vpack.c.bf16 %v1966_v59, %v1964_v57  ;;  %v3423_v62 = vpack.c.bf16 %v2545_v60, %v2543_v58  ;;  %v1968_v63 = vpop.f32.mrb[26].mxu0  ;;  %v2547_v0 = vpop.f32.mrb[26].mxu1 }
 0x248   :  { %v1970_v1 = vpop.f32.mrb[27].mxu0  ;;  %v2549_v2 = vpop.f32.mrb[27].mxu1 }
 0x249   :  { %3050 = vst [vmem:[%s5033_s2 + $0xc0] sm:$0xff] %v3422_v61  ;;  %3051 = vst [vmem:[%s5033_s2 + $0xc8] sm:$0xff] %v3423_v62  ;;  %v3424_v3 = vpack.c.bf16 %v1970_v1, %v1968_v63  ;;  %v3425_v4 = vpack.c.bf16 %v2549_v2, %v2547_v0 }
 0x24b   :  { %3052 = vst [vmem:[%s5033_s2 + $0xd0] sm:$0xff] %v3424_v3  ;;  %3053 = vst [vmem:[%s5033_s2 + $0xd8] sm:$0xff] %v3425_v4 }
 0x24d   :  { %v1974_v5 = vpop.f32.mrb[28].mxu0  ;;  %v2553_v6 = vpop.f32.mrb[28].mxu1 }
 0x24e   :  { %v1976_v7 = vpop.f32.mrb[29].mxu0  ;;  %v2555_v8 = vpop.f32.mrb[29].mxu1 }
 0x24f   :  { %v3426_v9 = vpack.c.bf16 %v1976_v7, %v1974_v5  ;;  %v3427_v10 = vpack.c.bf16 %v2555_v8, %v2553_v6  ;;  %v1978_v11 = vpop.f32.mrb[30].mxu0  ;;  %v2557_v12 = vpop.f32.mrb[30].mxu1 }
 0x250   :  { %v1980_v13 = vpop.f32.mrb[31].mxu0  ;;  %v2559_v14 = vpop.f32.mrb[31].mxu1 }
 0x251   :  { %3054 = vst [vmem:[%s5033_s2 + $0xe0] sm:$0xff] %v3426_v9  ;;  %3055 = vst [vmem:[%s5033_s2 + $0xe8] sm:$0xff] %v3427_v10  ;;  %v3428_v15 = vpack.c.bf16 %v1980_v13, %v1978_v11  ;;  %v3429_v16 = vpack.c.bf16 %v2559_v14, %v2557_v12 }
 0x253   :  { %3056 = vst [vmem:[%s5033_s2 + $0xf0] sm:$0xff] %v3428_v15  ;;  %3057 = vst [vmem:[%s5033_s2 + $0xf8] sm:$0xff] %v3429_v16 }
 0x255   :  { %v1984_v17 = vpop.f32.mrb[32].mxu0  ;;  %v2563_v18 = vpop.f32.mrb[32].mxu1 }
 0x256   :  { %v1986_v19 = vpop.f32.mrb[33].mxu0  ;;  %v2565_v20 = vpop.f32.mrb[33].mxu1 }
 0x257   :  { %v3430_v21 = vpack.c.bf16 %v1986_v19, %v1984_v17  ;;  %v3431_v22 = vpack.c.bf16 %v2565_v20, %v2563_v18  ;;  %v1988_v23 = vpop.f32.mrb[34].mxu0  ;;  %v2567_v24 = vpop.f32.mrb[34].mxu1 }
 0x258   :  { %v1990_v25 = vpop.f32.mrb[35].mxu0  ;;  %v2569_v26 = vpop.f32.mrb[35].mxu1 }
 0x259   :  { %3058 = vst [vmem:[%s5033_s2 + $0x100] sm:$0xff] %v3430_v21  ;;  %3059 = vst [vmem:[%s5033_s2 + $0x108] sm:$0xff] %v3431_v22  ;;  %v3432_v27 = vpack.c.bf16 %v1990_v25, %v1988_v23  ;;  %v3433_v28 = vpack.c.bf16 %v2569_v26, %v2567_v24 }
 0x25b   :  { %3060 = vst [vmem:[%s5033_s2 + $0x110] sm:$0xff] %v3432_v27  ;;  %3061 = vst [vmem:[%s5033_s2 + $0x118] sm:$0xff] %v3433_v28 }
 0x25d   :  { %v1994_v29 = vpop.f32.mrb[36].mxu0  ;;  %v2573_v30 = vpop.f32.mrb[36].mxu1 }
 0x25e   :  { %v1996_v31 = vpop.f32.mrb[37].mxu0  ;;  %v2575_v32 = vpop.f32.mrb[37].mxu1 }
 0x25f   :  { %v3434_v33 = vpack.c.bf16 %v1996_v31, %v1994_v29  ;;  %v3435_v34 = vpack.c.bf16 %v2575_v32, %v2573_v30  ;;  %v1998_v35 = vpop.f32.mrb[38].mxu0  ;;  %v2577_v36 = vpop.f32.mrb[38].mxu1 }
 0x260   :  { %v2000_v37 = vpop.f32.mrb[39].mxu0  ;;  %v2579_v38 = vpop.f32.mrb[39].mxu1 }
 0x261   :  { %3062 = vst [vmem:[%s5033_s2 + $0x120] sm:$0xff] %v3434_v33  ;;  %3063 = vst [vmem:[%s5033_s2 + $0x128] sm:$0xff] %v3435_v34  ;;  %v3436_v39 = vpack.c.bf16 %v2000_v37, %v1998_v35  ;;  %v3437_v40 = vpack.c.bf16 %v2579_v38, %v2577_v36 }
 0x263   :  { %3064 = vst [vmem:[%s5033_s2 + $0x130] sm:$0xff] %v3436_v39  ;;  %3065 = vst [vmem:[%s5033_s2 + $0x138] sm:$0xff] %v3437_v40 }
 0x265   :  { %v2004_v41 = vpop.f32.mrb[40].mxu0  ;;  %v2583_v42 = vpop.f32.mrb[40].mxu1 }
 0x266   :  { %v2006_v43 = vpop.f32.mrb[41].mxu0  ;;  %v2585_v44 = vpop.f32.mrb[41].mxu1 }
 0x267   :  { %v3438_v45 = vpack.c.bf16 %v2006_v43, %v2004_v41  ;;  %v3439_v46 = vpack.c.bf16 %v2585_v44, %v2583_v42  ;;  %v2008_v47 = vpop.f32.mrb[42].mxu0  ;;  %v2587_v48 = vpop.f32.mrb[42].mxu1 }
 0x268   :  { %v2010_v49 = vpop.f32.mrb[43].mxu0  ;;  %v2589_v50 = vpop.f32.mrb[43].mxu1 }
 0x269   :  { %3066 = vst [vmem:[%s5033_s2 + $0x140] sm:$0xff] %v3438_v45  ;;  %3067 = vst [vmem:[%s5033_s2 + $0x148] sm:$0xff] %v3439_v46  ;;  %v3440_v51 = vpack.c.bf16 %v2010_v49, %v2008_v47  ;;  %v3441_v52 = vpack.c.bf16 %v2589_v50, %v2587_v48 }
 0x26b   :  { %3068 = vst [vmem:[%s5033_s2 + $0x150] sm:$0xff] %v3440_v51  ;;  %3069 = vst [vmem:[%s5033_s2 + $0x158] sm:$0xff] %v3441_v52 }
 0x26d   :  { %v2014_v53 = vpop.f32.mrb[44].mxu0  ;;  %v2593_v54 = vpop.f32.mrb[44].mxu1 }
 0x26e   :  { %v2016_v55 = vpop.f32.mrb[45].mxu0  ;;  %v2595_v56 = vpop.f32.mrb[45].mxu1 }
 0x26f   :  { %v3442_v57 = vpack.c.bf16 %v2016_v55, %v2014_v53  ;;  %v3443_v58 = vpack.c.bf16 %v2595_v56, %v2593_v54  ;;  %v2018_v59 = vpop.f32.mrb[46].mxu0  ;;  %v2597_v60 = vpop.f32.mrb[46].mxu1 }
 0x270   :  { %v2020_v61 = vpop.f32.mrb[47].mxu0  ;;  %v2599_v62 = vpop.f32.mrb[47].mxu1 }
 0x271   :  { %3070 = vst [vmem:[%s5033_s2 + $0x160] sm:$0xff] %v3442_v57  ;;  %3071 = vst [vmem:[%s5033_s2 + $0x168] sm:$0xff] %v3443_v58  ;;  %v3444_v63 = vpack.c.bf16 %v2020_v61, %v2018_v59  ;;  %v3445_v0 = vpack.c.bf16 %v2599_v62, %v2597_v60 }
 0x273   :  { %3072 = vst [vmem:[%s5033_s2 + $0x170] sm:$0xff] %v3444_v63  ;;  %3073 = vst [vmem:[%s5033_s2 + $0x178] sm:$0xff] %v3445_v0 }
 0x275   :  { %v2024_v1 = vpop.f32.mrb[48].mxu0  ;;  %v2603_v2 = vpop.f32.mrb[48].mxu1 }
 0x276   :  { %v2026_v3 = vpop.f32.mrb[49].mxu0  ;;  %v2605_v4 = vpop.f32.mrb[49].mxu1 }
 0x277   :  { %v3446_v5 = vpack.c.bf16 %v2026_v3, %v2024_v1  ;;  %v3447_v6 = vpack.c.bf16 %v2605_v4, %v2603_v2  ;;  %v2028_v7 = vpop.f32.mrb[50].mxu0  ;;  %v2607_v8 = vpop.f32.mrb[50].mxu1 }
 0x278   :  { %v2030_v9 = vpop.f32.mrb[51].mxu0  ;;  %v2609_v10 = vpop.f32.mrb[51].mxu1 }
 0x279   :  { %3074 = vst [vmem:[%s5033_s2 + $0x180] sm:$0xff] %v3446_v5  ;;  %3075 = vst [vmem:[%s5033_s2 + $0x188] sm:$0xff] %v3447_v6  ;;  %v3448_v11 = vpack.c.bf16 %v2030_v9, %v2028_v7  ;;  %v3449_v12 = vpack.c.bf16 %v2609_v10, %v2607_v8 }
 0x27b   :  { %3076 = vst [vmem:[%s5033_s2 + $0x190] sm:$0xff] %v3448_v11  ;;  %3077 = vst [vmem:[%s5033_s2 + $0x198] sm:$0xff] %v3449_v12 }
 0x27d   :  { %v2034_v13 = vpop.f32.mrb[52].mxu0  ;;  %v2613_v14 = vpop.f32.mrb[52].mxu1 }
 0x27e   :  { %v2036_v15 = vpop.f32.mrb[53].mxu0  ;;  %v2615_v16 = vpop.f32.mrb[53].mxu1 }
 0x27f   :  { %v3450_v17 = vpack.c.bf16 %v2036_v15, %v2034_v13  ;;  %v3451_v18 = vpack.c.bf16 %v2615_v16, %v2613_v14  ;;  %v2038_v19 = vpop.f32.mrb[54].mxu0  ;;  %v2617_v20 = vpop.f32.mrb[54].mxu1 }
 0x280   :  { %v2040_v21 = vpop.f32.mrb[55].mxu0  ;;  %v2619_v22 = vpop.f32.mrb[55].mxu1 }
 0x281   :  { %3078 = vst [vmem:[%s5033_s2 + $0x1a0] sm:$0xff] %v3450_v17  ;;  %3079 = vst [vmem:[%s5033_s2 + $0x1a8] sm:$0xff] %v3451_v18  ;;  %v3452_v23 = vpack.c.bf16 %v2040_v21, %v2038_v19  ;;  %v3453_v24 = vpack.c.bf16 %v2619_v22, %v2617_v20 }
 0x283   :  { %3080 = vst [vmem:[%s5033_s2 + $0x1b0] sm:$0xff] %v3452_v23  ;;  %3081 = vst [vmem:[%s5033_s2 + $0x1b8] sm:$0xff] %v3453_v24 }
 0x285   :  { %v2044_v25 = vpop.f32.mrb[56].mxu0  ;;  %v2623_v26 = vpop.f32.mrb[56].mxu1 }
 0x286   :  { %v2046_v27 = vpop.f32.mrb[57].mxu0  ;;  %v2625_v28 = vpop.f32.mrb[57].mxu1 }
 0x287   :  { %v3454_v29 = vpack.c.bf16 %v2046_v27, %v2044_v25  ;;  %v3455_v30 = vpack.c.bf16 %v2625_v28, %v2623_v26  ;;  %v2048_v31 = vpop.f32.mrb[58].mxu0  ;;  %v2627_v32 = vpop.f32.mrb[58].mxu1 }
 0x288   :  { %v2050_v33 = vpop.f32.mrb[59].mxu0  ;;  %v2629_v34 = vpop.f32.mrb[59].mxu1 }
 0x289   :  { %3082 = vst [vmem:[%s5033_s2 + $0x1c0] sm:$0xff] %v3454_v29  ;;  %3083 = vst [vmem:[%s5033_s2 + $0x1c8] sm:$0xff] %v3455_v30  ;;  %v3456_v35 = vpack.c.bf16 %v2050_v33, %v2048_v31  ;;  %v3457_v36 = vpack.c.bf16 %v2629_v34, %v2627_v32 }
 0x28b   :  { %3084 = vst [vmem:[%s5033_s2 + $0x1d0] sm:$0xff] %v3456_v35  ;;  %3085 = vst [vmem:[%s5033_s2 + $0x1d8] sm:$0xff] %v3457_v36 }
 0x28d   :  { %v2054_v37 = vpop.f32.mrb[60].mxu0  ;;  %v2633_v38 = vpop.f32.mrb[60].mxu1 }
 0x28e   :  { %v2056_v39 = vpop.f32.mrb[61].mxu0  ;;  %v2635_v40 = vpop.f32.mrb[61].mxu1 }
 0x28f   :  { %v3458_v41 = vpack.c.bf16 %v2056_v39, %v2054_v37  ;;  %v3459_v42 = vpack.c.bf16 %v2635_v40, %v2633_v38  ;;  %v2058_v43 = vpop.f32.mrb[62].mxu0  ;;  %v2637_v44 = vpop.f32.mrb[62].mxu1 }
 0x290   :  { %v2060_v45 = vpop.f32.mrb[63].mxu0  ;;  %v2639_v46 = vpop.f32.mrb[63].mxu1 }
 0x291   :  { %3086 = vst [vmem:[%s5033_s2 + $0x1e0] sm:$0xff] %v3458_v41  ;;  %3087 = vst [vmem:[%s5033_s2 + $0x1e8] sm:$0xff] %v3459_v42  ;;  %v3460_v47 = vpack.c.bf16 %v2060_v45, %v2058_v43  ;;  %v3461_v48 = vpack.c.bf16 %v2639_v46, %v2637_v44 }
 0x293   :  { %3088 = vst [vmem:[%s5033_s2 + $0x1f0] sm:$0xff] %v3460_v47  ;;  %3089 = vst [vmem:[%s5033_s2 + $0x1f8] sm:$0xff] %v3461_v48 }

// kernel: net_forward.13
= control target key start
LH: loop header
LB: loop body
LE: loop exit
PB: predicated region body
PF: predicated region fallthrough
CT: control target
= control target key end

     0   :  { %s3368_s1 = inlined_call_operand.vmem [shape: bf16[256,512], index: 1, kind: input, shape index: {}]   ;;  %s3369_s0 = inlined_call_operand.vmem [shape: bf16[256,256], index: 0, kind: input, shape index: {}]   ;;  %s3370_s2 = inlined_call_operand.vmem [shape: f32[1,512], index: 2, kind: input, shape index: {}]   ;;  %s3371_s3 = inlined_call_operand.vmem [shape: bf16[256,512], index: 3, kind: output, shape index: {}]  }
   0x1   :  { %v2585_v0 = vld [vmem:[%s3368_s1 + $0x4] ss:$16 sps:$4 sm:$0xff]   ;;  %v2587_v1 = vld [vmem:[%s3368_s1 + $0xc] ss:$16 sps:$4 sm:$0xff]   ;;  %v2589_v2 = vld [vmem:[%s3368_s1] ss:$16 sps:$4 sm:$0xff]  }
   0x2   :  { %856 = vmatprep.subr.bf16.mxu0 %v2585_v0  ;;  %v2590_v3 = vld [vmem:[%s3368_s1 + $0x8] ss:$16 sps:$4 sm:$0xff]   ;;  %1049 = vmatprep.subr.bf16.mxu1 %v2587_v1  ;;  %v2591_v4 = vld [vmem:[%s3368_s1 + $0x24] ss:$16 sps:$4 sm:$0xff]   ;;  %v2593_v5 = vld [vmem:[%s3368_s1 + $0x2c] ss:$16 sps:$4 sm:$0xff]  }
   0x3   :  { %857 = vmatpush1.bf16.msra.mxu0 %v2589_v2  ;;  %1050 = vmatpush1.bf16.msra.mxu1 %v2590_v3  ;;  %v2595_v6 = vld [vmem:[%s3368_s1 + $0x20] ss:$16 sps:$4 sm:$0xff]   ;;  %v2596_v7 = vld [vmem:[%s3368_s1 + $0x28] ss:$16 sps:$4 sm:$0xff]   ;;  %v2597_v8 = vld [vmem:[%s3368_s1 + $0x44] ss:$16 sps:$4 sm:$0xff]  }
   0x4   :  { %858 = vmatprep.subr.bf16.mxu0 %v2591_v4  ;;  %1051 = vmatprep.subr.bf16.mxu1 %v2593_v5  ;;  %v2599_v9 = vld [vmem:[%s3368_s1 + $0x4c] ss:$16 sps:$4 sm:$0xff]   ;;  %v2601_v10 = vld [vmem:[%s3368_s1 + $0x40] ss:$16 sps:$4 sm:$0xff]   ;;  %v2602_v11 = vld [vmem:[%s3368_s1 + $0x48] ss:$16 sps:$4 sm:$0xff]  }
   0x5   :  { %v2603_v12 = vld [vmem:[%s3368_s1 + $0x64] ss:$16 sps:$4 sm:$0xff]   ;;  %v2605_v13 = vld [vmem:[%s3368_s1 + $0x6c] ss:$16 sps:$4 sm:$0xff]   ;;  %v2607_v14 = vld [vmem:[%s3368_s1 + $0x60] ss:$16 sps:$4 sm:$0xff]  }
   0x6   :  { %v2608_v15 = vld [vmem:[%s3368_s1 + $0x68] ss:$16 sps:$4 sm:$0xff]   ;;  %v2609_v16 = vld [vmem:[%s3368_s1 + $0x84] ss:$16 sps:$4 sm:$0xff]   ;;  %v2611_v17 = vld [vmem:[%s3368_s1 + $0x8c] ss:$16 sps:$4 sm:$0xff]  }
   0x7   :  { %859 = vmatpush1.bf16.msra.mxu0 %v2595_v6  ;;  %1052 = vmatpush1.bf16.msra.mxu1 %v2596_v7  ;;  %v2613_v18 = vld [vmem:[%s3368_s1 + $0x80] ss:$16 sps:$4 sm:$0xff]   ;;  %v2614_v19 = vld [vmem:[%s3368_s1 + $0x88] ss:$16 sps:$4 sm:$0xff]   ;;  %v2615_v20 = vld [vmem:[%s3368_s1 + $0xa4] ss:$16 sps:$4 sm:$0xff]  }
   0x8   :  { %860 = vmatprep.subr.bf16.mxu0 %v2597_v8  ;;  %1053 = vmatprep.subr.bf16.mxu1 %v2599_v9  ;;  %v2617_v21 = vld [vmem:[%s3368_s1 + $0xac] ss:$16 sps:$4 sm:$0xff]   ;;  %v2619_v22 = vld [vmem:[%s3368_s1 + $0xa0] ss:$16 sps:$4 sm:$0xff]   ;;  %v2620_v23 = vld [vmem:[%s3368_s1 + $0xa8] ss:$16 sps:$4 sm:$0xff]  }
   0x9   :  { %v2621_v24 = vld [vmem:[%s3368_s1 + $0xc4] ss:$16 sps:$4 sm:$0xff]   ;;  %v2623_v25 = vld [vmem:[%s3368_s1 + $0xcc] ss:$16 sps:$4 sm:$0xff]   ;;  %v2625_v26 = vld [vmem:[%s3368_s1 + $0xc0] ss:$16 sps:$4 sm:$0xff]  }
   0xa   :  { %v2626_v27 = vld [vmem:[%s3368_s1 + $0xc8] ss:$16 sps:$4 sm:$0xff]   ;;  %v2627_v28 = vld [vmem:[%s3368_s1 + $0xe4] ss:$16 sps:$4 sm:$0xff]   ;;  %v2629_v29 = vld [vmem:[%s3368_s1 + $0xec] ss:$16 sps:$4 sm:$0xff]  }
   0xb   :  { %861 = vmatpush1.bf16.msra.mxu0 %v2601_v10  ;;  %1054 = vmatpush1.bf16.msra.mxu1 %v2602_v11  ;;  %v2631_v30 = vld [vmem:[%s3368_s1 + $0xe0] ss:$16 sps:$4 sm:$0xff]   ;;  %v2632_v31 = vld [vmem:[%s3368_s1 + $0xe8] ss:$16 sps:$4 sm:$0xff]   ;;  %v2633_v32 = vld [vmem:[%s3368_s1 + $0x104] ss:$16 sps:$4 sm:$0xff]  }
   0xc   :  { %862 = vmatprep.subr.bf16.mxu0 %v2603_v12  ;;  %1055 = vmatprep.subr.bf16.mxu1 %v2605_v13  ;;  %v2635_v33 = vld [vmem:[%s3368_s1 + $0x10c] ss:$16 sps:$4 sm:$0xff]   ;;  %v2637_v34 = vld [vmem:[%s3368_s1 + $0x100] ss:$16 sps:$4 sm:$0xff]   ;;  %v2638_v35 = vld [vmem:[%s3368_s1 + $0x108] ss:$16 sps:$4 sm:$0xff]  }
   0xd   :  { %v2639_v36 = vld [vmem:[%s3368_s1 + $0x124] ss:$16 sps:$4 sm:$0xff]   ;;  %v2641_v37 = vld [vmem:[%s3368_s1 + $0x12c] ss:$16 sps:$4 sm:$0xff]   ;;  %v2643_v38 = vld [vmem:[%s3368_s1 + $0x120] ss:$16 sps:$4 sm:$0xff]  }
   0xe   :  { %v2644_v39 = vld [vmem:[%s3368_s1 + $0x128] ss:$16 sps:$4 sm:$0xff]   ;;  %v2645_v40 = vld [vmem:[%s3368_s1 + $0x144] ss:$16 sps:$4 sm:$0xff]   ;;  %v2647_v41 = vld [vmem:[%s3368_s1 + $0x14c] ss:$16 sps:$4 sm:$0xff]  }
   0xf   :  { %863 = vmatpush1.bf16.msra.mxu0 %v2607_v14  ;;  %1056 = vmatpush1.bf16.msra.mxu1 %v2608_v15  ;;  %v2649_v42 = vld [vmem:[%s3368_s1 + $0x140] ss:$16 sps:$4 sm:$0xff]   ;;  %v2650_v43 = vld [vmem:[%s3368_s1 + $0x148] ss:$16 sps:$4 sm:$0xff]   ;;  %v2651_v44 = vld [vmem:[%s3368_s1 + $0x164] ss:$16 sps:$4 sm:$0xff]  }
  0x10   :  { %864 = vmatprep.subr.bf16.mxu0 %v2609_v16  ;;  %1057 = vmatprep.subr.bf16.mxu1 %v2611_v17  ;;  %v2653_v45 = vld [vmem:[%s3368_s1 + $0x16c] ss:$16 sps:$4 sm:$0xff]   ;;  %v2655_v46 = vld [vmem:[%s3368_s1 + $0x160] ss:$16 sps:$4 sm:$0xff]   ;;  %v2656_v47 = vld [vmem:[%s3368_s1 + $0x168] ss:$16 sps:$4 sm:$0xff]  }
  0x11   :  { %v2683_v48 = vld [vmem:[%s3369_s0 + $0x4] ss:$8 sps:$4 sm:$0xff]   ;;  %v2661_v51 = vld [vmem:[%s3368_s1 + $0x180] ss:$16 sps:$4 sm:$0xff]   ;;  %v2662_v52 = vld [vmem:[%s3368_s1 + $0x188] ss:$16 sps:$4 sm:$0xff]  }
  0x12   :  { %v2657_v49 = vld [vmem:[%s3368_s1 + $0x184] ss:$16 sps:$4 sm:$0xff]   ;;  %v2659_v50 = vld [vmem:[%s3368_s1 + $0x18c] ss:$16 sps:$4 sm:$0xff]   ;;  %888 = vmatprep.mubr.bf16.mxu0 %v2683_v48  ;;  %1081 = vmatprep.mubr.bf16.mxu1 %v2683_v48  ;;  %v2667_v55 = vld [vmem:[%s3368_s1 + $0x1a0] ss:$16 sps:$4 sm:$0xff]  }
  0x13   :  { %865 = vmatpush1.bf16.msra.mxu0 %v2613_v18  ;;  %1058 = vmatpush1.bf16.msra.mxu1 %v2614_v19  ;;  %v2663_v53 = vld [vmem:[%s3368_s1 + $0x1a4] ss:$16 sps:$4 sm:$0xff]   ;;  %v2665_v54 = vld [vmem:[%s3368_s1 + $0x1ac] ss:$16 sps:$4 sm:$0xff]   ;;  %v2668_v56 = vld [vmem:[%s3368_s1 + $0x1a8] ss:$16 sps:$4 sm:$0xff]  }
  0x14   :  { %866 = vmatprep.subr.bf16.mxu0 %v2615_v20  ;;  %1059 = vmatprep.subr.bf16.mxu1 %v2617_v21  ;;  %v2669_v57 = vld [vmem:[%s3368_s1 + $0x1c4] ss:$16 sps:$4 sm:$0xff]   ;;  %v2671_v58 = vld [vmem:[%s3368_s1 + $0x1cc] ss:$16 sps:$4 sm:$0xff]   ;;  %v2673_v59 = vld [vmem:[%s3368_s1 + $0x1c0] ss:$16 sps:$4 sm:$0xff]  }
  0x15   :  { %v2674_v60 = vld [vmem:[%s3368_s1 + $0x1c8] ss:$16 sps:$4 sm:$0xff]   ;;  %v2675_v61 = vld [vmem:[%s3368_s1 + $0x1e4] ss:$16 sps:$4 sm:$0xff]   ;;  %v2677_v62 = vld [vmem:[%s3368_s1 + $0x1ec] ss:$16 sps:$4 sm:$0xff]  }
  0x16   :  { %v2679_v63 = vld [vmem:[%s3368_s1 + $0x1e0] ss:$16 sps:$4 sm:$0xff]   ;;  %v2680_v0 = vld [vmem:[%s3368_s1 + $0x1e8] ss:$16 sps:$4 sm:$0xff]   ;;  %v2684_v2 = vld [vmem:[%s3369_s0 + $0x14] ss:$8 sps:$4 sm:$0xff]  }
  0x17   :  { %867 = vmatpush1.bf16.msra.mxu0 %v2619_v22  ;;  %1060 = vmatpush1.bf16.msra.mxu1 %v2620_v23  ;;  %v2681_v1 = vld [vmem:[%s3369_s0] ss:$8 sps:$4 sm:$0xff]   ;;  %v2686_v3 = vld [vmem:[%s3369_s0 + $0x10] ss:$8 sps:$4 sm:$0xff]   ;;  %v2687_v4 = vld [vmem:[%s3369_s0 + $0x24] ss:$8 sps:$4 sm:$0xff]  }
  0x18   :  { %868 = vmatprep.subr.bf16.mxu0 %v2621_v24  ;;  %1061 = vmatprep.subr.bf16.mxu1 %v2623_v25  ;;  %v2689_v5 = vld [vmem:[%s3369_s0 + $0x20] ss:$8 sps:$4 sm:$0xff]   ;;  %v2690_v6 = vld [vmem:[%s3369_s0 + $0x34] ss:$8 sps:$4 sm:$0xff]   ;;  %v2692_v7 = vld [vmem:[%s3369_s0 + $0x30] ss:$8 sps:$4 sm:$0xff]  }
  0x19   :  { %v2693_v8 = vld [vmem:[%s3369_s0 + $0x44] ss:$8 sps:$4 sm:$0xff]   ;;  %v2695_v9 = vld [vmem:[%s3369_s0 + $0x40] ss:$8 sps:$4 sm:$0xff]   ;;  %v2696_v10 = vld [vmem:[%s3369_s0 + $0x54] ss:$8 sps:$4 sm:$0xff]  }
  0x1a   :  { %v2698_v11 = vld [vmem:[%s3369_s0 + $0x50] ss:$8 sps:$4 sm:$0xff]   ;;  %v2699_v12 = vld [vmem:[%s3369_s0 + $0x64] ss:$8 sps:$4 sm:$0xff]   ;;  %v2701_v13 = vld [vmem:[%s3369_s0 + $0x60] ss:$8 sps:$4 sm:$0xff]  }
  0x1b   :  { %869 = vmatpush1.bf16.msra.mxu0 %v2625_v26  ;;  %1062 = vmatpush1.bf16.msra.mxu1 %v2626_v27  ;;  %v2702_v14 = vld [vmem:[%s3369_s0 + $0x74] ss:$8 sps:$4 sm:$0xff]   ;;  %v2704_v15 = vld [vmem:[%s3369_s0 + $0x70] ss:$8 sps:$4 sm:$0xff]   ;;  %v2705_v16 = vld [vmem:[%s3369_s0 + $0x84] ss:$8 sps:$4 sm:$0xff]  }
  0x1c   :  { %870 = vmatprep.subr.bf16.mxu0 %v2627_v28  ;;  %1063 = vmatprep.subr.bf16.mxu1 %v2629_v29  ;;  %v2707_v17 = vld [vmem:[%s3369_s0 + $0x80] ss:$8 sps:$4 sm:$0xff]   ;;  %v2708_v18 = vld [vmem:[%s3369_s0 + $0x94] ss:$8 sps:$4 sm:$0xff]   ;;  %v2710_v19 = vld [vmem:[%s3369_s0 + $0x90] ss:$8 sps:$4 sm:$0xff]  }
  0x1d   :  { %v2711_v20 = vld [vmem:[%s3369_s0 + $0xa4] ss:$8 sps:$4 sm:$0xff]   ;;  %v2713_v21 = vld [vmem:[%s3369_s0 + $0xa0] ss:$8 sps:$4 sm:$0xff]   ;;  %v2714_v22 = vld [vmem:[%s3369_s0 + $0xb4] ss:$8 sps:$4 sm:$0xff]  }
  0x1e   :  { %v2716_v23 = vld [vmem:[%s3369_s0 + $0xb0] ss:$8 sps:$4 sm:$0xff]   ;;  %v2717_v24 = vld [vmem:[%s3369_s0 + $0xc4] ss:$8 sps:$4 sm:$0xff]   ;;  %v2719_v25 = vld [vmem:[%s3369_s0 + $0xc0] ss:$8 sps:$4 sm:$0xff]  }
  0x1f   :  { %871 = vmatpush1.bf16.msra.mxu0 %v2631_v30  ;;  %1064 = vmatpush1.bf16.msra.mxu1 %v2632_v31  ;;  %v2720_v26 = vld [vmem:[%s3369_s0 + $0xd4] ss:$8 sps:$4 sm:$0xff]   ;;  %v2722_v27 = vld [vmem:[%s3369_s0 + $0xd0] ss:$8 sps:$4 sm:$0xff]   ;;  %v2723_v28 = vld [vmem:[%s3369_s0 + $0xe4] ss:$8 sps:$4 sm:$0xff]  }
  0x20   :  { %872 = vmatprep.subr.bf16.mxu0 %v2633_v32  ;;  %1065 = vmatprep.subr.bf16.mxu1 %v2635_v33  ;;  %v2725_v29 = vld [vmem:[%s3369_s0 + $0xe0] ss:$8 sps:$4 sm:$0xff]   ;;  %v2726_v30 = vld [vmem:[%s3369_s0 + $0xf4] ss:$8 sps:$4 sm:$0xff]   ;;  %v2728_v31 = vld [vmem:[%s3369_s0 + $0xf0] ss:$8 sps:$4 sm:$0xff]   ;;  %v1631_v32 = vlaneseq }
  0x22   :  { %v1632_v33 = vshrl.u32 %v1631_v32, 7 }
  0x23   :  { %873 = vmatpush1.bf16.msra.mxu0 %v2637_v34  ;;  %1066 = vmatpush1.bf16.msra.mxu1 %v2638_v35 }
  0x24   :  { %874 = vmatprep.subr.bf16.mxu0 %v2639_v36  ;;  %1067 = vmatprep.subr.bf16.mxu1 %v2641_v37  ;;  %v1633_v34 = vsub.s32 0, %v1632_v33  ;;  %v1641_v35 = vsub.s32 2, %v1632_v33  ;;  %v1629_v36 = vld [vmem:[%s3370_s2] sm:$0xf]  ;;  %v1637_v37 = vsub.s32 1, %v1632_v33 }
  0x27   :  { %875 = vmatpush1.bf16.msra.mxu0 %v2643_v38  ;;  %1068 = vmatpush1.bf16.msra.mxu1 %v2644_v39  ;;  %v1645_v38 = vsub.s32 3, %v1632_v33  ;;  %v3040_v39 = vrot.slane %v1629_v36, %v1633_v34 }
  0x28   :  { %876 = vmatprep.subr.bf16.mxu0 %v2645_v40  ;;  %1069 = vmatprep.subr.bf16.mxu1 %v2647_v41  ;;  %v3042_v40 = vrot.slane %v1629_v36, %v1641_v35  ;;  %v3044_v41 = vrot.slane %v1629_v36, %v1637_v37 }
  0x2b   :  { %877 = vmatpush1.bf16.msra.mxu0 %v2649_v42  ;;  %1070 = vmatpush1.bf16.msra.mxu1 %v2650_v43  ;;  %v3046_v42 = vrot.slane %v1629_v36, %v1645_v38 }
  0x2c   :  { %878 = vmatprep.subr.bf16.mxu0 %v2651_v44  ;;  %1071 = vmatprep.subr.bf16.mxu1 %v2653_v45 }
  0x2f   :  { %879 = vmatpush1.bf16.msra.mxu0 %v2655_v46  ;;  %1072 = vmatpush1.bf16.msra.mxu1 %v2656_v47 }
  0x30   :  { %880 = vmatprep.subr.bf16.mxu0 %v2657_v49  ;;  %1073 = vmatprep.subr.bf16.mxu1 %v2659_v50 }
  0x33   :  { %881 = vmatpush1.bf16.msra.mxu0 %v2661_v51  ;;  %1074 = vmatpush1.bf16.msra.mxu1 %v2662_v52 }
  0x34   :  { %882 = vmatprep.subr.bf16.mxu0 %v2663_v53  ;;  %1075 = vmatprep.subr.bf16.mxu1 %v2665_v54 }
  0x37   :  { %883 = vmatpush1.bf16.msra.mxu0 %v2667_v55  ;;  %1076 = vmatpush1.bf16.msra.mxu1 %v2668_v56 }
  0x38   :  { %884 = vmatprep.subr.bf16.mxu0 %v2669_v57  ;;  %1077 = vmatprep.subr.bf16.mxu1 %v2671_v58 }
  0x3b   :  { %885 = vmatpush1.bf16.msra.mxu0 %v2673_v59  ;;  %1078 = vmatpush1.bf16.msra.mxu1 %v2674_v60 }
  0x3c   :  { %886 = vmatprep.subr.bf16.mxu0 %v2675_v61  ;;  %1079 = vmatprep.subr.bf16.mxu1 %v2677_v62 }
  0x3f   :  { %887 = vmatpush1.bf16.msra.mxu0 %v2679_v63  ;;  %1080 = vmatpush1.bf16.msra.mxu1 %v2680_v0 }
  0x42   :  { %889 = vmatmul.mubr.bf16.vlgmr.msra.gmra.mrb[0].mxu0 %v2681_v1  ;;  %1082 = vmatmul.mubr.bf16.vlgmr.msra.gmra.mrb[0].mxu1 %v2681_v1 }
  0x43   :  { %898 = vmatprep.mubr.bf16.mxu0 %v2684_v2  ;;  %1091 = vmatprep.mubr.bf16.mxu1 %v2684_v2 }
  0x4a   :  { %899 = vmatmul.mubr.bf16.gmra.mrb[4].mxu0 %v2686_v3  ;;  %1092 = vmatmul.mubr.bf16.gmra.mrb[4].mxu1 %v2686_v3 }
  0x4b   :  { %908 = vmatprep.mubr.bf16.mxu0 %v2687_v4  ;;  %1101 = vmatprep.mubr.bf16.mxu1 %v2687_v4 }
  0x52   :  { %909 = vmatmul.mubr.bf16.gmra.mrb[8].mxu0 %v2689_v5  ;;  %1102 = vmatmul.mubr.bf16.gmra.mrb[8].mxu1 %v2689_v5 }
  0x53   :  { %918 = vmatprep.mubr.bf16.mxu0 %v2690_v6  ;;  %1111 = vmatprep.mubr.bf16.mxu1 %v2690_v6 }
  0x5a   :  { %919 = vmatmul.mubr.bf16.gmra.mrb[12].mxu0 %v2692_v7  ;;  %1112 = vmatmul.mubr.bf16.gmra.mrb[12].mxu1 %v2692_v7 }
  0x5b   :  { %928 = vmatprep.mubr.bf16.mxu0 %v2693_v8  ;;  %1121 = vmatprep.mubr.bf16.mxu1 %v2693_v8 }
  0x62   :  { %929 = vmatmul.mubr.bf16.gmra.mrb[16].mxu0 %v2695_v9  ;;  %1122 = vmatmul.mubr.bf16.gmra.mrb[16].mxu1 %v2695_v9 }
  0x63   :  { %938 = vmatprep.mubr.bf16.mxu0 %v2696_v10  ;;  %1131 = vmatprep.mubr.bf16.mxu1 %v2696_v10 }
  0x6a   :  { %939 = vmatmul.mubr.bf16.gmra.mrb[20].mxu0 %v2698_v11  ;;  %1132 = vmatmul.mubr.bf16.gmra.mrb[20].mxu1 %v2698_v11 }
  0x6b   :  { %948 = vmatprep.mubr.bf16.mxu0 %v2699_v12  ;;  %1141 = vmatprep.mubr.bf16.mxu1 %v2699_v12 }
  0x72   :  { %949 = vmatmul.mubr.bf16.gmra.mrb[24].mxu0 %v2701_v13  ;;  %1142 = vmatmul.mubr.bf16.gmra.mrb[24].mxu1 %v2701_v13 }
  0x73   :  { %958 = vmatprep.mubr.bf16.mxu0 %v2702_v14  ;;  %1151 = vmatprep.mubr.bf16.mxu1 %v2702_v14 }
  0x7a   :  { %959 = vmatmul.mubr.bf16.gmra.mrb[28].mxu0 %v2704_v15  ;;  %1152 = vmatmul.mubr.bf16.gmra.mrb[28].mxu1 %v2704_v15 }
  0x7b   :  { %968 = vmatprep.mubr.bf16.mxu0 %v2705_v16  ;;  %1161 = vmatprep.mubr.bf16.mxu1 %v2705_v16 }
  0x82   :  { %969 = vmatmul.mubr.bf16.gmra.mrb[32].mxu0 %v2707_v17  ;;  %1162 = vmatmul.mubr.bf16.gmra.mrb[32].mxu1 %v2707_v17 }
  0x83   :  { %978 = vmatprep.mubr.bf16.mxu0 %v2708_v18  ;;  %1171 = vmatprep.mubr.bf16.mxu1 %v2708_v18 }
  0x8a   :  { %979 = vmatmul.mubr.bf16.gmra.mrb[36].mxu0 %v2710_v19  ;;  %1172 = vmatmul.mubr.bf16.gmra.mrb[36].mxu1 %v2710_v19 }
  0x8b   :  { %988 = vmatprep.mubr.bf16.mxu0 %v2711_v20  ;;  %1181 = vmatprep.mubr.bf16.mxu1 %v2711_v20 }
  0x92   :  { %989 = vmatmul.mubr.bf16.gmra.mrb[40].mxu0 %v2713_v21  ;;  %1182 = vmatmul.mubr.bf16.gmra.mrb[40].mxu1 %v2713_v21 }
  0x93   :  { %998 = vmatprep.mubr.bf16.mxu0 %v2714_v22  ;;  %1191 = vmatprep.mubr.bf16.mxu1 %v2714_v22 }
  0x9a   :  { %999 = vmatmul.mubr.bf16.gmra.mrb[44].mxu0 %v2716_v23  ;;  %1192 = vmatmul.mubr.bf16.gmra.mrb[44].mxu1 %v2716_v23 }
  0x9b   :  { %1008 = vmatprep.mubr.bf16.mxu0 %v2717_v24  ;;  %1201 = vmatprep.mubr.bf16.mxu1 %v2717_v24 }
  0xa2   :  { %1009 = vmatmul.mubr.bf16.gmra.mrb[48].mxu0 %v2719_v25  ;;  %1202 = vmatmul.mubr.bf16.gmra.mrb[48].mxu1 %v2719_v25 }
  0xa3   :  { %1018 = vmatprep.mubr.bf16.mxu0 %v2720_v26  ;;  %1211 = vmatprep.mubr.bf16.mxu1 %v2720_v26 }
  0xaa   :  { %1019 = vmatmul.mubr.bf16.gmra.mrb[52].mxu0 %v2722_v27  ;;  %1212 = vmatmul.mubr.bf16.gmra.mrb[52].mxu1 %v2722_v27 }
  0xab   :  { %1028 = vmatprep.mubr.bf16.mxu0 %v2723_v28  ;;  %1221 = vmatprep.mubr.bf16.mxu1 %v2723_v28 }
  0xb2   :  { %1029 = vmatmul.mubr.bf16.gmra.mrb[56].mxu0 %v2725_v29  ;;  %1222 = vmatmul.mubr.bf16.gmra.mrb[56].mxu1 %v2725_v29 }
  0xb3   :  { %1038 = vmatprep.mubr.bf16.mxu0 %v2726_v30  ;;  %1231 = vmatprep.mubr.bf16.mxu1 %v2726_v30 }
  0xba   :  { %1039 = vmatmul.mubr.bf16.gmra.mrb[60].mxu0 %v2728_v31  ;;  %1232 = vmatmul.mubr.bf16.gmra.mrb[60].mxu1 %v2728_v31 }
 0x115   :  { %v890_v43 = vpop.f32.mrb[0].mxu0  ;;  %v1083_v44 = vpop.f32.mrb[0].mxu1 }
 0x116   :  { %v1651_v45 = vadd.f32 %v3040_v39, %v890_v43  ;;  %v1653_v46 = vadd.f32 %v3042_v40, %v1083_v44  ;;  %v892_v47 = vpop.f32.mrb[1].mxu0  ;;  %v1085_v48 = vpop.f32.mrb[1].mxu1 }
 0x117   :  { %v1652_v49 = vadd.f32 %v3044_v41, %v892_v47  ;;  %v1654_v50 = vadd.f32 %v3046_v42, %v1085_v48  ;;  %v894_v51 = vpop.f32.mrb[2].mxu0  ;;  %v1087_v52 = vpop.f32.mrb[2].mxu1 }
 0x118   :  { %v1779_v53 = vmax.f32 %v1651_v45, 0.0  ;;  %v1781_v54 = vmax.f32 %v1653_v46, 0.0  ;;  %v1655_v55 = vadd.f32 %v3040_v39, %v894_v51  ;;  %v1657_v56 = vadd.f32 %v3042_v40, %v1087_v52  ;;  %v896_v57 = vpop.f32.mrb[3].mxu0  ;;  %v1089_v58 = vpop.f32.mrb[3].mxu1 }
 0x119   :  { %v1780_v59 = vmax.f32 %v1652_v49, 0.0  ;;  %v1782_v60 = vmax.f32 %v1654_v50, 0.0  ;;  %v1656_v61 = vadd.f32 %v3044_v41, %v896_v57  ;;  %v1658_v62 = vadd.f32 %v3046_v42, %v1089_v58 }
 0x11a   :  { %v1783_v63 = vmax.f32 %v1655_v55, 0.0  ;;  %v1785_v0 = vmax.f32 %v1657_v56, 0.0 }
 0x11b   :  { %v2521_v1 = vpack.c.bf16 %v1780_v59, %v1779_v53  ;;  %v2522_v2 = vpack.c.bf16 %v1782_v60, %v1781_v54  ;;  %v1784_v3 = vmax.f32 %v1656_v61, 0.0  ;;  %v1786_v4 = vmax.f32 %v1658_v62, 0.0 }
 0x11d   :  { %2291 = vst [vmem:[%s3371_s3] sm:$0xff] %v2521_v1  ;;  %2292 = vst [vmem:[%s3371_s3 + $0x8] sm:$0xff] %v2522_v2  ;;  %v2523_v5 = vpack.c.bf16 %v1784_v3, %v1783_v63  ;;  %v2524_v6 = vpack.c.bf16 %v1786_v4, %v1785_v0  ;;  %v900_v7 = vpop.f32.mrb[4].mxu0  ;;  %v1093_v8 = vpop.f32.mrb[4].mxu1 }
 0x11e   :  { %v1659_v9 = vadd.f32 %v3040_v39, %v900_v7  ;;  %v1661_v10 = vadd.f32 %v3042_v40, %v1093_v8  ;;  %v902_v11 = vpop.f32.mrb[5].mxu0  ;;  %v1095_v12 = vpop.f32.mrb[5].mxu1 }
 0x11f   :  { %2293 = vst [vmem:[%s3371_s3 + $0x10] sm:$0xff] %v2523_v5  ;;  %2294 = vst [vmem:[%s3371_s3 + $0x18] sm:$0xff] %v2524_v6  ;;  %v1660_v13 = vadd.f32 %v3044_v41, %v902_v11  ;;  %v1662_v14 = vadd.f32 %v3046_v42, %v1095_v12  ;;  %v904_v15 = vpop.f32.mrb[6].mxu0  ;;  %v1097_v16 = vpop.f32.mrb[6].mxu1 }
 0x120   :  { %v1787_v17 = vmax.f32 %v1659_v9, 0.0  ;;  %v1789_v18 = vmax.f32 %v1661_v10, 0.0  ;;  %v1663_v19 = vadd.f32 %v3040_v39, %v904_v15  ;;  %v1665_v20 = vadd.f32 %v3042_v40, %v1097_v16  ;;  %v906_v21 = vpop.f32.mrb[7].mxu0  ;;  %v1099_v22 = vpop.f32.mrb[7].mxu1 }
 0x121   :  { %v1788_v23 = vmax.f32 %v1660_v13, 0.0  ;;  %v1790_v24 = vmax.f32 %v1662_v14, 0.0  ;;  %v1664_v25 = vadd.f32 %v3044_v41, %v906_v21  ;;  %v1666_v26 = vadd.f32 %v3046_v42, %v1099_v22 }
 0x122   :  { %v1791_v27 = vmax.f32 %v1663_v19, 0.0  ;;  %v1793_v28 = vmax.f32 %v1665_v20, 0.0 }
 0x123   :  { %v2525_v29 = vpack.c.bf16 %v1788_v23, %v1787_v17  ;;  %v2526_v30 = vpack.c.bf16 %v1790_v24, %v1789_v18  ;;  %v1792_v31 = vmax.f32 %v1664_v25, 0.0  ;;  %v1794_v32 = vmax.f32 %v1666_v26, 0.0 }
 0x125   :  { %2295 = vst [vmem:[%s3371_s3 + $0x20] sm:$0xff] %v2525_v29  ;;  %2296 = vst [vmem:[%s3371_s3 + $0x28] sm:$0xff] %v2526_v30  ;;  %v2527_v33 = vpack.c.bf16 %v1792_v31, %v1791_v27  ;;  %v2528_v34 = vpack.c.bf16 %v1794_v32, %v1793_v28  ;;  %v910_v35 = vpop.f32.mrb[8].mxu0  ;;  %v1103_v36 = vpop.f32.mrb[8].mxu1 }
 0x126   :  { %v1667_v37 = vadd.f32 %v3040_v39, %v910_v35  ;;  %v1669_v38 = vadd.f32 %v3042_v40, %v1103_v36  ;;  %v912_v43 = vpop.f32.mrb[9].mxu0  ;;  %v1105_v44 = vpop.f32.mrb[9].mxu1 }
 0x127   :  { %2297 = vst [vmem:[%s3371_s3 + $0x30] sm:$0xff] %v2527_v33  ;;  %2298 = vst [vmem:[%s3371_s3 + $0x38] sm:$0xff] %v2528_v34  ;;  %v1668_v45 = vadd.f32 %v3044_v41, %v912_v43  ;;  %v1670_v46 = vadd.f32 %v3046_v42, %v1105_v44  ;;  %v914_v47 = vpop.f32.mrb[10].mxu0  ;;  %v1107_v48 = vpop.f32.mrb[10].mxu1 }
 0x128   :  { %v1795_v49 = vmax.f32 %v1667_v37, 0.0  ;;  %v1797_v50 = vmax.f32 %v1669_v38, 0.0  ;;  %v1671_v51 = vadd.f32 %v3040_v39, %v914_v47  ;;  %v1673_v52 = vadd.f32 %v3042_v40, %v1107_v48  ;;  %v916_v53 = vpop.f32.mrb[11].mxu0  ;;  %v1109_v54 = vpop.f32.mrb[11].mxu1 }
 0x129   :  { %v1796_v55 = vmax.f32 %v1668_v45, 0.0  ;;  %v1798_v56 = vmax.f32 %v1670_v46, 0.0  ;;  %v1672_v57 = vadd.f32 %v3044_v41, %v916_v53  ;;  %v1674_v58 = vadd.f32 %v3046_v42, %v1109_v54 }
 0x12a   :  { %v1799_v59 = vmax.f32 %v1671_v51, 0.0  ;;  %v1801_v60 = vmax.f32 %v1673_v52, 0.0 }
 0x12b   :  { %v2529_v61 = vpack.c.bf16 %v1796_v55, %v1795_v49  ;;  %v2530_v62 = vpack.c.bf16 %v1798_v56, %v1797_v50  ;;  %v1800_v63 = vmax.f32 %v1672_v57, 0.0  ;;  %v1802_v0 = vmax.f32 %v1674_v58, 0.0 }
 0x12d   :  { %2299 = vst [vmem:[%s3371_s3 + $0x40] sm:$0xff] %v2529_v61  ;;  %2300 = vst [vmem:[%s3371_s3 + $0x48] sm:$0xff] %v2530_v62  ;;  %v2531_v1 = vpack.c.bf16 %v1800_v63, %v1799_v59  ;;  %v2532_v2 = vpack.c.bf16 %v1802_v0, %v1801_v60  ;;  %v920_v3 = vpop.f32.mrb[12].mxu0  ;;  %v1113_v4 = vpop.f32.mrb[12].mxu1 }
 0x12e   :  { %v1675_v5 = vadd.f32 %v3040_v39, %v920_v3  ;;  %v1677_v6 = vadd.f32 %v3042_v40, %v1113_v4  ;;  %v922_v7 = vpop.f32.mrb[13].mxu0  ;;  %v1115_v8 = vpop.f32.mrb[13].mxu1 }
 0x12f   :  { %2301 = vst [vmem:[%s3371_s3 + $0x50] sm:$0xff] %v2531_v1  ;;  %2302 = vst [vmem:[%s3371_s3 + $0x58] sm:$0xff] %v2532_v2  ;;  %v1676_v9 = vadd.f32 %v3044_v41, %v922_v7  ;;  %v1678_v10 = vadd.f32 %v3046_v42, %v1115_v8  ;;  %v924_v11 = vpop.f32.mrb[14].mxu0  ;;  %v1117_v12 = vpop.f32.mrb[14].mxu1 }
 0x130   :  { %v1803_v13 = vmax.f32 %v1675_v5, 0.0  ;;  %v1805_v14 = vmax.f32 %v1677_v6, 0.0  ;;  %v1679_v15 = vadd.f32 %v3040_v39, %v924_v11  ;;  %v1681_v16 = vadd.f32 %v3042_v40, %v1117_v12  ;;  %v926_v17 = vpop.f32.mrb[15].mxu0  ;;  %v1119_v18 = vpop.f32.mrb[15].mxu1 }
 0x131   :  { %v1804_v19 = vmax.f32 %v1676_v9, 0.0  ;;  %v1806_v20 = vmax.f32 %v1678_v10, 0.0  ;;  %v1680_v21 = vadd.f32 %v3044_v41, %v926_v17  ;;  %v1682_v22 = vadd.f32 %v3046_v42, %v1119_v18 }
 0x132   :  { %v1807_v23 = vmax.f32 %v1679_v15, 0.0  ;;  %v1809_v24 = vmax.f32 %v1681_v16, 0.0 }
 0x133   :  { %v2533_v25 = vpack.c.bf16 %v1804_v19, %v1803_v13  ;;  %v2534_v26 = vpack.c.bf16 %v1806_v20, %v1805_v14  ;;  %v1808_v27 = vmax.f32 %v1680_v21, 0.0  ;;  %v1810_v28 = vmax.f32 %v1682_v22, 0.0 }
 0x135   :  { %2303 = vst [vmem:[%s3371_s3 + $0x60] sm:$0xff] %v2533_v25  ;;  %2304 = vst [vmem:[%s3371_s3 + $0x68] sm:$0xff] %v2534_v26  ;;  %v2535_v29 = vpack.c.bf16 %v1808_v27, %v1807_v23  ;;  %v2536_v30 = vpack.c.bf16 %v1810_v28, %v1809_v24  ;;  %v930_v31 = vpop.f32.mrb[16].mxu0  ;;  %v1123_v32 = vpop.f32.mrb[16].mxu1 }
 0x136   :  { %v1683_v33 = vadd.f32 %v3040_v39, %v930_v31  ;;  %v1685_v34 = vadd.f32 %v3042_v40, %v1123_v32  ;;  %v932_v35 = vpop.f32.mrb[17].mxu0  ;;  %v1125_v36 = vpop.f32.mrb[17].mxu1 }
 0x137   :  { %2305 = vst [vmem:[%s3371_s3 + $0x70] sm:$0xff] %v2535_v29  ;;  %2306 = vst [vmem:[%s3371_s3 + $0x78] sm:$0xff] %v2536_v30  ;;  %v1684_v37 = vadd.f32 %v3044_v41, %v932_v35  ;;  %v1686_v38 = vadd.f32 %v3046_v42, %v1125_v36  ;;  %v934_v43 = vpop.f32.mrb[18].mxu0  ;;  %v1127_v44 = vpop.f32.mrb[18].mxu1 }
 0x138   :  { %v1811_v45 = vmax.f32 %v1683_v33, 0.0  ;;  %v1813_v46 = vmax.f32 %v1685_v34, 0.0  ;;  %v1687_v47 = vadd.f32 %v3040_v39, %v934_v43  ;;  %v1689_v48 = vadd.f32 %v3042_v40, %v1127_v44  ;;  %v936_v49 = vpop.f32.mrb[19].mxu0  ;;  %v1129_v50 = vpop.f32.mrb[19].mxu1 }
 0x139   :  { %v1812_v51 = vmax.f32 %v1684_v37, 0.0  ;;  %v1814_v52 = vmax.f32 %v1686_v38, 0.0  ;;  %v1688_v53 = vadd.f32 %v3044_v41, %v936_v49  ;;  %v1690_v54 = vadd.f32 %v3046_v42, %v1129_v50 }
 0x13a   :  { %v1815_v55 = vmax.f32 %v1687_v47, 0.0  ;;  %v1817_v56 = vmax.f32 %v1689_v48, 0.0 }
 0x13b   :  { %v2537_v57 = vpack.c.bf16 %v1812_v51, %v1811_v45  ;;  %v2538_v58 = vpack.c.bf16 %v1814_v52, %v1813_v46  ;;  %v1816_v59 = vmax.f32 %v1688_v53, 0.0  ;;  %v1818_v60 = vmax.f32 %v1690_v54, 0.0 }
 0x13d   :  { %2307 = vst [vmem:[%s3371_s3 + $0x80] sm:$0xff] %v2537_v57  ;;  %2308 = vst [vmem:[%s3371_s3 + $0x88] sm:$0xff] %v2538_v58  ;;  %v2539_v61 = vpack.c.bf16 %v1816_v59, %v1815_v55  ;;  %v2540_v62 = vpack.c.bf16 %v1818_v60, %v1817_v56  ;;  %v940_v63 = vpop.f32.mrb[20].mxu0  ;;  %v1133_v0 = vpop.f32.mrb[20].mxu1 }
 0x13e   :  { %v1691_v1 = vadd.f32 %v3040_v39, %v940_v63  ;;  %v1693_v2 = vadd.f32 %v3042_v40, %v1133_v0  ;;  %v942_v3 = vpop.f32.mrb[21].mxu0  ;;  %v1135_v4 = vpop.f32.mrb[21].mxu1 }
 0x13f   :  { %2309 = vst [vmem:[%s3371_s3 + $0x90] sm:$0xff] %v2539_v61  ;;  %2310 = vst [vmem:[%s3371_s3 + $0x98] sm:$0xff] %v2540_v62  ;;  %v1692_v5 = vadd.f32 %v3044_v41, %v942_v3  ;;  %v1694_v6 = vadd.f32 %v3046_v42, %v1135_v4  ;;  %v944_v7 = vpop.f32.mrb[22].mxu0  ;;  %v1137_v8 = vpop.f32.mrb[22].mxu1 }
 0x140   :  { %v1819_v9 = vmax.f32 %v1691_v1, 0.0  ;;  %v1821_v10 = vmax.f32 %v1693_v2, 0.0  ;;  %v1695_v11 = vadd.f32 %v3040_v39, %v944_v7  ;;  %v1697_v12 = vadd.f32 %v3042_v40, %v1137_v8  ;;  %v946_v13 = vpop.f32.mrb[23].mxu0  ;;  %v1139_v14 = vpop.f32.mrb[23].mxu1 }
 0x141   :  { %v1820_v15 = vmax.f32 %v1692_v5, 0.0  ;;  %v1822_v16 = vmax.f32 %v1694_v6, 0.0  ;;  %v1696_v17 = vadd.f32 %v3044_v41, %v946_v13  ;;  %v1698_v18 = vadd.f32 %v3046_v42, %v1139_v14 }
 0x142   :  { %v1823_v19 = vmax.f32 %v1695_v11, 0.0  ;;  %v1825_v20 = vmax.f32 %v1697_v12, 0.0 }
 0x143   :  { %v2541_v21 = vpack.c.bf16 %v1820_v15, %v1819_v9  ;;  %v2542_v22 = vpack.c.bf16 %v1822_v16, %v1821_v10  ;;  %v1824_v23 = vmax.f32 %v1696_v17, 0.0  ;;  %v1826_v24 = vmax.f32 %v1698_v18, 0.0 }
 0x145   :  { %2311 = vst [vmem:[%s3371_s3 + $0xa0] sm:$0xff] %v2541_v21  ;;  %2312 = vst [vmem:[%s3371_s3 + $0xa8] sm:$0xff] %v2542_v22  ;;  %v2543_v25 = vpack.c.bf16 %v1824_v23, %v1823_v19  ;;  %v2544_v26 = vpack.c.bf16 %v1826_v24, %v1825_v20  ;;  %v950_v27 = vpop.f32.mrb[24].mxu0  ;;  %v1143_v28 = vpop.f32.mrb[24].mxu1 }
 0x146   :  { %v1699_v29 = vadd.f32 %v3040_v39, %v950_v27  ;;  %v1701_v30 = vadd.f32 %v3042_v40, %v1143_v28  ;;  %v952_v31 = vpop.f32.mrb[25].mxu0  ;;  %v1145_v32 = vpop.f32.mrb[25].mxu1 }
 0x147   :  { %2313 = vst [vmem:[%s3371_s3 + $0xb0] sm:$0xff] %v2543_v25  ;;  %2314 = vst [vmem:[%s3371_s3 + $0xb8] sm:$0xff] %v2544_v26  ;;  %v1700_v33 = vadd.f32 %v3044_v41, %v952_v31  ;;  %v1702_v34 = vadd.f32 %v3046_v42, %v1145_v32  ;;  %v954_v35 = vpop.f32.mrb[26].mxu0  ;;  %v1147_v36 = vpop.f32.mrb[26].mxu1 }
 0x148   :  { %v1827_v37 = vmax.f32 %v1699_v29, 0.0  ;;  %v1829_v38 = vmax.f32 %v1701_v30, 0.0  ;;  %v1703_v43 = vadd.f32 %v3040_v39, %v954_v35  ;;  %v1705_v44 = vadd.f32 %v3042_v40, %v1147_v36  ;;  %v956_v45 = vpop.f32.mrb[27].mxu0  ;;  %v1149_v46 = vpop.f32.mrb[27].mxu1 }
 0x149   :  { %v1828_v47 = vmax.f32 %v1700_v33, 0.0  ;;  %v1830_v48 = vmax.f32 %v1702_v34, 0.0  ;;  %v1704_v49 = vadd.f32 %v3044_v41, %v956_v45  ;;  %v1706_v50 = vadd.f32 %v3046_v42, %v1149_v46 }
 0x14a   :  { %v1831_v51 = vmax.f32 %v1703_v43, 0.0  ;;  %v1833_v52 = vmax.f32 %v1705_v44, 0.0 }
 0x14b   :  { %v2545_v53 = vpack.c.bf16 %v1828_v47, %v1827_v37  ;;  %v2546_v54 = vpack.c.bf16 %v1830_v48, %v1829_v38  ;;  %v1832_v55 = vmax.f32 %v1704_v49, 0.0  ;;  %v1834_v56 = vmax.f32 %v1706_v50, 0.0 }
 0x14d   :  { %2315 = vst [vmem:[%s3371_s3 + $0xc0] sm:$0xff] %v2545_v53  ;;  %2316 = vst [vmem:[%s3371_s3 + $0xc8] sm:$0xff] %v2546_v54  ;;  %v2547_v57 = vpack.c.bf16 %v1832_v55, %v1831_v51  ;;  %v2548_v58 = vpack.c.bf16 %v1834_v56, %v1833_v52  ;;  %v960_v59 = vpop.f32.mrb[28].mxu0  ;;  %v1153_v60 = vpop.f32.mrb[28].mxu1 }
 0x14e   :  { %v1707_v61 = vadd.f32 %v3040_v39, %v960_v59  ;;  %v1709_v62 = vadd.f32 %v3042_v40, %v1153_v60  ;;  %v962_v63 = vpop.f32.mrb[29].mxu0  ;;  %v1155_v0 = vpop.f32.mrb[29].mxu1 }
 0x14f   :  { %2317 = vst [vmem:[%s3371_s3 + $0xd0] sm:$0xff] %v2547_v57  ;;  %2318 = vst [vmem:[%s3371_s3 + $0xd8] sm:$0xff] %v2548_v58  ;;  %v1708_v1 = vadd.f32 %v3044_v41, %v962_v63  ;;  %v1710_v2 = vadd.f32 %v3046_v42, %v1155_v0  ;;  %v964_v3 = vpop.f32.mrb[30].mxu0  ;;  %v1157_v4 = vpop.f32.mrb[30].mxu1 }
 0x150   :  { %v1835_v5 = vmax.f32 %v1707_v61, 0.0  ;;  %v1837_v6 = vmax.f32 %v1709_v62, 0.0  ;;  %v1711_v7 = vadd.f32 %v3040_v39, %v964_v3  ;;  %v1713_v8 = vadd.f32 %v3042_v40, %v1157_v4  ;;  %v966_v9 = vpop.f32.mrb[31].mxu0  ;;  %v1159_v10 = vpop.f32.mrb[31].mxu1 }
 0x151   :  { %v1836_v11 = vmax.f32 %v1708_v1, 0.0  ;;  %v1838_v12 = vmax.f32 %v1710_v2, 0.0  ;;  %v1712_v13 = vadd.f32 %v3044_v41, %v966_v9  ;;  %v1714_v14 = vadd.f32 %v3046_v42, %v1159_v10 }
 0x152   :  { %v1839_v15 = vmax.f32 %v1711_v7, 0.0  ;;  %v1841_v16 = vmax.f32 %v1713_v8, 0.0 }
 0x153   :  { %v2549_v17 = vpack.c.bf16 %v1836_v11, %v1835_v5  ;;  %v2550_v18 = vpack.c.bf16 %v1838_v12, %v1837_v6  ;;  %v1840_v19 = vmax.f32 %v1712_v13, 0.0  ;;  %v1842_v20 = vmax.f32 %v1714_v14, 0.0 }
 0x155   :  { %2319 = vst [vmem:[%s3371_s3 + $0xe0] sm:$0xff] %v2549_v17  ;;  %2320 = vst [vmem:[%s3371_s3 + $0xe8] sm:$0xff] %v2550_v18  ;;  %v2551_v21 = vpack.c.bf16 %v1840_v19, %v1839_v15  ;;  %v2552_v22 = vpack.c.bf16 %v1842_v20, %v1841_v16  ;;  %v970_v23 = vpop.f32.mrb[32].mxu0  ;;  %v1163_v24 = vpop.f32.mrb[32].mxu1 }
 0x156   :  { %v1715_v25 = vadd.f32 %v3040_v39, %v970_v23  ;;  %v1717_v26 = vadd.f32 %v3042_v40, %v1163_v24  ;;  %v972_v27 = vpop.f32.mrb[33].mxu0  ;;  %v1165_v28 = vpop.f32.mrb[33].mxu1 }
 0x157   :  { %2321 = vst [vmem:[%s3371_s3 + $0xf0] sm:$0xff] %v2551_v21  ;;  %2322 = vst [vmem:[%s3371_s3 + $0xf8] sm:$0xff] %v2552_v22  ;;  %v1716_v29 = vadd.f32 %v3044_v41, %v972_v27  ;;  %v1718_v30 = vadd.f32 %v3046_v42, %v1165_v28  ;;  %v974_v31 = vpop.f32.mrb[34].mxu0  ;;  %v1167_v32 = vpop.f32.mrb[34].mxu1 }
 0x158   :  { %v1843_v33 = vmax.f32 %v1715_v25, 0.0  ;;  %v1845_v34 = vmax.f32 %v1717_v26, 0.0  ;;  %v1719_v35 = vadd.f32 %v3040_v39, %v974_v31  ;;  %v1721_v36 = vadd.f32 %v3042_v40, %v1167_v32  ;;  %v976_v37 = vpop.f32.mrb[35].mxu0  ;;  %v1169_v38 = vpop.f32.mrb[35].mxu1 }
 0x159   :  { %v1844_v43 = vmax.f32 %v1716_v29, 0.0  ;;  %v1846_v44 = vmax.f32 %v1718_v30, 0.0  ;;  %v1720_v45 = vadd.f32 %v3044_v41, %v976_v37  ;;  %v1722_v46 = vadd.f32 %v3046_v42, %v1169_v38 }
 0x15a   :  { %v1847_v47 = vmax.f32 %v1719_v35, 0.0  ;;  %v1849_v48 = vmax.f32 %v1721_v36, 0.0 }
 0x15b   :  { %v2553_v49 = vpack.c.bf16 %v1844_v43, %v1843_v33  ;;  %v2554_v50 = vpack.c.bf16 %v1846_v44, %v1845_v34  ;;  %v1848_v51 = vmax.f32 %v1720_v45, 0.0  ;;  %v1850_v52 = vmax.f32 %v1722_v46, 0.0 }
 0x15d   :  { %2323 = vst [vmem:[%s3371_s3 + $0x100] sm:$0xff] %v2553_v49  ;;  %2324 = vst [vmem:[%s3371_s3 + $0x108] sm:$0xff] %v2554_v50  ;;  %v2555_v53 = vpack.c.bf16 %v1848_v51, %v1847_v47  ;;  %v2556_v54 = vpack.c.bf16 %v1850_v52, %v1849_v48  ;;  %v980_v55 = vpop.f32.mrb[36].mxu0  ;;  %v1173_v56 = vpop.f32.mrb[36].mxu1 }
 0x15e   :  { %v1723_v57 = vadd.f32 %v3040_v39, %v980_v55  ;;  %v1725_v58 = vadd.f32 %v3042_v40, %v1173_v56  ;;  %v982_v59 = vpop.f32.mrb[37].mxu0  ;;  %v1175_v60 = vpop.f32.mrb[37].mxu1 }
 0x15f   :  { %2325 = vst [vmem:[%s3371_s3 + $0x110] sm:$0xff] %v2555_v53  ;;  %2326 = vst [vmem:[%s3371_s3 + $0x118] sm:$0xff] %v2556_v54  ;;  %v1724_v61 = vadd.f32 %v3044_v41, %v982_v59  ;;  %v1726_v62 = vadd.f32 %v3046_v42, %v1175_v60  ;;  %v984_v63 = vpop.f32.mrb[38].mxu0  ;;  %v1177_v0 = vpop.f32.mrb[38].mxu1 }
 0x160   :  { %v1851_v1 = vmax.f32 %v1723_v57, 0.0  ;;  %v1853_v2 = vmax.f32 %v1725_v58, 0.0  ;;  %v1727_v3 = vadd.f32 %v3040_v39, %v984_v63  ;;  %v1729_v4 = vadd.f32 %v3042_v40, %v1177_v0  ;;  %v986_v5 = vpop.f32.mrb[39].mxu0  ;;  %v1179_v6 = vpop.f32.mrb[39].mxu1 }
 0x161   :  { %v1852_v7 = vmax.f32 %v1724_v61, 0.0  ;;  %v1854_v8 = vmax.f32 %v1726_v62, 0.0  ;;  %v1728_v9 = vadd.f32 %v3044_v41, %v986_v5  ;;  %v1730_v10 = vadd.f32 %v3046_v42, %v1179_v6 }
 0x162   :  { %v1855_v11 = vmax.f32 %v1727_v3, 0.0  ;;  %v1857_v12 = vmax.f32 %v1729_v4, 0.0 }
 0x163   :  { %v2557_v13 = vpack.c.bf16 %v1852_v7, %v1851_v1  ;;  %v2558_v14 = vpack.c.bf16 %v1854_v8, %v1853_v2  ;;  %v1856_v15 = vmax.f32 %v1728_v9, 0.0  ;;  %v1858_v16 = vmax.f32 %v1730_v10, 0.0 }
 0x165   :  { %2327 = vst [vmem:[%s3371_s3 + $0x120] sm:$0xff] %v2557_v13  ;;  %2328 = vst [vmem:[%s3371_s3 + $0x128] sm:$0xff] %v2558_v14  ;;  %v2559_v17 = vpack.c.bf16 %v1856_v15, %v1855_v11  ;;  %v2560_v18 = vpack.c.bf16 %v1858_v16, %v1857_v12  ;;  %v990_v19 = vpop.f32.mrb[40].mxu0  ;;  %v1183_v20 = vpop.f32.mrb[40].mxu1 }
 0x166   :  { %v1731_v21 = vadd.f32 %v3040_v39, %v990_v19  ;;  %v1733_v22 = vadd.f32 %v3042_v40, %v1183_v20  ;;  %v992_v23 = vpop.f32.mrb[41].mxu0  ;;  %v1185_v24 = vpop.f32.mrb[41].mxu1 }
 0x167   :  { %2329 = vst [vmem:[%s3371_s3 + $0x130] sm:$0xff] %v2559_v17  ;;  %2330 = vst [vmem:[%s3371_s3 + $0x138] sm:$0xff] %v2560_v18  ;;  %v1732_v25 = vadd.f32 %v3044_v41, %v992_v23  ;;  %v1734_v26 = vadd.f32 %v3046_v42, %v1185_v24  ;;  %v994_v27 = vpop.f32.mrb[42].mxu0  ;;  %v1187_v28 = vpop.f32.mrb[42].mxu1 }
 0x168   :  { %v1859_v29 = vmax.f32 %v1731_v21, 0.0  ;;  %v1861_v30 = vmax.f32 %v1733_v22, 0.0  ;;  %v1735_v31 = vadd.f32 %v3040_v39, %v994_v27  ;;  %v1737_v32 = vadd.f32 %v3042_v40, %v1187_v28  ;;  %v996_v33 = vpop.f32.mrb[43].mxu0  ;;  %v1189_v34 = vpop.f32.mrb[43].mxu1 }
 0x169   :  { %v1860_v35 = vmax.f32 %v1732_v25, 0.0  ;;  %v1862_v36 = vmax.f32 %v1734_v26, 0.0  ;;  %v1736_v37 = vadd.f32 %v3044_v41, %v996_v33  ;;  %v1738_v38 = vadd.f32 %v3046_v42, %v1189_v34 }
 0x16a   :  { %v1863_v43 = vmax.f32 %v1735_v31, 0.0  ;;  %v1865_v44 = vmax.f32 %v1737_v32, 0.0 }
 0x16b   :  { %v2561_v45 = vpack.c.bf16 %v1860_v35, %v1859_v29  ;;  %v2562_v46 = vpack.c.bf16 %v1862_v36, %v1861_v30  ;;  %v1864_v47 = vmax.f32 %v1736_v37, 0.0  ;;  %v1866_v48 = vmax.f32 %v1738_v38, 0.0 }
 0x16d   :  { %2331 = vst [vmem:[%s3371_s3 + $0x140] sm:$0xff] %v2561_v45  ;;  %2332 = vst [vmem:[%s3371_s3 + $0x148] sm:$0xff] %v2562_v46  ;;  %v2563_v49 = vpack.c.bf16 %v1864_v47, %v1863_v43  ;;  %v2564_v50 = vpack.c.bf16 %v1866_v48, %v1865_v44  ;;  %v1000_v51 = vpop.f32.mrb[44].mxu0  ;;  %v1193_v52 = vpop.f32.mrb[44].mxu1 }
 0x16e   :  { %v1739_v53 = vadd.f32 %v3040_v39, %v1000_v51  ;;  %v1741_v54 = vadd.f32 %v3042_v40, %v1193_v52  ;;  %v1002_v55 = vpop.f32.mrb[45].mxu0  ;;  %v1195_v56 = vpop.f32.mrb[45].mxu1 }
 0x16f   :  { %2333 = vst [vmem:[%s3371_s3 + $0x150] sm:$0xff] %v2563_v49  ;;  %2334 = vst [vmem:[%s3371_s3 + $0x158] sm:$0xff] %v2564_v50  ;;  %v1740_v57 = vadd.f32 %v3044_v41, %v1002_v55  ;;  %v1742_v58 = vadd.f32 %v3046_v42, %v1195_v56  ;;  %v1004_v59 = vpop.f32.mrb[46].mxu0  ;;  %v1197_v60 = vpop.f32.mrb[46].mxu1 }
 0x170   :  { %v1867_v61 = vmax.f32 %v1739_v53, 0.0  ;;  %v1869_v62 = vmax.f32 %v1741_v54, 0.0  ;;  %v1743_v63 = vadd.f32 %v3040_v39, %v1004_v59  ;;  %v1745_v0 = vadd.f32 %v3042_v40, %v1197_v60  ;;  %v1006_v1 = vpop.f32.mrb[47].mxu0  ;;  %v1199_v2 = vpop.f32.mrb[47].mxu1 }
 0x171   :  { %v1868_v3 = vmax.f32 %v1740_v57, 0.0  ;;  %v1870_v4 = vmax.f32 %v1742_v58, 0.0  ;;  %v1744_v5 = vadd.f32 %v3044_v41, %v1006_v1  ;;  %v1746_v6 = vadd.f32 %v3046_v42, %v1199_v2 }
 0x172   :  { %v1871_v7 = vmax.f32 %v1743_v63, 0.0  ;;  %v1873_v8 = vmax.f32 %v1745_v0, 0.0 }
 0x173   :  { %v2565_v9 = vpack.c.bf16 %v1868_v3, %v1867_v61  ;;  %v2566_v10 = vpack.c.bf16 %v1870_v4, %v1869_v62  ;;  %v1872_v11 = vmax.f32 %v1744_v5, 0.0  ;;  %v1874_v12 = vmax.f32 %v1746_v6, 0.0 }
 0x175   :  { %2335 = vst [vmem:[%s3371_s3 + $0x160] sm:$0xff] %v2565_v9  ;;  %2336 = vst [vmem:[%s3371_s3 + $0x168] sm:$0xff] %v2566_v10  ;;  %v2567_v13 = vpack.c.bf16 %v1872_v11, %v1871_v7  ;;  %v2568_v14 = vpack.c.bf16 %v1874_v12, %v1873_v8  ;;  %v1010_v15 = vpop.f32.mrb[48].mxu0  ;;  %v1203_v16 = vpop.f32.mrb[48].mxu1 }
 0x176   :  { %v1747_v17 = vadd.f32 %v3040_v39, %v1010_v15  ;;  %v1749_v18 = vadd.f32 %v3042_v40, %v1203_v16  ;;  %v1012_v19 = vpop.f32.mrb[49].mxu0  ;;  %v1205_v20 = vpop.f32.mrb[49].mxu1 }
 0x177   :  { %2337 = vst [vmem:[%s3371_s3 + $0x170] sm:$0xff] %v2567_v13  ;;  %2338 = vst [vmem:[%s3371_s3 + $0x178] sm:$0xff] %v2568_v14  ;;  %v1748_v21 = vadd.f32 %v3044_v41, %v1012_v19  ;;  %v1750_v22 = vadd.f32 %v3046_v42, %v1205_v20  ;;  %v1014_v23 = vpop.f32.mrb[50].mxu0  ;;  %v1207_v24 = vpop.f32.mrb[50].mxu1 }
 0x178   :  { %v1875_v25 = vmax.f32 %v1747_v17, 0.0  ;;  %v1877_v26 = vmax.f32 %v1749_v18, 0.0  ;;  %v1751_v27 = vadd.f32 %v3040_v39, %v1014_v23  ;;  %v1753_v28 = vadd.f32 %v3042_v40, %v1207_v24  ;;  %v1016_v29 = vpop.f32.mrb[51].mxu0  ;;  %v1209_v30 = vpop.f32.mrb[51].mxu1 }
 0x179   :  { %v1876_v31 = vmax.f32 %v1748_v21, 0.0  ;;  %v1878_v32 = vmax.f32 %v1750_v22, 0.0  ;;  %v1752_v33 = vadd.f32 %v3044_v41, %v1016_v29  ;;  %v1754_v34 = vadd.f32 %v3046_v42, %v1209_v30 }
 0x17a   :  { %v1879_v35 = vmax.f32 %v1751_v27, 0.0  ;;  %v1881_v36 = vmax.f32 %v1753_v28, 0.0 }
 0x17b   :  { %v2569_v37 = vpack.c.bf16 %v1876_v31, %v1875_v25  ;;  %v2570_v38 = vpack.c.bf16 %v1878_v32, %v1877_v26  ;;  %v1880_v43 = vmax.f32 %v1752_v33, 0.0  ;;  %v1882_v44 = vmax.f32 %v1754_v34, 0.0 }
 0x17d   :  { %2339 = vst [vmem:[%s3371_s3 + $0x180] sm:$0xff] %v2569_v37  ;;  %2340 = vst [vmem:[%s3371_s3 + $0x188] sm:$0xff] %v2570_v38  ;;  %v2571_v45 = vpack.c.bf16 %v1880_v43, %v1879_v35  ;;  %v2572_v46 = vpack.c.bf16 %v1882_v44, %v1881_v36  ;;  %v1020_v47 = vpop.f32.mrb[52].mxu0  ;;  %v1213_v48 = vpop.f32.mrb[52].mxu1 }
 0x17e   :  { %v1755_v49 = vadd.f32 %v3040_v39, %v1020_v47  ;;  %v1757_v50 = vadd.f32 %v3042_v40, %v1213_v48  ;;  %v1022_v51 = vpop.f32.mrb[53].mxu0  ;;  %v1215_v52 = vpop.f32.mrb[53].mxu1 }
 0x17f   :  { %2341 = vst [vmem:[%s3371_s3 + $0x190] sm:$0xff] %v2571_v45  ;;  %2342 = vst [vmem:[%s3371_s3 + $0x198] sm:$0xff] %v2572_v46  ;;  %v1756_v53 = vadd.f32 %v3044_v41, %v1022_v51  ;;  %v1758_v54 = vadd.f32 %v3046_v42, %v1215_v52  ;;  %v1024_v55 = vpop.f32.mrb[54].mxu0  ;;  %v1217_v56 = vpop.f32.mrb[54].mxu1 }
 0x180   :  { %v1883_v57 = vmax.f32 %v1755_v49, 0.0  ;;  %v1885_v58 = vmax.f32 %v1757_v50, 0.0  ;;  %v1759_v59 = vadd.f32 %v3040_v39, %v1024_v55  ;;  %v1761_v60 = vadd.f32 %v3042_v40, %v1217_v56  ;;  %v1026_v61 = vpop.f32.mrb[55].mxu0  ;;  %v1219_v62 = vpop.f32.mrb[55].mxu1 }
 0x181   :  { %v1884_v63 = vmax.f32 %v1756_v53, 0.0  ;;  %v1886_v0 = vmax.f32 %v1758_v54, 0.0  ;;  %v1760_v1 = vadd.f32 %v3044_v41, %v1026_v61  ;;  %v1762_v2 = vadd.f32 %v3046_v42, %v1219_v62 }
 0x182   :  { %v1887_v3 = vmax.f32 %v1759_v59, 0.0  ;;  %v1889_v4 = vmax.f32 %v1761_v60, 0.0 }
 0x183   :  { %v2573_v5 = vpack.c.bf16 %v1884_v63, %v1883_v57  ;;  %v2574_v6 = vpack.c.bf16 %v1886_v0, %v1885_v58  ;;  %v1888_v7 = vmax.f32 %v1760_v1, 0.0  ;;  %v1890_v8 = vmax.f32 %v1762_v2, 0.0 }
 0x185   :  { %2343 = vst [vmem:[%s3371_s3 + $0x1a0] sm:$0xff] %v2573_v5  ;;  %2344 = vst [vmem:[%s3371_s3 + $0x1a8] sm:$0xff] %v2574_v6  ;;  %v2575_v9 = vpack.c.bf16 %v1888_v7, %v1887_v3  ;;  %v2576_v10 = vpack.c.bf16 %v1890_v8, %v1889_v4  ;;  %v1030_v11 = vpop.f32.mrb[56].mxu0  ;;  %v1223_v12 = vpop.f32.mrb[56].mxu1 }
 0x186   :  { %v1763_v13 = vadd.f32 %v3040_v39, %v1030_v11  ;;  %v1765_v14 = vadd.f32 %v3042_v40, %v1223_v12  ;;  %v1032_v15 = vpop.f32.mrb[57].mxu0  ;;  %v1225_v16 = vpop.f32.mrb[57].mxu1 }
 0x187   :  { %2345 = vst [vmem:[%s3371_s3 + $0x1b0] sm:$0xff] %v2575_v9  ;;  %2346 = vst [vmem:[%s3371_s3 + $0x1b8] sm:$0xff] %v2576_v10  ;;  %v1764_v17 = vadd.f32 %v3044_v41, %v1032_v15  ;;  %v1766_v18 = vadd.f32 %v3046_v42, %v1225_v16  ;;  %v1034_v19 = vpop.f32.mrb[58].mxu0  ;;  %v1227_v20 = vpop.f32.mrb[58].mxu1 }
 0x188   :  { %v1891_v21 = vmax.f32 %v1763_v13, 0.0  ;;  %v1893_v22 = vmax.f32 %v1765_v14, 0.0  ;;  %v1767_v23 = vadd.f32 %v3040_v39, %v1034_v19  ;;  %v1769_v24 = vadd.f32 %v3042_v40, %v1227_v20  ;;  %v1036_v25 = vpop.f32.mrb[59].mxu0  ;;  %v1229_v26 = vpop.f32.mrb[59].mxu1 }
 0x189   :  { %v1892_v27 = vmax.f32 %v1764_v17, 0.0  ;;  %v1894_v28 = vmax.f32 %v1766_v18, 0.0  ;;  %v1768_v29 = vadd.f32 %v3044_v41, %v1036_v25  ;;  %v1770_v30 = vadd.f32 %v3046_v42, %v1229_v26 }
 0x18a   :  { %v1895_v31 = vmax.f32 %v1767_v23, 0.0  ;;  %v1897_v32 = vmax.f32 %v1769_v24, 0.0 }
 0x18b   :  { %v2577_v33 = vpack.c.bf16 %v1892_v27, %v1891_v21  ;;  %v2578_v34 = vpack.c.bf16 %v1894_v28, %v1893_v22  ;;  %v1896_v35 = vmax.f32 %v1768_v29, 0.0  ;;  %v1898_v36 = vmax.f32 %v1770_v30, 0.0 }
 0x18d   :  { %2347 = vst [vmem:[%s3371_s3 + $0x1c0] sm:$0xff] %v2577_v33  ;;  %2348 = vst [vmem:[%s3371_s3 + $0x1c8] sm:$0xff] %v2578_v34  ;;  %v2579_v37 = vpack.c.bf16 %v1896_v35, %v1895_v31  ;;  %v2580_v38 = vpack.c.bf16 %v1898_v36, %v1897_v32  ;;  %v1040_v43 = vpop.f32.mrb[60].mxu0  ;;  %v1233_v44 = vpop.f32.mrb[60].mxu1 }
 0x18e   :  { %v1771_v45 = vadd.f32 %v3040_v39, %v1040_v43  ;;  %v1773_v46 = vadd.f32 %v3042_v40, %v1233_v44  ;;  %v1042_v47 = vpop.f32.mrb[61].mxu0  ;;  %v1235_v48 = vpop.f32.mrb[61].mxu1 }
 0x18f   :  { %2349 = vst [vmem:[%s3371_s3 + $0x1d0] sm:$0xff] %v2579_v37  ;;  %2350 = vst [vmem:[%s3371_s3 + $0x1d8] sm:$0xff] %v2580_v38  ;;  %v1772_v49 = vadd.f32 %v3044_v41, %v1042_v47  ;;  %v1774_v50 = vadd.f32 %v3046_v42, %v1235_v48  ;;  %v1044_v51 = vpop.f32.mrb[62].mxu0  ;;  %v1237_v52 = vpop.f32.mrb[62].mxu1 }
 0x190   :  { %v1899_v53 = vmax.f32 %v1771_v45, 0.0  ;;  %v1901_v54 = vmax.f32 %v1773_v46, 0.0  ;;  %v1775_v55 = vadd.f32 %v3040_v39, %v1044_v51  ;;  %v1777_v56 = vadd.f32 %v3042_v40, %v1237_v52  ;;  %v1046_v57 = vpop.f32.mrb[63].mxu0  ;;  %v1239_v58 = vpop.f32.mrb[63].mxu1 }
 0x191   :  { %v1900_v59 = vmax.f32 %v1772_v49, 0.0  ;;  %v1902_v60 = vmax.f32 %v1774_v50, 0.0  ;;  %v1776_v61 = vadd.f32 %v3044_v41, %v1046_v57  ;;  %v1778_v62 = vadd.f32 %v3046_v42, %v1239_v58 }
 0x192   :  { %v1903_v63 = vmax.f32 %v1775_v55, 0.0  ;;  %v1905_v0 = vmax.f32 %v1777_v56, 0.0 }
 0x193   :  { %v2581_v1 = vpack.c.bf16 %v1900_v59, %v1899_v53  ;;  %v2582_v2 = vpack.c.bf16 %v1902_v60, %v1901_v54  ;;  %v1904_v3 = vmax.f32 %v1776_v61, 0.0  ;;  %v1906_v4 = vmax.f32 %v1778_v62, 0.0 }
 0x195   :  { %2351 = vst [vmem:[%s3371_s3 + $0x1e0] sm:$0xff] %v2581_v1  ;;  %2352 = vst [vmem:[%s3371_s3 + $0x1e8] sm:$0xff] %v2582_v2  ;;  %v2583_v39 = vpack.c.bf16 %v1904_v3, %v1903_v63  ;;  %v2584_v40 = vpack.c.bf16 %v1906_v4, %v1905_v0 }
 0x197   :  { %2353 = vst [vmem:[%s3371_s3 + $0x1f0] sm:$0xff] %v2583_v39  ;;  %2354 = vst [vmem:[%s3371_s3 + $0x1f8] sm:$0xff] %v2584_v40 }

// kernel: net_forward.14
= control target key start
LH: loop header
LB: loop body
LE: loop exit
PB: predicated region body
PF: predicated region fallthrough
CT: control target
= control target key end

     0   :  { %s3779_s1 = inlined_call_operand.vmem [shape: bf16[512,384], index: 1, kind: input, shape index: {}]   ;;  %s3780_s0 = inlined_call_operand.vmem [shape: bf16[256,512], index: 0, kind: input, shape index: {}]   ;;  %s3781_s2 = inlined_call_operand.vmem [shape: bf16[256,384], index: 2, kind: output, shape index: {}]  }
   0x1   :  { %v2708_v0 = vld [vmem:[%s3779_s1 + $0x4] ss:$12 sps:$4 sm:$0xff]   ;;  %v2710_v1 = vld [vmem:[%s3779_s1 + $0xc8] ss:$12 sps:$4 sm:$0xff]   ;;  %v2711_v2 = vld [vmem:[%s3779_s1] ss:$12 sps:$4 sm:$0xff]  }
   0x2   :  { %1036 = vmatprep.subr.bf16.mxu0 %v2708_v0  ;;  %2420 = vmatprep.subr.bf16.mxu1 %v2710_v1  ;;  %v2712_v3 = vld [vmem:[%s3779_s1 + $0x8] ss:$12 sps:$4 sm:$0xff]   ;;  %v2715_v5 = vld [vmem:[%s3779_s1 + $0xe0] ss:$12 sps:$4 sm:$0xff]   ;;  %v2716_v6 = vld [vmem:[%s3779_s1 + $0x18] ss:$12 sps:$4 sm:$0xff]  }
   0x3   :  { %1037 = vmatpush1.bf16.msra.mxu0 %v2711_v2  ;;  %v2713_v4 = vld [vmem:[%s3779_s1 + $0x1c] ss:$12 sps:$4 sm:$0xff]   ;;  %2421 = vmatpush3.bf16.msra.mxu1 %v2712_v3  ;;  %v2717_v7 = vld [vmem:[%s3779_s1 + $0x20] ss:$12 sps:$4 sm:$0xff]   ;;  %v2720_v9 = vld [vmem:[%s3779_s1 + $0xf8] ss:$12 sps:$4 sm:$0xff]  }
   0x4   :  { %1038 = vmatprep.subr.bf16.mxu0 %v2713_v4  ;;  %2422 = vmatprep.subr.bf16.mxu1 %v2715_v5  ;;  %v2718_v8 = vld [vmem:[%s3779_s1 + $0x34] ss:$12 sps:$4 sm:$0xff]   ;;  %v2721_v10 = vld [vmem:[%s3779_s1 + $0x30] ss:$12 sps:$4 sm:$0xff]   ;;  %v2722_v11 = vld [vmem:[%s3779_s1 + $0x38] ss:$12 sps:$4 sm:$0xff]  }
   0x5   :  { %v2723_v12 = vld [vmem:[%s3779_s1 + $0x4c] ss:$12 sps:$4 sm:$0xff]   ;;  %v2725_v13 = vld [vmem:[%s3779_s1 + $0x110] ss:$12 sps:$4 sm:$0xff]   ;;  %v2726_v14 = vld [vmem:[%s3779_s1 + $0x48] ss:$12 sps:$4 sm:$0xff]  }
   0x6   :  { %v2727_v15 = vld [vmem:[%s3779_s1 + $0x50] ss:$12 sps:$4 sm:$0xff]   ;;  %v2730_v17 = vld [vmem:[%s3779_s1 + $0x128] ss:$12 sps:$4 sm:$0xff]   ;;  %v2731_v18 = vld [vmem:[%s3779_s1 + $0x60] ss:$12 sps:$4 sm:$0xff]  }
   0x7   :  { %1039 = vmatpush1.bf16.msra.mxu0 %v2716_v6  ;;  %2423 = vmatpush3.bf16.msra.mxu1 %v2717_v7  ;;  %v2728_v16 = vld [vmem:[%s3779_s1 + $0x64] ss:$12 sps:$4 sm:$0xff]   ;;  %v2732_v19 = vld [vmem:[%s3779_s1 + $0x68] ss:$12 sps:$4 sm:$0xff]   ;;  %v2735_v21 = vld [vmem:[%s3779_s1 + $0x140] ss:$12 sps:$4 sm:$0xff]  }
   0x8   :  { %1040 = vmatprep.subr.bf16.mxu0 %v2718_v8  ;;  %2424 = vmatprep.subr.bf16.mxu1 %v2720_v9  ;;  %v2733_v20 = vld [vmem:[%s3779_s1 + $0x7c] ss:$12 sps:$4 sm:$0xff]   ;;  %v2736_v22 = vld [vmem:[%s3779_s1 + $0x78] ss:$12 sps:$4 sm:$0xff]   ;;  %v2737_v23 = vld [vmem:[%s3779_s1 + $0x80] ss:$12 sps:$4 sm:$0xff]  }
   0x9   :  { %v2738_v24 = vld [vmem:[%s3779_s1 + $0x94] ss:$12 sps:$4 sm:$0xff]   ;;  %v2740_v25 = vld [vmem:[%s3779_s1 + $0x158] ss:$12 sps:$4 sm:$0xff]   ;;  %v2741_v26 = vld [vmem:[%s3779_s1 + $0x90] ss:$12 sps:$4 sm:$0xff]  }
   0xa   :  { %v2742_v27 = vld [vmem:[%s3779_s1 + $0x98] ss:$12 sps:$4 sm:$0xff]   ;;  %v2745_v29 = vld [vmem:[%s3779_s1 + $0x170] ss:$12 sps:$4 sm:$0xff]   ;;  %v2746_v30 = vld [vmem:[%s3779_s1 + $0xa8] ss:$12 sps:$4 sm:$0xff]  }
   0xb   :  { %1041 = vmatpush1.bf16.msra.mxu0 %v2721_v10  ;;  %2425 = vmatpush3.bf16.msra.mxu1 %v2722_v11  ;;  %v2743_v28 = vld [vmem:[%s3779_s1 + $0xac] ss:$12 sps:$4 sm:$0xff]   ;;  %v2750_v31 = vld [vmem:[%s3780_s0 + $0x4] ss:$16 sps:$4 sm:$0xff]   ;;  %v2747_v32 = vld [vmem:[%s3779_s1 + $0xb0] ss:$12 sps:$4 sm:$0xff]  }
   0xc   :  { %1042 = vmatprep.subr.bf16.mxu0 %v2723_v12  ;;  %2426 = vmatprep.subr.bf16.mxu1 %v2725_v13  ;;  %v2751_v33 = vld [vmem:[%s3779_s1 + $0xc4] ss:$12 sps:$4 sm:$0xff]   ;;  %v2753_v35 = vld [vmem:[%s3779_s1 + $0xc0] ss:$12 sps:$4 sm:$0xff]   ;;  %v2754_v36 = vld [vmem:[%s3779_s1 + $0xdc] ss:$12 sps:$4 sm:$0xff]  }
   0xd   :  { %1454 = vmatprep.mubr.bf16.mxu1 %v2750_v31  ;;  %v3052_v34 = vld [vmem:[%s3780_s0] ss:$16 sps:$4 sm:$0xff]   ;;  %1068 = vmatprep.mubr.bf16.mxu0 %v2750_v31  ;;  %v3063_v37 = vld [vmem:[%s3780_s0 + $0x24] ss:$16 sps:$4 sm:$0xff]   ;;  %v2763_v42 = vld [vmem:[%s3779_s1 + $0x10c] ss:$12 sps:$4 sm:$0xff]  }
   0xe   :  { %v2756_v38 = vld [vmem:[%s3779_s1 + $0xd8] ss:$12 sps:$4 sm:$0xff]   ;;  %v2759_v39 = vld [vmem:[%s3779_s1 + $0xf4] ss:$12 sps:$4 sm:$0xff]   ;;  %v2762_v41 = vld [vmem:[%s3779_s1 + $0xf0] ss:$12 sps:$4 sm:$0xff]  }
   0xf   :  { %1043 = vmatpush1.bf16.msra.mxu0 %v2726_v14  ;;  %2427 = vmatpush3.bf16.msra.mxu1 %v2727_v15  ;;  %v3076_v40 = vld [vmem:[%s3780_s0 + $0x20] ss:$16 sps:$4 sm:$0xff]   ;;  %v3087_v43 = vld [vmem:[%s3780_s0 + $0x44] ss:$16 sps:$4 sm:$0xff]   ;;  %v2772_v50 = vld [vmem:[%s3779_s1 + $0x13c] ss:$12 sps:$4 sm:$0xff]  }
  0x10   :  { %1044 = vmatprep.subr.bf16.mxu0 %v2728_v16  ;;  %2428 = vmatprep.subr.bf16.mxu1 %v2730_v17  ;;  %v2765_v44 = vld [vmem:[%s3779_s1 + $0x108] ss:$12 sps:$4 sm:$0xff]   ;;  %v2768_v47 = vld [vmem:[%s3779_s1 + $0x124] ss:$12 sps:$4 sm:$0xff]   ;;  %v2771_v49 = vld [vmem:[%s3779_s1 + $0x120] ss:$12 sps:$4 sm:$0xff]  }
  0x11   :  { %v2783_v45 = vld [vmem:[%s3779_s1 + $0x248] ss:$12 sps:$4 sm:$0xff]   ;;  %v3106_v48 = vld [vmem:[%s3780_s0 + $0x40] ss:$16 sps:$4 sm:$0xff]   ;;  %v2774_v54 = vld [vmem:[%s3779_s1 + $0x138] ss:$12 sps:$4 sm:$0xff]  }
  0x12   :  { %v2785_v46 = vld [vmem:[%s3779_s1 + $0x188] ss:$12 sps:$4 sm:$0xff]   ;;  %v2798_v52 = vld [vmem:[%s3779_s1 + $0x260] ss:$12 sps:$4 sm:$0xff]   ;;  %v2780_v57 = vld [vmem:[%s3779_s1 + $0x150] ss:$12 sps:$4 sm:$0xff]  }
  0x13   :  { %1045 = vmatpush1.bf16.msra.mxu0 %v2731_v18  ;;  %2429 = vmatpush3.bf16.msra.mxu1 %v2732_v19  ;;  %v3117_v51 = vld [vmem:[%s3780_s0 + $0x64] ss:$16 sps:$4 sm:$0xff]   ;;  %v2799_v53 = vld [vmem:[%s3779_s1 + $0x1a0] ss:$12 sps:$4 sm:$0xff]   ;;  %v2796_v3 = vld [vmem:[%s3779_s1 + $0x19c] ss:$12 sps:$4 sm:$0xff]  }
  0x14   :  { %1046 = vmatprep.subr.bf16.mxu0 %v2733_v20  ;;  %2430 = vmatprep.subr.bf16.mxu1 %v2735_v21  ;;  %v2777_v55 = vld [vmem:[%s3779_s1 + $0x154] ss:$12 sps:$4 sm:$0xff]   ;;  %v2781_v58 = vld [vmem:[%s3779_s1 + $0x16c] ss:$12 sps:$4 sm:$0xff]   ;;  %v2790_v63 = vld [vmem:[%s3779_s1 + $0x184] ss:$12 sps:$4 sm:$0xff]  }
  0x15   :  { %v3136_v56 = vld [vmem:[%s3780_s0 + $0x60] ss:$16 sps:$4 sm:$0xff]   ;;  %v3147_v59 = vld [vmem:[%s3780_s0 + $0x84] ss:$16 sps:$4 sm:$0xff]   ;;  %v2810_v13 = vld [vmem:[%s3779_s1 + $0x1cc] ss:$12 sps:$4 sm:$0xff]  }
  0x16   :  { %v2812_v60 = vld [vmem:[%s3779_s1 + $0x278] ss:$12 sps:$4 sm:$0xff]   ;;  %v2784_v62 = vld [vmem:[%s3779_s1 + $0x168] ss:$12 sps:$4 sm:$0xff]   ;;  %v2788_v0 = vld [vmem:[%s3779_s1 + $0x180] ss:$12 sps:$4 sm:$0xff]  }
  0x17   :  { %1047 = vmatpush1.bf16.msra.mxu0 %v2736_v22  ;;  %2431 = vmatpush3.bf16.msra.mxu1 %v2737_v23  ;;  %v2813_v61 = vld [vmem:[%s3779_s1 + $0x1b8] ss:$12 sps:$4 sm:$0xff]   ;;  %v3169_v1 = vld [vmem:[%s3780_s0 + $0x80] ss:$16 sps:$4 sm:$0xff]   ;;  %v2840_v11 = vld [vmem:[%s3779_s1 + $0x2a8] ss:$12 sps:$4 sm:$0xff]  }
  0x18   :  { %1048 = vmatprep.subr.bf16.mxu0 %v2738_v24  ;;  %2432 = vmatprep.subr.bf16.mxu1 %v2740_v25  ;;  %v3174_v2 = vld [vmem:[%s3780_s0 + $0xa4] ss:$16 sps:$4 sm:$0xff]   ;;  %v2826_v4 = vld [vmem:[%s3779_s1 + $0x290] ss:$12 sps:$4 sm:$0xff]   ;;  %v2816_v18 = vld [vmem:[%s3779_s1 + $0x1e0] ss:$12 sps:$4 sm:$0xff]  }
  0x19   :  { %v2827_v5 = vld [vmem:[%s3779_s1 + $0x1d0] ss:$12 sps:$4 sm:$0xff]   ;;  %v2794_v6 = vld [vmem:[%s3779_s1 + $0x198] ss:$12 sps:$4 sm:$0xff]   ;;  %v2804_v7 = vld [vmem:[%s3779_s1 + $0x1b4] ss:$12 sps:$4 sm:$0xff]  }
  0x1a   :  { %v3198_v8 = vld [vmem:[%s3780_s0 + $0xa0] ss:$16 sps:$4 sm:$0xff]   ;;  %v3203_v9 = vld [vmem:[%s3780_s0 + $0xc4] ss:$16 sps:$4 sm:$0xff]   ;;  %v2824_v21 = vld [vmem:[%s3779_s1 + $0x1fc] ss:$12 sps:$4 sm:$0xff]  }
  0x1b   :  { %1049 = vmatpush1.bf16.msra.mxu0 %v2741_v26  ;;  %2433 = vmatpush3.bf16.msra.mxu1 %v2742_v27  ;;  %v2802_v10 = vld [vmem:[%s3779_s1 + $0x1b0] ss:$12 sps:$4 sm:$0xff]   ;;  %v2841_v12 = vld [vmem:[%s3779_s1 + $0x1e8] ss:$12 sps:$4 sm:$0xff]   ;;  %v2854_v19 = vld [vmem:[%s3779_s1 + $0x2c0] ss:$12 sps:$4 sm:$0xff]  }
  0x1c   :  { %1050 = vmatprep.subr.bf16.mxu0 %v2743_v28  ;;  %2434 = vmatprep.subr.bf16.mxu1 %v2745_v29  ;;  %v2808_v14 = vld [vmem:[%s3779_s1 + $0x1c8] ss:$12 sps:$4 sm:$0xff]   ;;  %v3227_v15 = vld [vmem:[%s3780_s0 + $0xc0] ss:$16 sps:$4 sm:$0xff]   ;;  %v2822_v22 = vld [vmem:[%s3779_s1 + $0x1f8] ss:$12 sps:$4 sm:$0xff]  }
  0x1d   :  { %v2818_v16 = vld [vmem:[%s3779_s1 + $0x1e4] ss:$12 sps:$4 sm:$0xff]   ;;  %v2855_v20 = vld [vmem:[%s3779_s1 + $0x200] ss:$12 sps:$4 sm:$0xff]  }
  0x1e   :  { %v3235_v17 = vld [vmem:[%s3780_s0 + $0xe4] ss:$16 sps:$4 sm:$0xff]   ;;  %v3259_v23 = vld [vmem:[%s3780_s0 + $0xe0] ss:$16 sps:$4 sm:$0xff]   ;;  %v2838_v28 = vld [vmem:[%s3779_s1 + $0x22c] ss:$12 sps:$4 sm:$0xff]  }
  0x1f   :  { %1051 = vmatpush1.bf16.msra.mxu0 %v2746_v30  ;;  %2435 = vmatpush3.bf16.msra.mxu1 %v2747_v32  ;;  %v2832_v24 = vld [vmem:[%s3779_s1 + $0x214] ss:$12 sps:$4 sm:$0xff]   ;;  %v2830_v26 = vld [vmem:[%s3779_s1 + $0x210] ss:$12 sps:$4 sm:$0xff]   ;;  %v2868_v27 = vld [vmem:[%s3779_s1 + $0x2d8] ss:$12 sps:$4 sm:$0xff]  }
  0x20   :  { %1052 = vmatprep.subr.bf16.mxu0 %v2751_v33  ;;  %2532 = vmatprep.subr.bf16.mxu1 %v2783_v45  ;;  %v3267_v25 = vld [vmem:[%s3780_s0 + $0x104] ss:$16 sps:$4 sm:$0xff]   ;;  %v2870_v30 = vld [vmem:[%s3779_s1 + $0x2f0] ss:$12 sps:$4 sm:$0xff]  }
  0x21   :  { %v2869_v29 = vld [vmem:[%s3779_s1 + $0x218] ss:$12 sps:$4 sm:$0xff]   ;;  %v2871_v31 = vld [vmem:[%s3779_s1 + $0x230] ss:$12 sps:$4 sm:$0xff]   ;;  %v2836_v32 = vld [vmem:[%s3779_s1 + $0x228] ss:$12 sps:$4 sm:$0xff]  }
  0x22   :  { %1455 = vmatmul.mubr.bf16.vlgmr.msra.gmra.mrb[0].mxu1 %v3052_v34  ;;  %v2846_v33 = vld [vmem:[%s3779_s1 + $0x244] ss:$12 sps:$4 sm:$0xff]  }
  0x23   :  { %1053 = vmatpush1.bf16.msra.mxu0 %v2753_v35  ;;  %1462 = vmatprep.mubr.bf16.mxu1 %v3063_v37  ;;  %v2820_v35 = vld [vmem:[%s3780_s0 + $0x124] ss:$16 sps:$4 sm:$0xff]   ;;  %v2833_v45 = vld [vmem:[%s3780_s0 + $0x140] ss:$16 sps:$4 sm:$0xff]  }
  0x24   :  { %1054 = vmatprep.subr.bf16.mxu0 %v2754_v36  ;;  %2533 = vmatpush3.bf16.msra.mxu1 %v2785_v46  ;;  %v2844_v36 = vld [vmem:[%s3779_s1 + $0x240] ss:$12 sps:$4 sm:$0xff]   ;;  %v2877_v46 = vld [vmem:[%s3779_s1 + $0x2a4] ss:$12 sps:$4 sm:$0xff]  }
  0x25   :  { %2534 = vmatprep.subr.bf16.mxu1 %v2798_v52  ;;  %v2839_v52 = vld [vmem:[%s3780_s0 + $0x160] ss:$16 sps:$4 sm:$0xff]  }
  0x27   :  { %1055 = vmatpush1.bf16.msra.mxu0 %v2756_v38  ;;  %v2850_v38 = vld [vmem:[%s3779_s1 + $0x258] ss:$12 sps:$4 sm:$0xff]  }
  0x28   :  { %1056 = vmatprep.subr.bf16.mxu0 %v2759_v39  ;;  %2535 = vmatpush3.bf16.msra.mxu1 %v2799_v53  ;;  %v2860_v39 = vld [vmem:[%s3779_s1 + $0x274] ss:$12 sps:$4 sm:$0xff]  }
  0x29   :  { %2536 = vmatprep.subr.bf16.mxu1 %v2812_v60  ;;  %v2842_v53 = vld [vmem:[%s3780_s0 + $0x184] ss:$16 sps:$4 sm:$0xff]  }
  0x2a   :  { %1463 = vmatmul.mubr.bf16.gmra.mrb[4].mxu1 %v3076_v40  ;;  %v2856_v60 = vld [vmem:[%s3780_s0 + $0x1c4] ss:$16 sps:$4 sm:$0xff]  }
  0x2b   :  { %1057 = vmatpush1.bf16.msra.mxu0 %v2762_v41  ;;  %1470 = vmatprep.mubr.bf16.mxu1 %v3087_v43  ;;  %v2828_v41 = vld [vmem:[%s3780_s0 + $0x144] ss:$16 sps:$4 sm:$0xff]  }
  0x2c   :  { %1058 = vmatprep.subr.bf16.mxu0 %v2763_v42  ;;  %2537 = vmatpush3.bf16.msra.mxu1 %v2813_v61  ;;  %v2858_v42 = vld [vmem:[%s3779_s1 + $0x270] ss:$12 sps:$4 sm:$0xff]  }
  0x2d   :  { %2538 = vmatprep.subr.bf16.mxu1 %v2826_v4  ;;  %v2861_v61 = vld [vmem:[%s3780_s0 + $0x1c0] ss:$16 sps:$4 sm:$0xff]   ;;  %v2884_v4 = vld [vmem:[%s3780_s0 + $0x4c] ss:$16 sps:$4 sm:$0xff]  }
  0x2f   :  { %1059 = vmatpush1.bf16.msra.mxu0 %v2765_v44  ;;  %v2864_v44 = vld [vmem:[%s3779_s1 + $0x288] ss:$12 sps:$4 sm:$0xff]  }
  0x30   :  { %1060 = vmatprep.subr.bf16.mxu0 %v2768_v47  ;;  %2539 = vmatpush3.bf16.msra.mxu1 %v2827_v5  ;;  %v2834_v47 = vld [vmem:[%s3780_s0 + $0x164] ss:$16 sps:$4 sm:$0xff]   ;;  %v2889_v5 = vld [vmem:[%s3780_s0 + $0x48] ss:$16 sps:$4 sm:$0xff]  }
  0x31   :  { %2540 = vmatprep.subr.bf16.mxu1 %v2840_v11  ;;  %v2901_v11 = vld [vmem:[%s3780_s0 + $0xa8] ss:$16 sps:$4 sm:$0xff]  }
  0x32   :  { %1471 = vmatmul.mubr.bf16.gmra.mrb[8].mxu1 %v3106_v48 }
  0x33   :  { %1061 = vmatpush1.bf16.msra.mxu0 %v2771_v49  ;;  %1478 = vmatprep.mubr.bf16.mxu1 %v3117_v51  ;;  %v2882_v49 = vld [vmem:[%s3779_s1 + $0x2bc] ss:$12 sps:$4 sm:$0xff]  }
  0x34   :  { %1062 = vmatprep.subr.bf16.mxu0 %v2772_v50  ;;  %2541 = vmatpush3.bf16.msra.mxu1 %v2841_v12  ;;  %v2880_v50 = vld [vmem:[%s3779_s1 + $0x2b8] ss:$12 sps:$4 sm:$0xff]   ;;  %v2902_v12 = vld [vmem:[%s3780_s0 + $0xcc] ss:$16 sps:$4 sm:$0xff]  }
  0x35   :  { %2542 = vmatprep.subr.bf16.mxu1 %v2854_v19  ;;  %v2913_v19 = vld [vmem:[%s3780_s0 + $0x128] ss:$16 sps:$4 sm:$0xff]  }
  0x37   :  { %1063 = vmatpush1.bf16.msra.mxu0 %v2774_v54  ;;  %v2886_v54 = vld [vmem:[%s3779_s1 + $0x2d0] ss:$12 sps:$4 sm:$0xff]  }
  0x38   :  { %1064 = vmatprep.subr.bf16.mxu0 %v2777_v55  ;;  %2543 = vmatpush3.bf16.msra.mxu1 %v2855_v20  ;;  %v2894_v55 = vld [vmem:[%s3779_s1 + $0x2ec] ss:$12 sps:$4 sm:$0xff]  }
  0x39   :  { %2544 = vmatprep.subr.bf16.mxu1 %v2868_v27  ;;  %v2914_v20 = vld [vmem:[%s3780_s0 + $0x14c] ss:$16 sps:$4 sm:$0xff]  }
  0x3a   :  { %1479 = vmatmul.mubr.bf16.gmra.mrb[12].mxu1 %v3136_v56 }
  0x3b   :  { %1065 = vmatpush1.bf16.msra.mxu0 %v2780_v57  ;;  %1486 = vmatprep.mubr.bf16.mxu1 %v3147_v59  ;;  %v2847_v57 = vld [vmem:[%s3780_s0 + $0x180] ss:$16 sps:$4 sm:$0xff]  }
  0x3c   :  { %1066 = vmatprep.subr.bf16.mxu0 %v2781_v58  ;;  %2545 = vmatpush3.bf16.msra.mxu1 %v2869_v29  ;;  %v2848_v58 = vld [vmem:[%s3780_s0 + $0x1a4] ss:$16 sps:$4 sm:$0xff]  }
  0x3d   :  { %2546 = vmatprep.subr.bf16.mxu1 %v2870_v30 }
  0x3f   :  { %1067 = vmatpush1.bf16.msra.mxu0 %v2784_v62  ;;  %v2862_v62 = vld [vmem:[%s3780_s0 + $0x1e4] ss:$16 sps:$4 sm:$0xff]  }
  0x40   :  { %1229 = vmatprep.subr.bf16.mxu0 %v2790_v63  ;;  %2547 = vmatpush3.bf16.msra.mxu1 %v2871_v31  ;;  %v2867_v63 = vld [vmem:[%s3780_s0 + $0x1e0] ss:$16 sps:$4 sm:$0xff]  }
  0x42   :  { %1069 = vmatmul.mubr.bf16.vlgmr.msra.gmra.mrb[0].mxu0 %v3052_v34  ;;  %1487 = vmatmul.mubr.bf16.gmra.mrb[16].mxu1 %v3169_v1  ;;  %v2819_v34 = vld [vmem:[%s3780_s0 + $0x100] ss:$16 sps:$4 sm:$0xff]  }
  0x43   :  { %1230 = vmatpush1.bf16.msra.mxu0 %v2788_v0  ;;  %1078 = vmatprep.mubr.bf16.mxu0 %v3063_v37  ;;  %v2852_v37 = vld [vmem:[%s3779_s1 + $0x25c] ss:$12 sps:$4 sm:$0xff]  }
  0x44   :  { %1494 = vmatprep.mubr.bf16.mxu1 %v3174_v2  ;;  %1231 = vmatprep.subr.bf16.mxu0 %v2796_v3  ;;  %v2874_v0 = vld [vmem:[%s3780_s0 + $0xc] ss:$16 sps:$4 sm:$0xff]   ;;  %v2883_v3 = vld [vmem:[%s3780_s0 + $0x28] ss:$16 sps:$4 sm:$0xff]  }
  0x47   :  { %1232 = vmatpush1.bf16.msra.mxu0 %v2794_v6  ;;  %v2890_v6 = vld [vmem:[%s3780_s0 + $0x6c] ss:$16 sps:$4 sm:$0xff]  }
  0x48   :  { %1233 = vmatprep.subr.bf16.mxu0 %v2804_v7  ;;  %v2895_v7 = vld [vmem:[%s3780_s0 + $0x68] ss:$16 sps:$4 sm:$0xff]  }
  0x4a   :  { %1079 = vmatmul.mubr.bf16.gmra.mrb[4].mxu0 %v3076_v40  ;;  %1495 = vmatmul.mubr.bf16.gmra.mrb[20].mxu1 %v3198_v8  ;;  %v2825_v40 = vld [vmem:[%s3780_s0 + $0x120] ss:$16 sps:$4 sm:$0xff]  }
  0x4b   :  { %1088 = vmatprep.mubr.bf16.mxu0 %v3087_v43  ;;  %1502 = vmatprep.mubr.bf16.mxu1 %v3203_v9  ;;  %v2866_v43 = vld [vmem:[%s3779_s1 + $0x28c] ss:$12 sps:$4 sm:$0xff]  }
  0x4c   :  { %1234 = vmatpush1.bf16.msra.mxu0 %v2802_v10  ;;  %v2899_v10 = vld [vmem:[%s3780_s0 + $0xac] ss:$16 sps:$4 sm:$0xff]  }
  0x4d   :  { %1235 = vmatprep.subr.bf16.mxu0 %v2810_v13  ;;  %v2904_v13 = vld [vmem:[%s3780_s0 + $0xc8] ss:$16 sps:$4 sm:$0xff]  }
  0x50   :  { %1236 = vmatpush1.bf16.msra.mxu0 %v2808_v14  ;;  %v2905_v14 = vld [vmem:[%s3780_s0 + $0xec] ss:$16 sps:$4 sm:$0xff]  }
  0x51   :  { %1237 = vmatprep.subr.bf16.mxu0 %v2818_v16  ;;  %v2908_v16 = vld [vmem:[%s3780_s0 + $0x10c] ss:$16 sps:$4 sm:$0xff]  }
  0x52   :  { %1089 = vmatmul.mubr.bf16.gmra.mrb[8].mxu0 %v3106_v48  ;;  %1503 = vmatmul.mubr.bf16.gmra.mrb[24].mxu1 %v3227_v15  ;;  %v2875_v48 = vld [vmem:[%s3779_s1 + $0x2a0] ss:$12 sps:$4 sm:$0xff]  }
  0x53   :  { %1098 = vmatprep.mubr.bf16.mxu0 %v3117_v51  ;;  %1510 = vmatprep.mubr.bf16.mxu1 %v3235_v17  ;;  %v2888_v51 = vld [vmem:[%s3779_s1 + $0x2d4] ss:$12 sps:$4 sm:$0xff]  }
  0x54   :  { %1238 = vmatpush1.bf16.msra.mxu0 %v2816_v18  ;;  %v2911_v18 = vld [vmem:[%s3780_s0 + $0x12c] ss:$16 sps:$4 sm:$0xff]  }
  0x55   :  { %1239 = vmatprep.subr.bf16.mxu0 %v2824_v21  ;;  %v2916_v21 = vld [vmem:[%s3780_s0 + $0x148] ss:$16 sps:$4 sm:$0xff]  }
  0x58   :  { %1240 = vmatpush1.bf16.msra.mxu0 %v2822_v22  ;;  %v2917_v22 = vld [vmem:[%s3780_s0 + $0x16c] ss:$16 sps:$4 sm:$0xff]  }
  0x59   :  { %1241 = vmatprep.subr.bf16.mxu0 %v2832_v24  ;;  %v2919_v24 = vld [vmem:[%s3780_s0 + $0x168] ss:$16 sps:$4 sm:$0xff]  }
  0x5a   :  { %1099 = vmatmul.mubr.bf16.gmra.mrb[12].mxu0 %v3136_v56  ;;  %1511 = vmatmul.mubr.bf16.gmra.mrb[28].mxu1 %v3259_v23  ;;  %v2892_v56 = vld [vmem:[%s3779_s1 + $0x2e8] ss:$12 sps:$4 sm:$0xff]  }
  0x5b   :  { %1108 = vmatprep.mubr.bf16.mxu0 %v3147_v59  ;;  %1518 = vmatprep.mubr.bf16.mxu1 %v3267_v25  ;;  %v2853_v59 = vld [vmem:[%s3780_s0 + $0x1a0] ss:$16 sps:$4 sm:$0xff]  }
  0x5c   :  { %1242 = vmatpush1.bf16.msra.mxu0 %v2830_v26  ;;  %v2920_v26 = vld [vmem:[%s3780_s0 + $0x18c] ss:$16 sps:$4 sm:$0xff]  }
  0x5d   :  { %1243 = vmatprep.subr.bf16.mxu0 %v2838_v28 }
  0x60   :  { %1244 = vmatpush1.bf16.msra.mxu0 %v2836_v32  ;;  %v2922_v32 = vld [vmem:[%s3780_s0 + $0x188] ss:$16 sps:$4 sm:$0xff]  }
  0x61   :  { %1245 = vmatprep.subr.bf16.mxu0 %v2846_v33 }
  0x62   :  { %1109 = vmatmul.mubr.bf16.gmra.mrb[16].mxu0 %v3169_v1  ;;  %1519 = vmatmul.mubr.bf16.gmra.mrb[32].mxu1 %v2819_v34  ;;  %v2872_v1 = vld [vmem:[%s3780_s0 + $0x8] ss:$16 sps:$4 sm:$0xff]  }
  0x63   :  { %1118 = vmatprep.mubr.bf16.mxu0 %v3174_v2  ;;  %1526 = vmatprep.mubr.bf16.mxu1 %v2820_v35  ;;  %v2878_v2 = vld [vmem:[%s3780_s0 + $0x2c] ss:$16 sps:$4 sm:$0xff]  }
  0x64   :  { %1246 = vmatpush1.bf16.msra.mxu0 %v2844_v36 }
  0x65   :  { %1247 = vmatprep.subr.bf16.mxu0 %v2852_v37 }
  0x68   :  { %1248 = vmatpush1.bf16.msra.mxu0 %v2850_v38 }
  0x69   :  { %1249 = vmatprep.subr.bf16.mxu0 %v2860_v39 }
  0x6a   :  { %1119 = vmatmul.mubr.bf16.gmra.mrb[20].mxu0 %v3198_v8  ;;  %1527 = vmatmul.mubr.bf16.gmra.mrb[36].mxu1 %v2825_v40  ;;  %v2896_v8 = vld [vmem:[%s3780_s0 + $0x8c] ss:$16 sps:$4 sm:$0xff]  }
  0x6b   :  { %1128 = vmatprep.mubr.bf16.mxu0 %v3203_v9  ;;  %1534 = vmatprep.mubr.bf16.mxu1 %v2828_v41  ;;  %v2898_v9 = vld [vmem:[%s3780_s0 + $0x88] ss:$16 sps:$4 sm:$0xff]  }
  0x6c   :  { %1250 = vmatpush1.bf16.msra.mxu0 %v2858_v42  ;;  %v2926_v42 = vld [vmem:[%s3780_s0 + $0x1cc] ss:$16 sps:$4 sm:$0xff]  }
  0x6d   :  { %1251 = vmatprep.subr.bf16.mxu0 %v2866_v43 }
  0x70   :  { %1252 = vmatpush1.bf16.msra.mxu0 %v2864_v44 }
  0x71   :  { %1253 = vmatprep.subr.bf16.mxu0 %v2877_v46 }
  0x72   :  { %1129 = vmatmul.mubr.bf16.gmra.mrb[24].mxu0 %v3227_v15  ;;  %1535 = vmatmul.mubr.bf16.gmra.mrb[40].mxu1 %v2833_v45  ;;  %v2907_v15 = vld [vmem:[%s3780_s0 + $0xe8] ss:$16 sps:$4 sm:$0xff]  }
  0x73   :  { %1138 = vmatprep.mubr.bf16.mxu0 %v3235_v17  ;;  %1542 = vmatprep.mubr.bf16.mxu1 %v2834_v47  ;;  %v2910_v17 = vld [vmem:[%s3780_s0 + $0x108] ss:$16 sps:$4 sm:$0xff]  }
  0x74   :  { %1254 = vmatpush1.bf16.msra.mxu0 %v2875_v48  ;;  %v2928_v48 = vld [vmem:[%s3780_s0 + $0x1c8] ss:$16 sps:$4 sm:$0xff]  }
  0x75   :  { %1255 = vmatprep.subr.bf16.mxu0 %v2882_v49 }
  0x78   :  { %1256 = vmatpush1.bf16.msra.mxu0 %v2880_v50  ;;  %v2929_v50 = vld [vmem:[%s3780_s0 + $0x1ec] ss:$16 sps:$4 sm:$0xff]  }
  0x79   :  { %1257 = vmatprep.subr.bf16.mxu0 %v2888_v51 }
  0x7a   :  { %1139 = vmatmul.mubr.bf16.gmra.mrb[28].mxu0 %v3259_v23  ;;  %1543 = vmatmul.mubr.bf16.gmra.mrb[44].mxu1 %v2839_v52 }
  0x7b   :  { %1148 = vmatprep.mubr.bf16.mxu0 %v3267_v25  ;;  %1550 = vmatprep.mubr.bf16.mxu1 %v2842_v53 }
  0x7c   :  { %1258 = vmatpush1.bf16.msra.mxu0 %v2886_v54 }
  0x7d   :  { %1259 = vmatprep.subr.bf16.mxu0 %v2894_v55 }
  0x80   :  { %1260 = vmatpush1.bf16.msra.mxu0 %v2892_v56  ;;  %v2931_v56 = vld [vmem:[%s3780_s0 + $0x1e8] ss:$16 sps:$4 sm:$0xff]  }
  0x82   :  { %1149 = vmatmul.mubr.bf16.gmra.mrb[32].mxu0 %v2819_v34  ;;  %1551 = vmatmul.mubr.bf16.gmra.mrb[48].mxu1 %v2847_v57  ;;  %v2923_v34 = vld [vmem:[%s3780_s0 + $0x1ac] ss:$16 sps:$4 sm:$0xff]  }
  0x83   :  { %1158 = vmatprep.mubr.bf16.mxu0 %v2820_v35  ;;  %1558 = vmatprep.mubr.bf16.mxu1 %v2848_v58 }
  0x8a   :  { %1159 = vmatmul.mubr.bf16.gmra.mrb[36].mxu0 %v2825_v40  ;;  %1559 = vmatmul.mubr.bf16.gmra.mrb[52].mxu1 %v2853_v59  ;;  %v2925_v40 = vld [vmem:[%s3780_s0 + $0x1a8] ss:$16 sps:$4 sm:$0xff]  }
  0x8b   :  { %1168 = vmatprep.mubr.bf16.mxu0 %v2828_v41  ;;  %1566 = vmatprep.mubr.bf16.mxu1 %v2856_v60 }
  0x92   :  { %1169 = vmatmul.mubr.bf16.gmra.mrb[40].mxu0 %v2833_v45  ;;  %1567 = vmatmul.mubr.bf16.gmra.mrb[56].mxu1 %v2861_v61 }
  0x93   :  { %1178 = vmatprep.mubr.bf16.mxu0 %v2834_v47  ;;  %1574 = vmatprep.mubr.bf16.mxu1 %v2862_v62 }
  0x9a   :  { %1179 = vmatmul.mubr.bf16.gmra.mrb[44].mxu0 %v2839_v52  ;;  %1575 = vmatmul.mubr.bf16.gmra.mrb[60].mxu1 %v2867_v63 }
  0x9b   :  { %1188 = vmatprep.mubr.bf16.mxu0 %v2842_v53  ;;  %1615 = vmatprep.mubr.bf16.mxu1 %v2874_v0 }
  0xa2   :  { %1189 = vmatmul.mubr.bf16.gmra.mrb[48].mxu0 %v2847_v57  ;;  %1616 = vmatmul.mubr.bf16.vlgmr.msra.gmra.mrb[64].mxu1 %v2872_v1 }
  0xa3   :  { %1198 = vmatprep.mubr.bf16.mxu0 %v2848_v58  ;;  %1623 = vmatprep.mubr.bf16.mxu1 %v2878_v2 }
  0xaa   :  { %1199 = vmatmul.mubr.bf16.gmra.mrb[52].mxu0 %v2853_v59  ;;  %1624 = vmatmul.mubr.bf16.gmra.mrb[68].mxu1 %v2883_v3 }
  0xab   :  { %1208 = vmatprep.mubr.bf16.mxu0 %v2856_v60  ;;  %1631 = vmatprep.mubr.bf16.mxu1 %v2884_v4 }
  0xb2   :  { %1209 = vmatmul.mubr.bf16.gmra.mrb[56].mxu0 %v2861_v61  ;;  %1632 = vmatmul.mubr.bf16.gmra.mrb[72].mxu1 %v2889_v5 }
  0xb3   :  { %1218 = vmatprep.mubr.bf16.mxu0 %v2862_v62  ;;  %1639 = vmatprep.mubr.bf16.mxu1 %v2890_v6 }
  0xba   :  { %1219 = vmatmul.mubr.bf16.gmra.mrb[60].mxu0 %v2867_v63  ;;  %1640 = vmatmul.mubr.bf16.gmra.mrb[76].mxu1 %v2895_v7 }
  0xbb   :  { %1261 = vmatprep.mubr.bf16.mxu0 %v2874_v0  ;;  %1647 = vmatprep.mubr.bf16.mxu1 %v2896_v8 }
  0xc2   :  { %1262 = vmatmul.mubr.bf16.vlgmr.msra.gmra.mrb[0].mxu0 %v2872_v1  ;;  %1648 = vmatmul.mubr.bf16.gmra.mrb[80].mxu1 %v2898_v9 }
  0xc3   :  { %1271 = vmatprep.mubr.bf16.mxu0 %v2878_v2  ;;  %1655 = vmatprep.mubr.bf16.mxu1 %v2899_v10 }
  0xca   :  { %1272 = vmatmul.mubr.bf16.gmra.mrb[4].mxu0 %v2883_v3  ;;  %1656 = vmatmul.mubr.bf16.gmra.mrb[84].mxu1 %v2901_v11 }
  0xcb   :  { %1281 = vmatprep.mubr.bf16.mxu0 %v2884_v4  ;;  %1663 = vmatprep.mubr.bf16.mxu1 %v2902_v12 }
  0xd2   :  { %1282 = vmatmul.mubr.bf16.gmra.mrb[8].mxu0 %v2889_v5  ;;  %1664 = vmatmul.mubr.bf16.gmra.mrb[88].mxu1 %v2904_v13 }
  0xd3   :  { %1291 = vmatprep.mubr.bf16.mxu0 %v2890_v6  ;;  %1671 = vmatprep.mubr.bf16.mxu1 %v2905_v14 }
  0xda   :  { %1292 = vmatmul.mubr.bf16.gmra.mrb[12].mxu0 %v2895_v7  ;;  %1672 = vmatmul.mubr.bf16.gmra.mrb[92].mxu1 %v2907_v15 }
  0xdb   :  { %1301 = vmatprep.mubr.bf16.mxu0 %v2896_v8  ;;  %1679 = vmatprep.mubr.bf16.mxu1 %v2908_v16 }
  0xe2   :  { %1302 = vmatmul.mubr.bf16.gmra.mrb[16].mxu0 %v2898_v9  ;;  %1680 = vmatmul.mubr.bf16.gmra.mrb[96].mxu1 %v2910_v17 }
  0xe3   :  { %1311 = vmatprep.mubr.bf16.mxu0 %v2899_v10  ;;  %1687 = vmatprep.mubr.bf16.mxu1 %v2911_v18 }
  0xea   :  { %1312 = vmatmul.mubr.bf16.gmra.mrb[20].mxu0 %v2901_v11  ;;  %1688 = vmatmul.mubr.bf16.gmra.mrb[100].mxu1 %v2913_v19 }
  0xeb   :  { %1321 = vmatprep.mubr.bf16.mxu0 %v2902_v12  ;;  %1695 = vmatprep.mubr.bf16.mxu1 %v2914_v20 }
  0xf2   :  { %1322 = vmatmul.mubr.bf16.gmra.mrb[24].mxu0 %v2904_v13  ;;  %1696 = vmatmul.mubr.bf16.gmra.mrb[104].mxu1 %v2916_v21 }
  0xf3   :  { %1331 = vmatprep.mubr.bf16.mxu0 %v2905_v14  ;;  %1703 = vmatprep.mubr.bf16.mxu1 %v2917_v22 }
  0xf5   :  { %v2436_v23 = vpop.f32.mrb[0].mxu1 }
  0xf6   :  { %v2437_v25 = vpop.f32.mrb[1].mxu1 }
  0xf7   :  { %v3470_v27 = vadd.f32 %v2437_v25, %v2436_v23  ;;  %v2439_v28 = vpop.f32.mrb[2].mxu1 }
  0xf8   :  { %v2440_v29 = vpop.f32.mrb[3].mxu1 }
  0xf9   :  { %v3472_v30 = vadd.f32 %v2440_v29, %v2439_v28 }
  0xfa   :  { %1332 = vmatmul.mubr.bf16.gmra.mrb[28].mxu0 %v2907_v15  ;;  %1704 = vmatmul.mubr.bf16.gmra.mrb[108].mxu1 %v2919_v24 }
  0xfb   :  { %1341 = vmatprep.mubr.bf16.mxu0 %v2908_v16  ;;  %1711 = vmatprep.mubr.bf16.mxu1 %v2920_v26 }
  0xfd   :  { %v2442_v31 = vpop.f32.mrb[4].mxu1 }
  0xfe   :  { %v2443_v33 = vpop.f32.mrb[5].mxu1 }
  0xff   :  { %v3480_v35 = vadd.f32 %v2443_v33, %v2442_v31  ;;  %v2445_v36 = vpop.f32.mrb[6].mxu1 }
 0x100   :  { %v2446_v37 = vpop.f32.mrb[7].mxu1 }
 0x101   :  { %v3482_v38 = vadd.f32 %v2446_v37, %v2445_v36 }
 0x102   :  { %1342 = vmatmul.mubr.bf16.gmra.mrb[32].mxu0 %v2910_v17  ;;  %1712 = vmatmul.mubr.bf16.gmra.mrb[112].mxu1 %v2922_v32 }
 0x103   :  { %1351 = vmatprep.mubr.bf16.mxu0 %v2911_v18  ;;  %1719 = vmatprep.mubr.bf16.mxu1 %v2923_v34 }
 0x105   :  { %v2448_v39 = vpop.f32.mrb[8].mxu1 }
 0x106   :  { %v2449_v41 = vpop.f32.mrb[9].mxu1 }
 0x107   :  { %v3490_v43 = vadd.f32 %v2449_v41, %v2448_v39  ;;  %v2451_v44 = vpop.f32.mrb[10].mxu1 }
 0x108   :  { %v2452_v45 = vpop.f32.mrb[11].mxu1 }
 0x109   :  { %v3492_v46 = vadd.f32 %v2452_v45, %v2451_v44 }
 0x10a   :  { %1352 = vmatmul.mubr.bf16.gmra.mrb[36].mxu0 %v2913_v19  ;;  %1720 = vmatmul.mubr.bf16.gmra.mrb[116].mxu1 %v2925_v40 }
 0x10b   :  { %1361 = vmatprep.mubr.bf16.mxu0 %v2914_v20  ;;  %1727 = vmatprep.mubr.bf16.mxu1 %v2926_v42 }
 0x10d   :  { %v2454_v47 = vpop.f32.mrb[12].mxu1 }
 0x10e   :  { %v2455_v49 = vpop.f32.mrb[13].mxu1 }
 0x10f   :  { %v3500_v51 = vadd.f32 %v2455_v49, %v2454_v47  ;;  %v2457_v52 = vpop.f32.mrb[14].mxu1 }
 0x110   :  { %v2458_v53 = vpop.f32.mrb[15].mxu1 }
 0x111   :  { %v3502_v54 = vadd.f32 %v2458_v53, %v2457_v52 }
 0x112   :  { %1362 = vmatmul.mubr.bf16.gmra.mrb[40].mxu0 %v2916_v21  ;;  %1728 = vmatmul.mubr.bf16.gmra.mrb[120].mxu1 %v2928_v48 }
 0x113   :  { %1371 = vmatprep.mubr.bf16.mxu0 %v2917_v22  ;;  %1735 = vmatprep.mubr.bf16.mxu1 %v2929_v50 }
 0x115   :  { %v2460_v55 = vpop.f32.mrb[16].mxu1 }
 0x116   :  { %v2461_v57 = vpop.f32.mrb[17].mxu1 }
 0x117   :  { %v3507_v58 = vadd.f32 %v2461_v57, %v2460_v55  ;;  %v2463_v59 = vpop.f32.mrb[18].mxu1 }
 0x118   :  { %v2464_v60 = vpop.f32.mrb[19].mxu1 }
 0x119   :  { %v3509_v61 = vadd.f32 %v2464_v60, %v2463_v59 }
 0x11a   :  { %1372 = vmatmul.mubr.bf16.gmra.mrb[44].mxu0 %v2919_v24  ;;  %1736 = vmatmul.mubr.bf16.gmra.mrb[124].mxu1 %v2931_v56 }
 0x11b   :  { %1381 = vmatprep.mubr.bf16.mxu0 %v2920_v26 }
 0x11d   :  { %v2466_v62 = vpop.f32.mrb[20].mxu1 }
 0x11e   :  { %v2467_v63 = vpop.f32.mrb[21].mxu1 }
 0x11f   :  { %v3511_v0 = vadd.f32 %v2467_v63, %v2466_v62  ;;  %v2469_v1 = vpop.f32.mrb[22].mxu1 }
 0x120   :  { %v2470_v2 = vpop.f32.mrb[23].mxu1 }
 0x121   :  { %v3513_v3 = vadd.f32 %v2470_v2, %v2469_v1 }
 0x122   :  { %1382 = vmatmul.mubr.bf16.gmra.mrb[48].mxu0 %v2922_v32 }
 0x123   :  { %1391 = vmatprep.mubr.bf16.mxu0 %v2923_v34 }
 0x125   :  { %v2472_v4 = vpop.f32.mrb[24].mxu1 }
 0x126   :  { %v2473_v5 = vpop.f32.mrb[25].mxu1 }
 0x127   :  { %v3515_v6 = vadd.f32 %v2473_v5, %v2472_v4  ;;  %v2475_v7 = vpop.f32.mrb[26].mxu1 }
 0x128   :  { %v2476_v8 = vpop.f32.mrb[27].mxu1 }
 0x129   :  { %v3517_v9 = vadd.f32 %v2476_v8, %v2475_v7 }
 0x12a   :  { %1392 = vmatmul.mubr.bf16.gmra.mrb[52].mxu0 %v2925_v40 }
 0x12b   :  { %1401 = vmatprep.mubr.bf16.mxu0 %v2926_v42 }
 0x12d   :  { %v2478_v10 = vpop.f32.mrb[28].mxu1 }
 0x12e   :  { %v2479_v11 = vpop.f32.mrb[29].mxu1 }
 0x12f   :  { %v3519_v12 = vadd.f32 %v2479_v11, %v2478_v10  ;;  %v2481_v13 = vpop.f32.mrb[30].mxu1 }
 0x130   :  { %v2482_v14 = vpop.f32.mrb[31].mxu1 }
 0x131   :  { %v3521_v15 = vadd.f32 %v2482_v14, %v2481_v13 }
 0x132   :  { %1402 = vmatmul.mubr.bf16.gmra.mrb[56].mxu0 %v2928_v48 }
 0x133   :  { %1411 = vmatprep.mubr.bf16.mxu0 %v2929_v50 }
 0x135   :  { %v2484_v16 = vpop.f32.mrb[32].mxu1 }
 0x136   :  { %v2485_v17 = vpop.f32.mrb[33].mxu1 }
 0x137   :  { %v3523_v18 = vadd.f32 %v2485_v17, %v2484_v16  ;;  %v2487_v19 = vpop.f32.mrb[34].mxu1 }
 0x138   :  { %v2488_v20 = vpop.f32.mrb[35].mxu1 }
 0x139   :  { %v3525_v21 = vadd.f32 %v2488_v20, %v2487_v19 }
 0x13a   :  { %1412 = vmatmul.mubr.bf16.gmra.mrb[60].mxu0 %v2931_v56 }
 0x13d   :  { %v2490_v22 = vpop.f32.mrb[36].mxu1 }
 0x13e   :  { %v2491_v23 = vpop.f32.mrb[37].mxu1 }
 0x13f   :  { %v3527_v24 = vadd.f32 %v2491_v23, %v2490_v22  ;;  %v2493_v25 = vpop.f32.mrb[38].mxu1 }
 0x140   :  { %v2494_v26 = vpop.f32.mrb[39].mxu1 }
 0x141   :  { %v3529_v28 = vadd.f32 %v2494_v26, %v2493_v25 }
 0x145   :  { %v2496_v29 = vpop.f32.mrb[40].mxu1 }
 0x146   :  { %v2497_v31 = vpop.f32.mrb[41].mxu1 }
 0x147   :  { %v3531_v32 = vadd.f32 %v2497_v31, %v2496_v29  ;;  %v2499_v33 = vpop.f32.mrb[42].mxu1 }
 0x148   :  { %v2500_v34 = vpop.f32.mrb[43].mxu1 }
 0x149   :  { %v3533_v36 = vadd.f32 %v2500_v34, %v2499_v33 }
 0x14d   :  { %v2502_v37 = vpop.f32.mrb[44].mxu1 }
 0x14e   :  { %v2503_v39 = vpop.f32.mrb[45].mxu1 }
 0x14f   :  { %v3535_v40 = vadd.f32 %v2503_v39, %v2502_v37  ;;  %v2505_v41 = vpop.f32.mrb[46].mxu1 }
 0x150   :  { %v2506_v42 = vpop.f32.mrb[47].mxu1 }
 0x151   :  { %v3537_v44 = vadd.f32 %v2506_v42, %v2505_v41 }
 0x155   :  { %v2508_v45 = vpop.f32.mrb[48].mxu1 }
 0x156   :  { %v2509_v47 = vpop.f32.mrb[49].mxu1 }
 0x157   :  { %v3539_v48 = vadd.f32 %v2509_v47, %v2508_v45  ;;  %v2511_v49 = vpop.f32.mrb[50].mxu1 }
 0x158   :  { %v2512_v50 = vpop.f32.mrb[51].mxu1 }
 0x159   :  { %v3541_v52 = vadd.f32 %v2512_v50, %v2511_v49 }
 0x15d   :  { %v2514_v53 = vpop.f32.mrb[52].mxu1 }
 0x15e   :  { %v2515_v55 = vpop.f32.mrb[53].mxu1 }
 0x15f   :  { %v3543_v56 = vadd.f32 %v2515_v55, %v2514_v53  ;;  %v2517_v57 = vpop.f32.mrb[54].mxu1 }
 0x160   :  { %v2518_v59 = vpop.f32.mrb[55].mxu1 }
 0x161   :  { %v3545_v60 = vadd.f32 %v2518_v59, %v2517_v57 }
 0x165   :  { %v2520_v62 = vpop.f32.mrb[56].mxu1 }
 0x166   :  { %v2521_v63 = vpop.f32.mrb[57].mxu1 }
 0x167   :  { %v3547_v1 = vadd.f32 %v2521_v63, %v2520_v62  ;;  %v2523_v2 = vpop.f32.mrb[58].mxu1 }
 0x168   :  { %v2524_v4 = vpop.f32.mrb[59].mxu1 }
 0x169   :  { %v3549_v5 = vadd.f32 %v2524_v4, %v2523_v2 }
 0x16d   :  { %v2526_v7 = vpop.f32.mrb[60].mxu1 }
 0x16e   :  { %v2527_v8 = vpop.f32.mrb[61].mxu1 }
 0x16f   :  { %v3551_v10 = vadd.f32 %v2527_v8, %v2526_v7  ;;  %v2529_v11 = vpop.f32.mrb[62].mxu1 }
 0x170   :  { %v2530_v13 = vpop.f32.mrb[63].mxu1 }
 0x171   :  { %v3553_v14 = vadd.f32 %v2530_v13, %v2529_v11 }
 0x175   :  { %v2548_v16 = vpop.f32.mrb[64].mxu1 }
 0x176   :  { %v2549_v17 = vpop.f32.mrb[65].mxu1 }
 0x177   :  { %v2550_v19 = vadd.f32 %v2549_v17, %v2548_v16  ;;  %v2551_v20 = vpop.f32.mrb[66].mxu1 }
 0x178   :  { %v2552_v22 = vpop.f32.mrb[67].mxu1 }
 0x179   :  { %v1618_v23 = vadd.f32 %v2550_v19, %v3470_v27  ;;  %v2553_v25 = vadd.f32 %v2552_v22, %v2551_v20 }
 0x17b   :  { %v2357_v26 = vpack.c.bf16 %v1618_v23, %v1618_v23  ;;  %v1621_v29 = vadd.f32 %v2553_v25, %v3472_v30 }
 0x17d   :  { %2065 = vst [vmem:[%s3781_s2 + $0x8] sm:$0xf] %v2357_v26  ;;  %v2359_v31 = vpack.c.bf16 %v1621_v29, %v1621_v29  ;;  %v2554_v33 = vpop.f32.mrb[68].mxu1 }
 0x17e   :  { %v2555_v34 = vpop.f32.mrb[69].mxu1 }
 0x17f   :  { %2067 = vst [vmem:[%s3781_s2 + $0x14] sm:$0xf] %v2359_v31  ;;  %v2556_v37 = vadd.f32 %v2555_v34, %v2554_v33  ;;  %v2557_v39 = vpop.f32.mrb[70].mxu1 }
 0x180   :  { %v2558_v41 = vpop.f32.mrb[71].mxu1 }
 0x181   :  { %v1626_v27 = vadd.f32 %v2556_v37, %v3480_v35  ;;  %v2559_v42 = vadd.f32 %v2558_v41, %v2557_v39 }
 0x183   :  { %v2361_v45 = vpack.c.bf16 %v1626_v27, %v1626_v27  ;;  %v1629_v30 = vadd.f32 %v2559_v42, %v3482_v38 }
 0x185   :  { %2069 = vst [vmem:[%s3781_s2 + $0x20] sm:$0xf] %v2361_v45  ;;  %v2363_v47 = vpack.c.bf16 %v1629_v30, %v1629_v30  ;;  %v2560_v49 = vpop.f32.mrb[72].mxu1 }
 0x186   :  { %v2561_v50 = vpop.f32.mrb[73].mxu1 }
 0x187   :  { %2071 = vst [vmem:[%s3781_s2 + $0x2c] sm:$0xf] %v2363_v47  ;;  %v2562_v53 = vadd.f32 %v2561_v50, %v2560_v49  ;;  %v2563_v55 = vpop.f32.mrb[74].mxu1 }
 0x188   :  { %v2564_v57 = vpop.f32.mrb[75].mxu1 }
 0x189   :  { %v1634_v35 = vadd.f32 %v2562_v53, %v3490_v43  ;;  %v2565_v59 = vadd.f32 %v2564_v57, %v2563_v55 }
 0x18b   :  { %v2365_v62 = vpack.c.bf16 %v1634_v35, %v1634_v35  ;;  %v1637_v38 = vadd.f32 %v2565_v59, %v3492_v46 }
 0x18d   :  { %2073 = vst [vmem:[%s3781_s2 + $0x38] sm:$0xf] %v2365_v62  ;;  %v2367_v63 = vpack.c.bf16 %v1637_v38, %v1637_v38  ;;  %v2566_v2 = vpop.f32.mrb[76].mxu1 }
 0x18e   :  { %v2567_v4 = vpop.f32.mrb[77].mxu1 }
 0x18f   :  { %2075 = vst [vmem:[%s3781_s2 + $0x44] sm:$0xf] %v2367_v63  ;;  %v2568_v7 = vadd.f32 %v2567_v4, %v2566_v2  ;;  %v2569_v8 = vpop.f32.mrb[78].mxu1 }
 0x190   :  { %v2570_v11 = vpop.f32.mrb[79].mxu1 }
 0x191   :  { %v1642_v43 = vadd.f32 %v2568_v7, %v3500_v51  ;;  %v2571_v13 = vadd.f32 %v2570_v11, %v2569_v8 }
 0x193   :  { %v2369_v16 = vpack.c.bf16 %v1642_v43, %v1642_v43  ;;  %v1645_v46 = vadd.f32 %v2571_v13, %v3502_v54 }
 0x195   :  { %v1263_v17 = vpop.f32.mrb[0].mxu0  ;;  %2077 = vst [vmem:[%s3781_s2 + $0x50] sm:$0xf] %v2369_v16  ;;  %v2371_v19 = vpack.c.bf16 %v1645_v46, %v1645_v46  ;;  %v2572_v20 = vpop.f32.mrb[80].mxu1 }
 0x196   :  { %v1265_v22 = vpop.f32.mrb[1].mxu0  ;;  %v2573_v25 = vpop.f32.mrb[81].mxu1 }
 0x197   :  { %v2356_v23 = vpack.c.bf16 %v1265_v22, %v1263_v17  ;;  %v1267_v26 = vpop.f32.mrb[2].mxu0  ;;  %2079 = vst [vmem:[%s3781_s2 + $0x5c] sm:$0xf] %v2371_v19  ;;  %v2574_v51 = vadd.f32 %v2573_v25, %v2572_v20  ;;  %v2575_v29 = vpop.f32.mrb[82].mxu1 }
 0x198   :  { %v1269_v31 = vpop.f32.mrb[3].mxu0  ;;  %v2576_v33 = vpop.f32.mrb[83].mxu1 }
 0x199   :  { %2064 = vst [vmem:[%s3781_s2] sm:$0xff] %v2356_v23  ;;  %v2358_v54 = vpack.c.bf16 %v1269_v31, %v1267_v26  ;;  %v1650_v34 = vadd.f32 %v2574_v51, %v3507_v58  ;;  %v2577_v37 = vadd.f32 %v2576_v33, %v2575_v29 }
 0x19b   :  { %2066 = vst [vmem:[%s3781_s2 + $0xc] sm:$0xff] %v2358_v54  ;;  %v2373_v39 = vpack.c.bf16 %v1650_v34, %v1650_v34  ;;  %v1653_v41 = vadd.f32 %v2577_v37, %v3509_v61 }
 0x19d   :  { %v1273_v27 = vpop.f32.mrb[4].mxu0  ;;  %2081 = vst [vmem:[%s3781_s2 + $0x68] sm:$0xf] %v2373_v39  ;;  %v2375_v42 = vpack.c.bf16 %v1653_v41, %v1653_v41  ;;  %v2578_v45 = vpop.f32.mrb[84].mxu1 }
 0x19e   :  { %v1275_v30 = vpop.f32.mrb[5].mxu0  ;;  %v2579_v49 = vpop.f32.mrb[85].mxu1 }
 0x19f   :  { %v2360_v47 = vpack.c.bf16 %v1275_v30, %v1273_v27  ;;  %v1277_v50 = vpop.f32.mrb[6].mxu0  ;;  %2083 = vst [vmem:[%s3781_s2 + $0x74] sm:$0xf] %v2375_v42  ;;  %v2580_v58 = vadd.f32 %v2579_v49, %v2578_v45  ;;  %v2581_v53 = vpop.f32.mrb[86].mxu1 }
 0x1a0   :  { %v1279_v55 = vpop.f32.mrb[7].mxu0  ;;  %v2582_v57 = vpop.f32.mrb[87].mxu1 }
 0x1a1   :  { %2068 = vst [vmem:[%s3781_s2 + $0x18] sm:$0xff] %v2360_v47  ;;  %v2362_v61 = vpack.c.bf16 %v1279_v55, %v1277_v50  ;;  %v1658_v35 = vadd.f32 %v2580_v58, %v3511_v0  ;;  %v2583_v59 = vadd.f32 %v2582_v57, %v2581_v53 }
 0x1a3   :  { %2070 = vst [vmem:[%s3781_s2 + $0x24] sm:$0xff] %v2362_v61  ;;  %v2377_v62 = vpack.c.bf16 %v1658_v35, %v1658_v35  ;;  %v1661_v38 = vadd.f32 %v2583_v59, %v3513_v3 }
 0x1a5   :  { %v1283_v63 = vpop.f32.mrb[8].mxu0  ;;  %2085 = vst [vmem:[%s3781_s2 + $0x80] sm:$0xf] %v2377_v62  ;;  %v2379_v2 = vpack.c.bf16 %v1661_v38, %v1661_v38  ;;  %v2584_v4 = vpop.f32.mrb[88].mxu1 }
 0x1a6   :  { %v1285_v7 = vpop.f32.mrb[9].mxu0  ;;  %v2585_v11 = vpop.f32.mrb[89].mxu1 }
 0x1a7   :  { %v2364_v8 = vpack.c.bf16 %v1285_v7, %v1283_v63  ;;  %v1287_v43 = vpop.f32.mrb[10].mxu0  ;;  %2087 = vst [vmem:[%s3781_s2 + $0x8c] sm:$0xf] %v2379_v2  ;;  %v2586_v0 = vadd.f32 %v2585_v11, %v2584_v4  ;;  %v2587_v13 = vpop.f32.mrb[90].mxu1 }
 0x1a8   :  { %v1289_v16 = vpop.f32.mrb[11].mxu0  ;;  %v2588_v46 = vpop.f32.mrb[91].mxu1 }
 0x1a9   :  { %2072 = vst [vmem:[%s3781_s2 + $0x30] sm:$0xff] %v2364_v8  ;;  %v2366_v3 = vpack.c.bf16 %v1289_v16, %v1287_v43  ;;  %v1666_v17 = vadd.f32 %v2586_v0, %v3515_v6  ;;  %v2589_v19 = vadd.f32 %v2588_v46, %v2587_v13 }
 0x1ab   :  { %2074 = vst [vmem:[%s3781_s2 + $0x3c] sm:$0xff] %v2366_v3  ;;  %v2381_v20 = vpack.c.bf16 %v1666_v17, %v1666_v17  ;;  %v1669_v22 = vadd.f32 %v2589_v19, %v3517_v9 }
 0x1ad   :  { %v1293_v23 = vpop.f32.mrb[12].mxu0  ;;  %2089 = vst [vmem:[%s3781_s2 + $0x98] sm:$0xf] %v2381_v20  ;;  %v2383_v25 = vpack.c.bf16 %v1669_v22, %v1669_v22  ;;  %v2590_v26 = vpop.f32.mrb[92].mxu1 }
 0x1ae   :  { %v1295_v51 = vpop.f32.mrb[13].mxu0  ;;  %v2591_v31 = vpop.f32.mrb[93].mxu1 }
 0x1af   :  { %v2368_v29 = vpack.c.bf16 %v1295_v51, %v1293_v23  ;;  %v1297_v54 = vpop.f32.mrb[14].mxu0  ;;  %2091 = vst [vmem:[%s3781_s2 + $0xa4] sm:$0xf] %v2383_v25  ;;  %v2592_v6 = vadd.f32 %v2591_v31, %v2590_v26  ;;  %v2593_v33 = vpop.f32.mrb[94].mxu1 }
 0x1b0   :  { %v1299_v34 = vpop.f32.mrb[15].mxu0  ;;  %v2594_v37 = vpop.f32.mrb[95].mxu1 }
 0x1b1   :  { %2076 = vst [vmem:[%s3781_s2 + $0x48] sm:$0xff] %v2368_v29  ;;  %v2370_v9 = vpack.c.bf16 %v1299_v34, %v1297_v54  ;;  %v1674_v39 = vadd.f32 %v2592_v6, %v3519_v12  ;;  %v2595_v41 = vadd.f32 %v2594_v37, %v2593_v33 }
 0x1b3   :  { %2078 = vst [vmem:[%s3781_s2 + $0x54] sm:$0xff] %v2370_v9  ;;  %v2385_v27 = vpack.c.bf16 %v1674_v39, %v1674_v39  ;;  %v1677_v42 = vadd.f32 %v2595_v41, %v3521_v15 }
 0x1b5   :  { %v1303_v45 = vpop.f32.mrb[16].mxu0  ;;  %2093 = vst [vmem:[%s3781_s2 + $0xb0] sm:$0xf] %v2385_v27  ;;  %v2387_v30 = vpack.c.bf16 %v1677_v42, %v1677_v42  ;;  %v2596_v47 = vpop.f32.mrb[96].mxu1 }
 0x1b6   :  { %v1305_v49 = vpop.f32.mrb[17].mxu0  ;;  %v2597_v58 = vpop.f32.mrb[97].mxu1 }
 0x1b7   :  { %v2372_v50 = vpack.c.bf16 %v1305_v49, %v1303_v45  ;;  %v1307_v53 = vpop.f32.mrb[18].mxu0  ;;  %2095 = vst [vmem:[%s3781_s2 + $0xbc] sm:$0xf] %v2387_v30  ;;  %v2598_v12 = vadd.f32 %v2597_v58, %v2596_v47  ;;  %v2599_v55 = vpop.f32.mrb[98].mxu1 }
 0x1b8   :  { %v1309_v61 = vpop.f32.mrb[19].mxu0  ;;  %v2600_v57 = vpop.f32.mrb[99].mxu1 }
 0x1b9   :  { %2080 = vst [vmem:[%s3781_s2 + $0x60] sm:$0xff] %v2372_v50  ;;  %v2374_v15 = vpack.c.bf16 %v1309_v61, %v1307_v53  ;;  %v1682_v35 = vadd.f32 %v2598_v12, %v3523_v18  ;;  %v2601_v59 = vadd.f32 %v2600_v57, %v2599_v55 }
 0x1bb   :  { %2082 = vst [vmem:[%s3781_s2 + $0x6c] sm:$0xff] %v2374_v15  ;;  %v2389_v62 = vpack.c.bf16 %v1682_v35, %v1682_v35  ;;  %v1685_v38 = vadd.f32 %v2601_v59, %v3525_v21 }
 0x1bd   :  { %v1313_v63 = vpop.f32.mrb[20].mxu0  ;;  %2097 = vst [vmem:[%s3781_s2 + $0xc8] sm:$0xf] %v2389_v62  ;;  %v2391_v2 = vpack.c.bf16 %v1685_v38, %v1685_v38  ;;  %v2602_v4 = vpop.f32.mrb[100].mxu1 }
 0x1be   :  { %v1315_v7 = vpop.f32.mrb[21].mxu0  ;;  %v2603_v11 = vpop.f32.mrb[101].mxu1 }
 0x1bf   :  { %v2376_v8 = vpack.c.bf16 %v1315_v7, %v1313_v63  ;;  %v1317_v43 = vpop.f32.mrb[22].mxu0  ;;  %2099 = vst [vmem:[%s3781_s2 + $0xd4] sm:$0xf] %v2391_v2  ;;  %v2604_v18 = vadd.f32 %v2603_v11, %v2602_v4  ;;  %v2605_v0 = vpop.f32.mrb[102].mxu1 }
 0x1c0   :  { %v1319_v13 = vpop.f32.mrb[23].mxu0  ;;  %v2606_v16 = vpop.f32.mrb[103].mxu1 }
 0x1c1   :  { %2084 = vst [vmem:[%s3781_s2 + $0x78] sm:$0xff] %v2376_v8  ;;  %v2378_v21 = vpack.c.bf16 %v1319_v13, %v1317_v43  ;;  %v1690_v3 = vadd.f32 %v2604_v18, %v3527_v24  ;;  %v2607_v46 = vadd.f32 %v2606_v16, %v2605_v0 }
 0x1c3   :  { %2086 = vst [vmem:[%s3781_s2 + $0x84] sm:$0xff] %v2378_v21  ;;  %v2393_v17 = vpack.c.bf16 %v1690_v3, %v1690_v3  ;;  %v1693_v19 = vadd.f32 %v2607_v46, %v3529_v28 }
 0x1c5   :  { %v1323_v20 = vpop.f32.mrb[24].mxu0  ;;  %2101 = vst [vmem:[%s3781_s2 + $0xe0] sm:$0xf] %v2393_v17  ;;  %v2395_v22 = vpack.c.bf16 %v1693_v19, %v1693_v19  ;;  %v2608_v23 = vpop.f32.mrb[104].mxu1 }
 0x1c6   :  { %v1325_v25 = vpop.f32.mrb[25].mxu0  ;;  %v2609_v51 = vpop.f32.mrb[105].mxu1 }
 0x1c7   :  { %v2380_v26 = vpack.c.bf16 %v1325_v25, %v1323_v20  ;;  %v1327_v29 = vpop.f32.mrb[26].mxu0  ;;  %2103 = vst [vmem:[%s3781_s2 + $0xec] sm:$0xf] %v2395_v22  ;;  %v2610_v24 = vadd.f32 %v2609_v51, %v2608_v23  ;;  %v2611_v31 = vpop.f32.mrb[106].mxu1 }
 0x1c8   :  { %v1329_v54 = vpop.f32.mrb[27].mxu0  ;;  %v2612_v6 = vpop.f32.mrb[107].mxu1 }
 0x1c9   :  { %2088 = vst [vmem:[%s3781_s2 + $0x90] sm:$0xff] %v2380_v26  ;;  %v2382_v28 = vpack.c.bf16 %v1329_v54, %v1327_v29  ;;  %v1698_v33 = vadd.f32 %v2610_v24, %v3531_v32  ;;  %v2613_v34 = vadd.f32 %v2612_v6, %v2611_v31 }
 0x1cb   :  { %2090 = vst [vmem:[%s3781_s2 + $0x9c] sm:$0xff] %v2382_v28  ;;  %v2397_v9 = vpack.c.bf16 %v1698_v33, %v1698_v33  ;;  %v1701_v37 = vadd.f32 %v2613_v34, %v3533_v36 }
 0x1cd   :  { %v1333_v39 = vpop.f32.mrb[28].mxu0  ;;  %2105 = vst [vmem:[%s3781_s2 + $0xf8] sm:$0xf] %v2397_v9  ;;  %v2399_v41 = vpack.c.bf16 %v1701_v37, %v1701_v37  ;;  %v2614_v27 = vpop.f32.mrb[108].mxu1 }
 0x1ce   :  { %v1335_v42 = vpop.f32.mrb[29].mxu0  ;;  %v2615_v30 = vpop.f32.mrb[109].mxu1 }
 0x1cf   :  { %v2384_v45 = vpack.c.bf16 %v1335_v42, %v1333_v39  ;;  %v1337_v47 = vpop.f32.mrb[30].mxu0  ;;  %2107 = vst [vmem:[%s3781_s2 + $0x104] sm:$0xf] %v2399_v41  ;;  %v2616_v32 = vadd.f32 %v2615_v30, %v2614_v27  ;;  %v2617_v49 = vpop.f32.mrb[110].mxu1 }
 0x1d0   :  { %v1339_v50 = vpop.f32.mrb[31].mxu0  ;;  %v2618_v58 = vpop.f32.mrb[111].mxu1 }
 0x1d1   :  { %2092 = vst [vmem:[%s3781_s2 + $0xa8] sm:$0xff] %v2384_v45  ;;  %v2386_v36 = vpack.c.bf16 %v1339_v50, %v1337_v47  ;;  %v1706_v53 = vadd.f32 %v2616_v32, %v3535_v40  ;;  %v2619_v12 = vadd.f32 %v2618_v58, %v2617_v49 }
 0x1d3   :  { %2094 = vst [vmem:[%s3781_s2 + $0xb4] sm:$0xff] %v2386_v36  ;;  %v2401_v55 = vpack.c.bf16 %v1706_v53, %v1706_v53  ;;  %v1709_v61 = vadd.f32 %v2619_v12, %v3537_v44 }
 0x1d5   :  { %v1343_v15 = vpop.f32.mrb[32].mxu0  ;;  %2109 = vst [vmem:[%s3781_s2 + $0x110] sm:$0xf] %v2401_v55  ;;  %v2403_v57 = vpack.c.bf16 %v1709_v61, %v1709_v61  ;;  %v2620_v35 = vpop.f32.mrb[112].mxu1 }
 0x1d6   :  { %v1345_v59 = vpop.f32.mrb[33].mxu0  ;;  %v2621_v38 = vpop.f32.mrb[113].mxu1 }
 0x1d7   :  { %v2388_v62 = vpack.c.bf16 %v1345_v59, %v1343_v15  ;;  %v1347_v63 = vpop.f32.mrb[34].mxu0  ;;  %2111 = vst [vmem:[%s3781_s2 + $0x11c] sm:$0xf] %v2403_v57  ;;  %v2622_v40 = vadd.f32 %v2621_v38, %v2620_v35  ;;  %v2623_v2 = vpop.f32.mrb[114].mxu1 }
 0x1d8   :  { %v1349_v4 = vpop.f32.mrb[35].mxu0  ;;  %v2624_v7 = vpop.f32.mrb[115].mxu1 }
 0x1d9   :  { %2096 = vst [vmem:[%s3781_s2 + $0xc0] sm:$0xff] %v2388_v62  ;;  %v2390_v44 = vpack.c.bf16 %v1349_v4, %v1347_v63  ;;  %v1714_v8 = vadd.f32 %v2622_v40, %v3539_v48  ;;  %v2625_v11 = vadd.f32 %v2624_v7, %v2623_v2 }
 0x1db   :  { %2098 = vst [vmem:[%s3781_s2 + $0xcc] sm:$0xff] %v2390_v44  ;;  %v2405_v43 = vpack.c.bf16 %v1714_v8, %v1714_v8  ;;  %v1717_v18 = vadd.f32 %v2625_v11, %v3541_v52 }
 0x1dd   :  { %v1353_v0 = vpop.f32.mrb[36].mxu0  ;;  %2113 = vst [vmem:[%s3781_s2 + $0x128] sm:$0xf] %v2405_v43  ;;  %v2407_v13 = vpack.c.bf16 %v1717_v18, %v1717_v18  ;;  %v2626_v21 = vpop.f32.mrb[116].mxu1 }
 0x1de   :  { %v1355_v16 = vpop.f32.mrb[37].mxu0  ;;  %v2627_v46 = vpop.f32.mrb[117].mxu1 }
 0x1df   :  { %v2392_v3 = vpack.c.bf16 %v1355_v16, %v1353_v0  ;;  %v1357_v17 = vpop.f32.mrb[38].mxu0  ;;  %2115 = vst [vmem:[%s3781_s2 + $0x134] sm:$0xf] %v2407_v13  ;;  %v2628_v48 = vadd.f32 %v2627_v46, %v2626_v21  ;;  %v2629_v19 = vpop.f32.mrb[118].mxu1 }
 0x1e0   :  { %v1359_v20 = vpop.f32.mrb[39].mxu0  ;;  %v2630_v22 = vpop.f32.mrb[119].mxu1 }
 0x1e1   :  { %2100 = vst [vmem:[%s3781_s2 + $0xd8] sm:$0xff] %v2392_v3  ;;  %v2394_v52 = vpack.c.bf16 %v1359_v20, %v1357_v17  ;;  %v1722_v23 = vadd.f32 %v2628_v48, %v3543_v56  ;;  %v2631_v25 = vadd.f32 %v2630_v22, %v2629_v19 }
 0x1e3   :  { %2102 = vst [vmem:[%s3781_s2 + $0xe4] sm:$0xff] %v2394_v52  ;;  %v2409_v26 = vpack.c.bf16 %v1722_v23, %v1722_v23  ;;  %v1725_v51 = vadd.f32 %v2631_v25, %v3545_v60 }
 0x1e5   :  { %v1363_v29 = vpop.f32.mrb[40].mxu0  ;;  %2117 = vst [vmem:[%s3781_s2 + $0x140] sm:$0xf] %v2409_v26  ;;  %v2411_v24 = vpack.c.bf16 %v1725_v51, %v1725_v51  ;;  %v2632_v31 = vpop.f32.mrb[120].mxu1 }
 0x1e6   :  { %v1365_v54 = vpop.f32.mrb[41].mxu0  ;;  %v2633_v6 = vpop.f32.mrb[121].mxu1 }
 0x1e7   :  { %v2396_v28 = vpack.c.bf16 %v1365_v54, %v1363_v29  ;;  %v1367_v33 = vpop.f32.mrb[42].mxu0  ;;  %2119 = vst [vmem:[%s3781_s2 + $0x14c] sm:$0xf] %v2411_v24  ;;  %v2634_v56 = vadd.f32 %v2633_v6, %v2632_v31  ;;  %v2635_v34 = vpop.f32.mrb[122].mxu1 }
 0x1e8   :  { %v1369_v9 = vpop.f32.mrb[43].mxu0  ;;  %v2636_v37 = vpop.f32.mrb[123].mxu1 }
 0x1e9   :  { %2104 = vst [vmem:[%s3781_s2 + $0xf0] sm:$0xff] %v2396_v28  ;;  %v2398_v60 = vpack.c.bf16 %v1369_v9, %v1367_v33  ;;  %v1730_v39 = vadd.f32 %v2634_v56, %v3547_v1  ;;  %v2637_v41 = vadd.f32 %v2636_v37, %v2635_v34 }
 0x1eb   :  { %2106 = vst [vmem:[%s3781_s2 + $0xfc] sm:$0xff] %v2398_v60  ;;  %v2413_v27 = vpack.c.bf16 %v1730_v39, %v1730_v39  ;;  %v1733_v42 = vadd.f32 %v2637_v41, %v3549_v5 }
 0x1ed   :  { %v1373_v45 = vpop.f32.mrb[44].mxu0  ;;  %2121 = vst [vmem:[%s3781_s2 + $0x158] sm:$0xf] %v2413_v27  ;;  %v2415_v30 = vpack.c.bf16 %v1733_v42, %v1733_v42  ;;  %v2638_v47 = vpop.f32.mrb[124].mxu1 }
 0x1ee   :  { %v1375_v32 = vpop.f32.mrb[45].mxu0  ;;  %v2639_v50 = vpop.f32.mrb[125].mxu1 }
 0x1ef   :  { %v2400_v49 = vpack.c.bf16 %v1375_v32, %v1373_v45  ;;  %v1377_v36 = vpop.f32.mrb[46].mxu0  ;;  %2123 = vst [vmem:[%s3781_s2 + $0x164] sm:$0xf] %v2415_v30  ;;  %v2640_v1 = vadd.f32 %v2639_v50, %v2638_v47  ;;  %v2641_v58 = vpop.f32.mrb[126].mxu1 }
 0x1f0   :  { %v1379_v53 = vpop.f32.mrb[47].mxu0  ;;  %v2642_v12 = vpop.f32.mrb[127].mxu1 }
 0x1f1   :  { %2108 = vst [vmem:[%s3781_s2 + $0x108] sm:$0xff] %v2400_v49  ;;  %v2402_v5 = vpack.c.bf16 %v1379_v53, %v1377_v36  ;;  %v1738_v55 = vadd.f32 %v2640_v1, %v3551_v10  ;;  %v2643_v61 = vadd.f32 %v2642_v12, %v2641_v58 }
 0x1f3   :  { %2110 = vst [vmem:[%s3781_s2 + $0x114] sm:$0xff] %v2402_v5  ;;  %v2417_v15 = vpack.c.bf16 %v1738_v55, %v1738_v55  ;;  %v1741_v57 = vadd.f32 %v2643_v61, %v3553_v14 }
 0x1f5   :  { %v1383_v35 = vpop.f32.mrb[48].mxu0  ;;  %2125 = vst [vmem:[%s3781_s2 + $0x170] sm:$0xf] %v2417_v15  ;;  %v2419_v59 = vpack.c.bf16 %v1741_v57, %v1741_v57 }
 0x1f6   :  { %v1385_v62 = vpop.f32.mrb[49].mxu0 }
 0x1f7   :  { %v2404_v38 = vpack.c.bf16 %v1385_v62, %v1383_v35  ;;  %v1387_v63 = vpop.f32.mrb[50].mxu0  ;;  %2127 = vst [vmem:[%s3781_s2 + $0x17c] sm:$0xf] %v2419_v59 }
 0x1f8   :  { %v1389_v10 = vpop.f32.mrb[51].mxu0 }
 0x1f9   :  { %2112 = vst [vmem:[%s3781_s2 + $0x120] sm:$0xff] %v2404_v38  ;;  %v2406_v40 = vpack.c.bf16 %v1389_v10, %v1387_v63 }
 0x1fb   :  { %2114 = vst [vmem:[%s3781_s2 + $0x12c] sm:$0xff] %v2406_v40 }
 0x1fd   :  { %v1393_v14 = vpop.f32.mrb[52].mxu0 }
 0x1fe   :  { %v1395_v2 = vpop.f32.mrb[53].mxu0 }
 0x1ff   :  { %v2408_v4 = vpack.c.bf16 %v1395_v2, %v1393_v14  ;;  %v1397_v44 = vpop.f32.mrb[54].mxu0 }
 0x200   :  { %v1399_v7 = vpop.f32.mrb[55].mxu0 }
 0x201   :  { %2116 = vst [vmem:[%s3781_s2 + $0x138] sm:$0xff] %v2408_v4  ;;  %v2410_v8 = vpack.c.bf16 %v1399_v7, %v1397_v44 }
 0x203   :  { %2118 = vst [vmem:[%s3781_s2 + $0x144] sm:$0xff] %v2410_v8 }
 0x205   :  { %v1403_v11 = vpop.f32.mrb[56].mxu0 }
 0x206   :  { %v1405_v43 = vpop.f32.mrb[57].mxu0 }
 0x207   :  { %v2412_v18 = vpack.c.bf16 %v1405_v43, %v1403_v11  ;;  %v1407_v0 = vpop.f32.mrb[58].mxu0 }
 0x208   :  { %v1409_v13 = vpop.f32.mrb[59].mxu0 }
 0x209   :  { %2120 = vst [vmem:[%s3781_s2 + $0x150] sm:$0xff] %v2412_v18  ;;  %v2414_v21 = vpack.c.bf16 %v1409_v13, %v1407_v0 }
 0x20b   :  { %2122 = vst [vmem:[%s3781_s2 + $0x15c] sm:$0xff] %v2414_v21 }
 0x20d   :  { %v1413_v16 = vpop.f32.mrb[60].mxu0 }
 0x20e   :  { %v1415_v3 = vpop.f32.mrb[61].mxu0 }
 0x20f   :  { %v2416_v46 = vpack.c.bf16 %v1415_v3, %v1413_v16  ;;  %v1417_v17 = vpop.f32.mrb[62].mxu0 }
 0x210   :  { %v1419_v48 = vpop.f32.mrb[63].mxu0 }
 0x211   :  { %2124 = vst [vmem:[%s3781_s2 + $0x168] sm:$0xff] %v2416_v46  ;;  %v2418_v19 = vpack.c.bf16 %v1419_v48, %v1417_v17 }
 0x213   :  { %2126 = vst [vmem:[%s3781_s2 + $0x174] sm:$0xff] %v2418_v19 }

// kernel: net_forward.16
= control target key start
LH: loop header
LB: loop body
LE: loop exit
PB: predicated region body
PF: predicated region fallthrough
CT: control target
= control target key end

     0   :  { %v1595_v1 = vmov 0   ;;  %s2011_s1 = inlined_call_operand.vmem [shape: bf16[384,256], index: 1, kind: input, shape index: {}]   ;;  %s2012_s0 = inlined_call_operand.vmem [shape: bf16[256,384], index: 0, kind: input, shape index: {}]   ;;  %s2013_s2 = inlined_call_operand.vmem [shape: bf16[256,256], index: 2, kind: output, shape index: {}]  }
   0x1   :  { %v1459_v0 = vld [vmem:[%s2011_s1 + $0x4] ss:$8 sps:$4 sm:$0xff]   ;;  %845 = vmatprep.mubr.bf16.mxu0 %v1595_v1  ;;  %v1461_v2 = vld [vmem:[%s2011_s1] ss:$8 sps:$4 sm:$0xff]   ;;  %v1462_v3 = vld [vmem:[%s2011_s1 + $0x14] ss:$8 sps:$4 sm:$0xff]  }
   0x2   :  { %620 = vmatprep.subr.bf16.mxu1 %v1459_v0  ;;  %v1464_v4 = vld [vmem:[%s2011_s1 + $0x10] ss:$8 sps:$4 sm:$0xff]   ;;  %v1465_v5 = vld [vmem:[%s2011_s1 + $0x24] ss:$8 sps:$4 sm:$0xff]   ;;  %v1467_v6 = vld [vmem:[%s2011_s1 + $0x20] ss:$8 sps:$4 sm:$0xff]  }
   0x3   :  { %621 = vmatpush1.bf16.msra.mxu1 %v1461_v2  ;;  %v1468_v7 = vld [vmem:[%s2011_s1 + $0x34] ss:$8 sps:$4 sm:$0xff]   ;;  %v1470_v8 = vld [vmem:[%s2011_s1 + $0x30] ss:$8 sps:$4 sm:$0xff]   ;;  %v1483_v9 = vld [vmem:[%s2011_s1 + $0x104] ss:$8 sps:$4 sm:$0xff]  }
   0x4   :  { %622 = vmatprep.subr.bf16.mxu1 %v1462_v3  ;;  %v1485_v10 = vld [vmem:[%s2011_s1 + $0x100] ss:$8 sps:$4 sm:$0xff]   ;;  %v1471_v11 = vld [vmem:[%s2011_s1 + $0x44] ss:$8 sps:$4 sm:$0xff]   ;;  %813 = vmatprep.subr.bf16.mxu0 %v1483_v9  ;;  %v1489_v12 = vld [vmem:[%s2011_s1 + $0x114] ss:$8 sps:$4 sm:$0xff]  }
   0x5   :  { %814 = vmatpush1.bf16.msra.mxu0 %v1485_v10  ;;  %v1491_v13 = vld [vmem:[%s2011_s1 + $0x110] ss:$8 sps:$4 sm:$0xff]   ;;  %v1473_v14 = vld [vmem:[%s2011_s1 + $0x40] ss:$8 sps:$4 sm:$0xff]   ;;  %v1474_v15 = vld [vmem:[%s2011_s1 + $0x54] ss:$8 sps:$4 sm:$0xff]  }
   0x6   :  { %815 = vmatprep.subr.bf16.mxu0 %v1489_v12  ;;  %v1495_v16 = vld [vmem:[%s2011_s1 + $0x124] ss:$8 sps:$4 sm:$0xff]   ;;  %v1497_v17 = vld [vmem:[%s2011_s1 + $0x120] ss:$8 sps:$4 sm:$0xff]   ;;  %v1476_v18 = vld [vmem:[%s2011_s1 + $0x50] ss:$8 sps:$4 sm:$0xff]  }
   0x7   :  { %623 = vmatpush1.bf16.msra.mxu1 %v1464_v4  ;;  %v1501_v19 = vld [vmem:[%s2011_s1 + $0x134] ss:$8 sps:$4 sm:$0xff]   ;;  %v1477_v20 = vld [vmem:[%s2011_s1 + $0x64] ss:$8 sps:$4 sm:$0xff]   ;;  %v1503_v21 = vld [vmem:[%s2011_s1 + $0x130] ss:$8 sps:$4 sm:$0xff]  }
   0x8   :  { %624 = vmatprep.subr.bf16.mxu1 %v1465_v5  ;;  %v1479_v22 = vld [vmem:[%s2011_s1 + $0x60] ss:$8 sps:$4 sm:$0xff]   ;;  %v1507_v23 = vld [vmem:[%s2011_s1 + $0x144] ss:$8 sps:$4 sm:$0xff]   ;;  %v1480_v24 = vld [vmem:[%s2011_s1 + $0x74] ss:$8 sps:$4 sm:$0xff]  }
   0x9   :  { %816 = vmatpush1.bf16.msra.mxu0 %v1491_v13  ;;  %v1509_v25 = vld [vmem:[%s2011_s1 + $0x140] ss:$8 sps:$4 sm:$0xff]   ;;  %v1482_v26 = vld [vmem:[%s2011_s1 + $0x70] ss:$8 sps:$4 sm:$0xff]   ;;  %v1513_v27 = vld [vmem:[%s2011_s1 + $0x154] ss:$8 sps:$4 sm:$0xff]  }
   0xa   :  { %817 = vmatprep.subr.bf16.mxu0 %v1495_v16  ;;  %v1486_v28 = vld [vmem:[%s2011_s1 + $0x84] ss:$8 sps:$4 sm:$0xff]   ;;  %v1515_v29 = vld [vmem:[%s2011_s1 + $0x150] ss:$8 sps:$4 sm:$0xff]   ;;  %v1488_v30 = vld [vmem:[%s2011_s1 + $0x80] ss:$8 sps:$4 sm:$0xff]  }
   0xb   :  { %625 = vmatpush1.bf16.msra.mxu1 %v1467_v6  ;;  %v1519_v31 = vld [vmem:[%s2011_s1 + $0x164] ss:$8 sps:$4 sm:$0xff]   ;;  %v1492_v32 = vld [vmem:[%s2011_s1 + $0x94] ss:$8 sps:$4 sm:$0xff]   ;;  %v1494_v33 = vld [vmem:[%s2011_s1 + $0x90] ss:$8 sps:$4 sm:$0xff]  }
   0xc   :  { %626 = vmatprep.subr.bf16.mxu1 %v1468_v7  ;;  %v1521_v34 = vld [vmem:[%s2011_s1 + $0x160] ss:$8 sps:$4 sm:$0xff]   ;;  %v1534_v35 = vld [vmem:[%s2012_s0 + $0x4] ss:$12 sps:$4 sm:$0xff]   ;;  %v1525_v36 = vld [vmem:[%s2011_s1 + $0x174] ss:$8 sps:$4 sm:$0xff]  }
   0xd   :  { %818 = vmatpush1.bf16.msra.mxu0 %v1497_v17  ;;  %v1498_v37 = vld [vmem:[%s2011_s1 + $0xa4] ss:$8 sps:$4 sm:$0xff]   ;;  %652 = vmatprep.mubr.bf16.mxu1 %v1534_v35  ;;  %v1527_v38 = vld [vmem:[%s2011_s1 + $0x170] ss:$8 sps:$4 sm:$0xff]   ;;  %v1500_v39 = vld [vmem:[%s2011_s1 + $0xa0] ss:$8 sps:$4 sm:$0xff]  }
   0xe   :  { %819 = vmatprep.subr.bf16.mxu0 %v1501_v19  ;;  %v1504_v40 = vld [vmem:[%s2011_s1 + $0xb4] ss:$8 sps:$4 sm:$0xff]   ;;  %v1506_v42 = vld [vmem:[%s2011_s1 + $0xb0] ss:$8 sps:$4 sm:$0xff]   ;;  %v1510_v43 = vld [vmem:[%s2011_s1 + $0xc4] ss:$8 sps:$4 sm:$0xff]  }
   0xf   :  { %627 = vmatpush1.bf16.msra.mxu1 %v1470_v8  ;;  %v1531_v41 = vld [vmem:[%s2012_s0 + $0x8] ss:$12 sps:$4 sm:$0xff]   ;;  %v1535_v46 = vld [vmem:[%s2012_s0 + $0x20] ss:$12 sps:$4 sm:$0xff]   ;;  %v1518_v47 = vld [vmem:[%s2011_s1 + $0xd0] ss:$8 sps:$4 sm:$0xff]  }
  0x10   :  { %628 = vmatprep.subr.bf16.mxu1 %v1471_v11  ;;  %v1512_v44 = vld [vmem:[%s2011_s1 + $0xc0] ss:$8 sps:$4 sm:$0xff]   ;;  %v1516_v45 = vld [vmem:[%s2011_s1 + $0xd4] ss:$8 sps:$4 sm:$0xff]   ;;  %v1522_v48 = vld [vmem:[%s2011_s1 + $0xe4] ss:$8 sps:$4 sm:$0xff]  }
  0x11   :  { %820 = vmatpush1.bf16.msra.mxu0 %v1503_v21  ;;  %v1524_v49 = vld [vmem:[%s2011_s1 + $0xe0] ss:$8 sps:$4 sm:$0xff]   ;;  %v1528_v50 = vld [vmem:[%s2011_s1 + $0xf4] ss:$8 sps:$4 sm:$0xff]   ;;  %v1539_v51 = vld [vmem:[%s2012_s0 + $0x38] ss:$12 sps:$4 sm:$0xff]  }
  0x12   :  { %821 = vmatprep.subr.bf16.mxu0 %v1507_v23  ;;  %v1530_v52 = vld [vmem:[%s2011_s1 + $0xf0] ss:$8 sps:$4 sm:$0xff]   ;;  %v1532_v53 = vld [vmem:[%s2012_s0] ss:$12 sps:$4 sm:$0xff]   ;;  %v1536_v54 = vld [vmem:[%s2012_s0 + $0x1c] ss:$12 sps:$4 sm:$0xff]  }
  0x13   :  { %629 = vmatpush1.bf16.msra.mxu1 %v1473_v14  ;;  %v1543_v55 = vld [vmem:[%s2012_s0 + $0x50] ss:$12 sps:$4 sm:$0xff]   ;;  %v1538_v56 = vld [vmem:[%s2012_s0 + $0x18] ss:$12 sps:$4 sm:$0xff]   ;;  %v1540_v57 = vld [vmem:[%s2012_s0 + $0x34] ss:$12 sps:$4 sm:$0xff]  }
  0x14   :  { %630 = vmatprep.subr.bf16.mxu1 %v1474_v15  ;;  %v1547_v58 = vld [vmem:[%s2012_s0 + $0x68] ss:$12 sps:$4 sm:$0xff]   ;;  %v1542_v59 = vld [vmem:[%s2012_s0 + $0x30] ss:$12 sps:$4 sm:$0xff]   ;;  %v1544_v60 = vld [vmem:[%s2012_s0 + $0x4c] ss:$12 sps:$4 sm:$0xff]  }
  0x15   :  { %822 = vmatpush1.bf16.msra.mxu0 %v1509_v25  ;;  %v1551_v61 = vld [vmem:[%s2012_s0 + $0x80] ss:$12 sps:$4 sm:$0xff]   ;;  %v1546_v62 = vld [vmem:[%s2012_s0 + $0x48] ss:$12 sps:$4 sm:$0xff]   ;;  %v1548_v63 = vld [vmem:[%s2012_s0 + $0x64] ss:$12 sps:$4 sm:$0xff]  }
  0x16   :  { %823 = vmatprep.subr.bf16.mxu0 %v1513_v27  ;;  %v1555_v0 = vld [vmem:[%s2012_s0 + $0x98] ss:$12 sps:$4 sm:$0xff]   ;;  %v1550_v2 = vld [vmem:[%s2012_s0 + $0x60] ss:$12 sps:$4 sm:$0xff]   ;;  %v1552_v3 = vld [vmem:[%s2012_s0 + $0x7c] ss:$12 sps:$4 sm:$0xff]  }
  0x17   :  { %631 = vmatpush1.bf16.msra.mxu1 %v1476_v18  ;;  %v1559_v4 = vld [vmem:[%s2012_s0 + $0xb0] ss:$12 sps:$4 sm:$0xff]   ;;  %v1554_v5 = vld [vmem:[%s2012_s0 + $0x78] ss:$12 sps:$4 sm:$0xff]   ;;  %v1556_v6 = vld [vmem:[%s2012_s0 + $0x94] ss:$12 sps:$4 sm:$0xff]  }
  0x18   :  { %632 = vmatprep.subr.bf16.mxu1 %v1477_v20  ;;  %v1563_v7 = vld [vmem:[%s2012_s0 + $0xc8] ss:$12 sps:$4 sm:$0xff]   ;;  %v1558_v8 = vld [vmem:[%s2012_s0 + $0x90] ss:$12 sps:$4 sm:$0xff]   ;;  %v1560_v9 = vld [vmem:[%s2012_s0 + $0xac] ss:$12 sps:$4 sm:$0xff]  }
  0x19   :  { %824 = vmatpush1.bf16.msra.mxu0 %v1515_v29  ;;  %v1567_v10 = vld [vmem:[%s2012_s0 + $0xe0] ss:$12 sps:$4 sm:$0xff]   ;;  %v1562_v11 = vld [vmem:[%s2012_s0 + $0xa8] ss:$12 sps:$4 sm:$0xff]   ;;  %v1564_v12 = vld [vmem:[%s2012_s0 + $0xc4] ss:$12 sps:$4 sm:$0xff]  }
  0x1a   :  { %825 = vmatprep.subr.bf16.mxu0 %v1519_v31  ;;  %v1571_v13 = vld [vmem:[%s2012_s0 + $0xf8] ss:$12 sps:$4 sm:$0xff]   ;;  %v1566_v14 = vld [vmem:[%s2012_s0 + $0xc0] ss:$12 sps:$4 sm:$0xff]   ;;  %v1568_v15 = vld [vmem:[%s2012_s0 + $0xdc] ss:$12 sps:$4 sm:$0xff]  }
  0x1b   :  { %633 = vmatpush1.bf16.msra.mxu1 %v1479_v22  ;;  %v1575_v16 = vld [vmem:[%s2012_s0 + $0x110] ss:$12 sps:$4 sm:$0xff]   ;;  %v1570_v17 = vld [vmem:[%s2012_s0 + $0xd8] ss:$12 sps:$4 sm:$0xff]   ;;  %v1572_v18 = vld [vmem:[%s2012_s0 + $0xf4] ss:$12 sps:$4 sm:$0xff]  }
  0x1c   :  { %634 = vmatprep.subr.bf16.mxu1 %v1480_v24  ;;  %v1579_v19 = vld [vmem:[%s2012_s0 + $0x128] ss:$12 sps:$4 sm:$0xff]   ;;  %v1574_v20 = vld [vmem:[%s2012_s0 + $0xf0] ss:$12 sps:$4 sm:$0xff]   ;;  %v1576_v21 = vld [vmem:[%s2012_s0 + $0x10c] ss:$12 sps:$4 sm:$0xff]  }
  0x1d   :  { %826 = vmatpush1.bf16.msra.mxu0 %v1521_v34  ;;  %v1583_v22 = vld [vmem:[%s2012_s0 + $0x140] ss:$12 sps:$4 sm:$0xff]   ;;  %v1578_v23 = vld [vmem:[%s2012_s0 + $0x108] ss:$12 sps:$4 sm:$0xff]   ;;  %v1580_v24 = vld [vmem:[%s2012_s0 + $0x124] ss:$12 sps:$4 sm:$0xff]  }
  0x1e   :  { %827 = vmatprep.subr.bf16.mxu0 %v1525_v36  ;;  %v1587_v25 = vld [vmem:[%s2012_s0 + $0x158] ss:$12 sps:$4 sm:$0xff]   ;;  %v1584_v27 = vld [vmem:[%s2012_s0 + $0x13c] ss:$12 sps:$4 sm:$0xff]  }
  0x1f   :  { %635 = vmatpush1.bf16.msra.mxu1 %v1482_v26  ;;  %v1582_v26 = vld [vmem:[%s2012_s0 + $0x120] ss:$12 sps:$4 sm:$0xff]   ;;  %v1586_v29 = vld [vmem:[%s2012_s0 + $0x138] ss:$12 sps:$4 sm:$0xff]  }
  0x20   :  { %636 = vmatprep.subr.bf16.mxu1 %v1486_v28  ;;  %v1591_v28 = vld [vmem:[%s2012_s0 + $0x170] ss:$12 sps:$4 sm:$0xff]   ;;  %v1592_v31 = vld [vmem:[%s2012_s0 + $0x16c] ss:$12 sps:$4 sm:$0xff]  }
  0x21   :  { %828 = vmatpush1.bf16.msra.mxu0 %v1527_v38 }
  0x23   :  { %637 = vmatpush1.bf16.msra.mxu1 %v1488_v30  ;;  %v1588_v30 = vld [vmem:[%s2012_s0 + $0x154] ss:$12 sps:$4 sm:$0xff]  }
  0x24   :  { %638 = vmatprep.subr.bf16.mxu1 %v1492_v32  ;;  %846 = vmatmul.mubr.bf16.vlgmr.msra.gmra.mrb[0].mxu0 %v1531_v41  ;;  %v1594_v32 = vld [vmem:[%s2012_s0 + $0x168] ss:$12 sps:$4 sm:$0xff]  }
  0x25   :  { %855 = vmatprep.mubr.bf16.mxu0 %v1595_v1 }
  0x27   :  { %639 = vmatpush1.bf16.msra.mxu1 %v1494_v33 }
  0x28   :  { %640 = vmatprep.subr.bf16.mxu1 %v1498_v37 }
  0x2b   :  { %641 = vmatpush1.bf16.msra.mxu1 %v1500_v39 }
  0x2c   :  { %642 = vmatprep.subr.bf16.mxu1 %v1504_v40  ;;  %856 = vmatmul.mubr.bf16.gmra.mrb[4].mxu0 %v1535_v46 }
  0x2d   :  { %865 = vmatprep.mubr.bf16.mxu0 %v1595_v1 }
  0x2f   :  { %643 = vmatpush1.bf16.msra.mxu1 %v1506_v42 }
  0x30   :  { %644 = vmatprep.subr.bf16.mxu1 %v1510_v43 }
  0x33   :  { %645 = vmatpush1.bf16.msra.mxu1 %v1512_v44 }
  0x34   :  { %646 = vmatprep.subr.bf16.mxu1 %v1516_v45  ;;  %866 = vmatmul.mubr.bf16.gmra.mrb[8].mxu0 %v1539_v51 }
  0x35   :  { %875 = vmatprep.mubr.bf16.mxu0 %v1595_v1 }
  0x37   :  { %647 = vmatpush1.bf16.msra.mxu1 %v1518_v47 }
  0x38   :  { %648 = vmatprep.subr.bf16.mxu1 %v1522_v48 }
  0x3b   :  { %649 = vmatpush1.bf16.msra.mxu1 %v1524_v49 }
  0x3c   :  { %650 = vmatprep.subr.bf16.mxu1 %v1528_v50  ;;  %876 = vmatmul.mubr.bf16.gmra.mrb[12].mxu0 %v1543_v55 }
  0x3d   :  { %885 = vmatprep.mubr.bf16.mxu0 %v1595_v1 }
  0x3f   :  { %651 = vmatpush1.bf16.msra.mxu1 %v1530_v52 }
  0x42   :  { %653 = vmatmul.mubr.bf16.vlgmr.msra.gmra.mrb[0].mxu1 %v1532_v53 }
  0x43   :  { %662 = vmatprep.mubr.bf16.mxu1 %v1536_v54 }
  0x44   :  { %886 = vmatmul.mubr.bf16.gmra.mrb[16].mxu0 %v1547_v58 }
  0x45   :  { %895 = vmatprep.mubr.bf16.mxu0 %v1595_v1 }
  0x4a   :  { %663 = vmatmul.mubr.bf16.gmra.mrb[4].mxu1 %v1538_v56 }
  0x4b   :  { %672 = vmatprep.mubr.bf16.mxu1 %v1540_v57 }
  0x4c   :  { %896 = vmatmul.mubr.bf16.gmra.mrb[20].mxu0 %v1551_v61 }
  0x4d   :  { %905 = vmatprep.mubr.bf16.mxu0 %v1595_v1 }
  0x52   :  { %673 = vmatmul.mubr.bf16.gmra.mrb[8].mxu1 %v1542_v59 }
  0x53   :  { %682 = vmatprep.mubr.bf16.mxu1 %v1544_v60 }
  0x54   :  { %906 = vmatmul.mubr.bf16.gmra.mrb[24].mxu0 %v1555_v0 }
  0x55   :  { %915 = vmatprep.mubr.bf16.mxu0 %v1595_v1 }
  0x5a   :  { %683 = vmatmul.mubr.bf16.gmra.mrb[12].mxu1 %v1546_v62 }
  0x5b   :  { %692 = vmatprep.mubr.bf16.mxu1 %v1548_v63 }
  0x5c   :  { %916 = vmatmul.mubr.bf16.gmra.mrb[28].mxu0 %v1559_v4 }
  0x5d   :  { %925 = vmatprep.mubr.bf16.mxu0 %v1595_v1 }
  0x62   :  { %693 = vmatmul.mubr.bf16.gmra.mrb[16].mxu1 %v1550_v2 }
  0x63   :  { %702 = vmatprep.mubr.bf16.mxu1 %v1552_v3 }
  0x64   :  { %926 = vmatmul.mubr.bf16.gmra.mrb[32].mxu0 %v1563_v7 }
  0x65   :  { %935 = vmatprep.mubr.bf16.mxu0 %v1595_v1 }
  0x6a   :  { %703 = vmatmul.mubr.bf16.gmra.mrb[20].mxu1 %v1554_v5 }
  0x6b   :  { %712 = vmatprep.mubr.bf16.mxu1 %v1556_v6 }
  0x6c   :  { %936 = vmatmul.mubr.bf16.gmra.mrb[36].mxu0 %v1567_v10 }
  0x6d   :  { %945 = vmatprep.mubr.bf16.mxu0 %v1595_v1 }
  0x72   :  { %713 = vmatmul.mubr.bf16.gmra.mrb[24].mxu1 %v1558_v8 }
  0x73   :  { %722 = vmatprep.mubr.bf16.mxu1 %v1560_v9 }
  0x74   :  { %946 = vmatmul.mubr.bf16.gmra.mrb[40].mxu0 %v1571_v13 }
  0x75   :  { %955 = vmatprep.mubr.bf16.mxu0 %v1595_v1 }
  0x7a   :  { %723 = vmatmul.mubr.bf16.gmra.mrb[28].mxu1 %v1562_v11 }
  0x7b   :  { %732 = vmatprep.mubr.bf16.mxu1 %v1564_v12 }
  0x7c   :  { %956 = vmatmul.mubr.bf16.gmra.mrb[44].mxu0 %v1575_v16 }
  0x7d   :  { %965 = vmatprep.mubr.bf16.mxu0 %v1595_v1 }
  0x82   :  { %733 = vmatmul.mubr.bf16.gmra.mrb[32].mxu1 %v1566_v14 }
  0x83   :  { %742 = vmatprep.mubr.bf16.mxu1 %v1568_v15 }
  0x84   :  { %966 = vmatmul.mubr.bf16.gmra.mrb[48].mxu0 %v1579_v19 }
  0x85   :  { %975 = vmatprep.mubr.bf16.mxu0 %v1595_v1 }
  0x8a   :  { %743 = vmatmul.mubr.bf16.gmra.mrb[36].mxu1 %v1570_v17 }
  0x8b   :  { %752 = vmatprep.mubr.bf16.mxu1 %v1572_v18 }
  0x8c   :  { %976 = vmatmul.mubr.bf16.gmra.mrb[52].mxu0 %v1583_v22 }
  0x8d   :  { %985 = vmatprep.mubr.bf16.mxu0 %v1595_v1 }
  0x92   :  { %753 = vmatmul.mubr.bf16.gmra.mrb[40].mxu1 %v1574_v20 }
  0x93   :  { %762 = vmatprep.mubr.bf16.mxu1 %v1576_v21 }
  0x94   :  { %986 = vmatmul.mubr.bf16.gmra.mrb[56].mxu0 %v1587_v25 }
  0x95   :  { %995 = vmatprep.mubr.bf16.mxu0 %v1595_v1  ;;  %v1590_v1 = vld [vmem:[%s2012_s0 + $0x150] ss:$12 sps:$4 sm:$0xff]  }
  0x9a   :  { %763 = vmatmul.mubr.bf16.gmra.mrb[44].mxu1 %v1578_v23 }
  0x9b   :  { %772 = vmatprep.mubr.bf16.mxu1 %v1580_v24 }
  0x9c   :  { %996 = vmatmul.mubr.bf16.gmra.mrb[60].mxu0 %v1591_v28 }
  0xa2   :  { %773 = vmatmul.mubr.bf16.gmra.mrb[48].mxu1 %v1582_v26 }
  0xa3   :  { %782 = vmatprep.mubr.bf16.mxu1 %v1584_v27 }
  0xaa   :  { %783 = vmatmul.mubr.bf16.gmra.mrb[52].mxu1 %v1586_v29 }
  0xab   :  { %792 = vmatprep.mubr.bf16.mxu1 %v1588_v30 }
  0xb2   :  { %793 = vmatmul.mubr.bf16.gmra.mrb[56].mxu1 %v1590_v1 }
  0xb3   :  { %802 = vmatprep.mubr.bf16.mxu1 %v1592_v31 }
  0xba   :  { %803 = vmatmul.mubr.bf16.gmra.mrb[60].mxu1 %v1594_v32 }
  0xf7   :  { %v847_v33 = vpop.f32.mrb[0].mxu0 }
  0xf8   :  { %v849_v34 = vpop.f32.mrb[1].mxu0 }
  0xf9   :  { %v851_v35 = vpop.f32.mrb[2].mxu0 }
  0xfa   :  { %v853_v36 = vpop.f32.mrb[3].mxu0 }
  0xff   :  { %v857_v37 = vpop.f32.mrb[4].mxu0 }
 0x100   :  { %v859_v38 = vpop.f32.mrb[5].mxu0 }
 0x101   :  { %v861_v39 = vpop.f32.mrb[6].mxu0 }
 0x102   :  { %v863_v40 = vpop.f32.mrb[7].mxu0 }
 0x107   :  { %v867_v41 = vpop.f32.mrb[8].mxu0 }
 0x108   :  { %v869_v42 = vpop.f32.mrb[9].mxu0 }
 0x109   :  { %v871_v43 = vpop.f32.mrb[10].mxu0 }
 0x10a   :  { %v873_v44 = vpop.f32.mrb[11].mxu0 }
 0x10f   :  { %v877_v52 = vpop.f32.mrb[12].mxu0 }
 0x110   :  { %v879_v55 = vpop.f32.mrb[13].mxu0 }
 0x111   :  { %v881_v56 = vpop.f32.mrb[14].mxu0 }
 0x112   :  { %v883_v58 = vpop.f32.mrb[15].mxu0 }
 0x115   :  { %v654_v45 = vpop.f32.mrb[0].mxu1 }
 0x116   :  { %v848_v46 = vadd.f32 %v847_v33, %v654_v45  ;;  %v656_v47 = vpop.f32.mrb[1].mxu1 }
 0x117   :  { %v850_v48 = vadd.f32 %v849_v34, %v656_v47  ;;  %v658_v49 = vpop.f32.mrb[2].mxu1  ;;  %v887_v3 = vpop.f32.mrb[16].mxu0 }
 0x118   :  { %v852_v50 = vadd.f32 %v851_v35, %v658_v49  ;;  %v660_v51 = vpop.f32.mrb[3].mxu1  ;;  %v889_v6 = vpop.f32.mrb[17].mxu0 }
 0x119   :  { %v1362_v53 = vpack.c.bf16 %v850_v48, %v848_v46  ;;  %v854_v54 = vadd.f32 %v853_v36, %v660_v51  ;;  %v891_v7 = vpop.f32.mrb[18].mxu0 }
 0x11a   :  { %v893_v9 = vpop.f32.mrb[19].mxu0 }
 0x11b   :  { %1198 = vst [vmem:[%s2013_s2] sm:$0xff] %v1362_v53  ;;  %v1363_v57 = vpack.c.bf16 %v854_v54, %v852_v50 }
 0x11d   :  { %1199 = vst [vmem:[%s2013_s2 + $0x8] sm:$0xff] %v1363_v57  ;;  %v664_v59 = vpop.f32.mrb[4].mxu1 }
 0x11e   :  { %v858_v60 = vadd.f32 %v857_v37, %v664_v59  ;;  %v666_v61 = vpop.f32.mrb[5].mxu1 }
 0x11f   :  { %v860_v62 = vadd.f32 %v859_v38, %v666_v61  ;;  %v668_v63 = vpop.f32.mrb[6].mxu1  ;;  %v897_v17 = vpop.f32.mrb[20].mxu0 }
 0x120   :  { %v862_v0 = vadd.f32 %v861_v39, %v668_v63  ;;  %v670_v2 = vpop.f32.mrb[7].mxu1  ;;  %v899_v20 = vpop.f32.mrb[21].mxu0 }
 0x121   :  { %v1364_v4 = vpack.c.bf16 %v860_v62, %v858_v60  ;;  %v864_v5 = vadd.f32 %v863_v40, %v670_v2  ;;  %v901_v21 = vpop.f32.mrb[22].mxu0 }
 0x122   :  { %v903_v23 = vpop.f32.mrb[23].mxu0 }
 0x123   :  { %1200 = vst [vmem:[%s2013_s2 + $0x10] sm:$0xff] %v1364_v4  ;;  %v1365_v8 = vpack.c.bf16 %v864_v5, %v862_v0 }
 0x125   :  { %1201 = vst [vmem:[%s2013_s2 + $0x18] sm:$0xff] %v1365_v8  ;;  %v674_v10 = vpop.f32.mrb[8].mxu1 }
 0x126   :  { %v868_v11 = vadd.f32 %v867_v41, %v674_v10  ;;  %v676_v12 = vpop.f32.mrb[9].mxu1 }
 0x127   :  { %v870_v13 = vadd.f32 %v869_v42, %v676_v12  ;;  %v678_v14 = vpop.f32.mrb[10].mxu1  ;;  %v907_v1 = vpop.f32.mrb[24].mxu0 }
 0x128   :  { %v872_v15 = vadd.f32 %v871_v43, %v678_v14  ;;  %v680_v16 = vpop.f32.mrb[11].mxu1  ;;  %v909_v33 = vpop.f32.mrb[25].mxu0 }
 0x129   :  { %v1366_v18 = vpack.c.bf16 %v870_v13, %v868_v11  ;;  %v874_v19 = vadd.f32 %v873_v44, %v680_v16  ;;  %v911_v34 = vpop.f32.mrb[26].mxu0 }
 0x12a   :  { %v913_v36 = vpop.f32.mrb[27].mxu0 }
 0x12b   :  { %1202 = vst [vmem:[%s2013_s2 + $0x20] sm:$0xff] %v1366_v18  ;;  %v1367_v22 = vpack.c.bf16 %v874_v19, %v872_v15 }
 0x12d   :  { %1203 = vst [vmem:[%s2013_s2 + $0x28] sm:$0xff] %v1367_v22  ;;  %v684_v24 = vpop.f32.mrb[12].mxu1 }
 0x12e   :  { %v878_v25 = vadd.f32 %v877_v52, %v684_v24  ;;  %v686_v26 = vpop.f32.mrb[13].mxu1 }
 0x12f   :  { %v880_v27 = vadd.f32 %v879_v55, %v686_v26  ;;  %v688_v28 = vpop.f32.mrb[14].mxu1  ;;  %v917_v44 = vpop.f32.mrb[28].mxu0 }
 0x130   :  { %v882_v29 = vadd.f32 %v881_v56, %v688_v28  ;;  %v690_v30 = vpop.f32.mrb[15].mxu1  ;;  %v919_v47 = vpop.f32.mrb[29].mxu0 }
 0x131   :  { %v1368_v31 = vpack.c.bf16 %v880_v27, %v878_v25  ;;  %v884_v32 = vadd.f32 %v883_v58, %v690_v30  ;;  %v921_v48 = vpop.f32.mrb[30].mxu0 }
 0x132   :  { %v923_v50 = vpop.f32.mrb[31].mxu0 }
 0x133   :  { %1204 = vst [vmem:[%s2013_s2 + $0x30] sm:$0xff] %v1368_v31  ;;  %v1369_v35 = vpack.c.bf16 %v884_v32, %v882_v29 }
 0x135   :  { %1205 = vst [vmem:[%s2013_s2 + $0x38] sm:$0xff] %v1369_v35  ;;  %v694_v37 = vpop.f32.mrb[16].mxu1 }
 0x136   :  { %v888_v38 = vadd.f32 %v887_v3, %v694_v37  ;;  %v696_v39 = vpop.f32.mrb[17].mxu1 }
 0x137   :  { %v890_v40 = vadd.f32 %v889_v6, %v696_v39  ;;  %v698_v41 = vpop.f32.mrb[18].mxu1  ;;  %v927_v58 = vpop.f32.mrb[32].mxu0 }
 0x138   :  { %v892_v42 = vadd.f32 %v891_v7, %v698_v41  ;;  %v700_v43 = vpop.f32.mrb[19].mxu1  ;;  %v929_v61 = vpop.f32.mrb[33].mxu0 }
 0x139   :  { %v1370_v45 = vpack.c.bf16 %v890_v40, %v888_v38  ;;  %v894_v46 = vadd.f32 %v893_v9, %v700_v43  ;;  %v931_v62 = vpop.f32.mrb[34].mxu0 }
 0x13a   :  { %v933_v0 = vpop.f32.mrb[35].mxu0 }
 0x13b   :  { %1206 = vst [vmem:[%s2013_s2 + $0x40] sm:$0xff] %v1370_v45  ;;  %v1371_v49 = vpack.c.bf16 %v894_v46, %v892_v42 }
 0x13d   :  { %1207 = vst [vmem:[%s2013_s2 + $0x48] sm:$0xff] %v1371_v49  ;;  %v704_v51 = vpop.f32.mrb[20].mxu1 }
 0x13e   :  { %v898_v52 = vadd.f32 %v897_v17, %v704_v51  ;;  %v706_v53 = vpop.f32.mrb[21].mxu1 }
 0x13f   :  { %v900_v54 = vadd.f32 %v899_v20, %v706_v53  ;;  %v708_v55 = vpop.f32.mrb[22].mxu1  ;;  %v937_v9 = vpop.f32.mrb[36].mxu0 }
 0x140   :  { %v902_v56 = vadd.f32 %v901_v21, %v708_v55  ;;  %v710_v57 = vpop.f32.mrb[23].mxu1  ;;  %v939_v12 = vpop.f32.mrb[37].mxu0 }
 0x141   :  { %v1372_v59 = vpack.c.bf16 %v900_v54, %v898_v52  ;;  %v904_v60 = vadd.f32 %v903_v23, %v710_v57  ;;  %v941_v13 = vpop.f32.mrb[38].mxu0 }
 0x142   :  { %v943_v15 = vpop.f32.mrb[39].mxu0 }
 0x143   :  { %1208 = vst [vmem:[%s2013_s2 + $0x50] sm:$0xff] %v1372_v59  ;;  %v1373_v63 = vpack.c.bf16 %v904_v60, %v902_v56 }
 0x145   :  { %1209 = vst [vmem:[%s2013_s2 + $0x58] sm:$0xff] %v1373_v63  ;;  %v714_v2 = vpop.f32.mrb[24].mxu1 }
 0x146   :  { %v908_v3 = vadd.f32 %v907_v1, %v714_v2  ;;  %v716_v4 = vpop.f32.mrb[25].mxu1 }
 0x147   :  { %v910_v5 = vadd.f32 %v909_v33, %v716_v4  ;;  %v718_v6 = vpop.f32.mrb[26].mxu1  ;;  %v947_v23 = vpop.f32.mrb[40].mxu0 }
 0x148   :  { %v912_v7 = vadd.f32 %v911_v34, %v718_v6  ;;  %v720_v8 = vpop.f32.mrb[27].mxu1  ;;  %v949_v26 = vpop.f32.mrb[41].mxu0 }
 0x149   :  { %v1374_v10 = vpack.c.bf16 %v910_v5, %v908_v3  ;;  %v914_v11 = vadd.f32 %v913_v36, %v720_v8  ;;  %v951_v27 = vpop.f32.mrb[42].mxu0 }
 0x14a   :  { %v953_v29 = vpop.f32.mrb[43].mxu0 }
 0x14b   :  { %1210 = vst [vmem:[%s2013_s2 + $0x60] sm:$0xff] %v1374_v10  ;;  %v1375_v14 = vpack.c.bf16 %v914_v11, %v912_v7 }
 0x14d   :  { %1211 = vst [vmem:[%s2013_s2 + $0x68] sm:$0xff] %v1375_v14  ;;  %v724_v16 = vpop.f32.mrb[28].mxu1 }
 0x14e   :  { %v918_v17 = vadd.f32 %v917_v44, %v724_v16  ;;  %v726_v18 = vpop.f32.mrb[29].mxu1 }
 0x14f   :  { %v920_v19 = vadd.f32 %v919_v47, %v726_v18  ;;  %v728_v20 = vpop.f32.mrb[30].mxu1  ;;  %v957_v36 = vpop.f32.mrb[44].mxu0 }
 0x150   :  { %v922_v21 = vadd.f32 %v921_v48, %v728_v20  ;;  %v730_v22 = vpop.f32.mrb[31].mxu1  ;;  %v959_v39 = vpop.f32.mrb[45].mxu0 }
 0x151   :  { %v1376_v24 = vpack.c.bf16 %v920_v19, %v918_v17  ;;  %v924_v25 = vadd.f32 %v923_v50, %v730_v22  ;;  %v961_v40 = vpop.f32.mrb[46].mxu0 }
 0x152   :  { %v963_v42 = vpop.f32.mrb[47].mxu0 }
 0x153   :  { %1212 = vst [vmem:[%s2013_s2 + $0x70] sm:$0xff] %v1376_v24  ;;  %v1377_v28 = vpack.c.bf16 %v924_v25, %v922_v21 }
 0x155   :  { %1213 = vst [vmem:[%s2013_s2 + $0x78] sm:$0xff] %v1377_v28  ;;  %v734_v30 = vpop.f32.mrb[32].mxu1 }
 0x156   :  { %v928_v1 = vadd.f32 %v927_v58, %v734_v30  ;;  %v736_v31 = vpop.f32.mrb[33].mxu1 }
 0x157   :  { %v930_v32 = vadd.f32 %v929_v61, %v736_v31  ;;  %v738_v33 = vpop.f32.mrb[34].mxu1  ;;  %v967_v50 = vpop.f32.mrb[48].mxu0 }
 0x158   :  { %v932_v34 = vadd.f32 %v931_v62, %v738_v33  ;;  %v740_v35 = vpop.f32.mrb[35].mxu1  ;;  %v969_v53 = vpop.f32.mrb[49].mxu0 }
 0x159   :  { %v1378_v37 = vpack.c.bf16 %v930_v32, %v928_v1  ;;  %v934_v38 = vadd.f32 %v933_v0, %v740_v35  ;;  %v971_v54 = vpop.f32.mrb[50].mxu0 }
 0x15a   :  { %v973_v56 = vpop.f32.mrb[51].mxu0 }
 0x15b   :  { %1214 = vst [vmem:[%s2013_s2 + $0x80] sm:$0xff] %v1378_v37  ;;  %v1379_v41 = vpack.c.bf16 %v934_v38, %v932_v34 }
 0x15d   :  { %1215 = vst [vmem:[%s2013_s2 + $0x88] sm:$0xff] %v1379_v41  ;;  %v744_v43 = vpop.f32.mrb[36].mxu1 }
 0x15e   :  { %v938_v44 = vadd.f32 %v937_v9, %v744_v43  ;;  %v746_v45 = vpop.f32.mrb[37].mxu1 }
 0x15f   :  { %v940_v46 = vadd.f32 %v939_v12, %v746_v45  ;;  %v748_v47 = vpop.f32.mrb[38].mxu1  ;;  %v977_v0 = vpop.f32.mrb[52].mxu0 }
 0x160   :  { %v942_v48 = vadd.f32 %v941_v13, %v748_v47  ;;  %v750_v49 = vpop.f32.mrb[39].mxu1  ;;  %v979_v4 = vpop.f32.mrb[53].mxu0 }
 0x161   :  { %v1380_v51 = vpack.c.bf16 %v940_v46, %v938_v44  ;;  %v944_v52 = vadd.f32 %v943_v15, %v750_v49  ;;  %v981_v5 = vpop.f32.mrb[54].mxu0 }
 0x162   :  { %v983_v7 = vpop.f32.mrb[55].mxu0 }
 0x163   :  { %1216 = vst [vmem:[%s2013_s2 + $0x90] sm:$0xff] %v1380_v51  ;;  %v1381_v55 = vpack.c.bf16 %v944_v52, %v942_v48 }
 0x165   :  { %1217 = vst [vmem:[%s2013_s2 + $0x98] sm:$0xff] %v1381_v55  ;;  %v754_v57 = vpop.f32.mrb[40].mxu1 }
 0x166   :  { %v948_v58 = vadd.f32 %v947_v23, %v754_v57  ;;  %v756_v59 = vpop.f32.mrb[41].mxu1 }
 0x167   :  { %v950_v60 = vadd.f32 %v949_v26, %v756_v59  ;;  %v758_v61 = vpop.f32.mrb[42].mxu1  ;;  %v987_v15 = vpop.f32.mrb[56].mxu0 }
 0x168   :  { %v952_v62 = vadd.f32 %v951_v27, %v758_v61  ;;  %v760_v63 = vpop.f32.mrb[43].mxu1  ;;  %v989_v18 = vpop.f32.mrb[57].mxu0 }
 0x169   :  { %v1382_v2 = vpack.c.bf16 %v950_v60, %v948_v58  ;;  %v954_v3 = vadd.f32 %v953_v29, %v760_v63  ;;  %v991_v19 = vpop.f32.mrb[58].mxu0 }
 0x16a   :  { %v993_v21 = vpop.f32.mrb[59].mxu0 }
 0x16b   :  { %1218 = vst [vmem:[%s2013_s2 + $0xa0] sm:$0xff] %v1382_v2  ;;  %v1383_v6 = vpack.c.bf16 %v954_v3, %v952_v62 }
 0x16d   :  { %1219 = vst [vmem:[%s2013_s2 + $0xa8] sm:$0xff] %v1383_v6  ;;  %v764_v8 = vpop.f32.mrb[44].mxu1 }
 0x16e   :  { %v958_v9 = vadd.f32 %v957_v36, %v764_v8  ;;  %v766_v10 = vpop.f32.mrb[45].mxu1 }
 0x16f   :  { %v960_v11 = vadd.f32 %v959_v39, %v766_v10  ;;  %v768_v12 = vpop.f32.mrb[46].mxu1  ;;  %v997_v29 = vpop.f32.mrb[60].mxu0 }
 0x170   :  { %v962_v13 = vadd.f32 %v961_v40, %v768_v12  ;;  %v770_v14 = vpop.f32.mrb[47].mxu1  ;;  %v999_v31 = vpop.f32.mrb[61].mxu0 }
 0x171   :  { %v1384_v16 = vpack.c.bf16 %v960_v11, %v958_v9  ;;  %v964_v17 = vadd.f32 %v963_v42, %v770_v14  ;;  %v1001_v32 = vpop.f32.mrb[62].mxu0 }
 0x172   :  { %v1003_v34 = vpop.f32.mrb[63].mxu0 }
 0x173   :  { %1220 = vst [vmem:[%s2013_s2 + $0xb0] sm:$0xff] %v1384_v16  ;;  %v1385_v20 = vpack.c.bf16 %v964_v17, %v962_v13 }
 0x175   :  { %1221 = vst [vmem:[%s2013_s2 + $0xb8] sm:$0xff] %v1385_v20  ;;  %v774_v22 = vpop.f32.mrb[48].mxu1 }
 0x176   :  { %v968_v23 = vadd.f32 %v967_v50, %v774_v22  ;;  %v776_v24 = vpop.f32.mrb[49].mxu1 }
 0x177   :  { %v970_v25 = vadd.f32 %v969_v53, %v776_v24  ;;  %v778_v26 = vpop.f32.mrb[50].mxu1 }
 0x178   :  { %v972_v27 = vadd.f32 %v971_v54, %v778_v26  ;;  %v780_v28 = vpop.f32.mrb[51].mxu1 }
 0x179   :  { %v1386_v30 = vpack.c.bf16 %v970_v25, %v968_v23  ;;  %v974_v1 = vadd.f32 %v973_v56, %v780_v28 }
 0x17b   :  { %1222 = vst [vmem:[%s2013_s2 + $0xc0] sm:$0xff] %v1386_v30  ;;  %v1387_v33 = vpack.c.bf16 %v974_v1, %v972_v27 }
 0x17d   :  { %1223 = vst [vmem:[%s2013_s2 + $0xc8] sm:$0xff] %v1387_v33  ;;  %v784_v35 = vpop.f32.mrb[52].mxu1 }
 0x17e   :  { %v978_v36 = vadd.f32 %v977_v0, %v784_v35  ;;  %v786_v37 = vpop.f32.mrb[53].mxu1 }
 0x17f   :  { %v980_v38 = vadd.f32 %v979_v4, %v786_v37  ;;  %v788_v39 = vpop.f32.mrb[54].mxu1 }
 0x180   :  { %v982_v40 = vadd.f32 %v981_v5, %v788_v39  ;;  %v790_v41 = vpop.f32.mrb[55].mxu1 }
 0x181   :  { %v1388_v42 = vpack.c.bf16 %v980_v38, %v978_v36  ;;  %v984_v43 = vadd.f32 %v983_v7, %v790_v41 }
 0x183   :  { %1224 = vst [vmem:[%s2013_s2 + $0xd0] sm:$0xff] %v1388_v42  ;;  %v1389_v44 = vpack.c.bf16 %v984_v43, %v982_v40 }
 0x185   :  { %1225 = vst [vmem:[%s2013_s2 + $0xd8] sm:$0xff] %v1389_v44  ;;  %v794_v45 = vpop.f32.mrb[56].mxu1 }
 0x186   :  { %v988_v46 = vadd.f32 %v987_v15, %v794_v45  ;;  %v796_v47 = vpop.f32.mrb[57].mxu1 }
 0x187   :  { %v990_v48 = vadd.f32 %v989_v18, %v796_v47  ;;  %v798_v49 = vpop.f32.mrb[58].mxu1 }
 0x188   :  { %v992_v50 = vadd.f32 %v991_v19, %v798_v49  ;;  %v800_v51 = vpop.f32.mrb[59].mxu1 }
 0x189   :  { %v1390_v52 = vpack.c.bf16 %v990_v48, %v988_v46  ;;  %v994_v53 = vadd.f32 %v993_v21, %v800_v51 }
 0x18b   :  { %1226 = vst [vmem:[%s2013_s2 + $0xe0] sm:$0xff] %v1390_v52  ;;  %v1391_v54 = vpack.c.bf16 %v994_v53, %v992_v50 }
 0x18d   :  { %1227 = vst [vmem:[%s2013_s2 + $0xe8] sm:$0xff] %v1391_v54  ;;  %v804_v55 = vpop.f32.mrb[60].mxu1 }
 0x18e   :  { %v998_v56 = vadd.f32 %v997_v29, %v804_v55  ;;  %v806_v57 = vpop.f32.mrb[61].mxu1 }
 0x18f   :  { %v1000_v58 = vadd.f32 %v999_v31, %v806_v57  ;;  %v808_v59 = vpop.f32.mrb[62].mxu1 }
 0x190   :  { %v1002_v60 = vadd.f32 %v1001_v32, %v808_v59  ;;  %v810_v61 = vpop.f32.mrb[63].mxu1 }
 0x191   :  { %v1392_v62 = vpack.c.bf16 %v1000_v58, %v998_v56  ;;  %v1004_v63 = vadd.f32 %v1003_v34, %v810_v61 }
 0x193   :  { %1228 = vst [vmem:[%s2013_s2 + $0xf0] sm:$0xff] %v1392_v62  ;;  %v1393_v0 = vpack.c.bf16 %v1004_v63, %v1002_v60 }
 0x195   :  { %1229 = vst [vmem:[%s2013_s2 + $0xf8] sm:$0xff] %v1393_v0 }

// kernel: net_forward.17
= control target key start
LH: loop header
LB: loop body
LE: loop exit
PB: predicated region body
PF: predicated region fallthrough
CT: control target
= control target key end

     0   :  { %s1929_s1 = inlined_call_operand.vmem [shape: bf16[256,256], index: 1, kind: input, shape index: {}]   ;;  %s1930_s0 = inlined_call_operand.vmem [shape: bf16[256,256], index: 0, kind: input, shape index: {}]   ;;  %s1931_s2 = inlined_call_operand.vmem [shape: f32[1,256], index: 2, kind: input, shape index: {}]   ;;  %s1932_s3 = inlined_call_operand.vmem [shape: bf16[256,256], index: 3, kind: output, shape index: {}]  }
   0x1   :  { %v1454_v0 = vld [vmem:[%s1929_s1 + $0x4] ss:$8 sps:$4 sm:$0xff]   ;;  %v1456_v1 = vld [vmem:[%s1929_s1] ss:$8 sps:$4 sm:$0xff]   ;;  %v1457_v2 = vld [vmem:[%s1929_s1 + $0x14] ss:$8 sps:$4 sm:$0xff]  }
   0x2   :  { %536 = vmatprep.subr.bf16.mxu0 %v1454_v0  ;;  %1422 = vmatprep.subr.bf16.mxu1 %v1454_v0  ;;  %v1459_v3 = vld [vmem:[%s1929_s1 + $0x10] ss:$8 sps:$4 sm:$0xff]   ;;  %v1460_v4 = vld [vmem:[%s1929_s1 + $0x24] ss:$8 sps:$4 sm:$0xff]   ;;  %v1462_v5 = vld [vmem:[%s1929_s1 + $0x20] ss:$8 sps:$4 sm:$0xff]   ;;  %v926_v0 = vlaneseq }
   0x3   :  { %537 = vmatpush1.bf16.msra.mxu0 %v1456_v1  ;;  %1438 = vmatpush1.bf16.msra.mxu1 %v1456_v1  ;;  %v1463_v6 = vld [vmem:[%s1929_s1 + $0x34] ss:$8 sps:$4 sm:$0xff]   ;;  %v1465_v7 = vld [vmem:[%s1929_s1 + $0x30] ss:$8 sps:$4 sm:$0xff]   ;;  %v1466_v8 = vld [vmem:[%s1929_s1 + $0x44] ss:$8 sps:$4 sm:$0xff]  }
   0x4   :  { %538 = vmatprep.subr.bf16.mxu0 %v1457_v2  ;;  %1423 = vmatprep.subr.bf16.mxu1 %v1457_v2  ;;  %v1468_v9 = vld [vmem:[%s1929_s1 + $0x40] ss:$8 sps:$4 sm:$0xff]   ;;  %v1469_v10 = vld [vmem:[%s1929_s1 + $0x54] ss:$8 sps:$4 sm:$0xff]   ;;  %v1471_v11 = vld [vmem:[%s1929_s1 + $0x50] ss:$8 sps:$4 sm:$0xff]  }
   0x5   :  { %v1472_v12 = vld [vmem:[%s1929_s1 + $0x64] ss:$8 sps:$4 sm:$0xff]   ;;  %v1474_v14 = vld [vmem:[%s1929_s1 + $0x60] ss:$8 sps:$4 sm:$0xff]   ;;  %v1475_v16 = vld [vmem:[%s1929_s1 + $0x74] ss:$8 sps:$4 sm:$0xff]  }
   0x6   :  { %v1504_v13 = vld [vmem:[%s1930_s0 + $0x4] ss:$8 sps:$4 sm:$0xff]   ;;  %v1477_v17 = vld [vmem:[%s1929_s1 + $0x70] ss:$8 sps:$4 sm:$0xff]   ;;  %v1480_v19 = vld [vmem:[%s1929_s1 + $0x80] ss:$8 sps:$4 sm:$0xff]  }
   0x7   :  { %539 = vmatpush1.bf16.msra.mxu0 %v1459_v3  ;;  %1439 = vmatpush1.bf16.msra.mxu1 %v1459_v3  ;;  %v1507_v15 = vld [vmem:[%s1930_s0 + $0x84] ss:$8 sps:$4 sm:$0xff]   ;;  %v1481_v20 = vld [vmem:[%s1929_s1 + $0x94] ss:$8 sps:$4 sm:$0xff]   ;;  %v1483_v21 = vld [vmem:[%s1929_s1 + $0x90] ss:$8 sps:$4 sm:$0xff]  }
   0x8   :  { %540 = vmatprep.subr.bf16.mxu0 %v1460_v4  ;;  %1424 = vmatprep.subr.bf16.mxu1 %v1460_v4  ;;  %v1478_v18 = vld [vmem:[%s1929_s1 + $0x84] ss:$8 sps:$4 sm:$0xff]   ;;  %v1486_v23 = vld [vmem:[%s1929_s1 + $0xa0] ss:$8 sps:$4 sm:$0xff]   ;;  %v1487_v24 = vld [vmem:[%s1929_s1 + $0xb4] ss:$8 sps:$4 sm:$0xff]  }
   0x9   :  { %568 = vmatprep.mubr.bf16.mxu0 %v1504_v13  ;;  %648 = vmatprep.mubr.bf16.mxu1 %v1507_v15  ;;  %v1484_v22 = vld [vmem:[%s1929_s1 + $0xa4] ss:$8 sps:$4 sm:$0xff]   ;;  %v1489_v25 = vld [vmem:[%s1929_s1 + $0xb0] ss:$8 sps:$4 sm:$0xff]   ;;  %v1492_v27 = vld [vmem:[%s1929_s1 + $0xc0] ss:$8 sps:$4 sm:$0xff]  }
   0xa   :  { %v1490_v26 = vld [vmem:[%s1929_s1 + $0xc4] ss:$8 sps:$4 sm:$0xff]   ;;  %v1493_v28 = vld [vmem:[%s1929_s1 + $0xd4] ss:$8 sps:$4 sm:$0xff]   ;;  %v1495_v29 = vld [vmem:[%s1929_s1 + $0xd0] ss:$8 sps:$4 sm:$0xff]  }
   0xb   :  { %541 = vmatpush1.bf16.msra.mxu0 %v1462_v5  ;;  %1440 = vmatpush1.bf16.msra.mxu1 %v1462_v5  ;;  %v1496_v30 = vld [vmem:[%s1929_s1 + $0xe4] ss:$8 sps:$4 sm:$0xff]   ;;  %v1498_v31 = vld [vmem:[%s1929_s1 + $0xe0] ss:$8 sps:$4 sm:$0xff]   ;;  %v1499_v32 = vld [vmem:[%s1929_s1 + $0xf4] ss:$8 sps:$4 sm:$0xff]  }
   0xc   :  { %542 = vmatprep.subr.bf16.mxu0 %v1463_v6  ;;  %1425 = vmatprep.subr.bf16.mxu1 %v1463_v6  ;;  %v1501_v33 = vld [vmem:[%s1929_s1 + $0xf0] ss:$8 sps:$4 sm:$0xff]   ;;  %v1502_v34 = vld [vmem:[%s1930_s0] ss:$8 sps:$4 sm:$0xff]   ;;  %v1508_v36 = vld [vmem:[%s1930_s0 + $0x14] ss:$8 sps:$4 sm:$0xff]  }
   0xd   :  { %v1505_v35 = vld [vmem:[%s1930_s0 + $0x80] ss:$8 sps:$4 sm:$0xff]   ;;  %v1510_v37 = vld [vmem:[%s1930_s0 + $0x94] ss:$8 sps:$4 sm:$0xff]   ;;  %v1512_v38 = vld [vmem:[%s1930_s0 + $0x10] ss:$8 sps:$4 sm:$0xff]  }
   0xe   :  { %v1513_v39 = vld [vmem:[%s1930_s0 + $0x90] ss:$8 sps:$4 sm:$0xff]   ;;  %v1514_v40 = vld [vmem:[%s1930_s0 + $0x24] ss:$8 sps:$4 sm:$0xff]   ;;  %v1518_v42 = vld [vmem:[%s1930_s0 + $0x20] ss:$8 sps:$4 sm:$0xff]  }
   0xf   :  { %543 = vmatpush1.bf16.msra.mxu0 %v1465_v7  ;;  %1441 = vmatpush1.bf16.msra.mxu1 %v1465_v7  ;;  %v1516_v41 = vld [vmem:[%s1930_s0 + $0xa4] ss:$8 sps:$4 sm:$0xff]   ;;  %v1519_v43 = vld [vmem:[%s1930_s0 + $0xa0] ss:$8 sps:$4 sm:$0xff]   ;;  %v1520_v44 = vld [vmem:[%s1930_s0 + $0x34] ss:$8 sps:$4 sm:$0xff]  }
  0x10   :  { %544 = vmatprep.subr.bf16.mxu0 %v1466_v8  ;;  %1426 = vmatprep.subr.bf16.mxu1 %v1466_v8  ;;  %v1522_v45 = vld [vmem:[%s1930_s0 + $0xb4] ss:$8 sps:$4 sm:$0xff]   ;;  %v1524_v46 = vld [vmem:[%s1930_s0 + $0x30] ss:$8 sps:$4 sm:$0xff]   ;;  %v1526_v48 = vld [vmem:[%s1930_s0 + $0x44] ss:$8 sps:$4 sm:$0xff]  }
  0x11   :  { %v1525_v47 = vld [vmem:[%s1930_s0 + $0xb0] ss:$8 sps:$4 sm:$0xff]   ;;  %v1528_v49 = vld [vmem:[%s1930_s0 + $0xc4] ss:$8 sps:$4 sm:$0xff]   ;;  %v1530_v50 = vld [vmem:[%s1930_s0 + $0x40] ss:$8 sps:$4 sm:$0xff]  }
  0x12   :  { %v1531_v51 = vld [vmem:[%s1930_s0 + $0xc0] ss:$8 sps:$4 sm:$0xff]   ;;  %v1532_v52 = vld [vmem:[%s1930_s0 + $0x54] ss:$8 sps:$4 sm:$0xff]   ;;  %v1536_v54 = vld [vmem:[%s1930_s0 + $0x50] ss:$8 sps:$4 sm:$0xff]  }
  0x13   :  { %545 = vmatpush1.bf16.msra.mxu0 %v1468_v9  ;;  %1442 = vmatpush1.bf16.msra.mxu1 %v1468_v9  ;;  %v1534_v53 = vld [vmem:[%s1930_s0 + $0xd4] ss:$8 sps:$4 sm:$0xff]   ;;  %v1537_v55 = vld [vmem:[%s1930_s0 + $0xd0] ss:$8 sps:$4 sm:$0xff]   ;;  %v1538_v56 = vld [vmem:[%s1930_s0 + $0x64] ss:$8 sps:$4 sm:$0xff]  }
  0x14   :  { %546 = vmatprep.subr.bf16.mxu0 %v1469_v10  ;;  %1427 = vmatprep.subr.bf16.mxu1 %v1469_v10  ;;  %v1540_v57 = vld [vmem:[%s1930_s0 + $0xe4] ss:$8 sps:$4 sm:$0xff]   ;;  %v1542_v58 = vld [vmem:[%s1930_s0 + $0x60] ss:$8 sps:$4 sm:$0xff]   ;;  %v1544_v60 = vld [vmem:[%s1930_s0 + $0x74] ss:$8 sps:$4 sm:$0xff]  }
  0x15   :  { %v1543_v59 = vld [vmem:[%s1930_s0 + $0xe0] ss:$8 sps:$4 sm:$0xff]   ;;  %v1546_v61 = vld [vmem:[%s1930_s0 + $0xf4] ss:$8 sps:$4 sm:$0xff]   ;;  %v1548_v62 = vld [vmem:[%s1930_s0 + $0x70] ss:$8 sps:$4 sm:$0xff]  }
  0x16   :  { %v1549_v63 = vld [vmem:[%s1930_s0 + $0xf0] ss:$8 sps:$4 sm:$0xff]   ;;  %v927_v1 = vshrl.u32 %v926_v0, 7  ;;  %v924_v3 = vld [vmem:[%s1931_s2] sm:$0x3] }
  0x17   :  { %547 = vmatpush1.bf16.msra.mxu0 %v1471_v11  ;;  %1443 = vmatpush1.bf16.msra.mxu1 %v1471_v11 }
  0x18   :  { %548 = vmatprep.subr.bf16.mxu0 %v1472_v12  ;;  %1428 = vmatprep.subr.bf16.mxu1 %v1472_v12  ;;  %v928_v2 = vsub.s32 0, %v927_v1  ;;  %v932_v4 = vsub.s32 1, %v927_v1 }
  0x1a   :  { %v1765_v5 = vrot.slane %v924_v3, %v928_v2  ;;  %v1767_v6 = vrot.slane %v924_v3, %v932_v4 }
  0x1b   :  { %549 = vmatpush1.bf16.msra.mxu0 %v1474_v14  ;;  %1444 = vmatpush1.bf16.msra.mxu1 %v1474_v14 }
  0x1c   :  { %550 = vmatprep.subr.bf16.mxu0 %v1475_v16  ;;  %1429 = vmatprep.subr.bf16.mxu1 %v1475_v16 }
  0x1f   :  { %551 = vmatpush1.bf16.msra.mxu0 %v1477_v17  ;;  %1445 = vmatpush1.bf16.msra.mxu1 %v1477_v17 }
  0x20   :  { %552 = vmatprep.subr.bf16.mxu0 %v1478_v18  ;;  %1430 = vmatprep.subr.bf16.mxu1 %v1478_v18 }
  0x23   :  { %553 = vmatpush1.bf16.msra.mxu0 %v1480_v19  ;;  %1446 = vmatpush1.bf16.msra.mxu1 %v1480_v19 }
  0x24   :  { %554 = vmatprep.subr.bf16.mxu0 %v1481_v20  ;;  %1431 = vmatprep.subr.bf16.mxu1 %v1481_v20 }
  0x27   :  { %555 = vmatpush1.bf16.msra.mxu0 %v1483_v21  ;;  %1447 = vmatpush1.bf16.msra.mxu1 %v1483_v21 }
  0x28   :  { %556 = vmatprep.subr.bf16.mxu0 %v1484_v22  ;;  %1432 = vmatprep.subr.bf16.mxu1 %v1484_v22 }
  0x2b   :  { %557 = vmatpush1.bf16.msra.mxu0 %v1486_v23  ;;  %1448 = vmatpush1.bf16.msra.mxu1 %v1486_v23 }
  0x2c   :  { %558 = vmatprep.subr.bf16.mxu0 %v1487_v24  ;;  %1433 = vmatprep.subr.bf16.mxu1 %v1487_v24 }
  0x2f   :  { %559 = vmatpush1.bf16.msra.mxu0 %v1489_v25  ;;  %1449 = vmatpush1.bf16.msra.mxu1 %v1489_v25 }
  0x30   :  { %560 = vmatprep.subr.bf16.mxu0 %v1490_v26  ;;  %1434 = vmatprep.subr.bf16.mxu1 %v1490_v26 }
  0x33   :  { %561 = vmatpush1.bf16.msra.mxu0 %v1492_v27  ;;  %1450 = vmatpush1.bf16.msra.mxu1 %v1492_v27 }
  0x34   :  { %562 = vmatprep.subr.bf16.mxu0 %v1493_v28  ;;  %1435 = vmatprep.subr.bf16.mxu1 %v1493_v28 }
  0x37   :  { %563 = vmatpush1.bf16.msra.mxu0 %v1495_v29  ;;  %1451 = vmatpush1.bf16.msra.mxu1 %v1495_v29 }
  0x38   :  { %564 = vmatprep.subr.bf16.mxu0 %v1496_v30  ;;  %1436 = vmatprep.subr.bf16.mxu1 %v1496_v30 }
  0x3b   :  { %565 = vmatpush1.bf16.msra.mxu0 %v1498_v31  ;;  %1452 = vmatpush1.bf16.msra.mxu1 %v1498_v31 }
  0x3c   :  { %566 = vmatprep.subr.bf16.mxu0 %v1499_v32  ;;  %1437 = vmatprep.subr.bf16.mxu1 %v1499_v32 }
  0x3f   :  { %567 = vmatpush1.bf16.msra.mxu0 %v1501_v33  ;;  %1453 = vmatpush1.bf16.msra.mxu1 %v1501_v33 }
  0x42   :  { %569 = vmatmul.mubr.bf16.vlgmr.msra.gmra.mrb[0].mxu0 %v1502_v34  ;;  %649 = vmatmul.mubr.bf16.vlgmr.msra.gmra.mrb[0].mxu1 %v1505_v35 }
  0x43   :  { %578 = vmatprep.mubr.bf16.mxu0 %v1508_v36  ;;  %658 = vmatprep.mubr.bf16.mxu1 %v1510_v37 }
  0x4a   :  { %579 = vmatmul.mubr.bf16.gmra.mrb[4].mxu0 %v1512_v38  ;;  %659 = vmatmul.mubr.bf16.gmra.mrb[4].mxu1 %v1513_v39 }
  0x4b   :  { %588 = vmatprep.mubr.bf16.mxu0 %v1514_v40  ;;  %668 = vmatprep.mubr.bf16.mxu1 %v1516_v41 }
  0x52   :  { %589 = vmatmul.mubr.bf16.gmra.mrb[8].mxu0 %v1518_v42  ;;  %669 = vmatmul.mubr.bf16.gmra.mrb[8].mxu1 %v1519_v43 }
  0x53   :  { %598 = vmatprep.mubr.bf16.mxu0 %v1520_v44  ;;  %678 = vmatprep.mubr.bf16.mxu1 %v1522_v45 }
  0x5a   :  { %599 = vmatmul.mubr.bf16.gmra.mrb[12].mxu0 %v1524_v46  ;;  %679 = vmatmul.mubr.bf16.gmra.mrb[12].mxu1 %v1525_v47 }
  0x5b   :  { %608 = vmatprep.mubr.bf16.mxu0 %v1526_v48  ;;  %688 = vmatprep.mubr.bf16.mxu1 %v1528_v49 }
  0x62   :  { %609 = vmatmul.mubr.bf16.gmra.mrb[16].mxu0 %v1530_v50  ;;  %689 = vmatmul.mubr.bf16.gmra.mrb[16].mxu1 %v1531_v51 }
  0x63   :  { %618 = vmatprep.mubr.bf16.mxu0 %v1532_v52  ;;  %698 = vmatprep.mubr.bf16.mxu1 %v1534_v53 }
  0x6a   :  { %619 = vmatmul.mubr.bf16.gmra.mrb[20].mxu0 %v1536_v54  ;;  %699 = vmatmul.mubr.bf16.gmra.mrb[20].mxu1 %v1537_v55 }
  0x6b   :  { %628 = vmatprep.mubr.bf16.mxu0 %v1538_v56  ;;  %708 = vmatprep.mubr.bf16.mxu1 %v1540_v57 }
  0x72   :  { %629 = vmatmul.mubr.bf16.gmra.mrb[24].mxu0 %v1542_v58  ;;  %709 = vmatmul.mubr.bf16.gmra.mrb[24].mxu1 %v1543_v59 }
  0x73   :  { %638 = vmatprep.mubr.bf16.mxu0 %v1544_v60  ;;  %718 = vmatprep.mubr.bf16.mxu1 %v1546_v61 }
  0x7a   :  { %639 = vmatmul.mubr.bf16.gmra.mrb[28].mxu0 %v1548_v62  ;;  %719 = vmatmul.mubr.bf16.gmra.mrb[28].mxu1 %v1549_v63 }
 0x115   :  { %v570_v7 = vpop.f32.mrb[0].mxu0  ;;  %v650_v8 = vpop.f32.mrb[0].mxu1 }
 0x116   :  { %v936_v9 = vadd.f32 %v1765_v5, %v570_v7  ;;  %v968_v10 = vadd.f32 %v1765_v5, %v650_v8  ;;  %v572_v11 = vpop.f32.mrb[1].mxu0  ;;  %v652_v12 = vpop.f32.mrb[1].mxu1 }
 0x117   :  { %v937_v13 = vadd.f32 %v1767_v6, %v572_v11  ;;  %v969_v14 = vadd.f32 %v1767_v6, %v652_v12  ;;  %v574_v15 = vpop.f32.mrb[2].mxu0  ;;  %v654_v16 = vpop.f32.mrb[2].mxu1 }
 0x118   :  { %v1000_v17 = vmax.f32 %v936_v9, 0.0  ;;  %v1032_v18 = vmax.f32 %v968_v10, 0.0  ;;  %v938_v19 = vadd.f32 %v1765_v5, %v574_v15  ;;  %v970_v20 = vadd.f32 %v1765_v5, %v654_v16  ;;  %v576_v21 = vpop.f32.mrb[3].mxu0  ;;  %v656_v22 = vpop.f32.mrb[3].mxu1 }
 0x119   :  { %v1001_v23 = vmax.f32 %v937_v13, 0.0  ;;  %v1033_v24 = vmax.f32 %v969_v14, 0.0  ;;  %v939_v25 = vadd.f32 %v1767_v6, %v576_v21  ;;  %v971_v26 = vadd.f32 %v1767_v6, %v656_v22 }
 0x11a   :  { %v1002_v27 = vmax.f32 %v938_v19, 0.0  ;;  %v1034_v28 = vmax.f32 %v970_v20, 0.0 }
 0x11b   :  { %v1390_v29 = vpack.c.bf16 %v1001_v23, %v1000_v17  ;;  %v1406_v30 = vpack.c.bf16 %v1033_v24, %v1032_v18  ;;  %v1003_v31 = vmax.f32 %v939_v25, 0.0  ;;  %v1035_v32 = vmax.f32 %v971_v26, 0.0 }
 0x11d   :  { %1256 = vst [vmem:[%s1932_s3] sm:$0xff] %v1390_v29  ;;  %1272 = vst [vmem:[%s1932_s3 + $0x80] sm:$0xff] %v1406_v30  ;;  %v1391_v33 = vpack.c.bf16 %v1003_v31, %v1002_v27  ;;  %v1407_v34 = vpack.c.bf16 %v1035_v32, %v1034_v28  ;;  %v580_v35 = vpop.f32.mrb[4].mxu0  ;;  %v660_v36 = vpop.f32.mrb[4].mxu1 }
 0x11e   :  { %v940_v37 = vadd.f32 %v1765_v5, %v580_v35  ;;  %v972_v38 = vadd.f32 %v1765_v5, %v660_v36  ;;  %v582_v39 = vpop.f32.mrb[5].mxu0  ;;  %v662_v40 = vpop.f32.mrb[5].mxu1 }
 0x11f   :  { %1257 = vst [vmem:[%s1932_s3 + $0x8] sm:$0xff] %v1391_v33  ;;  %1273 = vst [vmem:[%s1932_s3 + $0x88] sm:$0xff] %v1407_v34  ;;  %v941_v41 = vadd.f32 %v1767_v6, %v582_v39  ;;  %v973_v42 = vadd.f32 %v1767_v6, %v662_v40  ;;  %v584_v43 = vpop.f32.mrb[6].mxu0  ;;  %v664_v44 = vpop.f32.mrb[6].mxu1 }
 0x120   :  { %v1004_v45 = vmax.f32 %v940_v37, 0.0  ;;  %v1036_v46 = vmax.f32 %v972_v38, 0.0  ;;  %v942_v47 = vadd.f32 %v1765_v5, %v584_v43  ;;  %v974_v48 = vadd.f32 %v1765_v5, %v664_v44  ;;  %v586_v49 = vpop.f32.mrb[7].mxu0  ;;  %v666_v50 = vpop.f32.mrb[7].mxu1 }
 0x121   :  { %v1005_v51 = vmax.f32 %v941_v41, 0.0  ;;  %v1037_v52 = vmax.f32 %v973_v42, 0.0  ;;  %v943_v53 = vadd.f32 %v1767_v6, %v586_v49  ;;  %v975_v54 = vadd.f32 %v1767_v6, %v666_v50 }
 0x122   :  { %v1006_v55 = vmax.f32 %v942_v47, 0.0  ;;  %v1038_v56 = vmax.f32 %v974_v48, 0.0 }
 0x123   :  { %v1392_v57 = vpack.c.bf16 %v1005_v51, %v1004_v45  ;;  %v1408_v58 = vpack.c.bf16 %v1037_v52, %v1036_v46  ;;  %v1007_v59 = vmax.f32 %v943_v53, 0.0  ;;  %v1039_v60 = vmax.f32 %v975_v54, 0.0 }
 0x125   :  { %1258 = vst [vmem:[%s1932_s3 + $0x10] sm:$0xff] %v1392_v57  ;;  %1274 = vst [vmem:[%s1932_s3 + $0x90] sm:$0xff] %v1408_v58  ;;  %v1393_v61 = vpack.c.bf16 %v1007_v59, %v1006_v55  ;;  %v1409_v62 = vpack.c.bf16 %v1039_v60, %v1038_v56  ;;  %v590_v63 = vpop.f32.mrb[8].mxu0  ;;  %v670_v0 = vpop.f32.mrb[8].mxu1 }
 0x126   :  { %v944_v1 = vadd.f32 %v1765_v5, %v590_v63  ;;  %v976_v2 = vadd.f32 %v1765_v5, %v670_v0  ;;  %v592_v3 = vpop.f32.mrb[9].mxu0  ;;  %v672_v4 = vpop.f32.mrb[9].mxu1 }
 0x127   :  { %1259 = vst [vmem:[%s1932_s3 + $0x18] sm:$0xff] %v1393_v61  ;;  %1275 = vst [vmem:[%s1932_s3 + $0x98] sm:$0xff] %v1409_v62  ;;  %v945_v7 = vadd.f32 %v1767_v6, %v592_v3  ;;  %v977_v8 = vadd.f32 %v1767_v6, %v672_v4  ;;  %v594_v9 = vpop.f32.mrb[10].mxu0  ;;  %v674_v10 = vpop.f32.mrb[10].mxu1 }
 0x128   :  { %v1008_v11 = vmax.f32 %v944_v1, 0.0  ;;  %v1040_v12 = vmax.f32 %v976_v2, 0.0  ;;  %v946_v13 = vadd.f32 %v1765_v5, %v594_v9  ;;  %v978_v14 = vadd.f32 %v1765_v5, %v674_v10  ;;  %v596_v15 = vpop.f32.mrb[11].mxu0  ;;  %v676_v16 = vpop.f32.mrb[11].mxu1 }
 0x129   :  { %v1009_v17 = vmax.f32 %v945_v7, 0.0  ;;  %v1041_v18 = vmax.f32 %v977_v8, 0.0  ;;  %v947_v19 = vadd.f32 %v1767_v6, %v596_v15  ;;  %v979_v20 = vadd.f32 %v1767_v6, %v676_v16 }
 0x12a   :  { %v1010_v21 = vmax.f32 %v946_v13, 0.0  ;;  %v1042_v22 = vmax.f32 %v978_v14, 0.0 }
 0x12b   :  { %v1394_v23 = vpack.c.bf16 %v1009_v17, %v1008_v11  ;;  %v1410_v24 = vpack.c.bf16 %v1041_v18, %v1040_v12  ;;  %v1011_v25 = vmax.f32 %v947_v19, 0.0  ;;  %v1043_v26 = vmax.f32 %v979_v20, 0.0 }
 0x12d   :  { %1260 = vst [vmem:[%s1932_s3 + $0x20] sm:$0xff] %v1394_v23  ;;  %1276 = vst [vmem:[%s1932_s3 + $0xa0] sm:$0xff] %v1410_v24  ;;  %v1395_v27 = vpack.c.bf16 %v1011_v25, %v1010_v21  ;;  %v1411_v28 = vpack.c.bf16 %v1043_v26, %v1042_v22  ;;  %v600_v29 = vpop.f32.mrb[12].mxu0  ;;  %v680_v30 = vpop.f32.mrb[12].mxu1 }
 0x12e   :  { %v948_v31 = vadd.f32 %v1765_v5, %v600_v29  ;;  %v980_v32 = vadd.f32 %v1765_v5, %v680_v30  ;;  %v602_v33 = vpop.f32.mrb[13].mxu0  ;;  %v682_v34 = vpop.f32.mrb[13].mxu1 }
 0x12f   :  { %1261 = vst [vmem:[%s1932_s3 + $0x28] sm:$0xff] %v1395_v27  ;;  %1277 = vst [vmem:[%s1932_s3 + $0xa8] sm:$0xff] %v1411_v28  ;;  %v949_v35 = vadd.f32 %v1767_v6, %v602_v33  ;;  %v981_v36 = vadd.f32 %v1767_v6, %v682_v34  ;;  %v604_v37 = vpop.f32.mrb[14].mxu0  ;;  %v684_v38 = vpop.f32.mrb[14].mxu1 }
 0x130   :  { %v1012_v39 = vmax.f32 %v948_v31, 0.0  ;;  %v1044_v40 = vmax.f32 %v980_v32, 0.0  ;;  %v950_v41 = vadd.f32 %v1765_v5, %v604_v37  ;;  %v982_v42 = vadd.f32 %v1765_v5, %v684_v38  ;;  %v606_v43 = vpop.f32.mrb[15].mxu0  ;;  %v686_v44 = vpop.f32.mrb[15].mxu1 }
 0x131   :  { %v1013_v45 = vmax.f32 %v949_v35, 0.0  ;;  %v1045_v46 = vmax.f32 %v981_v36, 0.0  ;;  %v951_v47 = vadd.f32 %v1767_v6, %v606_v43  ;;  %v983_v48 = vadd.f32 %v1767_v6, %v686_v44 }
 0x132   :  { %v1014_v49 = vmax.f32 %v950_v41, 0.0  ;;  %v1046_v50 = vmax.f32 %v982_v42, 0.0 }
 0x133   :  { %v1396_v51 = vpack.c.bf16 %v1013_v45, %v1012_v39  ;;  %v1412_v52 = vpack.c.bf16 %v1045_v46, %v1044_v40  ;;  %v1015_v53 = vmax.f32 %v951_v47, 0.0  ;;  %v1047_v54 = vmax.f32 %v983_v48, 0.0 }
 0x135   :  { %1262 = vst [vmem:[%s1932_s3 + $0x30] sm:$0xff] %v1396_v51  ;;  %1278 = vst [vmem:[%s1932_s3 + $0xb0] sm:$0xff] %v1412_v52  ;;  %v1397_v55 = vpack.c.bf16 %v1015_v53, %v1014_v49  ;;  %v1413_v56 = vpack.c.bf16 %v1047_v54, %v1046_v50  ;;  %v610_v57 = vpop.f32.mrb[16].mxu0  ;;  %v690_v58 = vpop.f32.mrb[16].mxu1 }
 0x136   :  { %v952_v59 = vadd.f32 %v1765_v5, %v610_v57  ;;  %v984_v60 = vadd.f32 %v1765_v5, %v690_v58  ;;  %v612_v61 = vpop.f32.mrb[17].mxu0  ;;  %v692_v62 = vpop.f32.mrb[17].mxu1 }
 0x137   :  { %1263 = vst [vmem:[%s1932_s3 + $0x38] sm:$0xff] %v1397_v55  ;;  %1279 = vst [vmem:[%s1932_s3 + $0xb8] sm:$0xff] %v1413_v56  ;;  %v953_v63 = vadd.f32 %v1767_v6, %v612_v61  ;;  %v985_v0 = vadd.f32 %v1767_v6, %v692_v62  ;;  %v614_v1 = vpop.f32.mrb[18].mxu0  ;;  %v694_v2 = vpop.f32.mrb[18].mxu1 }
 0x138   :  { %v1016_v3 = vmax.f32 %v952_v59, 0.0  ;;  %v1048_v4 = vmax.f32 %v984_v60, 0.0  ;;  %v954_v7 = vadd.f32 %v1765_v5, %v614_v1  ;;  %v986_v8 = vadd.f32 %v1765_v5, %v694_v2  ;;  %v616_v9 = vpop.f32.mrb[19].mxu0  ;;  %v696_v10 = vpop.f32.mrb[19].mxu1 }
 0x139   :  { %v1017_v11 = vmax.f32 %v953_v63, 0.0  ;;  %v1049_v12 = vmax.f32 %v985_v0, 0.0  ;;  %v955_v13 = vadd.f32 %v1767_v6, %v616_v9  ;;  %v987_v14 = vadd.f32 %v1767_v6, %v696_v10 }
 0x13a   :  { %v1018_v15 = vmax.f32 %v954_v7, 0.0  ;;  %v1050_v16 = vmax.f32 %v986_v8, 0.0 }
 0x13b   :  { %v1398_v17 = vpack.c.bf16 %v1017_v11, %v1016_v3  ;;  %v1414_v18 = vpack.c.bf16 %v1049_v12, %v1048_v4  ;;  %v1019_v19 = vmax.f32 %v955_v13, 0.0  ;;  %v1051_v20 = vmax.f32 %v987_v14, 0.0 }
 0x13d   :  { %1264 = vst [vmem:[%s1932_s3 + $0x40] sm:$0xff] %v1398_v17  ;;  %1280 = vst [vmem:[%s1932_s3 + $0xc0] sm:$0xff] %v1414_v18  ;;  %v1399_v21 = vpack.c.bf16 %v1019_v19, %v1018_v15  ;;  %v1415_v22 = vpack.c.bf16 %v1051_v20, %v1050_v16  ;;  %v620_v23 = vpop.f32.mrb[20].mxu0  ;;  %v700_v24 = vpop.f32.mrb[20].mxu1 }
 0x13e   :  { %v956_v25 = vadd.f32 %v1765_v5, %v620_v23  ;;  %v988_v26 = vadd.f32 %v1765_v5, %v700_v24  ;;  %v622_v27 = vpop.f32.mrb[21].mxu0  ;;  %v702_v28 = vpop.f32.mrb[21].mxu1 }
 0x13f   :  { %1265 = vst [vmem:[%s1932_s3 + $0x48] sm:$0xff] %v1399_v21  ;;  %1281 = vst [vmem:[%s1932_s3 + $0xc8] sm:$0xff] %v1415_v22  ;;  %v957_v29 = vadd.f32 %v1767_v6, %v622_v27  ;;  %v989_v30 = vadd.f32 %v1767_v6, %v702_v28  ;;  %v624_v31 = vpop.f32.mrb[22].mxu0  ;;  %v704_v32 = vpop.f32.mrb[22].mxu1 }
 0x140   :  { %v1020_v33 = vmax.f32 %v956_v25, 0.0  ;;  %v1052_v34 = vmax.f32 %v988_v26, 0.0  ;;  %v958_v35 = vadd.f32 %v1765_v5, %v624_v31  ;;  %v990_v36 = vadd.f32 %v1765_v5, %v704_v32  ;;  %v626_v37 = vpop.f32.mrb[23].mxu0  ;;  %v706_v38 = vpop.f32.mrb[23].mxu1 }
 0x141   :  { %v1021_v39 = vmax.f32 %v957_v29, 0.0  ;;  %v1053_v40 = vmax.f32 %v989_v30, 0.0  ;;  %v959_v41 = vadd.f32 %v1767_v6, %v626_v37  ;;  %v991_v42 = vadd.f32 %v1767_v6, %v706_v38 }
 0x142   :  { %v1022_v43 = vmax.f32 %v958_v35, 0.0  ;;  %v1054_v44 = vmax.f32 %v990_v36, 0.0 }
 0x143   :  { %v1400_v45 = vpack.c.bf16 %v1021_v39, %v1020_v33  ;;  %v1416_v46 = vpack.c.bf16 %v1053_v40, %v1052_v34  ;;  %v1023_v47 = vmax.f32 %v959_v41, 0.0  ;;  %v1055_v48 = vmax.f32 %v991_v42, 0.0 }
 0x145   :  { %1266 = vst [vmem:[%s1932_s3 + $0x50] sm:$0xff] %v1400_v45  ;;  %1282 = vst [vmem:[%s1932_s3 + $0xd0] sm:$0xff] %v1416_v46  ;;  %v1401_v49 = vpack.c.bf16 %v1023_v47, %v1022_v43  ;;  %v1417_v50 = vpack.c.bf16 %v1055_v48, %v1054_v44  ;;  %v630_v51 = vpop.f32.mrb[24].mxu0  ;;  %v710_v52 = vpop.f32.mrb[24].mxu1 }
 0x146   :  { %v960_v53 = vadd.f32 %v1765_v5, %v630_v51  ;;  %v992_v54 = vadd.f32 %v1765_v5, %v710_v52  ;;  %v632_v55 = vpop.f32.mrb[25].mxu0  ;;  %v712_v56 = vpop.f32.mrb[25].mxu1 }
 0x147   :  { %1267 = vst [vmem:[%s1932_s3 + $0x58] sm:$0xff] %v1401_v49  ;;  %1283 = vst [vmem:[%s1932_s3 + $0xd8] sm:$0xff] %v1417_v50  ;;  %v961_v57 = vadd.f32 %v1767_v6, %v632_v55  ;;  %v993_v58 = vadd.f32 %v1767_v6, %v712_v56  ;;  %v634_v59 = vpop.f32.mrb[26].mxu0  ;;  %v714_v60 = vpop.f32.mrb[26].mxu1 }
 0x148   :  { %v1024_v61 = vmax.f32 %v960_v53, 0.0  ;;  %v1056_v62 = vmax.f32 %v992_v54, 0.0  ;;  %v962_v63 = vadd.f32 %v1765_v5, %v634_v59  ;;  %v994_v0 = vadd.f32 %v1765_v5, %v714_v60  ;;  %v636_v1 = vpop.f32.mrb[27].mxu0  ;;  %v716_v2 = vpop.f32.mrb[27].mxu1 }
 0x149   :  { %v1025_v3 = vmax.f32 %v961_v57, 0.0  ;;  %v1057_v4 = vmax.f32 %v993_v58, 0.0  ;;  %v963_v7 = vadd.f32 %v1767_v6, %v636_v1  ;;  %v995_v8 = vadd.f32 %v1767_v6, %v716_v2 }
 0x14a   :  { %v1026_v9 = vmax.f32 %v962_v63, 0.0  ;;  %v1058_v10 = vmax.f32 %v994_v0, 0.0 }
 0x14b   :  { %v1402_v11 = vpack.c.bf16 %v1025_v3, %v1024_v61  ;;  %v1418_v12 = vpack.c.bf16 %v1057_v4, %v1056_v62  ;;  %v1027_v13 = vmax.f32 %v963_v7, 0.0  ;;  %v1059_v14 = vmax.f32 %v995_v8, 0.0 }
 0x14d   :  { %1268 = vst [vmem:[%s1932_s3 + $0x60] sm:$0xff] %v1402_v11  ;;  %1284 = vst [vmem:[%s1932_s3 + $0xe0] sm:$0xff] %v1418_v12  ;;  %v1403_v15 = vpack.c.bf16 %v1027_v13, %v1026_v9  ;;  %v1419_v16 = vpack.c.bf16 %v1059_v14, %v1058_v10  ;;  %v640_v17 = vpop.f32.mrb[28].mxu0  ;;  %v720_v18 = vpop.f32.mrb[28].mxu1 }
 0x14e   :  { %v964_v19 = vadd.f32 %v1765_v5, %v640_v17  ;;  %v996_v20 = vadd.f32 %v1765_v5, %v720_v18  ;;  %v642_v21 = vpop.f32.mrb[29].mxu0  ;;  %v722_v22 = vpop.f32.mrb[29].mxu1 }
 0x14f   :  { %1269 = vst [vmem:[%s1932_s3 + $0x68] sm:$0xff] %v1403_v15  ;;  %1285 = vst [vmem:[%s1932_s3 + $0xe8] sm:$0xff] %v1419_v16  ;;  %v965_v23 = vadd.f32 %v1767_v6, %v642_v21  ;;  %v997_v24 = vadd.f32 %v1767_v6, %v722_v22  ;;  %v644_v25 = vpop.f32.mrb[30].mxu0  ;;  %v724_v26 = vpop.f32.mrb[30].mxu1 }
 0x150   :  { %v1028_v27 = vmax.f32 %v964_v19, 0.0  ;;  %v1060_v28 = vmax.f32 %v996_v20, 0.0  ;;  %v966_v29 = vadd.f32 %v1765_v5, %v644_v25  ;;  %v998_v30 = vadd.f32 %v1765_v5, %v724_v26  ;;  %v646_v31 = vpop.f32.mrb[31].mxu0  ;;  %v726_v32 = vpop.f32.mrb[31].mxu1 }
 0x151   :  { %v1029_v33 = vmax.f32 %v965_v23, 0.0  ;;  %v1061_v34 = vmax.f32 %v997_v24, 0.0  ;;  %v967_v35 = vadd.f32 %v1767_v6, %v646_v31  ;;  %v999_v36 = vadd.f32 %v1767_v6, %v726_v32 }
 0x152   :  { %v1030_v37 = vmax.f32 %v966_v29, 0.0  ;;  %v1062_v38 = vmax.f32 %v998_v30, 0.0 }
 0x153   :  { %v1404_v39 = vpack.c.bf16 %v1029_v33, %v1028_v27  ;;  %v1420_v40 = vpack.c.bf16 %v1061_v34, %v1060_v28  ;;  %v1031_v41 = vmax.f32 %v967_v35, 0.0  ;;  %v1063_v42 = vmax.f32 %v999_v36, 0.0 }
 0x155   :  { %1270 = vst [vmem:[%s1932_s3 + $0x70] sm:$0xff] %v1404_v39  ;;  %1286 = vst [vmem:[%s1932_s3 + $0xf0] sm:$0xff] %v1420_v40  ;;  %v1405_v5 = vpack.c.bf16 %v1031_v41, %v1030_v37  ;;  %v1421_v43 = vpack.c.bf16 %v1063_v42, %v1062_v38 }
 0x157   :  { %1271 = vst [vmem:[%s1932_s3 + $0x78] sm:$0xff] %v1405_v5  ;;  %1287 = vst [vmem:[%s1932_s3 + $0xf8] sm:$0xff] %v1421_v43 }

// kernel: net_forward.18
= control target key start
LH: loop header
LB: loop body
LE: loop exit
PB: predicated region body
PF: predicated region fallthrough
CT: control target
= control target key end

     0   :  { %s1263_s1 = inlined_call_operand.vmem [shape: bf16[256,128], index: 1, kind: input, shape index: {}]   ;;  %s1264_s0 = inlined_call_operand.vmem [shape: bf16[256,256], index: 0, kind: input, shape index: {}]   ;;  %s1265_s2 = inlined_call_operand.vmem [shape: bf16[256,128], index: 2, kind: output, shape index: {}]  }
   0x1   :  { %v992_v0 = vld [vmem:[%s1263_s1 + $0x40] sm:$0xff]   ;;  %v994_v2 = vld [vmem:[%s1263_s1 + $0x48] sm:$0xff]   ;;  %v996_v4 = vld [vmem:[%s1263_s1 + $0x50] sm:$0xff]  }
   0x2   :  { %v993_v1 = vld [vmem:[%s1263_s1] sm:$0xff]   ;;  %864 = vmatprep.subr.bf16.mxu0 %v992_v0  ;;  %976 = vmatprep.subr.bf16.mxu1 %v992_v0  ;;  %v995_v3 = vld [vmem:[%s1263_s1 + $0x8] sm:$0xff]   ;;  %v997_v5 = vld [vmem:[%s1263_s1 + $0x10] sm:$0xff]  }
   0x3   :  { %865 = vmatpush3.bf16.msra.mxu0 %v993_v1  ;;  %984 = vmatpush3.bf16.msra.mxu1 %v993_v1  ;;  %v998_v6 = vld [vmem:[%s1263_s1 + $0x58] sm:$0xff]   ;;  %v1000_v8 = vld [vmem:[%s1263_s1 + $0x60] sm:$0xff]   ;;  %v1002_v10 = vld [vmem:[%s1263_s1 + $0x68] sm:$0xff]  }
   0x4   :  { %866 = vmatprep.subr.bf16.mxu0 %v994_v2  ;;  %977 = vmatprep.subr.bf16.mxu1 %v994_v2  ;;  %v999_v7 = vld [vmem:[%s1263_s1 + $0x18] sm:$0xff]   ;;  %v1001_v9 = vld [vmem:[%s1263_s1 + $0x20] sm:$0xff]   ;;  %v1003_v13 = vld [vmem:[%s1263_s1 + $0x28] sm:$0xff]  }
   0x5   :  { %v1010_v11 = vld [vmem:[%s1264_s0 + $0x4] ss:$8 sps:$4 sm:$0xff]   ;;  %v1004_v14 = vld [vmem:[%s1263_s1 + $0x70] sm:$0xff]   ;;  %v1006_v16 = vld [vmem:[%s1263_s1 + $0x78] sm:$0xff]  }
   0x6   :  { %v1013_v12 = vld [vmem:[%s1264_s0 + $0x84] ss:$8 sps:$4 sm:$0xff]   ;;  %364 = vmatprep.mubr.bf16.mxu0 %v1010_v11  ;;  %v1005_v15 = vld [vmem:[%s1263_s1 + $0x30] sm:$0xff]   ;;  %v1007_v17 = vld [vmem:[%s1263_s1 + $0x38] sm:$0xff]  }
   0x7   :  { %867 = vmatpush3.bf16.msra.mxu0 %v995_v3  ;;  %985 = vmatpush3.bf16.msra.mxu1 %v995_v3  ;;  %v1008_v18 = vld [vmem:[%s1264_s0] ss:$8 sps:$4 sm:$0xff]   ;;  %v1014_v20 = vld [vmem:[%s1264_s0 + $0x14] ss:$8 sps:$4 sm:$0xff]   ;;  %v1018_v22 = vld [vmem:[%s1264_s0 + $0x10] ss:$8 sps:$4 sm:$0xff]  }
   0x8   :  { %868 = vmatprep.subr.bf16.mxu0 %v996_v4  ;;  %978 = vmatprep.subr.bf16.mxu1 %v996_v4  ;;  %v1011_v19 = vld [vmem:[%s1264_s0 + $0x80] ss:$8 sps:$4 sm:$0xff]   ;;  %v1016_v21 = vld [vmem:[%s1264_s0 + $0x94] ss:$8 sps:$4 sm:$0xff]   ;;  %v1019_v23 = vld [vmem:[%s1264_s0 + $0x90] ss:$8 sps:$4 sm:$0xff]  }
   0x9   :  { %428 = vmatprep.mubr.bf16.mxu1 %v1013_v12  ;;  %v1020_v24 = vld [vmem:[%s1264_s0 + $0x24] ss:$8 sps:$4 sm:$0xff]   ;;  %v1024_v26 = vld [vmem:[%s1264_s0 + $0x20] ss:$8 sps:$4 sm:$0xff]   ;;  %v1026_v28 = vld [vmem:[%s1264_s0 + $0x34] ss:$8 sps:$4 sm:$0xff]  }
   0xa   :  { %v1022_v25 = vld [vmem:[%s1264_s0 + $0xa4] ss:$8 sps:$4 sm:$0xff]   ;;  %v1025_v27 = vld [vmem:[%s1264_s0 + $0xa0] ss:$8 sps:$4 sm:$0xff]   ;;  %v1028_v29 = vld [vmem:[%s1264_s0 + $0xb4] ss:$8 sps:$4 sm:$0xff]  }
   0xb   :  { %869 = vmatpush3.bf16.msra.mxu0 %v997_v5  ;;  %986 = vmatpush3.bf16.msra.mxu1 %v997_v5  ;;  %v1030_v30 = vld [vmem:[%s1264_s0 + $0x30] ss:$8 sps:$4 sm:$0xff]   ;;  %v1032_v32 = vld [vmem:[%s1264_s0 + $0x44] ss:$8 sps:$4 sm:$0xff]   ;;  %v1036_v34 = vld [vmem:[%s1264_s0 + $0x40] ss:$8 sps:$4 sm:$0xff]  }
   0xc   :  { %870 = vmatprep.subr.bf16.mxu0 %v998_v6  ;;  %979 = vmatprep.subr.bf16.mxu1 %v998_v6  ;;  %v1031_v31 = vld [vmem:[%s1264_s0 + $0xb0] ss:$8 sps:$4 sm:$0xff]   ;;  %v1034_v33 = vld [vmem:[%s1264_s0 + $0xc4] ss:$8 sps:$4 sm:$0xff]   ;;  %v1037_v35 = vld [vmem:[%s1264_s0 + $0xc0] ss:$8 sps:$4 sm:$0xff]  }
   0xd   :  { %v1038_v36 = vld [vmem:[%s1264_s0 + $0x54] ss:$8 sps:$4 sm:$0xff]   ;;  %v1042_v38 = vld [vmem:[%s1264_s0 + $0x50] ss:$8 sps:$4 sm:$0xff]   ;;  %v1044_v40 = vld [vmem:[%s1264_s0 + $0x64] ss:$8 sps:$4 sm:$0xff]  }
   0xe   :  { %v1040_v37 = vld [vmem:[%s1264_s0 + $0xd4] ss:$8 sps:$4 sm:$0xff]   ;;  %v1043_v39 = vld [vmem:[%s1264_s0 + $0xd0] ss:$8 sps:$4 sm:$0xff]   ;;  %v1046_v41 = vld [vmem:[%s1264_s0 + $0xe4] ss:$8 sps:$4 sm:$0xff]  }
   0xf   :  { %871 = vmatpush3.bf16.msra.mxu0 %v999_v7  ;;  %987 = vmatpush3.bf16.msra.mxu1 %v999_v7  ;;  %v1048_v42 = vld [vmem:[%s1264_s0 + $0x60] ss:$8 sps:$4 sm:$0xff]   ;;  %v1050_v44 = vld [vmem:[%s1264_s0 + $0x74] ss:$8 sps:$4 sm:$0xff]   ;;  %v1054_v46 = vld [vmem:[%s1264_s0 + $0x70] ss:$8 sps:$4 sm:$0xff]  }
  0x10   :  { %872 = vmatprep.subr.bf16.mxu0 %v1000_v8  ;;  %980 = vmatprep.subr.bf16.mxu1 %v1000_v8  ;;  %v1049_v43 = vld [vmem:[%s1264_s0 + $0xe0] ss:$8 sps:$4 sm:$0xff]   ;;  %v1052_v45 = vld [vmem:[%s1264_s0 + $0xf4] ss:$8 sps:$4 sm:$0xff]   ;;  %v1055_v47 = vld [vmem:[%s1264_s0 + $0xf0] ss:$8 sps:$4 sm:$0xff]  }
  0x13   :  { %873 = vmatpush3.bf16.msra.mxu0 %v1001_v9  ;;  %988 = vmatpush3.bf16.msra.mxu1 %v1001_v9 }
  0x14   :  { %874 = vmatprep.subr.bf16.mxu0 %v1002_v10  ;;  %981 = vmatprep.subr.bf16.mxu1 %v1002_v10 }
  0x17   :  { %875 = vmatpush3.bf16.msra.mxu0 %v1003_v13  ;;  %989 = vmatpush3.bf16.msra.mxu1 %v1003_v13 }
  0x18   :  { %876 = vmatprep.subr.bf16.mxu0 %v1004_v14  ;;  %982 = vmatprep.subr.bf16.mxu1 %v1004_v14 }
  0x1b   :  { %877 = vmatpush3.bf16.msra.mxu0 %v1005_v15  ;;  %990 = vmatpush3.bf16.msra.mxu1 %v1005_v15 }
  0x1c   :  { %878 = vmatprep.subr.bf16.mxu0 %v1006_v16  ;;  %983 = vmatprep.subr.bf16.mxu1 %v1006_v16 }
  0x1f   :  { %879 = vmatpush3.bf16.msra.mxu0 %v1007_v17  ;;  %991 = vmatpush3.bf16.msra.mxu1 %v1007_v17 }
  0x22   :  { %365 = vmatmul.mubr.bf16.vlgmr.msra.gmra.mrb[0].mxu0 %v1008_v18  ;;  %429 = vmatmul.mubr.bf16.vlgmr.msra.gmra.mrb[0].mxu1 %v1011_v19 }
  0x23   :  { %372 = vmatprep.mubr.bf16.mxu0 %v1014_v20  ;;  %436 = vmatprep.mubr.bf16.mxu1 %v1016_v21 }
  0x2a   :  { %373 = vmatmul.mubr.bf16.gmra.mrb[4].mxu0 %v1018_v22  ;;  %437 = vmatmul.mubr.bf16.gmra.mrb[4].mxu1 %v1019_v23 }
  0x2b   :  { %380 = vmatprep.mubr.bf16.mxu0 %v1020_v24  ;;  %444 = vmatprep.mubr.bf16.mxu1 %v1022_v25 }
  0x32   :  { %381 = vmatmul.mubr.bf16.gmra.mrb[8].mxu0 %v1024_v26  ;;  %445 = vmatmul.mubr.bf16.gmra.mrb[8].mxu1 %v1025_v27 }
  0x33   :  { %388 = vmatprep.mubr.bf16.mxu0 %v1026_v28  ;;  %452 = vmatprep.mubr.bf16.mxu1 %v1028_v29 }
  0x3a   :  { %389 = vmatmul.mubr.bf16.gmra.mrb[12].mxu0 %v1030_v30  ;;  %453 = vmatmul.mubr.bf16.gmra.mrb[12].mxu1 %v1031_v31 }
  0x3b   :  { %396 = vmatprep.mubr.bf16.mxu0 %v1032_v32  ;;  %460 = vmatprep.mubr.bf16.mxu1 %v1034_v33 }
  0x42   :  { %397 = vmatmul.mubr.bf16.gmra.mrb[16].mxu0 %v1036_v34  ;;  %461 = vmatmul.mubr.bf16.gmra.mrb[16].mxu1 %v1037_v35 }
  0x43   :  { %404 = vmatprep.mubr.bf16.mxu0 %v1038_v36  ;;  %468 = vmatprep.mubr.bf16.mxu1 %v1040_v37 }
  0x4a   :  { %405 = vmatmul.mubr.bf16.gmra.mrb[20].mxu0 %v1042_v38  ;;  %469 = vmatmul.mubr.bf16.gmra.mrb[20].mxu1 %v1043_v39 }
  0x4b   :  { %412 = vmatprep.mubr.bf16.mxu0 %v1044_v40  ;;  %476 = vmatprep.mubr.bf16.mxu1 %v1046_v41 }
  0x52   :  { %413 = vmatmul.mubr.bf16.gmra.mrb[24].mxu0 %v1048_v42  ;;  %477 = vmatmul.mubr.bf16.gmra.mrb[24].mxu1 %v1049_v43 }
  0x53   :  { %420 = vmatprep.mubr.bf16.mxu0 %v1050_v44  ;;  %484 = vmatprep.mubr.bf16.mxu1 %v1052_v45 }
  0x5a   :  { %421 = vmatmul.mubr.bf16.gmra.mrb[28].mxu0 %v1054_v46  ;;  %485 = vmatmul.mubr.bf16.gmra.mrb[28].mxu1 %v1055_v47 }
  0xf5   :  { %v880_v48 = vpop.f32.mrb[0].mxu0  ;;  %v928_v49 = vpop.f32.mrb[0].mxu1 }
  0xf6   :  { %v881_v50 = vpop.f32.mrb[1].mxu0  ;;  %v929_v51 = vpop.f32.mrb[1].mxu1 }
  0xf7   :  { %v882_v52 = vadd.f32 %v881_v50, %v880_v48  ;;  %v930_v53 = vadd.f32 %v929_v51, %v928_v49  ;;  %v883_v54 = vpop.f32.mrb[2].mxu0  ;;  %v931_v55 = vpop.f32.mrb[2].mxu1 }
  0xf8   :  { %v884_v56 = vpop.f32.mrb[3].mxu0  ;;  %v932_v57 = vpop.f32.mrb[3].mxu1 }
  0xf9   :  { %v885_v58 = vadd.f32 %v884_v56, %v883_v54  ;;  %v933_v59 = vadd.f32 %v932_v57, %v931_v55 }
  0xfb   :  { %v772_v60 = vpack.c.bf16 %v885_v58, %v882_v52  ;;  %v812_v61 = vpack.c.bf16 %v933_v59, %v930_v53 }
  0xfd   :  { %773 = vst [vmem:[%s1265_s2] sm:$0xff] %v772_v60   ;;  %856 = vst [vmem:[%s1265_s2 + $0x40] sm:$0xff] %v812_v61   ;;  %v886_v62 = vpop.f32.mrb[4].mxu0  ;;  %v934_v63 = vpop.f32.mrb[4].mxu1 }
  0xfe   :  { %v887_v0 = vpop.f32.mrb[5].mxu0  ;;  %v935_v1 = vpop.f32.mrb[5].mxu1 }
  0xff   :  { %v888_v2 = vadd.f32 %v887_v0, %v886_v62  ;;  %v936_v3 = vadd.f32 %v935_v1, %v934_v63  ;;  %v889_v4 = vpop.f32.mrb[6].mxu0  ;;  %v937_v5 = vpop.f32.mrb[6].mxu1 }
 0x100   :  { %v890_v6 = vpop.f32.mrb[7].mxu0  ;;  %v938_v7 = vpop.f32.mrb[7].mxu1 }
 0x101   :  { %v891_v8 = vadd.f32 %v890_v6, %v889_v4  ;;  %v939_v9 = vadd.f32 %v938_v7, %v937_v5 }
 0x103   :  { %v777_v10 = vpack.c.bf16 %v891_v8, %v888_v2  ;;  %v817_v11 = vpack.c.bf16 %v939_v9, %v936_v3 }
 0x105   :  { %849 = vst [vmem:[%s1265_s2 + $0x8] sm:$0xff] %v777_v10   ;;  %857 = vst [vmem:[%s1265_s2 + $0x48] sm:$0xff] %v817_v11   ;;  %v892_v12 = vpop.f32.mrb[8].mxu0  ;;  %v940_v13 = vpop.f32.mrb[8].mxu1 }
 0x106   :  { %v893_v14 = vpop.f32.mrb[9].mxu0  ;;  %v941_v15 = vpop.f32.mrb[9].mxu1 }
 0x107   :  { %v894_v16 = vadd.f32 %v893_v14, %v892_v12  ;;  %v942_v17 = vadd.f32 %v941_v15, %v940_v13  ;;  %v895_v18 = vpop.f32.mrb[10].mxu0  ;;  %v943_v19 = vpop.f32.mrb[10].mxu1 }
 0x108   :  { %v896_v20 = vpop.f32.mrb[11].mxu0  ;;  %v944_v21 = vpop.f32.mrb[11].mxu1 }
 0x109   :  { %v897_v22 = vadd.f32 %v896_v20, %v895_v18  ;;  %v945_v23 = vadd.f32 %v944_v21, %v943_v19 }
 0x10b   :  { %v782_v24 = vpack.c.bf16 %v897_v22, %v894_v16  ;;  %v822_v25 = vpack.c.bf16 %v945_v23, %v942_v17 }
 0x10d   :  { %850 = vst [vmem:[%s1265_s2 + $0x10] sm:$0xff] %v782_v24   ;;  %858 = vst [vmem:[%s1265_s2 + $0x50] sm:$0xff] %v822_v25   ;;  %v898_v26 = vpop.f32.mrb[12].mxu0  ;;  %v946_v27 = vpop.f32.mrb[12].mxu1 }
 0x10e   :  { %v899_v28 = vpop.f32.mrb[13].mxu0  ;;  %v947_v29 = vpop.f32.mrb[13].mxu1 }
 0x10f   :  { %v900_v30 = vadd.f32 %v899_v28, %v898_v26  ;;  %v948_v31 = vadd.f32 %v947_v29, %v946_v27  ;;  %v901_v32 = vpop.f32.mrb[14].mxu0  ;;  %v949_v33 = vpop.f32.mrb[14].mxu1 }
 0x110   :  { %v902_v34 = vpop.f32.mrb[15].mxu0  ;;  %v950_v35 = vpop.f32.mrb[15].mxu1 }
 0x111   :  { %v903_v36 = vadd.f32 %v902_v34, %v901_v32  ;;  %v951_v37 = vadd.f32 %v950_v35, %v949_v33 }
 0x113   :  { %v787_v38 = vpack.c.bf16 %v903_v36, %v900_v30  ;;  %v827_v39 = vpack.c.bf16 %v951_v37, %v948_v31 }
 0x115   :  { %851 = vst [vmem:[%s1265_s2 + $0x18] sm:$0xff] %v787_v38   ;;  %859 = vst [vmem:[%s1265_s2 + $0x58] sm:$0xff] %v827_v39   ;;  %v904_v40 = vpop.f32.mrb[16].mxu0  ;;  %v952_v41 = vpop.f32.mrb[16].mxu1 }
 0x116   :  { %v905_v42 = vpop.f32.mrb[17].mxu0  ;;  %v953_v43 = vpop.f32.mrb[17].mxu1 }
 0x117   :  { %v906_v44 = vadd.f32 %v905_v42, %v904_v40  ;;  %v954_v45 = vadd.f32 %v953_v43, %v952_v41  ;;  %v907_v46 = vpop.f32.mrb[18].mxu0  ;;  %v955_v47 = vpop.f32.mrb[18].mxu1 }
 0x118   :  { %v908_v48 = vpop.f32.mrb[19].mxu0  ;;  %v956_v49 = vpop.f32.mrb[19].mxu1 }
 0x119   :  { %v909_v50 = vadd.f32 %v908_v48, %v907_v46  ;;  %v957_v51 = vadd.f32 %v956_v49, %v955_v47 }
 0x11b   :  { %v792_v52 = vpack.c.bf16 %v909_v50, %v906_v44  ;;  %v832_v53 = vpack.c.bf16 %v957_v51, %v954_v45 }
 0x11d   :  { %852 = vst [vmem:[%s1265_s2 + $0x20] sm:$0xff] %v792_v52   ;;  %860 = vst [vmem:[%s1265_s2 + $0x60] sm:$0xff] %v832_v53   ;;  %v910_v54 = vpop.f32.mrb[20].mxu0  ;;  %v958_v55 = vpop.f32.mrb[20].mxu1 }
 0x11e   :  { %v911_v56 = vpop.f32.mrb[21].mxu0  ;;  %v959_v57 = vpop.f32.mrb[21].mxu1 }
 0x11f   :  { %v912_v58 = vadd.f32 %v911_v56, %v910_v54  ;;  %v960_v59 = vadd.f32 %v959_v57, %v958_v55  ;;  %v913_v60 = vpop.f32.mrb[22].mxu0  ;;  %v961_v61 = vpop.f32.mrb[22].mxu1 }
 0x120   :  { %v914_v62 = vpop.f32.mrb[23].mxu0  ;;  %v962_v63 = vpop.f32.mrb[23].mxu1 }
 0x121   :  { %v915_v0 = vadd.f32 %v914_v62, %v913_v60  ;;  %v963_v1 = vadd.f32 %v962_v63, %v961_v61 }
 0x123   :  { %v797_v2 = vpack.c.bf16 %v915_v0, %v912_v58  ;;  %v837_v3 = vpack.c.bf16 %v963_v1, %v960_v59 }
 0x125   :  { %853 = vst [vmem:[%s1265_s2 + $0x28] sm:$0xff] %v797_v2   ;;  %861 = vst [vmem:[%s1265_s2 + $0x68] sm:$0xff] %v837_v3   ;;  %v916_v4 = vpop.f32.mrb[24].mxu0  ;;  %v964_v5 = vpop.f32.mrb[24].mxu1 }
 0x126   :  { %v917_v6 = vpop.f32.mrb[25].mxu0  ;;  %v965_v7 = vpop.f32.mrb[25].mxu1 }
 0x127   :  { %v918_v8 = vadd.f32 %v917_v6, %v916_v4  ;;  %v966_v9 = vadd.f32 %v965_v7, %v964_v5  ;;  %v919_v10 = vpop.f32.mrb[26].mxu0  ;;  %v967_v11 = vpop.f32.mrb[26].mxu1 }
 0x128   :  { %v920_v12 = vpop.f32.mrb[27].mxu0  ;;  %v968_v13 = vpop.f32.mrb[27].mxu1 }
 0x129   :  { %v921_v14 = vadd.f32 %v920_v12, %v919_v10  ;;  %v969_v15 = vadd.f32 %v968_v13, %v967_v11 }
 0x12b   :  { %v802_v16 = vpack.c.bf16 %v921_v14, %v918_v8  ;;  %v842_v17 = vpack.c.bf16 %v969_v15, %v966_v9 }
 0x12d   :  { %854 = vst [vmem:[%s1265_s2 + $0x30] sm:$0xff] %v802_v16   ;;  %862 = vst [vmem:[%s1265_s2 + $0x70] sm:$0xff] %v842_v17   ;;  %v922_v18 = vpop.f32.mrb[28].mxu0  ;;  %v970_v19 = vpop.f32.mrb[28].mxu1 }
 0x12e   :  { %v923_v20 = vpop.f32.mrb[29].mxu0  ;;  %v971_v21 = vpop.f32.mrb[29].mxu1 }
 0x12f   :  { %v924_v22 = vadd.f32 %v923_v20, %v922_v18  ;;  %v972_v23 = vadd.f32 %v971_v21, %v970_v19  ;;  %v925_v24 = vpop.f32.mrb[30].mxu0  ;;  %v973_v25 = vpop.f32.mrb[30].mxu1 }
 0x130   :  { %v926_v26 = vpop.f32.mrb[31].mxu0  ;;  %v974_v27 = vpop.f32.mrb[31].mxu1 }
 0x131   :  { %v927_v28 = vadd.f32 %v926_v26, %v925_v24  ;;  %v975_v29 = vadd.f32 %v974_v27, %v973_v25 }
 0x133   :  { %v807_v30 = vpack.c.bf16 %v927_v28, %v924_v22  ;;  %v847_v31 = vpack.c.bf16 %v975_v29, %v972_v23 }
 0x135   :  { %855 = vst [vmem:[%s1265_s2 + $0x38] sm:$0xff] %v807_v30   ;;  %863 = vst [vmem:[%s1265_s2 + $0x78] sm:$0xff] %v847_v31  }

// kernel: net_forward.15
= control target key start
LH: loop header
LB: loop body
LE: loop exit
PB: predicated region body
PF: predicated region fallthrough
CT: control target
= control target key end

     0   :  { %s2962_s1 = inlined_call_operand.vmem [shape: bf16[256,384], index: 1, kind: input, shape index: {}]   ;;  %s2963_s0 = inlined_call_operand.vmem [shape: bf16[256,256], index: 0, kind: input, shape index: {}]   ;;  %s2964_s2 = inlined_call_operand.vmem [shape: f32[1,384], index: 2, kind: input, shape index: {}]   ;;  %s2965_s3 = inlined_call_operand.vmem [shape: bf16[256,384], index: 3, kind: output, shape index: {}]  }
   0x1   :  { %v2293_v0 = vld [vmem:[%s2962_s1 + $0x4] ss:$12 sps:$4 sm:$0xff]   ;;  %v2295_v1 = vld [vmem:[%s2962_s1] ss:$12 sps:$4 sm:$0xff]   ;;  %v2296_v2 = vld [vmem:[%s2962_s1 + $0x1c] ss:$12 sps:$4 sm:$0xff]  }
   0x2   :  { %729 = vmatprep.subr.bf16.mxu0 %v2293_v0  ;;  %v2298_v3 = vld [vmem:[%s2962_s1 + $0x18] ss:$12 sps:$4 sm:$0xff]   ;;  %v2299_v4 = vld [vmem:[%s2962_s1 + $0x34] ss:$12 sps:$4 sm:$0xff]   ;;  %v2301_v5 = vld [vmem:[%s2962_s1 + $0x30] ss:$12 sps:$4 sm:$0xff]  }
   0x3   :  { %730 = vmatpush1.bf16.msra.mxu0 %v2295_v1  ;;  %v2302_v6 = vld [vmem:[%s2962_s1 + $0x4c] ss:$12 sps:$4 sm:$0xff]   ;;  %v2314_v7 = vld [vmem:[%s2962_s1 + $0xc8] ss:$12 sps:$4 sm:$0xff]   ;;  %v2305_v9 = vld [vmem:[%s2962_s1 + $0x64] ss:$12 sps:$4 sm:$0xff]  }
   0x4   :  { %731 = vmatprep.subr.bf16.mxu0 %v2296_v2  ;;  %v2304_v8 = vld [vmem:[%s2962_s1 + $0x48] ss:$12 sps:$4 sm:$0xff]   ;;  %2181 = vmatprep.subr.bf16.mxu1 %v2314_v7  ;;  %v2319_v11 = vld [vmem:[%s2962_s1 + $0xe0] ss:$12 sps:$4 sm:$0xff]   ;;  %v2324_v15 = vld [vmem:[%s2962_s1 + $0xf8] ss:$12 sps:$4 sm:$0xff]  }
   0x5   :  { %v2317_v10 = vld [vmem:[%s2962_s1 + $0x8] ss:$12 sps:$4 sm:$0xff]   ;;  %v2307_v12 = vld [vmem:[%s2962_s1 + $0x60] ss:$12 sps:$4 sm:$0xff]   ;;  %v2310_v16 = vld [vmem:[%s2962_s1 + $0x78] ss:$12 sps:$4 sm:$0xff]  }
   0x6   :  { %2182 = vmatpush3.bf16.msra.mxu1 %v2317_v10  ;;  %v2308_v13 = vld [vmem:[%s2962_s1 + $0x7c] ss:$12 sps:$4 sm:$0xff]   ;;  %v2322_v14 = vld [vmem:[%s2962_s1 + $0x20] ss:$12 sps:$4 sm:$0xff]   ;;  %v2327_v17 = vld [vmem:[%s2962_s1 + $0x38] ss:$12 sps:$4 sm:$0xff]  }
   0x7   :  { %732 = vmatpush1.bf16.msra.mxu0 %v2298_v3  ;;  %2183 = vmatprep.subr.bf16.mxu1 %v2319_v11  ;;  %v2311_v18 = vld [vmem:[%s2962_s1 + $0x94] ss:$12 sps:$4 sm:$0xff]   ;;  %v2329_v19 = vld [vmem:[%s2962_s1 + $0x110] ss:$12 sps:$4 sm:$0xff]   ;;  %v2315_v23 = vld [vmem:[%s2962_s1 + $0xac] ss:$12 sps:$4 sm:$0xff]  }
   0x8   :  { %733 = vmatprep.subr.bf16.mxu0 %v2299_v4  ;;  %v2313_v20 = vld [vmem:[%s2962_s1 + $0x90] ss:$12 sps:$4 sm:$0xff]   ;;  %v2334_v22 = vld [vmem:[%s2962_s1 + $0x128] ss:$12 sps:$4 sm:$0xff]   ;;  %v2339_v26 = vld [vmem:[%s2962_s1 + $0x140] ss:$12 sps:$4 sm:$0xff]  }
   0x9   :  { %v2332_v21 = vld [vmem:[%s2962_s1 + $0x50] ss:$12 sps:$4 sm:$0xff]   ;;  %v2318_v24 = vld [vmem:[%s2962_s1 + $0xa8] ss:$12 sps:$4 sm:$0xff]   ;;  %v2323_v28 = vld [vmem:[%s2962_s1 + $0xc0] ss:$12 sps:$4 sm:$0xff]  }
   0xa   :  { %2184 = vmatpush3.bf16.msra.mxu1 %v2322_v14  ;;  %v2337_v25 = vld [vmem:[%s2962_s1 + $0x68] ss:$12 sps:$4 sm:$0xff]   ;;  %v2320_v27 = vld [vmem:[%s2962_s1 + $0xc4] ss:$12 sps:$4 sm:$0xff]   ;;  %v2342_v29 = vld [vmem:[%s2962_s1 + $0x80] ss:$12 sps:$4 sm:$0xff]  }
   0xb   :  { %734 = vmatpush1.bf16.msra.mxu0 %v2301_v5  ;;  %2185 = vmatprep.subr.bf16.mxu1 %v2324_v15  ;;  %v2344_v30 = vld [vmem:[%s2962_s1 + $0x158] ss:$12 sps:$4 sm:$0xff]   ;;  %v2325_v31 = vld [vmem:[%s2962_s1 + $0xdc] ss:$12 sps:$4 sm:$0xff]   ;;  %v2330_v35 = vld [vmem:[%s2962_s1 + $0xf4] ss:$12 sps:$4 sm:$0xff]  }
   0xc   :  { %735 = vmatprep.subr.bf16.mxu0 %v2302_v6  ;;  %v2347_v32 = vld [vmem:[%s2962_s1 + $0x98] ss:$12 sps:$4 sm:$0xff]   ;;  %v2349_v34 = vld [vmem:[%s2962_s1 + $0x170] ss:$12 sps:$4 sm:$0xff]   ;;  %v2354_v40 = vld [vmem:[%s2963_s0] ss:$8 sps:$4 sm:$0xff]  }
   0xd   :  { %v2328_v33 = vld [vmem:[%s2962_s1 + $0xd8] ss:$12 sps:$4 sm:$0xff]   ;;  %v2352_v37 = vld [vmem:[%s2962_s1 + $0xb0] ss:$12 sps:$4 sm:$0xff]   ;;  %v2338_v42 = vld [vmem:[%s2962_s1 + $0x108] ss:$12 sps:$4 sm:$0xff]  }
   0xe   :  { %2186 = vmatpush3.bf16.msra.mxu1 %v2327_v17  ;;  %v2356_v36 = vld [vmem:[%s2963_s0 + $0x4] ss:$8 sps:$4 sm:$0xff]   ;;  %v2333_v38 = vld [vmem:[%s2962_s1 + $0xf0] ss:$12 sps:$4 sm:$0xff]   ;;  %v2350_v49 = vld [vmem:[%s2962_s1 + $0x154] ss:$12 sps:$4 sm:$0xff]  }
   0xf   :  { %736 = vmatpush1.bf16.msra.mxu0 %v2304_v8  ;;  %2187 = vmatprep.subr.bf16.mxu1 %v2329_v19  ;;  %v2335_v39 = vld [vmem:[%s2962_s1 + $0x10c] ss:$12 sps:$4 sm:$0xff]   ;;  %v2360_v41 = vld [vmem:[%s2963_s0 + $0x14] ss:$8 sps:$4 sm:$0xff]   ;;  %v2340_v43 = vld [vmem:[%s2962_s1 + $0x124] ss:$12 sps:$4 sm:$0xff]  }
  0x10   :  { %737 = vmatprep.subr.bf16.mxu0 %v2305_v9  ;;  %954 = vmatprep.mubr.bf16.mxu1 %v2356_v36  ;;  %v2343_v44 = vld [vmem:[%s2962_s1 + $0x120] ss:$12 sps:$4 sm:$0xff]   ;;  %v2345_v45 = vld [vmem:[%s2962_s1 + $0x13c] ss:$12 sps:$4 sm:$0xff]   ;;  %v2362_v46 = vld [vmem:[%s2963_s0 + $0x10] ss:$8 sps:$4 sm:$0xff]  }
  0x11   :  { %761 = vmatprep.mubr.bf16.mxu0 %v2356_v36  ;;  %v2363_v47 = vld [vmem:[%s2963_s0 + $0x24] ss:$8 sps:$4 sm:$0xff]   ;;  %v2353_v50 = vld [vmem:[%s2962_s1 + $0x150] ss:$12 sps:$4 sm:$0xff]   ;;  %v2365_v52 = vld [vmem:[%s2963_s0 + $0x20] ss:$8 sps:$4 sm:$0xff]  }
  0x12   :  { %2188 = vmatpush3.bf16.msra.mxu1 %v2332_v21  ;;  %v2348_v48 = vld [vmem:[%s2962_s1 + $0x138] ss:$12 sps:$4 sm:$0xff]   ;;  %v2366_v53 = vld [vmem:[%s2963_s0 + $0x34] ss:$8 sps:$4 sm:$0xff]   ;;  %v2371_v57 = vld [vmem:[%s2963_s0 + $0x40] ss:$8 sps:$4 sm:$0xff]  }
  0x13   :  { %738 = vmatpush1.bf16.msra.mxu0 %v2307_v12  ;;  %2189 = vmatprep.subr.bf16.mxu1 %v2334_v22  ;;  %v2357_v51 = vld [vmem:[%s2962_s1 + $0x16c] ss:$12 sps:$4 sm:$0xff]   ;;  %v2359_v54 = vld [vmem:[%s2962_s1 + $0x168] ss:$12 sps:$4 sm:$0xff]   ;;  %v1374_v19 = vld [vmem:[%s2964_s2] sm:$0x7] }
  0x14   :  { %739 = vmatprep.subr.bf16.mxu0 %v2308_v13  ;;  %v2368_v55 = vld [vmem:[%s2963_s0 + $0x30] ss:$8 sps:$4 sm:$0xff]   ;;  %v2369_v56 = vld [vmem:[%s2963_s0 + $0x44] ss:$8 sps:$4 sm:$0xff]   ;;  %v2372_v58 = vld [vmem:[%s2963_s0 + $0x54] ss:$8 sps:$4 sm:$0xff]  }
  0x15   :  { %v2374_v59 = vld [vmem:[%s2963_s0 + $0x50] ss:$8 sps:$4 sm:$0xff]   ;;  %v2375_v60 = vld [vmem:[%s2963_s0 + $0x64] ss:$8 sps:$4 sm:$0xff]   ;;  %v2377_v61 = vld [vmem:[%s2963_s0 + $0x60] ss:$8 sps:$4 sm:$0xff]  }
  0x16   :  { %2190 = vmatpush3.bf16.msra.mxu1 %v2337_v25  ;;  %v2378_v62 = vld [vmem:[%s2963_s0 + $0x74] ss:$8 sps:$4 sm:$0xff]   ;;  %v2380_v63 = vld [vmem:[%s2963_s0 + $0x70] ss:$8 sps:$4 sm:$0xff]   ;;  %v2381_v0 = vld [vmem:[%s2963_s0 + $0x84] ss:$8 sps:$4 sm:$0xff]  }
  0x17   :  { %740 = vmatpush1.bf16.msra.mxu0 %v2310_v16  ;;  %2191 = vmatprep.subr.bf16.mxu1 %v2339_v26  ;;  %v2383_v1 = vld [vmem:[%s2963_s0 + $0x80] ss:$8 sps:$4 sm:$0xff]   ;;  %v2384_v2 = vld [vmem:[%s2963_s0 + $0x94] ss:$8 sps:$4 sm:$0xff]   ;;  %v2386_v3 = vld [vmem:[%s2963_s0 + $0x90] ss:$8 sps:$4 sm:$0xff]   ;;  %v1376_v16 = vlaneseq }
  0x18   :  { %741 = vmatprep.subr.bf16.mxu0 %v2311_v18  ;;  %v2387_v4 = vld [vmem:[%s2963_s0 + $0xa4] ss:$8 sps:$4 sm:$0xff]   ;;  %v2389_v5 = vld [vmem:[%s2963_s0 + $0xa0] ss:$8 sps:$4 sm:$0xff]   ;;  %v2390_v6 = vld [vmem:[%s2963_s0 + $0xb4] ss:$8 sps:$4 sm:$0xff]  }
  0x19   :  { %v2392_v7 = vld [vmem:[%s2963_s0 + $0xb0] ss:$8 sps:$4 sm:$0xff]   ;;  %v2393_v8 = vld [vmem:[%s2963_s0 + $0xc4] ss:$8 sps:$4 sm:$0xff]   ;;  %v2395_v9 = vld [vmem:[%s2963_s0 + $0xc0] ss:$8 sps:$4 sm:$0xff]  }
  0x1a   :  { %2192 = vmatpush3.bf16.msra.mxu1 %v2342_v29  ;;  %v2396_v10 = vld [vmem:[%s2963_s0 + $0xd4] ss:$8 sps:$4 sm:$0xff]   ;;  %v2398_v11 = vld [vmem:[%s2963_s0 + $0xd0] ss:$8 sps:$4 sm:$0xff]   ;;  %v2399_v12 = vld [vmem:[%s2963_s0 + $0xe4] ss:$8 sps:$4 sm:$0xff]  }
  0x1b   :  { %742 = vmatpush1.bf16.msra.mxu0 %v2313_v20  ;;  %2193 = vmatprep.subr.bf16.mxu1 %v2344_v30  ;;  %v2401_v13 = vld [vmem:[%s2963_s0 + $0xe0] ss:$8 sps:$4 sm:$0xff]   ;;  %v2402_v14 = vld [vmem:[%s2963_s0 + $0xf4] ss:$8 sps:$4 sm:$0xff]   ;;  %v2404_v15 = vld [vmem:[%s2963_s0 + $0xf0] ss:$8 sps:$4 sm:$0xff]  }
  0x1c   :  { %743 = vmatprep.subr.bf16.mxu0 %v2315_v23  ;;  %v1377_v17 = vshrl.u32 %v1376_v16, 7 }
  0x1e   :  { %2194 = vmatpush3.bf16.msra.mxu1 %v2347_v32  ;;  %v1386_v18 = vsub.s32 2, %v1377_v17 }
  0x1f   :  { %744 = vmatpush1.bf16.msra.mxu0 %v2318_v24  ;;  %2195 = vmatprep.subr.bf16.mxu1 %v2349_v34 }
  0x20   :  { %745 = vmatprep.subr.bf16.mxu0 %v2320_v27  ;;  %v2668_v21 = vrot.slane %v1374_v19, %v1386_v18 }
  0x22   :  { %2196 = vmatpush3.bf16.msra.mxu1 %v2352_v37 }
  0x23   :  { %746 = vmatpush1.bf16.msra.mxu0 %v2323_v28 }
  0x24   :  { %747 = vmatprep.subr.bf16.mxu0 %v2325_v31 }
  0x25   :  { %955 = vmatmul.mubr.bf16.vlgmr.msra.gmra.mrb[0].mxu1 %v2354_v40 }
  0x26   :  { %962 = vmatprep.mubr.bf16.mxu1 %v2360_v41 }
  0x27   :  { %748 = vmatpush1.bf16.msra.mxu0 %v2328_v33 }
  0x28   :  { %749 = vmatprep.subr.bf16.mxu0 %v2330_v35 }
  0x2b   :  { %750 = vmatpush1.bf16.msra.mxu0 %v2333_v38 }
  0x2c   :  { %751 = vmatprep.subr.bf16.mxu0 %v2335_v39 }
  0x2d   :  { %963 = vmatmul.mubr.bf16.gmra.mrb[4].mxu1 %v2362_v46 }
  0x2e   :  { %970 = vmatprep.mubr.bf16.mxu1 %v2363_v47 }
  0x2f   :  { %752 = vmatpush1.bf16.msra.mxu0 %v2338_v42 }
  0x30   :  { %753 = vmatprep.subr.bf16.mxu0 %v2340_v43  ;;  %v1382_v43 = vsub.s32 1, %v1377_v17 }
  0x33   :  { %754 = vmatpush1.bf16.msra.mxu0 %v2343_v44 }
  0x34   :  { %755 = vmatprep.subr.bf16.mxu0 %v2345_v45 }
  0x35   :  { %971 = vmatmul.mubr.bf16.gmra.mrb[8].mxu1 %v2365_v52 }
  0x36   :  { %978 = vmatprep.mubr.bf16.mxu1 %v2366_v53 }
  0x37   :  { %756 = vmatpush1.bf16.msra.mxu0 %v2348_v48 }
  0x38   :  { %757 = vmatprep.subr.bf16.mxu0 %v2350_v49 }
  0x3b   :  { %758 = vmatpush1.bf16.msra.mxu0 %v2353_v50 }
  0x3c   :  { %759 = vmatprep.subr.bf16.mxu0 %v2357_v51 }
  0x3d   :  { %979 = vmatmul.mubr.bf16.gmra.mrb[12].mxu1 %v2368_v55 }
  0x3e   :  { %986 = vmatprep.mubr.bf16.mxu1 %v2369_v56 }
  0x3f   :  { %760 = vmatpush1.bf16.msra.mxu0 %v2359_v54 }
  0x42   :  { %762 = vmatmul.mubr.bf16.vlgmr.msra.gmra.mrb[0].mxu0 %v2354_v40  ;;  %v1378_v40 = vsub.s32 0, %v1377_v17 }
  0x43   :  { %771 = vmatprep.mubr.bf16.mxu0 %v2360_v41 }
  0x44   :  { %v2680_v48 = vrot.slane %v1374_v19, %v1378_v40 }
  0x45   :  { %987 = vmatmul.mubr.bf16.gmra.mrb[16].mxu1 %v2371_v57 }
  0x46   :  { %994 = vmatprep.mubr.bf16.mxu1 %v2372_v58 }
  0x4a   :  { %772 = vmatmul.mubr.bf16.gmra.mrb[4].mxu0 %v2362_v46 }
  0x4b   :  { %781 = vmatprep.mubr.bf16.mxu0 %v2363_v47 }
  0x4d   :  { %995 = vmatmul.mubr.bf16.gmra.mrb[20].mxu1 %v2374_v59 }
  0x4e   :  { %1002 = vmatprep.mubr.bf16.mxu1 %v2375_v60 }
  0x52   :  { %782 = vmatmul.mubr.bf16.gmra.mrb[8].mxu0 %v2365_v52  ;;  %v2685_v52 = vrot.slane %v1374_v19, %v1382_v43 }
  0x53   :  { %791 = vmatprep.mubr.bf16.mxu0 %v2366_v53 }
  0x55   :  { %1003 = vmatmul.mubr.bf16.gmra.mrb[24].mxu1 %v2377_v61 }
  0x56   :  { %1010 = vmatprep.mubr.bf16.mxu1 %v2378_v62 }
  0x5a   :  { %792 = vmatmul.mubr.bf16.gmra.mrb[12].mxu0 %v2368_v55 }
  0x5b   :  { %801 = vmatprep.mubr.bf16.mxu0 %v2369_v56 }
  0x5d   :  { %1011 = vmatmul.mubr.bf16.gmra.mrb[28].mxu1 %v2380_v63 }
  0x5e   :  { %1018 = vmatprep.mubr.bf16.mxu1 %v2381_v0 }
  0x62   :  { %802 = vmatmul.mubr.bf16.gmra.mrb[16].mxu0 %v2371_v57 }
  0x63   :  { %811 = vmatprep.mubr.bf16.mxu0 %v2372_v58 }
  0x65   :  { %1019 = vmatmul.mubr.bf16.gmra.mrb[32].mxu1 %v2383_v1 }
  0x66   :  { %1026 = vmatprep.mubr.bf16.mxu1 %v2384_v2 }
  0x6a   :  { %812 = vmatmul.mubr.bf16.gmra.mrb[20].mxu0 %v2374_v59 }
  0x6b   :  { %821 = vmatprep.mubr.bf16.mxu0 %v2375_v60 }
  0x6d   :  { %1027 = vmatmul.mubr.bf16.gmra.mrb[36].mxu1 %v2386_v3 }
  0x6e   :  { %1034 = vmatprep.mubr.bf16.mxu1 %v2387_v4 }
  0x72   :  { %822 = vmatmul.mubr.bf16.gmra.mrb[24].mxu0 %v2377_v61 }
  0x73   :  { %831 = vmatprep.mubr.bf16.mxu0 %v2378_v62 }
  0x75   :  { %1035 = vmatmul.mubr.bf16.gmra.mrb[40].mxu1 %v2389_v5 }
  0x76   :  { %1042 = vmatprep.mubr.bf16.mxu1 %v2390_v6 }
  0x7a   :  { %832 = vmatmul.mubr.bf16.gmra.mrb[28].mxu0 %v2380_v63 }
  0x7b   :  { %841 = vmatprep.mubr.bf16.mxu0 %v2381_v0 }
  0x7d   :  { %1043 = vmatmul.mubr.bf16.gmra.mrb[44].mxu1 %v2392_v7 }
  0x7e   :  { %1050 = vmatprep.mubr.bf16.mxu1 %v2393_v8 }
  0x82   :  { %842 = vmatmul.mubr.bf16.gmra.mrb[32].mxu0 %v2383_v1 }
  0x83   :  { %851 = vmatprep.mubr.bf16.mxu0 %v2384_v2 }
  0x85   :  { %1051 = vmatmul.mubr.bf16.gmra.mrb[48].mxu1 %v2395_v9 }
  0x86   :  { %1058 = vmatprep.mubr.bf16.mxu1 %v2396_v10 }
  0x8a   :  { %852 = vmatmul.mubr.bf16.gmra.mrb[36].mxu0 %v2386_v3 }
  0x8b   :  { %861 = vmatprep.mubr.bf16.mxu0 %v2387_v4 }
  0x8d   :  { %1059 = vmatmul.mubr.bf16.gmra.mrb[52].mxu1 %v2398_v11 }
  0x8e   :  { %1066 = vmatprep.mubr.bf16.mxu1 %v2399_v12 }
  0x92   :  { %862 = vmatmul.mubr.bf16.gmra.mrb[40].mxu0 %v2389_v5 }
  0x93   :  { %871 = vmatprep.mubr.bf16.mxu0 %v2390_v6 }
  0x95   :  { %1067 = vmatmul.mubr.bf16.gmra.mrb[56].mxu1 %v2401_v13 }
  0x96   :  { %1074 = vmatprep.mubr.bf16.mxu1 %v2402_v14 }
  0x9a   :  { %872 = vmatmul.mubr.bf16.gmra.mrb[44].mxu0 %v2392_v7 }
  0x9b   :  { %881 = vmatprep.mubr.bf16.mxu0 %v2393_v8 }
  0x9d   :  { %1075 = vmatmul.mubr.bf16.gmra.mrb[60].mxu1 %v2404_v15 }
  0xa2   :  { %882 = vmatmul.mubr.bf16.gmra.mrb[48].mxu0 %v2395_v9 }
  0xa3   :  { %891 = vmatprep.mubr.bf16.mxu0 %v2396_v10 }
  0xaa   :  { %892 = vmatmul.mubr.bf16.gmra.mrb[52].mxu0 %v2398_v11 }
  0xab   :  { %901 = vmatprep.mubr.bf16.mxu0 %v2399_v12 }
  0xb2   :  { %902 = vmatmul.mubr.bf16.gmra.mrb[56].mxu0 %v2401_v13 }
  0xb3   :  { %911 = vmatprep.mubr.bf16.mxu0 %v2402_v14 }
  0xba   :  { %912 = vmatmul.mubr.bf16.gmra.mrb[60].mxu0 %v2404_v15 }
  0xf8   :  { %v2197_v20 = vpop.f32.mrb[0].mxu1 }
  0xf9   :  { %v2198_v22 = vpop.f32.mrb[1].mxu1 }
  0xfa   :  { %v2199_v23 = vadd.f32 %v2198_v22, %v2197_v20  ;;  %v2200_v24 = vpop.f32.mrb[2].mxu1 }
  0xfb   :  { %v2201_v25 = vpop.f32.mrb[3].mxu1 }
  0xfc   :  { %v1393_v26 = vadd.f32 %v2199_v23, %v2668_v21  ;;  %v2202_v27 = vadd.f32 %v2201_v25, %v2200_v24 }
  0xfe   :  { %v1489_v28 = vmax.f32 %v1393_v26, 0.0  ;;  %v1396_v29 = vadd.f32 %v2202_v27, %v2668_v21 }
 0x100   :  { %v2118_v30 = vpack.c.bf16 %v1489_v28, %v1489_v28  ;;  %v1492_v31 = vmax.f32 %v1396_v29, 0.0  ;;  %v2203_v32 = vpop.f32.mrb[4].mxu1 }
 0x101   :  { %v2204_v33 = vpop.f32.mrb[5].mxu1 }
 0x102   :  { %1904 = vst [vmem:[%s2965_s3 + $0x8] sm:$0xf] %v2118_v30  ;;  %v2120_v34 = vpack.c.bf16 %v1492_v31, %v1492_v31  ;;  %v2205_v35 = vadd.f32 %v2204_v33, %v2203_v32  ;;  %v2206_v36 = vpop.f32.mrb[6].mxu1 }
 0x103   :  { %v2207_v37 = vpop.f32.mrb[7].mxu1 }
 0x104   :  { %1906 = vst [vmem:[%s2965_s3 + $0x14] sm:$0xf] %v2120_v34  ;;  %v1399_v38 = vadd.f32 %v2205_v35, %v2668_v21  ;;  %v2208_v39 = vadd.f32 %v2207_v37, %v2206_v36 }
 0x106   :  { %v1495_v41 = vmax.f32 %v1399_v38, 0.0  ;;  %v1402_v42 = vadd.f32 %v2208_v39, %v2668_v21 }
 0x108   :  { %v2122_v44 = vpack.c.bf16 %v1495_v41, %v1495_v41  ;;  %v1498_v45 = vmax.f32 %v1402_v42, 0.0  ;;  %v2209_v46 = vpop.f32.mrb[8].mxu1 }
 0x109   :  { %v2210_v47 = vpop.f32.mrb[9].mxu1 }
 0x10a   :  { %1908 = vst [vmem:[%s2965_s3 + $0x20] sm:$0xf] %v2122_v44  ;;  %v2124_v49 = vpack.c.bf16 %v1498_v45, %v1498_v45  ;;  %v2211_v50 = vadd.f32 %v2210_v47, %v2209_v46  ;;  %v2212_v51 = vpop.f32.mrb[10].mxu1 }
 0x10b   :  { %v2213_v53 = vpop.f32.mrb[11].mxu1 }
 0x10c   :  { %1910 = vst [vmem:[%s2965_s3 + $0x2c] sm:$0xf] %v2124_v49  ;;  %v1405_v54 = vadd.f32 %v2211_v50, %v2668_v21  ;;  %v2214_v55 = vadd.f32 %v2213_v53, %v2212_v51 }
 0x10e   :  { %v1501_v59 = vmax.f32 %v1405_v54, 0.0  ;;  %v1408_v60 = vadd.f32 %v2214_v55, %v2668_v21 }
 0x110   :  { %v2126_v2 = vpack.c.bf16 %v1501_v59, %v1501_v59  ;;  %v1504_v3 = vmax.f32 %v1408_v60, 0.0  ;;  %v2215_v4 = vpop.f32.mrb[12].mxu1 }
 0x111   :  { %v2216_v7 = vpop.f32.mrb[13].mxu1 }
 0x112   :  { %1912 = vst [vmem:[%s2965_s3 + $0x38] sm:$0xf] %v2126_v2  ;;  %v2128_v9 = vpack.c.bf16 %v1504_v3, %v1504_v3  ;;  %v2217_v10 = vadd.f32 %v2216_v7, %v2215_v4  ;;  %v2218_v11 = vpop.f32.mrb[14].mxu1 }
 0x113   :  { %v2219_v14 = vpop.f32.mrb[15].mxu1 }
 0x114   :  { %1914 = vst [vmem:[%s2965_s3 + $0x44] sm:$0xf] %v2128_v9  ;;  %v1411_v15 = vadd.f32 %v2217_v10, %v2668_v21  ;;  %v2220_v16 = vadd.f32 %v2219_v14, %v2218_v11 }
 0x115   :  { %v763_v56 = vpop.f32.mrb[0].mxu0 }
 0x116   :  { %v1391_v57 = vadd.f32 %v2680_v48, %v763_v56  ;;  %v765_v58 = vpop.f32.mrb[1].mxu0  ;;  %v1507_v22 = vmax.f32 %v1411_v15, 0.0  ;;  %v1414_v23 = vadd.f32 %v2220_v16, %v2668_v21 }
 0x117   :  { %v1392_v61 = vadd.f32 %v2685_v52, %v765_v58  ;;  %v767_v62 = vpop.f32.mrb[2].mxu0 }
 0x118   :  { %v1487_v63 = vmax.f32 %v1391_v57, 0.0  ;;  %v1394_v0 = vadd.f32 %v2680_v48, %v767_v62  ;;  %v769_v1 = vpop.f32.mrb[3].mxu0  ;;  %v2130_v29 = vpack.c.bf16 %v1507_v22, %v1507_v22  ;;  %v1510_v30 = vmax.f32 %v1414_v23, 0.0  ;;  %v2221_v31 = vpop.f32.mrb[16].mxu1 }
 0x119   :  { %v1488_v5 = vmax.f32 %v1392_v61, 0.0  ;;  %v1395_v6 = vadd.f32 %v2685_v52, %v769_v1  ;;  %v2222_v34 = vpop.f32.mrb[17].mxu1 }
 0x11a   :  { %v1490_v8 = vmax.f32 %v1394_v0, 0.0  ;;  %1916 = vst [vmem:[%s2965_s3 + $0x50] sm:$0xf] %v2130_v29  ;;  %v2132_v36 = vpack.c.bf16 %v1510_v30, %v1510_v30  ;;  %v2223_v37 = vadd.f32 %v2222_v34, %v2221_v31  ;;  %v2224_v38 = vpop.f32.mrb[18].mxu1 }
 0x11b   :  { %v2117_v12 = vpack.c.bf16 %v1488_v5, %v1487_v63  ;;  %v1491_v13 = vmax.f32 %v1395_v6, 0.0  ;;  %v2225_v41 = vpop.f32.mrb[19].mxu1 }
 0x11c   :  { %1918 = vst [vmem:[%s2965_s3 + $0x5c] sm:$0xf] %v2132_v36  ;;  %v1417_v42 = vadd.f32 %v2223_v37, %v2668_v21  ;;  %v2226_v43 = vadd.f32 %v2225_v41, %v2224_v38 }
 0x11d   :  { %1903 = vst [vmem:[%s2965_s3] sm:$0xff] %v2117_v12  ;;  %v2119_v17 = vpack.c.bf16 %v1491_v13, %v1490_v8  ;;  %v773_v18 = vpop.f32.mrb[4].mxu0 }
 0x11e   :  { %v1397_v19 = vadd.f32 %v2680_v48, %v773_v18  ;;  %v775_v20 = vpop.f32.mrb[5].mxu0  ;;  %v1513_v49 = vmax.f32 %v1417_v42, 0.0  ;;  %v1420_v50 = vadd.f32 %v2226_v43, %v2668_v21 }
 0x11f   :  { %1905 = vst [vmem:[%s2965_s3 + $0xc] sm:$0xff] %v2119_v17  ;;  %v1398_v24 = vadd.f32 %v2685_v52, %v775_v20  ;;  %v777_v25 = vpop.f32.mrb[6].mxu0 }
 0x120   :  { %v1493_v26 = vmax.f32 %v1397_v19, 0.0  ;;  %v1400_v27 = vadd.f32 %v2680_v48, %v777_v25  ;;  %v779_v28 = vpop.f32.mrb[7].mxu0  ;;  %v2134_v57 = vpack.c.bf16 %v1513_v49, %v1513_v49  ;;  %v1516_v58 = vmax.f32 %v1420_v50, 0.0  ;;  %v2227_v59 = vpop.f32.mrb[20].mxu1 }
 0x121   :  { %v1494_v32 = vmax.f32 %v1398_v24, 0.0  ;;  %v1401_v33 = vadd.f32 %v2685_v52, %v779_v28  ;;  %v2228_v62 = vpop.f32.mrb[21].mxu1 }
 0x122   :  { %v1496_v35 = vmax.f32 %v1400_v27, 0.0  ;;  %1920 = vst [vmem:[%s2965_s3 + $0x68] sm:$0xf] %v2134_v57  ;;  %v2136_v0 = vpack.c.bf16 %v1516_v58, %v1516_v58  ;;  %v2229_v1 = vadd.f32 %v2228_v62, %v2227_v59  ;;  %v2230_v2 = vpop.f32.mrb[22].mxu1 }
 0x123   :  { %v2121_v39 = vpack.c.bf16 %v1494_v32, %v1493_v26  ;;  %v1497_v40 = vmax.f32 %v1401_v33, 0.0  ;;  %v2231_v5 = vpop.f32.mrb[23].mxu1 }
 0x124   :  { %1922 = vst [vmem:[%s2965_s3 + $0x74] sm:$0xf] %v2136_v0  ;;  %v1423_v6 = vadd.f32 %v2229_v1, %v2668_v21  ;;  %v2232_v7 = vadd.f32 %v2231_v5, %v2230_v2 }
 0x125   :  { %1907 = vst [vmem:[%s2965_s3 + $0x18] sm:$0xff] %v2121_v39  ;;  %v2123_v44 = vpack.c.bf16 %v1497_v40, %v1496_v35  ;;  %v783_v45 = vpop.f32.mrb[8].mxu0 }
 0x126   :  { %v1403_v46 = vadd.f32 %v2680_v48, %v783_v45  ;;  %v785_v47 = vpop.f32.mrb[9].mxu0  ;;  %v1519_v12 = vmax.f32 %v1423_v6, 0.0  ;;  %v1426_v13 = vadd.f32 %v2232_v7, %v2668_v21 }
 0x127   :  { %1909 = vst [vmem:[%s2965_s3 + $0x24] sm:$0xff] %v2123_v44  ;;  %v1404_v51 = vadd.f32 %v2685_v52, %v785_v47  ;;  %v787_v53 = vpop.f32.mrb[10].mxu0 }
 0x128   :  { %v1499_v54 = vmax.f32 %v1403_v46, 0.0  ;;  %v1406_v55 = vadd.f32 %v2680_v48, %v787_v53  ;;  %v789_v56 = vpop.f32.mrb[11].mxu0  ;;  %v2138_v19 = vpack.c.bf16 %v1519_v12, %v1519_v12  ;;  %v1522_v20 = vmax.f32 %v1426_v13, 0.0  ;;  %v2233_v22 = vpop.f32.mrb[24].mxu1 }
 0x129   :  { %v1500_v60 = vmax.f32 %v1404_v51, 0.0  ;;  %v1407_v61 = vadd.f32 %v2685_v52, %v789_v56  ;;  %v2234_v25 = vpop.f32.mrb[25].mxu1 }
 0x12a   :  { %v1502_v63 = vmax.f32 %v1406_v55, 0.0  ;;  %1924 = vst [vmem:[%s2965_s3 + $0x80] sm:$0xf] %v2138_v19  ;;  %v2140_v27 = vpack.c.bf16 %v1522_v20, %v1522_v20  ;;  %v2235_v28 = vadd.f32 %v2234_v25, %v2233_v22  ;;  %v2236_v29 = vpop.f32.mrb[26].mxu1 }
 0x12b   :  { %v2125_v3 = vpack.c.bf16 %v1500_v60, %v1499_v54  ;;  %v1503_v4 = vmax.f32 %v1407_v61, 0.0  ;;  %v2237_v32 = vpop.f32.mrb[27].mxu1 }
 0x12c   :  { %1926 = vst [vmem:[%s2965_s3 + $0x8c] sm:$0xf] %v2140_v27  ;;  %v1429_v33 = vadd.f32 %v2235_v28, %v2668_v21  ;;  %v2238_v34 = vadd.f32 %v2237_v32, %v2236_v29 }
 0x12d   :  { %1911 = vst [vmem:[%s2965_s3 + $0x30] sm:$0xff] %v2125_v3  ;;  %v2127_v8 = vpack.c.bf16 %v1503_v4, %v1502_v63  ;;  %v793_v9 = vpop.f32.mrb[12].mxu0 }
 0x12e   :  { %v1409_v10 = vadd.f32 %v2680_v48, %v793_v9  ;;  %v795_v11 = vpop.f32.mrb[13].mxu0  ;;  %v1525_v39 = vmax.f32 %v1429_v33, 0.0  ;;  %v1432_v40 = vadd.f32 %v2238_v34, %v2668_v21 }
 0x12f   :  { %1913 = vst [vmem:[%s2965_s3 + $0x3c] sm:$0xff] %v2127_v8  ;;  %v1410_v14 = vadd.f32 %v2685_v52, %v795_v11  ;;  %v797_v15 = vpop.f32.mrb[14].mxu0 }
 0x130   :  { %v1505_v16 = vmax.f32 %v1409_v10, 0.0  ;;  %v1412_v17 = vadd.f32 %v2680_v48, %v797_v15  ;;  %v799_v18 = vpop.f32.mrb[15].mxu0  ;;  %v2142_v46 = vpack.c.bf16 %v1525_v39, %v1525_v39  ;;  %v1528_v47 = vmax.f32 %v1432_v40, 0.0  ;;  %v2239_v49 = vpop.f32.mrb[28].mxu1 }
 0x131   :  { %v1506_v23 = vmax.f32 %v1410_v14, 0.0  ;;  %v1413_v24 = vadd.f32 %v2685_v52, %v799_v18  ;;  %v2240_v53 = vpop.f32.mrb[29].mxu1 }
 0x132   :  { %v1508_v26 = vmax.f32 %v1412_v17, 0.0  ;;  %1928 = vst [vmem:[%s2965_s3 + $0x98] sm:$0xf] %v2142_v46  ;;  %v2144_v55 = vpack.c.bf16 %v1528_v47, %v1528_v47  ;;  %v2241_v56 = vadd.f32 %v2240_v53, %v2239_v49  ;;  %v2242_v57 = vpop.f32.mrb[30].mxu1 }
 0x133   :  { %v2129_v30 = vpack.c.bf16 %v1506_v23, %v1505_v16  ;;  %v1509_v31 = vmax.f32 %v1413_v24, 0.0  ;;  %v2243_v60 = vpop.f32.mrb[31].mxu1 }
 0x134   :  { %1930 = vst [vmem:[%s2965_s3 + $0xa4] sm:$0xf] %v2144_v55  ;;  %v1435_v61 = vadd.f32 %v2241_v56, %v2668_v21  ;;  %v2244_v62 = vadd.f32 %v2243_v60, %v2242_v57 }
 0x135   :  { %1915 = vst [vmem:[%s2965_s3 + $0x48] sm:$0xff] %v2129_v30  ;;  %v2131_v35 = vpack.c.bf16 %v1509_v31, %v1508_v26  ;;  %v803_v36 = vpop.f32.mrb[16].mxu0 }
 0x136   :  { %v1415_v37 = vadd.f32 %v2680_v48, %v803_v36  ;;  %v805_v38 = vpop.f32.mrb[17].mxu0  ;;  %v1531_v3 = vmax.f32 %v1435_v61, 0.0  ;;  %v1438_v4 = vadd.f32 %v2244_v62, %v2668_v21 }
 0x137   :  { %1917 = vst [vmem:[%s2965_s3 + $0x54] sm:$0xff] %v2131_v35  ;;  %v1416_v41 = vadd.f32 %v2685_v52, %v805_v38  ;;  %v807_v42 = vpop.f32.mrb[18].mxu0 }
 0x138   :  { %v1511_v43 = vmax.f32 %v1415_v37, 0.0  ;;  %v1418_v44 = vadd.f32 %v2680_v48, %v807_v42  ;;  %v809_v45 = vpop.f32.mrb[19].mxu0  ;;  %v2146_v10 = vpack.c.bf16 %v1531_v3, %v1531_v3  ;;  %v1534_v11 = vmax.f32 %v1438_v4, 0.0  ;;  %v2245_v12 = vpop.f32.mrb[32].mxu1 }
 0x139   :  { %v1512_v50 = vmax.f32 %v1416_v41, 0.0  ;;  %v1419_v51 = vadd.f32 %v2685_v52, %v809_v45  ;;  %v2246_v15 = vpop.f32.mrb[33].mxu1 }
 0x13a   :  { %v1514_v54 = vmax.f32 %v1418_v44, 0.0  ;;  %1932 = vst [vmem:[%s2965_s3 + $0xb0] sm:$0xf] %v2146_v10  ;;  %v2148_v17 = vpack.c.bf16 %v1534_v11, %v1534_v11  ;;  %v2247_v18 = vadd.f32 %v2246_v15, %v2245_v12  ;;  %v2248_v19 = vpop.f32.mrb[34].mxu1 }
 0x13b   :  { %v2133_v58 = vpack.c.bf16 %v1512_v50, %v1511_v43  ;;  %v1515_v59 = vmax.f32 %v1419_v51, 0.0  ;;  %v2249_v23 = vpop.f32.mrb[35].mxu1 }
 0x13c   :  { %1934 = vst [vmem:[%s2965_s3 + $0xbc] sm:$0xf] %v2148_v17  ;;  %v1441_v24 = vadd.f32 %v2247_v18, %v2668_v21  ;;  %v2250_v25 = vadd.f32 %v2249_v23, %v2248_v19 }
 0x13d   :  { %1919 = vst [vmem:[%s2965_s3 + $0x60] sm:$0xff] %v2133_v58  ;;  %v2135_v63 = vpack.c.bf16 %v1515_v59, %v1514_v54  ;;  %v813_v0 = vpop.f32.mrb[20].mxu0 }
 0x13e   :  { %v1421_v1 = vadd.f32 %v2680_v48, %v813_v0  ;;  %v815_v2 = vpop.f32.mrb[21].mxu0  ;;  %v1537_v30 = vmax.f32 %v1441_v24, 0.0  ;;  %v1444_v31 = vadd.f32 %v2250_v25, %v2668_v21 }
 0x13f   :  { %1921 = vst [vmem:[%s2965_s3 + $0x6c] sm:$0xff] %v2135_v63  ;;  %v1422_v5 = vadd.f32 %v2685_v52, %v815_v2  ;;  %v817_v6 = vpop.f32.mrb[22].mxu0 }
 0x140   :  { %v1517_v7 = vmax.f32 %v1421_v1, 0.0  ;;  %v1424_v8 = vadd.f32 %v2680_v48, %v817_v6  ;;  %v819_v9 = vpop.f32.mrb[23].mxu0  ;;  %v2150_v37 = vpack.c.bf16 %v1537_v30, %v1537_v30  ;;  %v1540_v38 = vmax.f32 %v1444_v31, 0.0  ;;  %v2251_v39 = vpop.f32.mrb[36].mxu1 }
 0x141   :  { %v1518_v13 = vmax.f32 %v1422_v5, 0.0  ;;  %v1425_v14 = vadd.f32 %v2685_v52, %v819_v9  ;;  %v2252_v42 = vpop.f32.mrb[37].mxu1 }
 0x142   :  { %v1520_v16 = vmax.f32 %v1424_v8, 0.0  ;;  %1936 = vst [vmem:[%s2965_s3 + $0xc8] sm:$0xf] %v2150_v37  ;;  %v2152_v44 = vpack.c.bf16 %v1540_v38, %v1540_v38  ;;  %v2253_v45 = vadd.f32 %v2252_v42, %v2251_v39  ;;  %v2254_v46 = vpop.f32.mrb[38].mxu1 }
 0x143   :  { %v2137_v20 = vpack.c.bf16 %v1518_v13, %v1517_v7  ;;  %v1521_v22 = vmax.f32 %v1425_v14, 0.0  ;;  %v2255_v50 = vpop.f32.mrb[39].mxu1 }
 0x144   :  { %1938 = vst [vmem:[%s2965_s3 + $0xd4] sm:$0xf] %v2152_v44  ;;  %v1447_v51 = vadd.f32 %v2253_v45, %v2668_v21  ;;  %v2256_v53 = vadd.f32 %v2255_v50, %v2254_v46 }
 0x145   :  { %1923 = vst [vmem:[%s2965_s3 + $0x78] sm:$0xff] %v2137_v20  ;;  %v2139_v26 = vpack.c.bf16 %v1521_v22, %v1520_v16  ;;  %v823_v27 = vpop.f32.mrb[24].mxu0 }
 0x146   :  { %v1427_v28 = vadd.f32 %v2680_v48, %v823_v27  ;;  %v825_v29 = vpop.f32.mrb[25].mxu0  ;;  %v1543_v58 = vmax.f32 %v1447_v51, 0.0  ;;  %v1450_v59 = vadd.f32 %v2256_v53, %v2668_v21 }
 0x147   :  { %1925 = vst [vmem:[%s2965_s3 + $0x84] sm:$0xff] %v2139_v26  ;;  %v1428_v32 = vadd.f32 %v2685_v52, %v825_v29  ;;  %v827_v33 = vpop.f32.mrb[26].mxu0 }
 0x148   :  { %v1523_v34 = vmax.f32 %v1427_v28, 0.0  ;;  %v1430_v35 = vadd.f32 %v2680_v48, %v827_v33  ;;  %v829_v36 = vpop.f32.mrb[27].mxu0  ;;  %v2154_v1 = vpack.c.bf16 %v1543_v58, %v1543_v58  ;;  %v1546_v2 = vmax.f32 %v1450_v59, 0.0  ;;  %v2257_v3 = vpop.f32.mrb[40].mxu1 }
 0x149   :  { %v1524_v40 = vmax.f32 %v1428_v32, 0.0  ;;  %v1431_v41 = vadd.f32 %v2685_v52, %v829_v36  ;;  %v2258_v6 = vpop.f32.mrb[41].mxu1 }
 0x14a   :  { %v1526_v43 = vmax.f32 %v1430_v35, 0.0  ;;  %1940 = vst [vmem:[%s2965_s3 + $0xe0] sm:$0xf] %v2154_v1  ;;  %v2156_v8 = vpack.c.bf16 %v1546_v2, %v1546_v2  ;;  %v2259_v9 = vadd.f32 %v2258_v6, %v2257_v3  ;;  %v2260_v10 = vpop.f32.mrb[42].mxu1 }
 0x14b   :  { %v2141_v47 = vpack.c.bf16 %v1524_v40, %v1523_v34  ;;  %v1527_v49 = vmax.f32 %v1431_v41, 0.0  ;;  %v2261_v13 = vpop.f32.mrb[43].mxu1 }
 0x14c   :  { %1942 = vst [vmem:[%s2965_s3 + $0xec] sm:$0xf] %v2156_v8  ;;  %v1453_v14 = vadd.f32 %v2259_v9, %v2668_v21  ;;  %v2262_v15 = vadd.f32 %v2261_v13, %v2260_v10 }
 0x14d   :  { %1927 = vst [vmem:[%s2965_s3 + $0x90] sm:$0xff] %v2141_v47  ;;  %v2143_v54 = vpack.c.bf16 %v1527_v49, %v1526_v43  ;;  %v833_v55 = vpop.f32.mrb[28].mxu0 }
 0x14e   :  { %v1433_v56 = vadd.f32 %v2680_v48, %v833_v55  ;;  %v835_v57 = vpop.f32.mrb[29].mxu0  ;;  %v1549_v20 = vmax.f32 %v1453_v14, 0.0  ;;  %v1456_v22 = vadd.f32 %v2262_v15, %v2668_v21 }
 0x14f   :  { %1929 = vst [vmem:[%s2965_s3 + $0x9c] sm:$0xff] %v2143_v54  ;;  %v1434_v60 = vadd.f32 %v2685_v52, %v835_v57  ;;  %v837_v61 = vpop.f32.mrb[30].mxu0 }
 0x150   :  { %v1529_v62 = vmax.f32 %v1433_v56, 0.0  ;;  %v1436_v63 = vadd.f32 %v2680_v48, %v837_v61  ;;  %v839_v0 = vpop.f32.mrb[31].mxu0  ;;  %v2158_v28 = vpack.c.bf16 %v1549_v20, %v1549_v20  ;;  %v1552_v29 = vmax.f32 %v1456_v22, 0.0  ;;  %v2263_v30 = vpop.f32.mrb[44].mxu1 }
 0x151   :  { %v1530_v4 = vmax.f32 %v1434_v60, 0.0  ;;  %v1437_v5 = vadd.f32 %v2685_v52, %v839_v0  ;;  %v2264_v33 = vpop.f32.mrb[45].mxu1 }
 0x152   :  { %v1532_v7 = vmax.f32 %v1436_v63, 0.0  ;;  %1944 = vst [vmem:[%s2965_s3 + $0xf8] sm:$0xf] %v2158_v28  ;;  %v2160_v35 = vpack.c.bf16 %v1552_v29, %v1552_v29  ;;  %v2265_v36 = vadd.f32 %v2264_v33, %v2263_v30  ;;  %v2266_v37 = vpop.f32.mrb[46].mxu1 }
 0x153   :  { %v2145_v11 = vpack.c.bf16 %v1530_v4, %v1529_v62  ;;  %v1533_v12 = vmax.f32 %v1437_v5, 0.0  ;;  %v2267_v40 = vpop.f32.mrb[47].mxu1 }
 0x154   :  { %1946 = vst [vmem:[%s2965_s3 + $0x104] sm:$0xf] %v2160_v35  ;;  %v1459_v41 = vadd.f32 %v2265_v36, %v2668_v21  ;;  %v2268_v42 = vadd.f32 %v2267_v40, %v2266_v37 }
 0x155   :  { %1931 = vst [vmem:[%s2965_s3 + $0xa8] sm:$0xff] %v2145_v11  ;;  %v2147_v16 = vpack.c.bf16 %v1533_v12, %v1532_v7  ;;  %v843_v17 = vpop.f32.mrb[32].mxu0 }
 0x156   :  { %v1439_v18 = vadd.f32 %v2680_v48, %v843_v17  ;;  %v845_v19 = vpop.f32.mrb[33].mxu0  ;;  %v1555_v47 = vmax.f32 %v1459_v41, 0.0  ;;  %v1462_v49 = vadd.f32 %v2268_v42, %v2668_v21 }
 0x157   :  { %1933 = vst [vmem:[%s2965_s3 + $0xb4] sm:$0xff] %v2147_v16  ;;  %v1440_v23 = vadd.f32 %v2685_v52, %v845_v19  ;;  %v847_v24 = vpop.f32.mrb[34].mxu0 }
 0x158   :  { %v1535_v25 = vmax.f32 %v1439_v18, 0.0  ;;  %v1442_v26 = vadd.f32 %v2680_v48, %v847_v24  ;;  %v849_v27 = vpop.f32.mrb[35].mxu0  ;;  %v2162_v56 = vpack.c.bf16 %v1555_v47, %v1555_v47  ;;  %v1558_v57 = vmax.f32 %v1462_v49, 0.0  ;;  %v2269_v58 = vpop.f32.mrb[48].mxu1 }
 0x159   :  { %v1536_v31 = vmax.f32 %v1440_v23, 0.0  ;;  %v1443_v32 = vadd.f32 %v2685_v52, %v849_v27  ;;  %v2270_v61 = vpop.f32.mrb[49].mxu1 }
 0x15a   :  { %v1538_v34 = vmax.f32 %v1442_v26, 0.0  ;;  %1948 = vst [vmem:[%s2965_s3 + $0x110] sm:$0xf] %v2162_v56  ;;  %v2164_v63 = vpack.c.bf16 %v1558_v57, %v1558_v57  ;;  %v2271_v0 = vadd.f32 %v2270_v61, %v2269_v58  ;;  %v2272_v1 = vpop.f32.mrb[50].mxu1 }
 0x15b   :  { %v2149_v38 = vpack.c.bf16 %v1536_v31, %v1535_v25  ;;  %v1539_v39 = vmax.f32 %v1443_v32, 0.0  ;;  %v2273_v4 = vpop.f32.mrb[51].mxu1 }
 0x15c   :  { %1950 = vst [vmem:[%s2965_s3 + $0x11c] sm:$0xf] %v2164_v63  ;;  %v1465_v5 = vadd.f32 %v2271_v0, %v2668_v21  ;;  %v2274_v6 = vadd.f32 %v2273_v4, %v2272_v1 }
 0x15d   :  { %1935 = vst [vmem:[%s2965_s3 + $0xc0] sm:$0xff] %v2149_v38  ;;  %v2151_v43 = vpack.c.bf16 %v1539_v39, %v1538_v34  ;;  %v853_v44 = vpop.f32.mrb[36].mxu0 }
 0x15e   :  { %v1445_v45 = vadd.f32 %v2680_v48, %v853_v44  ;;  %v855_v46 = vpop.f32.mrb[37].mxu0  ;;  %v1561_v11 = vmax.f32 %v1465_v5, 0.0  ;;  %v1468_v12 = vadd.f32 %v2274_v6, %v2668_v21 }
 0x15f   :  { %1937 = vst [vmem:[%s2965_s3 + $0xcc] sm:$0xff] %v2151_v43  ;;  %v1446_v50 = vadd.f32 %v2685_v52, %v855_v46  ;;  %v857_v51 = vpop.f32.mrb[38].mxu0 }
 0x160   :  { %v1541_v53 = vmax.f32 %v1445_v45, 0.0  ;;  %v1448_v54 = vadd.f32 %v2680_v48, %v857_v51  ;;  %v859_v55 = vpop.f32.mrb[39].mxu0  ;;  %v2166_v18 = vpack.c.bf16 %v1561_v11, %v1561_v11  ;;  %v1564_v19 = vmax.f32 %v1468_v12, 0.0  ;;  %v2275_v20 = vpop.f32.mrb[52].mxu1 }
 0x161   :  { %v1542_v59 = vmax.f32 %v1446_v50, 0.0  ;;  %v1449_v60 = vadd.f32 %v2685_v52, %v859_v55  ;;  %v2276_v24 = vpop.f32.mrb[53].mxu1 }
 0x162   :  { %v1544_v62 = vmax.f32 %v1448_v54, 0.0  ;;  %1952 = vst [vmem:[%s2965_s3 + $0x128] sm:$0xf] %v2166_v18  ;;  %v2168_v26 = vpack.c.bf16 %v1564_v19, %v1564_v19  ;;  %v2277_v27 = vadd.f32 %v2276_v24, %v2275_v20  ;;  %v2278_v28 = vpop.f32.mrb[54].mxu1 }
 0x163   :  { %v2153_v2 = vpack.c.bf16 %v1542_v59, %v1541_v53  ;;  %v1545_v3 = vmax.f32 %v1449_v60, 0.0  ;;  %v2279_v31 = vpop.f32.mrb[55].mxu1 }
 0x164   :  { %1954 = vst [vmem:[%s2965_s3 + $0x134] sm:$0xf] %v2168_v26  ;;  %v1471_v32 = vadd.f32 %v2277_v27, %v2668_v21  ;;  %v2280_v33 = vadd.f32 %v2279_v31, %v2278_v28 }
 0x165   :  { %1939 = vst [vmem:[%s2965_s3 + $0xd8] sm:$0xff] %v2153_v2  ;;  %v2155_v7 = vpack.c.bf16 %v1545_v3, %v1544_v62  ;;  %v863_v8 = vpop.f32.mrb[40].mxu0 }
 0x166   :  { %v1451_v9 = vadd.f32 %v2680_v48, %v863_v8  ;;  %v865_v10 = vpop.f32.mrb[41].mxu0  ;;  %v1567_v38 = vmax.f32 %v1471_v32, 0.0  ;;  %v1474_v39 = vadd.f32 %v2280_v33, %v2668_v21 }
 0x167   :  { %1941 = vst [vmem:[%s2965_s3 + $0xe4] sm:$0xff] %v2155_v7  ;;  %v1452_v13 = vadd.f32 %v2685_v52, %v865_v10  ;;  %v867_v14 = vpop.f32.mrb[42].mxu0 }
 0x168   :  { %v1547_v15 = vmax.f32 %v1451_v9, 0.0  ;;  %v1454_v16 = vadd.f32 %v2680_v48, %v867_v14  ;;  %v869_v17 = vpop.f32.mrb[43].mxu0  ;;  %v2170_v45 = vpack.c.bf16 %v1567_v38, %v1567_v38  ;;  %v1570_v46 = vmax.f32 %v1474_v39, 0.0  ;;  %v2281_v47 = vpop.f32.mrb[56].mxu1 }
 0x169   :  { %v1548_v22 = vmax.f32 %v1452_v13, 0.0  ;;  %v1455_v23 = vadd.f32 %v2685_v52, %v869_v17  ;;  %v2282_v51 = vpop.f32.mrb[57].mxu1 }
 0x16a   :  { %v1550_v25 = vmax.f32 %v1454_v16, 0.0  ;;  %1956 = vst [vmem:[%s2965_s3 + $0x140] sm:$0xf] %v2170_v45  ;;  %v2172_v54 = vpack.c.bf16 %v1570_v46, %v1570_v46  ;;  %v2283_v55 = vadd.f32 %v2282_v51, %v2281_v47  ;;  %v2284_v56 = vpop.f32.mrb[58].mxu1 }
 0x16b   :  { %v2157_v29 = vpack.c.bf16 %v1548_v22, %v1547_v15  ;;  %v1551_v30 = vmax.f32 %v1455_v23, 0.0  ;;  %v2285_v59 = vpop.f32.mrb[59].mxu1 }
 0x16c   :  { %1958 = vst [vmem:[%s2965_s3 + $0x14c] sm:$0xf] %v2172_v54  ;;  %v1477_v60 = vadd.f32 %v2283_v55, %v2668_v21  ;;  %v2286_v61 = vadd.f32 %v2285_v59, %v2284_v56 }
 0x16d   :  { %1943 = vst [vmem:[%s2965_s3 + $0xf0] sm:$0xff] %v2157_v29  ;;  %v2159_v34 = vpack.c.bf16 %v1551_v30, %v1550_v25  ;;  %v873_v35 = vpop.f32.mrb[44].mxu0 }
 0x16e   :  { %v1457_v36 = vadd.f32 %v2680_v48, %v873_v35  ;;  %v875_v37 = vpop.f32.mrb[45].mxu0  ;;  %v1573_v2 = vmax.f32 %v1477_v60, 0.0  ;;  %v1480_v3 = vadd.f32 %v2286_v61, %v2668_v21 }
 0x16f   :  { %1945 = vst [vmem:[%s2965_s3 + $0xfc] sm:$0xff] %v2159_v34  ;;  %v1458_v40 = vadd.f32 %v2685_v52, %v875_v37  ;;  %v877_v41 = vpop.f32.mrb[46].mxu0 }
 0x170   :  { %v1553_v42 = vmax.f32 %v1457_v36, 0.0  ;;  %v1460_v43 = vadd.f32 %v2680_v48, %v877_v41  ;;  %v879_v44 = vpop.f32.mrb[47].mxu0  ;;  %v2174_v9 = vpack.c.bf16 %v1573_v2, %v1573_v2  ;;  %v1576_v10 = vmax.f32 %v1480_v3, 0.0  ;;  %v2287_v11 = vpop.f32.mrb[60].mxu1 }
 0x171   :  { %v1554_v49 = vmax.f32 %v1458_v40, 0.0  ;;  %v1461_v50 = vadd.f32 %v2685_v52, %v879_v44  ;;  %v2288_v14 = vpop.f32.mrb[61].mxu1 }
 0x172   :  { %v1556_v53 = vmax.f32 %v1460_v43, 0.0  ;;  %1960 = vst [vmem:[%s2965_s3 + $0x158] sm:$0xf] %v2174_v9  ;;  %v2176_v16 = vpack.c.bf16 %v1576_v10, %v1576_v10  ;;  %v2289_v17 = vadd.f32 %v2288_v14, %v2287_v11  ;;  %v2290_v18 = vpop.f32.mrb[62].mxu1 }
 0x173   :  { %v2161_v57 = vpack.c.bf16 %v1554_v49, %v1553_v42  ;;  %v1557_v58 = vmax.f32 %v1461_v50, 0.0  ;;  %v2291_v22 = vpop.f32.mrb[63].mxu1 }
 0x174   :  { %1962 = vst [vmem:[%s2965_s3 + $0x164] sm:$0xf] %v2176_v16  ;;  %v1483_v23 = vadd.f32 %v2289_v17, %v2668_v21  ;;  %v2292_v24 = vadd.f32 %v2291_v22, %v2290_v18 }
 0x175   :  { %1947 = vst [vmem:[%s2965_s3 + $0x108] sm:$0xff] %v2161_v57  ;;  %v2163_v62 = vpack.c.bf16 %v1557_v58, %v1556_v53  ;;  %v883_v63 = vpop.f32.mrb[48].mxu0 }
 0x176   :  { %v1463_v0 = vadd.f32 %v2680_v48, %v883_v63  ;;  %v885_v1 = vpop.f32.mrb[49].mxu0  ;;  %v1579_v29 = vmax.f32 %v1483_v23, 0.0  ;;  %v1486_v30 = vadd.f32 %v2292_v24, %v2668_v21 }
 0x177   :  { %1949 = vst [vmem:[%s2965_s3 + $0x114] sm:$0xff] %v2163_v62  ;;  %v1464_v4 = vadd.f32 %v2685_v52, %v885_v1  ;;  %v887_v5 = vpop.f32.mrb[50].mxu0 }
 0x178   :  { %v1559_v6 = vmax.f32 %v1463_v0, 0.0  ;;  %v1466_v7 = vadd.f32 %v2680_v48, %v887_v5  ;;  %v889_v8 = vpop.f32.mrb[51].mxu0  ;;  %v2178_v36 = vpack.c.bf16 %v1579_v29, %v1579_v29  ;;  %v1582_v37 = vmax.f32 %v1486_v30, 0.0 }
 0x179   :  { %v1560_v12 = vmax.f32 %v1464_v4, 0.0  ;;  %v1467_v13 = vadd.f32 %v2685_v52, %v889_v8 }
 0x17a   :  { %v1562_v15 = vmax.f32 %v1466_v7, 0.0  ;;  %1964 = vst [vmem:[%s2965_s3 + $0x170] sm:$0xf] %v2178_v36  ;;  %v2180_v21 = vpack.c.bf16 %v1582_v37, %v1582_v37 }
 0x17b   :  { %v2165_v19 = vpack.c.bf16 %v1560_v12, %v1559_v6  ;;  %v1563_v20 = vmax.f32 %v1467_v13, 0.0 }
 0x17c   :  { %1966 = vst [vmem:[%s2965_s3 + $0x17c] sm:$0xf] %v2180_v21 }
 0x17d   :  { %1951 = vst [vmem:[%s2965_s3 + $0x120] sm:$0xff] %v2165_v19  ;;  %v2167_v25 = vpack.c.bf16 %v1563_v20, %v1562_v15  ;;  %v893_v26 = vpop.f32.mrb[52].mxu0 }
 0x17e   :  { %v1469_v27 = vadd.f32 %v2680_v48, %v893_v26  ;;  %v895_v28 = vpop.f32.mrb[53].mxu0 }
 0x17f   :  { %1953 = vst [vmem:[%s2965_s3 + $0x12c] sm:$0xff] %v2167_v25  ;;  %v1470_v31 = vadd.f32 %v2685_v52, %v895_v28  ;;  %v897_v32 = vpop.f32.mrb[54].mxu0 }
 0x180   :  { %v1565_v33 = vmax.f32 %v1469_v27, 0.0  ;;  %v1472_v34 = vadd.f32 %v2680_v48, %v897_v32  ;;  %v899_v35 = vpop.f32.mrb[55].mxu0 }
 0x181   :  { %v1566_v38 = vmax.f32 %v1470_v31, 0.0  ;;  %v1473_v39 = vadd.f32 %v2685_v52, %v899_v35 }
 0x182   :  { %v1568_v40 = vmax.f32 %v1472_v34, 0.0 }
 0x183   :  { %v2169_v41 = vpack.c.bf16 %v1566_v38, %v1565_v33  ;;  %v1569_v42 = vmax.f32 %v1473_v39, 0.0 }
 0x185   :  { %1955 = vst [vmem:[%s2965_s3 + $0x138] sm:$0xff] %v2169_v41  ;;  %v2171_v43 = vpack.c.bf16 %v1569_v42, %v1568_v40  ;;  %v903_v44 = vpop.f32.mrb[56].mxu0 }
 0x186   :  { %v1475_v45 = vadd.f32 %v2680_v48, %v903_v44  ;;  %v905_v46 = vpop.f32.mrb[57].mxu0 }
 0x187   :  { %1957 = vst [vmem:[%s2965_s3 + $0x144] sm:$0xff] %v2171_v43  ;;  %v1476_v47 = vadd.f32 %v2685_v52, %v905_v46  ;;  %v907_v49 = vpop.f32.mrb[58].mxu0 }
 0x188   :  { %v1571_v50 = vmax.f32 %v1475_v45, 0.0  ;;  %v1478_v51 = vadd.f32 %v2680_v48, %v907_v49  ;;  %v909_v53 = vpop.f32.mrb[59].mxu0 }
 0x189   :  { %v1572_v54 = vmax.f32 %v1476_v47, 0.0  ;;  %v1479_v55 = vadd.f32 %v2685_v52, %v909_v53 }
 0x18a   :  { %v1574_v56 = vmax.f32 %v1478_v51, 0.0 }
 0x18b   :  { %v2173_v57 = vpack.c.bf16 %v1572_v54, %v1571_v50  ;;  %v1575_v58 = vmax.f32 %v1479_v55, 0.0 }
 0x18d   :  { %1959 = vst [vmem:[%s2965_s3 + $0x150] sm:$0xff] %v2173_v57  ;;  %v2175_v59 = vpack.c.bf16 %v1575_v58, %v1574_v56  ;;  %v913_v60 = vpop.f32.mrb[60].mxu0 }
 0x18e   :  { %v1481_v61 = vadd.f32 %v2680_v48, %v913_v60  ;;  %v915_v62 = vpop.f32.mrb[61].mxu0 }
 0x18f   :  { %1961 = vst [vmem:[%s2965_s3 + $0x15c] sm:$0xff] %v2175_v59  ;;  %v1482_v63 = vadd.f32 %v2685_v52, %v915_v62  ;;  %v917_v0 = vpop.f32.mrb[62].mxu0 }
 0x190   :  { %v1577_v1 = vmax.f32 %v1481_v61, 0.0  ;;  %v1484_v2 = vadd.f32 %v2680_v48, %v917_v0  ;;  %v919_v3 = vpop.f32.mrb[63].mxu0 }
 0x191   :  { %v1578_v4 = vmax.f32 %v1482_v63, 0.0  ;;  %v1485_v5 = vadd.f32 %v2685_v52, %v919_v3 }
 0x192   :  { %v1580_v6 = vmax.f32 %v1484_v2, 0.0 }
 0x193   :  { %v2177_v7 = vpack.c.bf16 %v1578_v4, %v1577_v1  ;;  %v1581_v8 = vmax.f32 %v1485_v5, 0.0 }
 0x195   :  { %1963 = vst [vmem:[%s2965_s3 + $0x168] sm:$0xff] %v2177_v7  ;;  %v2179_v9 = vpack.c.bf16 %v1581_v8, %v1580_v6 }
 0x197   :  { %1965 = vst [vmem:[%s2965_s3 + $0x174] sm:$0xff] %v2179_v9 }

// kernel: net_forward.19
= control target key start
LH: loop header
LB: loop body
LE: loop exit
PB: predicated region body
PF: predicated region fallthrough
CT: control target
= control target key end

     0   :  { %s1554_s1 = inlined_call_operand.vmem [shape: bf16[256,128], index: 1, kind: input, shape index: {}]   ;;  %s1555_s0 = inlined_call_operand.vmem [shape: bf16[256,256], index: 0, kind: input, shape index: {}]   ;;  %s1556_s2 = inlined_call_operand.vmem [shape: f32[1,128], index: 2, kind: input, shape index: {}]   ;;  %s1557_s3 = inlined_call_operand.vmem [shape: bf16[256,128], index: 3, kind: output, shape index: {}]  }
   0x1   :  { %v1241_v0 = vld [vmem:[%s1554_s1 + $0x40] sm:$0xff]   ;;  %v1243_v2 = vld [vmem:[%s1554_s1 + $0x48] sm:$0xff]   ;;  %v1245_v4 = vld [vmem:[%s1554_s1 + $0x50] sm:$0xff]  }
   0x2   :  { %v1242_v1 = vld [vmem:[%s1554_s1] sm:$0xff]   ;;  %1113 = vmatprep.subr.bf16.mxu0 %v1241_v0  ;;  %1225 = vmatprep.subr.bf16.mxu1 %v1241_v0  ;;  %v1244_v3 = vld [vmem:[%s1554_s1 + $0x8] sm:$0xff]   ;;  %v1246_v5 = vld [vmem:[%s1554_s1 + $0x10] sm:$0xff]  }
   0x3   :  { %1114 = vmatpush3.bf16.msra.mxu0 %v1242_v1  ;;  %1233 = vmatpush3.bf16.msra.mxu1 %v1242_v1  ;;  %v1247_v6 = vld [vmem:[%s1554_s1 + $0x58] sm:$0xff]   ;;  %v1249_v8 = vld [vmem:[%s1554_s1 + $0x60] sm:$0xff]   ;;  %v1251_v10 = vld [vmem:[%s1554_s1 + $0x68] sm:$0xff]  }
   0x4   :  { %1115 = vmatprep.subr.bf16.mxu0 %v1243_v2  ;;  %1226 = vmatprep.subr.bf16.mxu1 %v1243_v2  ;;  %v1248_v7 = vld [vmem:[%s1554_s1 + $0x18] sm:$0xff]   ;;  %v1250_v9 = vld [vmem:[%s1554_s1 + $0x20] sm:$0xff]   ;;  %v1252_v13 = vld [vmem:[%s1554_s1 + $0x28] sm:$0xff]  }
   0x5   :  { %v1259_v11 = vld [vmem:[%s1555_s0 + $0x4] ss:$8 sps:$4 sm:$0xff]   ;;  %v1253_v14 = vld [vmem:[%s1554_s1 + $0x70] sm:$0xff]   ;;  %v1255_v16 = vld [vmem:[%s1554_s1 + $0x78] sm:$0xff]  }
   0x6   :  { %v1262_v12 = vld [vmem:[%s1555_s0 + $0x84] ss:$8 sps:$4 sm:$0xff]   ;;  %440 = vmatprep.mubr.bf16.mxu0 %v1259_v11  ;;  %v1254_v15 = vld [vmem:[%s1554_s1 + $0x30] sm:$0xff]   ;;  %v1256_v17 = vld [vmem:[%s1554_s1 + $0x38] sm:$0xff]  }
   0x7   :  { %1116 = vmatpush3.bf16.msra.mxu0 %v1244_v3  ;;  %1234 = vmatpush3.bf16.msra.mxu1 %v1244_v3  ;;  %v1257_v18 = vld [vmem:[%s1555_s0] ss:$8 sps:$4 sm:$0xff]   ;;  %v1263_v20 = vld [vmem:[%s1555_s0 + $0x14] ss:$8 sps:$4 sm:$0xff]   ;;  %v1267_v22 = vld [vmem:[%s1555_s0 + $0x10] ss:$8 sps:$4 sm:$0xff]  }
   0x8   :  { %1117 = vmatprep.subr.bf16.mxu0 %v1245_v4  ;;  %1227 = vmatprep.subr.bf16.mxu1 %v1245_v4  ;;  %v1260_v19 = vld [vmem:[%s1555_s0 + $0x80] ss:$8 sps:$4 sm:$0xff]   ;;  %v1265_v21 = vld [vmem:[%s1555_s0 + $0x94] ss:$8 sps:$4 sm:$0xff]   ;;  %v1268_v23 = vld [vmem:[%s1555_s0 + $0x90] ss:$8 sps:$4 sm:$0xff]  }
   0x9   :  { %504 = vmatprep.mubr.bf16.mxu1 %v1262_v12  ;;  %v1269_v24 = vld [vmem:[%s1555_s0 + $0x24] ss:$8 sps:$4 sm:$0xff]   ;;  %v1273_v26 = vld [vmem:[%s1555_s0 + $0x20] ss:$8 sps:$4 sm:$0xff]   ;;  %v1275_v28 = vld [vmem:[%s1555_s0 + $0x34] ss:$8 sps:$4 sm:$0xff]  }
   0xa   :  { %v1271_v25 = vld [vmem:[%s1555_s0 + $0xa4] ss:$8 sps:$4 sm:$0xff]   ;;  %v1274_v27 = vld [vmem:[%s1555_s0 + $0xa0] ss:$8 sps:$4 sm:$0xff]   ;;  %v1277_v29 = vld [vmem:[%s1555_s0 + $0xb4] ss:$8 sps:$4 sm:$0xff]  }
   0xb   :  { %1118 = vmatpush3.bf16.msra.mxu0 %v1246_v5  ;;  %1235 = vmatpush3.bf16.msra.mxu1 %v1246_v5  ;;  %v1279_v30 = vld [vmem:[%s1555_s0 + $0x30] ss:$8 sps:$4 sm:$0xff]   ;;  %v1281_v32 = vld [vmem:[%s1555_s0 + $0x44] ss:$8 sps:$4 sm:$0xff]   ;;  %v1285_v34 = vld [vmem:[%s1555_s0 + $0x40] ss:$8 sps:$4 sm:$0xff]  }
   0xc   :  { %1119 = vmatprep.subr.bf16.mxu0 %v1247_v6  ;;  %1228 = vmatprep.subr.bf16.mxu1 %v1247_v6  ;;  %v1280_v31 = vld [vmem:[%s1555_s0 + $0xb0] ss:$8 sps:$4 sm:$0xff]   ;;  %v1283_v33 = vld [vmem:[%s1555_s0 + $0xc4] ss:$8 sps:$4 sm:$0xff]   ;;  %v1286_v35 = vld [vmem:[%s1555_s0 + $0xc0] ss:$8 sps:$4 sm:$0xff]  }
   0xd   :  { %v1287_v36 = vld [vmem:[%s1555_s0 + $0x54] ss:$8 sps:$4 sm:$0xff]   ;;  %v1291_v38 = vld [vmem:[%s1555_s0 + $0x50] ss:$8 sps:$4 sm:$0xff]   ;;  %v1293_v40 = vld [vmem:[%s1555_s0 + $0x64] ss:$8 sps:$4 sm:$0xff]  }
   0xe   :  { %v1289_v37 = vld [vmem:[%s1555_s0 + $0xd4] ss:$8 sps:$4 sm:$0xff]   ;;  %v1292_v39 = vld [vmem:[%s1555_s0 + $0xd0] ss:$8 sps:$4 sm:$0xff]   ;;  %v1295_v41 = vld [vmem:[%s1555_s0 + $0xe4] ss:$8 sps:$4 sm:$0xff]  }
   0xf   :  { %1120 = vmatpush3.bf16.msra.mxu0 %v1248_v7  ;;  %1236 = vmatpush3.bf16.msra.mxu1 %v1248_v7  ;;  %v1297_v42 = vld [vmem:[%s1555_s0 + $0x60] ss:$8 sps:$4 sm:$0xff]   ;;  %v1299_v44 = vld [vmem:[%s1555_s0 + $0x74] ss:$8 sps:$4 sm:$0xff]   ;;  %v1303_v46 = vld [vmem:[%s1555_s0 + $0x70] ss:$8 sps:$4 sm:$0xff]  }
  0x10   :  { %1121 = vmatprep.subr.bf16.mxu0 %v1249_v8  ;;  %1229 = vmatprep.subr.bf16.mxu1 %v1249_v8  ;;  %v1298_v43 = vld [vmem:[%s1555_s0 + $0xe0] ss:$8 sps:$4 sm:$0xff]   ;;  %v1301_v45 = vld [vmem:[%s1555_s0 + $0xf4] ss:$8 sps:$4 sm:$0xff]   ;;  %v1304_v47 = vld [vmem:[%s1555_s0 + $0xf0] ss:$8 sps:$4 sm:$0xff]  }
  0x11   :  { %v1472_v51 = vld [vmem:[%s1556_s2] ss:$0 sm:$0xff] }
  0x13   :  { %1122 = vmatpush3.bf16.msra.mxu0 %v1250_v9  ;;  %1237 = vmatpush3.bf16.msra.mxu1 %v1250_v9 }
  0x14   :  { %1123 = vmatprep.subr.bf16.mxu0 %v1251_v10  ;;  %1230 = vmatprep.subr.bf16.mxu1 %v1251_v10 }
  0x17   :  { %1124 = vmatpush3.bf16.msra.mxu0 %v1252_v13  ;;  %1238 = vmatpush3.bf16.msra.mxu1 %v1252_v13 }
  0x18   :  { %1125 = vmatprep.subr.bf16.mxu0 %v1253_v14  ;;  %1231 = vmatprep.subr.bf16.mxu1 %v1253_v14 }
  0x1b   :  { %1126 = vmatpush3.bf16.msra.mxu0 %v1254_v15  ;;  %1239 = vmatpush3.bf16.msra.mxu1 %v1254_v15 }
  0x1c   :  { %1127 = vmatprep.subr.bf16.mxu0 %v1255_v16  ;;  %1232 = vmatprep.subr.bf16.mxu1 %v1255_v16 }
  0x1f   :  { %1128 = vmatpush3.bf16.msra.mxu0 %v1256_v17  ;;  %1240 = vmatpush3.bf16.msra.mxu1 %v1256_v17 }
  0x22   :  { %441 = vmatmul.mubr.bf16.vlgmr.msra.gmra.mrb[0].mxu0 %v1257_v18  ;;  %505 = vmatmul.mubr.bf16.vlgmr.msra.gmra.mrb[0].mxu1 %v1260_v19 }
  0x23   :  { %448 = vmatprep.mubr.bf16.mxu0 %v1263_v20  ;;  %512 = vmatprep.mubr.bf16.mxu1 %v1265_v21 }
  0x2a   :  { %449 = vmatmul.mubr.bf16.gmra.mrb[4].mxu0 %v1267_v22  ;;  %513 = vmatmul.mubr.bf16.gmra.mrb[4].mxu1 %v1268_v23 }
  0x2b   :  { %456 = vmatprep.mubr.bf16.mxu0 %v1269_v24  ;;  %520 = vmatprep.mubr.bf16.mxu1 %v1271_v25 }
  0x32   :  { %457 = vmatmul.mubr.bf16.gmra.mrb[8].mxu0 %v1273_v26  ;;  %521 = vmatmul.mubr.bf16.gmra.mrb[8].mxu1 %v1274_v27 }
  0x33   :  { %464 = vmatprep.mubr.bf16.mxu0 %v1275_v28  ;;  %528 = vmatprep.mubr.bf16.mxu1 %v1277_v29 }
  0x3a   :  { %465 = vmatmul.mubr.bf16.gmra.mrb[12].mxu0 %v1279_v30  ;;  %529 = vmatmul.mubr.bf16.gmra.mrb[12].mxu1 %v1280_v31 }
  0x3b   :  { %472 = vmatprep.mubr.bf16.mxu0 %v1281_v32  ;;  %536 = vmatprep.mubr.bf16.mxu1 %v1283_v33 }
  0x42   :  { %473 = vmatmul.mubr.bf16.gmra.mrb[16].mxu0 %v1285_v34  ;;  %537 = vmatmul.mubr.bf16.gmra.mrb[16].mxu1 %v1286_v35 }
  0x43   :  { %480 = vmatprep.mubr.bf16.mxu0 %v1287_v36  ;;  %544 = vmatprep.mubr.bf16.mxu1 %v1289_v37 }
  0x4a   :  { %481 = vmatmul.mubr.bf16.gmra.mrb[20].mxu0 %v1291_v38  ;;  %545 = vmatmul.mubr.bf16.gmra.mrb[20].mxu1 %v1292_v39 }
  0x4b   :  { %488 = vmatprep.mubr.bf16.mxu0 %v1293_v40  ;;  %552 = vmatprep.mubr.bf16.mxu1 %v1295_v41 }
  0x52   :  { %489 = vmatmul.mubr.bf16.gmra.mrb[24].mxu0 %v1297_v42  ;;  %553 = vmatmul.mubr.bf16.gmra.mrb[24].mxu1 %v1298_v43 }
  0x53   :  { %496 = vmatprep.mubr.bf16.mxu0 %v1299_v44  ;;  %560 = vmatprep.mubr.bf16.mxu1 %v1301_v45 }
  0x5a   :  { %497 = vmatmul.mubr.bf16.gmra.mrb[28].mxu0 %v1303_v46  ;;  %561 = vmatmul.mubr.bf16.gmra.mrb[28].mxu1 %v1304_v47 }
  0xf5   :  { %v1129_v48 = vpop.f32.mrb[0].mxu0  ;;  %v1177_v49 = vpop.f32.mrb[0].mxu1 }
  0xf6   :  { %v1130_v50 = vpop.f32.mrb[1].mxu0  ;;  %v1178_v52 = vpop.f32.mrb[1].mxu1 }
  0xf7   :  { %v1131_v53 = vadd.f32 %v1130_v50, %v1129_v48  ;;  %v1179_v54 = vadd.f32 %v1178_v52, %v1177_v49  ;;  %v1132_v55 = vpop.f32.mrb[2].mxu0  ;;  %v1180_v56 = vpop.f32.mrb[2].mxu1 }
  0xf8   :  { %v1133_v57 = vpop.f32.mrb[3].mxu0  ;;  %v1181_v58 = vpop.f32.mrb[3].mxu1 }
  0xf9   :  { %v675_v59 = vadd.f32 %v1131_v53, %v1472_v51  ;;  %v691_v60 = vadd.f32 %v1179_v54, %v1472_v51  ;;  %v1134_v61 = vadd.f32 %v1133_v57, %v1132_v55  ;;  %v1182_v62 = vadd.f32 %v1181_v58, %v1180_v56 }
  0xfb   :  { %v676_v63 = vadd.f32 %v1134_v61, %v1472_v51  ;;  %v692_v0 = vadd.f32 %v1182_v62, %v1472_v51  ;;  %v707_v1 = vmax.f32 %v675_v59, 0.0  ;;  %v723_v2 = vmax.f32 %v691_v60, 0.0 }
  0xfd   :  { %v708_v3 = vmax.f32 %v676_v63, 0.0  ;;  %v724_v4 = vmax.f32 %v692_v0, 0.0  ;;  %v1135_v5 = vpop.f32.mrb[4].mxu0  ;;  %v1183_v6 = vpop.f32.mrb[4].mxu1 }
  0xfe   :  { %v1136_v7 = vpop.f32.mrb[5].mxu0  ;;  %v1184_v8 = vpop.f32.mrb[5].mxu1 }
  0xff   :  { %v1021_v9 = vpack.c.bf16 %v708_v3, %v707_v1  ;;  %v1061_v10 = vpack.c.bf16 %v724_v4, %v723_v2  ;;  %v1137_v11 = vadd.f32 %v1136_v7, %v1135_v5  ;;  %v1185_v12 = vadd.f32 %v1184_v8, %v1183_v6  ;;  %v1138_v13 = vpop.f32.mrb[6].mxu0  ;;  %v1186_v14 = vpop.f32.mrb[6].mxu1 }
 0x100   :  { %v1139_v15 = vpop.f32.mrb[7].mxu0  ;;  %v1187_v16 = vpop.f32.mrb[7].mxu1 }
 0x101   :  { %1022 = vst [vmem:[%s1557_s3] sm:$0xff] %v1021_v9   ;;  %1105 = vst [vmem:[%s1557_s3 + $0x40] sm:$0xff] %v1061_v10   ;;  %v677_v17 = vadd.f32 %v1137_v11, %v1472_v51  ;;  %v693_v18 = vadd.f32 %v1185_v12, %v1472_v51  ;;  %v1140_v19 = vadd.f32 %v1139_v15, %v1138_v13 }
 0x102   :  { %v1188_v20 = vadd.f32 %v1187_v16, %v1186_v14 }
 0x103   :  { %v678_v21 = vadd.f32 %v1140_v19, %v1472_v51  ;;  %v709_v23 = vmax.f32 %v677_v17, 0.0  ;;  %v725_v24 = vmax.f32 %v693_v18, 0.0 }
 0x104   :  { %v694_v22 = vadd.f32 %v1188_v20, %v1472_v51 }
 0x105   :  { %v710_v25 = vmax.f32 %v678_v21, 0.0  ;;  %v1141_v27 = vpop.f32.mrb[8].mxu0  ;;  %v1189_v28 = vpop.f32.mrb[8].mxu1 }
 0x106   :  { %v726_v26 = vmax.f32 %v694_v22, 0.0  ;;  %v1142_v29 = vpop.f32.mrb[9].mxu0  ;;  %v1190_v30 = vpop.f32.mrb[9].mxu1 }
 0x107   :  { %v1026_v31 = vpack.c.bf16 %v710_v25, %v709_v23  ;;  %v1143_v33 = vadd.f32 %v1142_v29, %v1141_v27  ;;  %v1191_v34 = vadd.f32 %v1190_v30, %v1189_v28  ;;  %v1144_v35 = vpop.f32.mrb[10].mxu0  ;;  %v1192_v36 = vpop.f32.mrb[10].mxu1 }
 0x108   :  { %v1066_v32 = vpack.c.bf16 %v726_v26, %v725_v24  ;;  %v1145_v37 = vpop.f32.mrb[11].mxu0  ;;  %v1193_v38 = vpop.f32.mrb[11].mxu1 }
 0x109   :  { %1098 = vst [vmem:[%s1557_s3 + $0x8] sm:$0xff] %v1026_v31   ;;  %v679_v39 = vadd.f32 %v1143_v33, %v1472_v51  ;;  %v695_v40 = vadd.f32 %v1191_v34, %v1472_v51  ;;  %v1146_v41 = vadd.f32 %v1145_v37, %v1144_v35  ;;  %v1194_v42 = vadd.f32 %v1193_v38, %v1192_v36 }
 0x10a   :  { %1106 = vst [vmem:[%s1557_s3 + $0x48] sm:$0xff] %v1066_v32  }
 0x10b   :  { %v680_v43 = vadd.f32 %v1146_v41, %v1472_v51  ;;  %v696_v44 = vadd.f32 %v1194_v42, %v1472_v51  ;;  %v711_v45 = vmax.f32 %v679_v39, 0.0  ;;  %v727_v46 = vmax.f32 %v695_v40, 0.0 }
 0x10d   :  { %v712_v47 = vmax.f32 %v680_v43, 0.0  ;;  %v728_v48 = vmax.f32 %v696_v44, 0.0  ;;  %v1147_v49 = vpop.f32.mrb[12].mxu0  ;;  %v1195_v50 = vpop.f32.mrb[12].mxu1 }
 0x10e   :  { %v1148_v52 = vpop.f32.mrb[13].mxu0  ;;  %v1196_v53 = vpop.f32.mrb[13].mxu1 }
 0x10f   :  { %v1031_v54 = vpack.c.bf16 %v712_v47, %v711_v45  ;;  %v1071_v55 = vpack.c.bf16 %v728_v48, %v727_v46  ;;  %v1149_v56 = vadd.f32 %v1148_v52, %v1147_v49  ;;  %v1197_v57 = vadd.f32 %v1196_v53, %v1195_v50  ;;  %v1150_v58 = vpop.f32.mrb[14].mxu0  ;;  %v1198_v59 = vpop.f32.mrb[14].mxu1 }
 0x110   :  { %v1151_v60 = vpop.f32.mrb[15].mxu0  ;;  %v1199_v61 = vpop.f32.mrb[15].mxu1 }
 0x111   :  { %1099 = vst [vmem:[%s1557_s3 + $0x10] sm:$0xff] %v1031_v54   ;;  %1107 = vst [vmem:[%s1557_s3 + $0x50] sm:$0xff] %v1071_v55   ;;  %v681_v62 = vadd.f32 %v1149_v56, %v1472_v51  ;;  %v697_v63 = vadd.f32 %v1197_v57, %v1472_v51  ;;  %v1152_v0 = vadd.f32 %v1151_v60, %v1150_v58 }
 0x112   :  { %v1200_v1 = vadd.f32 %v1199_v61, %v1198_v59 }
 0x113   :  { %v682_v2 = vadd.f32 %v1152_v0, %v1472_v51  ;;  %v713_v4 = vmax.f32 %v681_v62, 0.0  ;;  %v729_v5 = vmax.f32 %v697_v63, 0.0 }
 0x114   :  { %v698_v3 = vadd.f32 %v1200_v1, %v1472_v51 }
 0x115   :  { %v714_v6 = vmax.f32 %v682_v2, 0.0  ;;  %v1153_v8 = vpop.f32.mrb[16].mxu0  ;;  %v1201_v9 = vpop.f32.mrb[16].mxu1 }
 0x116   :  { %v730_v7 = vmax.f32 %v698_v3, 0.0  ;;  %v1154_v10 = vpop.f32.mrb[17].mxu0  ;;  %v1202_v11 = vpop.f32.mrb[17].mxu1 }
 0x117   :  { %v1036_v12 = vpack.c.bf16 %v714_v6, %v713_v4  ;;  %v1155_v14 = vadd.f32 %v1154_v10, %v1153_v8  ;;  %v1203_v15 = vadd.f32 %v1202_v11, %v1201_v9  ;;  %v1156_v16 = vpop.f32.mrb[18].mxu0  ;;  %v1204_v17 = vpop.f32.mrb[18].mxu1 }
 0x118   :  { %v1076_v13 = vpack.c.bf16 %v730_v7, %v729_v5  ;;  %v1157_v18 = vpop.f32.mrb[19].mxu0  ;;  %v1205_v19 = vpop.f32.mrb[19].mxu1 }
 0x119   :  { %1100 = vst [vmem:[%s1557_s3 + $0x18] sm:$0xff] %v1036_v12   ;;  %v683_v20 = vadd.f32 %v1155_v14, %v1472_v51  ;;  %v699_v21 = vadd.f32 %v1203_v15, %v1472_v51  ;;  %v1158_v22 = vadd.f32 %v1157_v18, %v1156_v16  ;;  %v1206_v23 = vadd.f32 %v1205_v19, %v1204_v17 }
 0x11a   :  { %1108 = vst [vmem:[%s1557_s3 + $0x58] sm:$0xff] %v1076_v13  }
 0x11b   :  { %v684_v24 = vadd.f32 %v1158_v22, %v1472_v51  ;;  %v700_v25 = vadd.f32 %v1206_v23, %v1472_v51  ;;  %v715_v26 = vmax.f32 %v683_v20, 0.0  ;;  %v731_v27 = vmax.f32 %v699_v21, 0.0 }
 0x11d   :  { %v716_v28 = vmax.f32 %v684_v24, 0.0  ;;  %v732_v29 = vmax.f32 %v700_v25, 0.0  ;;  %v1159_v30 = vpop.f32.mrb[20].mxu0  ;;  %v1207_v31 = vpop.f32.mrb[20].mxu1 }
 0x11e   :  { %v1160_v32 = vpop.f32.mrb[21].mxu0  ;;  %v1208_v33 = vpop.f32.mrb[21].mxu1 }
 0x11f   :  { %v1041_v34 = vpack.c.bf16 %v716_v28, %v715_v26  ;;  %v1081_v35 = vpack.c.bf16 %v732_v29, %v731_v27  ;;  %v1161_v36 = vadd.f32 %v1160_v32, %v1159_v30  ;;  %v1209_v37 = vadd.f32 %v1208_v33, %v1207_v31  ;;  %v1162_v38 = vpop.f32.mrb[22].mxu0  ;;  %v1210_v39 = vpop.f32.mrb[22].mxu1 }
 0x120   :  { %v1163_v40 = vpop.f32.mrb[23].mxu0  ;;  %v1211_v41 = vpop.f32.mrb[23].mxu1 }
 0x121   :  { %1101 = vst [vmem:[%s1557_s3 + $0x20] sm:$0xff] %v1041_v34   ;;  %1109 = vst [vmem:[%s1557_s3 + $0x60] sm:$0xff] %v1081_v35   ;;  %v685_v42 = vadd.f32 %v1161_v36, %v1472_v51  ;;  %v701_v43 = vadd.f32 %v1209_v37, %v1472_v51  ;;  %v1164_v44 = vadd.f32 %v1163_v40, %v1162_v38 }
 0x122   :  { %v1212_v45 = vadd.f32 %v1211_v41, %v1210_v39 }
 0x123   :  { %v686_v46 = vadd.f32 %v1164_v44, %v1472_v51  ;;  %v717_v48 = vmax.f32 %v685_v42, 0.0  ;;  %v733_v49 = vmax.f32 %v701_v43, 0.0 }
 0x124   :  { %v702_v47 = vadd.f32 %v1212_v45, %v1472_v51 }
 0x125   :  { %v718_v50 = vmax.f32 %v686_v46, 0.0  ;;  %v1165_v53 = vpop.f32.mrb[24].mxu0  ;;  %v1213_v54 = vpop.f32.mrb[24].mxu1 }
 0x126   :  { %v734_v52 = vmax.f32 %v702_v47, 0.0  ;;  %v1166_v55 = vpop.f32.mrb[25].mxu0  ;;  %v1214_v56 = vpop.f32.mrb[25].mxu1 }
 0x127   :  { %v1046_v57 = vpack.c.bf16 %v718_v50, %v717_v48  ;;  %v1167_v59 = vadd.f32 %v1166_v55, %v1165_v53  ;;  %v1215_v60 = vadd.f32 %v1214_v56, %v1213_v54  ;;  %v1168_v61 = vpop.f32.mrb[26].mxu0  ;;  %v1216_v62 = vpop.f32.mrb[26].mxu1 }
 0x128   :  { %v1086_v58 = vpack.c.bf16 %v734_v52, %v733_v49  ;;  %v1169_v63 = vpop.f32.mrb[27].mxu0  ;;  %v1217_v0 = vpop.f32.mrb[27].mxu1 }
 0x129   :  { %1102 = vst [vmem:[%s1557_s3 + $0x28] sm:$0xff] %v1046_v57   ;;  %v687_v1 = vadd.f32 %v1167_v59, %v1472_v51  ;;  %v703_v2 = vadd.f32 %v1215_v60, %v1472_v51  ;;  %v1170_v3 = vadd.f32 %v1169_v63, %v1168_v61  ;;  %v1218_v4 = vadd.f32 %v1217_v0, %v1216_v62 }
 0x12a   :  { %1110 = vst [vmem:[%s1557_s3 + $0x68] sm:$0xff] %v1086_v58  }
 0x12b   :  { %v688_v5 = vadd.f32 %v1170_v3, %v1472_v51  ;;  %v704_v6 = vadd.f32 %v1218_v4, %v1472_v51  ;;  %v719_v7 = vmax.f32 %v687_v1, 0.0  ;;  %v735_v8 = vmax.f32 %v703_v2, 0.0 }
 0x12d   :  { %v720_v9 = vmax.f32 %v688_v5, 0.0  ;;  %v736_v10 = vmax.f32 %v704_v6, 0.0  ;;  %v1171_v11 = vpop.f32.mrb[28].mxu0  ;;  %v1219_v12 = vpop.f32.mrb[28].mxu1 }
 0x12e   :  { %v1172_v13 = vpop.f32.mrb[29].mxu0  ;;  %v1220_v14 = vpop.f32.mrb[29].mxu1 }
 0x12f   :  { %v1051_v15 = vpack.c.bf16 %v720_v9, %v719_v7  ;;  %v1091_v16 = vpack.c.bf16 %v736_v10, %v735_v8  ;;  %v1173_v17 = vadd.f32 %v1172_v13, %v1171_v11  ;;  %v1221_v18 = vadd.f32 %v1220_v14, %v1219_v12  ;;  %v1174_v19 = vpop.f32.mrb[30].mxu0  ;;  %v1222_v20 = vpop.f32.mrb[30].mxu1 }
 0x130   :  { %v1175_v21 = vpop.f32.mrb[31].mxu0  ;;  %v1223_v22 = vpop.f32.mrb[31].mxu1 }
 0x131   :  { %1103 = vst [vmem:[%s1557_s3 + $0x30] sm:$0xff] %v1051_v15   ;;  %1111 = vst [vmem:[%s1557_s3 + $0x70] sm:$0xff] %v1091_v16   ;;  %v689_v23 = vadd.f32 %v1173_v17, %v1472_v51  ;;  %v705_v24 = vadd.f32 %v1221_v18, %v1472_v51  ;;  %v1176_v25 = vadd.f32 %v1175_v21, %v1174_v19 }
 0x132   :  { %v1224_v26 = vadd.f32 %v1223_v22, %v1222_v20 }
 0x133   :  { %v690_v27 = vadd.f32 %v1176_v25, %v1472_v51  ;;  %v721_v29 = vmax.f32 %v689_v23, 0.0  ;;  %v737_v30 = vmax.f32 %v705_v24, 0.0 }
 0x134   :  { %v706_v28 = vadd.f32 %v1224_v26, %v1472_v51 }
 0x135   :  { %v722_v31 = vmax.f32 %v690_v27, 0.0 }
 0x136   :  { %v738_v32 = vmax.f32 %v706_v28, 0.0 }
 0x137   :  { %v1056_v33 = vpack.c.bf16 %v722_v31, %v721_v29 }
 0x138   :  { %v1096_v34 = vpack.c.bf16 %v738_v32, %v737_v30 }
 0x139   :  { %1104 = vst [vmem:[%s1557_s3 + $0x38] sm:$0xff] %v1056_v33  }
 0x13a   :  { %1112 = vst [vmem:[%s1557_s3 + $0x78] sm:$0xff] %v1096_v34  }

// kernel: net_forward.20
= control target key start
LH: loop header
LB: loop body
LE: loop exit
PB: predicated region body
PF: predicated region fallthrough
CT: control target
= control target key end

     0   :  { %s959_s1 = inlined_call_operand.vmem [shape: bf16[128,128], index: 1, kind: input, shape index: {}]   ;;  %s960_s0 = inlined_call_operand.vmem [shape: bf16[256,128], index: 0, kind: input, shape index: {}]   ;;  %s961_s2 = inlined_call_operand.vmem [shape: bf16[256,128], index: 2, kind: output, shape index: {}]  }
   0x1   :  { %v800_v0 = vld [vmem:[%s959_s1] sm:$0xff]   ;;  %v801_v1 = vld [vmem:[%s959_s1 + $0x8] sm:$0xff]   ;;  %v802_v2 = vld [vmem:[%s959_s1 + $0x10] sm:$0xff]  }
   0x2   :  { %736 = vmatprep.subr.bf16.mxu0 %v800_v0  ;;  %784 = vmatprep.subr.bf16.mxu1 %v800_v0  ;;  %v803_v3 = vld [vmem:[%s959_s1 + $0x18] sm:$0xff]   ;;  %v808_v4 = vld [vmem:[%s960_s0] sm:$0xff]   ;;  %v805_v7 = vld [vmem:[%s959_s1 + $0x28] sm:$0xff]  }
   0x3   :  { %737 = vmatpush3.bf16.msra.mxu0 %v800_v0  ;;  %792 = vmatpush3.bf16.msra.mxu1 %v800_v0  ;;  %v809_v5 = vld [vmem:[%s960_s0 + $0x40] sm:$0xff]   ;;  %v806_v8 = vld [vmem:[%s959_s1 + $0x30] sm:$0xff]   ;;  %v807_v9 = vld [vmem:[%s959_s1 + $0x38] sm:$0xff]  }
   0x4   :  { %738 = vmatprep.subr.bf16.mxu0 %v801_v1  ;;  %785 = vmatprep.subr.bf16.mxu1 %v801_v1  ;;  %v804_v6 = vld [vmem:[%s959_s1 + $0x20] sm:$0xff]   ;;  %v810_v10 = vld [vmem:[%s960_s0 + $0x8] sm:$0xff]   ;;  %v812_v12 = vld [vmem:[%s960_s0 + $0x10] sm:$0xff]  }
   0x5   :  { %752 = vmatprep.mubr.bf16.mxu0 %v808_v4  ;;  %768 = vmatprep.mubr.bf16.mxu1 %v809_v5  ;;  %v811_v11 = vld [vmem:[%s960_s0 + $0x48] sm:$0xff]   ;;  %v813_v13 = vld [vmem:[%s960_s0 + $0x50] sm:$0xff]   ;;  %v814_v14 = vld [vmem:[%s960_s0 + $0x18] sm:$0xff]  }
   0x6   :  { %v815_v15 = vld [vmem:[%s960_s0 + $0x58] sm:$0xff]   ;;  %v816_v16 = vld [vmem:[%s960_s0 + $0x20] sm:$0xff]   ;;  %v818_v18 = vld [vmem:[%s960_s0 + $0x28] sm:$0xff]  }
   0x7   :  { %739 = vmatpush3.bf16.msra.mxu0 %v801_v1  ;;  %793 = vmatpush3.bf16.msra.mxu1 %v801_v1  ;;  %v817_v17 = vld [vmem:[%s960_s0 + $0x60] sm:$0xff]   ;;  %v819_v19 = vld [vmem:[%s960_s0 + $0x68] sm:$0xff]   ;;  %v820_v20 = vld [vmem:[%s960_s0 + $0x30] sm:$0xff]  }
   0x8   :  { %740 = vmatprep.subr.bf16.mxu0 %v802_v2  ;;  %786 = vmatprep.subr.bf16.mxu1 %v802_v2  ;;  %v821_v21 = vld [vmem:[%s960_s0 + $0x70] sm:$0xff]   ;;  %v822_v22 = vld [vmem:[%s960_s0 + $0x38] sm:$0xff]  }
   0x9   :  { %v823_v23 = vld [vmem:[%s960_s0 + $0x78] sm:$0xff]  }
   0xb   :  { %741 = vmatpush3.bf16.msra.mxu0 %v802_v2  ;;  %794 = vmatpush3.bf16.msra.mxu1 %v802_v2 }
   0xc   :  { %742 = vmatprep.subr.bf16.mxu0 %v803_v3  ;;  %787 = vmatprep.subr.bf16.mxu1 %v803_v3 }
   0xf   :  { %743 = vmatpush3.bf16.msra.mxu0 %v803_v3  ;;  %795 = vmatpush3.bf16.msra.mxu1 %v803_v3 }
  0x10   :  { %744 = vmatprep.subr.bf16.mxu0 %v804_v6  ;;  %788 = vmatprep.subr.bf16.mxu1 %v804_v6 }
  0x13   :  { %745 = vmatpush3.bf16.msra.mxu0 %v804_v6  ;;  %796 = vmatpush3.bf16.msra.mxu1 %v804_v6 }
  0x14   :  { %746 = vmatprep.subr.bf16.mxu0 %v805_v7  ;;  %789 = vmatprep.subr.bf16.mxu1 %v805_v7 }
  0x17   :  { %747 = vmatpush3.bf16.msra.mxu0 %v805_v7  ;;  %797 = vmatpush3.bf16.msra.mxu1 %v805_v7 }
  0x18   :  { %748 = vmatprep.subr.bf16.mxu0 %v806_v8  ;;  %790 = vmatprep.subr.bf16.mxu1 %v806_v8 }
  0x1b   :  { %749 = vmatpush3.bf16.msra.mxu0 %v806_v8  ;;  %798 = vmatpush3.bf16.msra.mxu1 %v806_v8 }
  0x1c   :  { %750 = vmatprep.subr.bf16.mxu0 %v807_v9  ;;  %791 = vmatprep.subr.bf16.mxu1 %v807_v9 }
  0x1f   :  { %751 = vmatpush3.bf16.msra.mxu0 %v807_v9  ;;  %799 = vmatpush3.bf16.msra.mxu1 %v807_v9 }
  0x22   :  { %753 = vmatmul.mubr.bf16.vlgmr.msra.gmra.mrb[0].mxu0 %v810_v10  ;;  %769 = vmatmul.mubr.bf16.vlgmr.msra.gmra.mrb[0].mxu1 %v811_v11 }
  0x23   :  { %756 = vmatprep.mubr.bf16.mxu0 %v812_v12  ;;  %772 = vmatprep.mubr.bf16.mxu1 %v813_v13 }
  0x2a   :  { %757 = vmatmul.mubr.bf16.gmra.mrb[4].mxu0 %v814_v14  ;;  %773 = vmatmul.mubr.bf16.gmra.mrb[4].mxu1 %v815_v15 }
  0x2b   :  { %760 = vmatprep.mubr.bf16.mxu0 %v816_v16  ;;  %776 = vmatprep.mubr.bf16.mxu1 %v817_v17 }
  0x32   :  { %761 = vmatmul.mubr.bf16.gmra.mrb[8].mxu0 %v818_v18  ;;  %777 = vmatmul.mubr.bf16.gmra.mrb[8].mxu1 %v819_v19 }
  0x33   :  { %764 = vmatprep.mubr.bf16.mxu0 %v820_v20  ;;  %780 = vmatprep.mubr.bf16.mxu1 %v821_v21 }
  0x3a   :  { %765 = vmatmul.mubr.bf16.gmra.mrb[12].mxu0 %v822_v22  ;;  %781 = vmatmul.mubr.bf16.gmra.mrb[12].mxu1 %v823_v23 }
  0xf5   :  { %v754_v24 = vpop.f32.mrb[0].mxu0  ;;  %v770_v25 = vpop.f32.mrb[0].mxu1 }
  0xf6   :  { %v238_v26 = vpop.f32.mrb[1].mxu0  ;;  %v302_v27 = vpop.f32.mrb[1].mxu1 }
  0xf7   :  { %v755_v28 = vpop.f32.mrb[2].mxu0  ;;  %v771_v29 = vpop.f32.mrb[2].mxu1 }
  0xf8   :  { %v625_v30 = vpack.c.bf16 %v755_v28, %v754_v24  ;;  %v665_v31 = vpack.c.bf16 %v771_v29, %v770_v25  ;;  %v241_v32 = vpop.f32.mrb[3].mxu0  ;;  %v305_v33 = vpop.f32.mrb[3].mxu1 }
  0xf9   :  { %v620_v34 = vpack.c.bf16 %v241_v32, %v238_v26  ;;  %v660_v35 = vpack.c.bf16 %v305_v33, %v302_v27 }
  0xfa   :  { %697 = vst [vmem:[%s961_s2 + $0x8] sm:$0xff] %v625_v30   ;;  %705 = vst [vmem:[%s961_s2 + $0x48] sm:$0xff] %v665_v31  }
  0xfb   :  { %621 = vst [vmem:[%s961_s2] sm:$0xff] %v620_v34   ;;  %704 = vst [vmem:[%s961_s2 + $0x40] sm:$0xff] %v660_v35  }
  0xfd   :  { %v758_v36 = vpop.f32.mrb[4].mxu0  ;;  %v774_v37 = vpop.f32.mrb[4].mxu1 }
  0xfe   :  { %v254_v38 = vpop.f32.mrb[5].mxu0  ;;  %v318_v39 = vpop.f32.mrb[5].mxu1 }
  0xff   :  { %v759_v40 = vpop.f32.mrb[6].mxu0  ;;  %v775_v41 = vpop.f32.mrb[6].mxu1 }
 0x100   :  { %v635_v42 = vpack.c.bf16 %v759_v40, %v758_v36  ;;  %v675_v43 = vpack.c.bf16 %v775_v41, %v774_v37  ;;  %v257_v44 = vpop.f32.mrb[7].mxu0  ;;  %v321_v45 = vpop.f32.mrb[7].mxu1 }
 0x101   :  { %v630_v46 = vpack.c.bf16 %v257_v44, %v254_v38  ;;  %v670_v47 = vpack.c.bf16 %v321_v45, %v318_v39 }
 0x102   :  { %699 = vst [vmem:[%s961_s2 + $0x18] sm:$0xff] %v635_v42   ;;  %707 = vst [vmem:[%s961_s2 + $0x58] sm:$0xff] %v675_v43  }
 0x103   :  { %698 = vst [vmem:[%s961_s2 + $0x10] sm:$0xff] %v630_v46   ;;  %706 = vst [vmem:[%s961_s2 + $0x50] sm:$0xff] %v670_v47  }
 0x105   :  { %v762_v48 = vpop.f32.mrb[8].mxu0  ;;  %v778_v49 = vpop.f32.mrb[8].mxu1 }
 0x106   :  { %v270_v50 = vpop.f32.mrb[9].mxu0  ;;  %v334_v51 = vpop.f32.mrb[9].mxu1 }
 0x107   :  { %v763_v52 = vpop.f32.mrb[10].mxu0  ;;  %v779_v53 = vpop.f32.mrb[10].mxu1 }
 0x108   :  { %v645_v54 = vpack.c.bf16 %v763_v52, %v762_v48  ;;  %v685_v55 = vpack.c.bf16 %v779_v53, %v778_v49  ;;  %v273_v56 = vpop.f32.mrb[11].mxu0  ;;  %v337_v57 = vpop.f32.mrb[11].mxu1 }
 0x109   :  { %v640_v58 = vpack.c.bf16 %v273_v56, %v270_v50  ;;  %v680_v59 = vpack.c.bf16 %v337_v57, %v334_v51 }
 0x10a   :  { %701 = vst [vmem:[%s961_s2 + $0x28] sm:$0xff] %v645_v54   ;;  %709 = vst [vmem:[%s961_s2 + $0x68] sm:$0xff] %v685_v55  }
 0x10b   :  { %700 = vst [vmem:[%s961_s2 + $0x20] sm:$0xff] %v640_v58   ;;  %708 = vst [vmem:[%s961_s2 + $0x60] sm:$0xff] %v680_v59  }
 0x10d   :  { %v766_v60 = vpop.f32.mrb[12].mxu0  ;;  %v782_v61 = vpop.f32.mrb[12].mxu1 }
 0x10e   :  { %v286_v62 = vpop.f32.mrb[13].mxu0  ;;  %v350_v63 = vpop.f32.mrb[13].mxu1 }
 0x10f   :  { %v767_v0 = vpop.f32.mrb[14].mxu0  ;;  %v783_v1 = vpop.f32.mrb[14].mxu1 }
 0x110   :  { %v655_v2 = vpack.c.bf16 %v767_v0, %v766_v60  ;;  %v695_v3 = vpack.c.bf16 %v783_v1, %v782_v61  ;;  %v289_v4 = vpop.f32.mrb[15].mxu0  ;;  %v353_v5 = vpop.f32.mrb[15].mxu1 }
 0x111   :  { %v650_v6 = vpack.c.bf16 %v289_v4, %v286_v62  ;;  %v690_v7 = vpack.c.bf16 %v353_v5, %v350_v63 }
 0x112   :  { %703 = vst [vmem:[%s961_s2 + $0x38] sm:$0xff] %v655_v2   ;;  %711 = vst [vmem:[%s961_s2 + $0x78] sm:$0xff] %v695_v3  }
 0x113   :  { %702 = vst [vmem:[%s961_s2 + $0x30] sm:$0xff] %v650_v6   ;;  %710 = vst [vmem:[%s961_s2 + $0x70] sm:$0xff] %v690_v7  }

// kernel: net_forward.21
= control target key start
LH: loop header
LB: loop body
LE: loop exit
PB: predicated region body
PF: predicated region fallthrough
CT: control target
= control target key end

     0   :  { %v707_v48 = vlaneseq  ;;  %s2185_s1 = inlined_call_operand.vmem [shape: bf16[256,128], index: 1, kind: input, shape index: {}]   ;;  %s2186_s0 = inlined_call_operand.vmem [shape: bf16[256,256], index: 0, kind: input, shape index: {}]   ;;  %s2187_s2 = inlined_call_operand.vmem [shape: f32[1,128], index: 2, kind: input, shape index: {}]   ;;  %s2188_s3 = inlined_call_operand.vmem [shape: f32[256,128], index: 3, kind: output, shape index: {}]  }
   0x1   :  { %v1309_v0 = vld [vmem:[%s2185_s1 + $0x40] sm:$0xff]   ;;  %v1311_v2 = vld [vmem:[%s2185_s1 + $0x48] sm:$0xff]   ;;  %v1313_v4 = vld [vmem:[%s2185_s1 + $0x50] sm:$0xff]  }
   0x2   :  { %v1310_v1 = vld [vmem:[%s2185_s1] sm:$0xff]   ;;  %1181 = vmatprep.subr.bf16.mxu0 %v1309_v0  ;;  %1293 = vmatprep.subr.bf16.mxu1 %v1309_v0  ;;  %v1312_v3 = vld [vmem:[%s2185_s1 + $0x8] sm:$0xff]   ;;  %v1314_v5 = vld [vmem:[%s2185_s1 + $0x10] sm:$0xff]   ;;  %v1665_v49 = vand.u32 127, %v707_v48 }
   0x3   :  { %1182 = vmatpush3.bf16.msra.mxu0 %v1310_v1  ;;  %1301 = vmatpush3.bf16.msra.mxu1 %v1310_v1  ;;  %v1315_v6 = vld [vmem:[%s2185_s1 + $0x58] sm:$0xff]   ;;  %v1317_v8 = vld [vmem:[%s2185_s1 + $0x60] sm:$0xff]   ;;  %v1319_v10 = vld [vmem:[%s2185_s1 + $0x68] sm:$0xff]  }
   0x4   :  { %1183 = vmatprep.subr.bf16.mxu0 %v1311_v2  ;;  %1294 = vmatprep.subr.bf16.mxu1 %v1311_v2  ;;  %v1316_v7 = vld [vmem:[%s2185_s1 + $0x18] sm:$0xff]   ;;  %v1318_v9 = vld [vmem:[%s2185_s1 + $0x20] sm:$0xff]   ;;  %v1320_v13 = vld [vmem:[%s2185_s1 + $0x28] sm:$0xff]   ;;  %vm709_vm0 = vcmp.lt.s32.totalorder %v1665_v49, 10 }
   0x5   :  { %v1327_v11 = vld [vmem:[%s2186_s0 + $0x4] ss:$8 sps:$4 sm:$0xff]   ;;  %v1321_v14 = vld [vmem:[%s2185_s1 + $0x70] sm:$0xff]   ;;  %v1323_v16 = vld [vmem:[%s2185_s1 + $0x78] sm:$0xff]  }
   0x6   :  { %v1330_v12 = vld [vmem:[%s2186_s0 + $0x84] ss:$8 sps:$4 sm:$0xff]   ;;  %440 = vmatprep.mubr.bf16.mxu0 %v1327_v11  ;;  %v1322_v15 = vld [vmem:[%s2185_s1 + $0x30] sm:$0xff]   ;;  %v1324_v17 = vld [vmem:[%s2185_s1 + $0x38] sm:$0xff]  }
   0x7   :  { %1184 = vmatpush3.bf16.msra.mxu0 %v1312_v3  ;;  %1302 = vmatpush3.bf16.msra.mxu1 %v1312_v3  ;;  %v1325_v18 = vld [vmem:[%s2186_s0] ss:$8 sps:$4 sm:$0xff]   ;;  %v1331_v20 = vld [vmem:[%s2186_s0 + $0x14] ss:$8 sps:$4 sm:$0xff]   ;;  %v1333_v22 = vld [vmem:[%s2186_s0 + $0x10] ss:$8 sps:$4 sm:$0xff]  }
   0x8   :  { %1185 = vmatprep.subr.bf16.mxu0 %v1313_v4  ;;  %1295 = vmatprep.subr.bf16.mxu1 %v1313_v4  ;;  %v1328_v19 = vld [vmem:[%s2186_s0 + $0x80] ss:$8 sps:$4 sm:$0xff]   ;;  %v1334_v21 = vld [vmem:[%s2186_s0 + $0x94] ss:$8 sps:$4 sm:$0xff]   ;;  %v1336_v23 = vld [vmem:[%s2186_s0 + $0x90] ss:$8 sps:$4 sm:$0xff]  }
   0x9   :  { %504 = vmatprep.mubr.bf16.mxu1 %v1330_v12  ;;  %v1337_v24 = vld [vmem:[%s2186_s0 + $0x24] ss:$8 sps:$4 sm:$0xff]   ;;  %v1339_v26 = vld [vmem:[%s2186_s0 + $0x20] ss:$8 sps:$4 sm:$0xff]   ;;  %v1343_v28 = vld [vmem:[%s2186_s0 + $0x34] ss:$8 sps:$4 sm:$0xff]  }
   0xa   :  { %v1340_v25 = vld [vmem:[%s2186_s0 + $0xa4] ss:$8 sps:$4 sm:$0xff]   ;;  %v1342_v27 = vld [vmem:[%s2186_s0 + $0xa0] ss:$8 sps:$4 sm:$0xff]   ;;  %v1346_v29 = vld [vmem:[%s2186_s0 + $0xb4] ss:$8 sps:$4 sm:$0xff]  }
   0xb   :  { %1186 = vmatpush3.bf16.msra.mxu0 %v1314_v5  ;;  %1303 = vmatpush3.bf16.msra.mxu1 %v1314_v5  ;;  %v1345_v30 = vld [vmem:[%s2186_s0 + $0x30] ss:$8 sps:$4 sm:$0xff]   ;;  %v1349_v32 = vld [vmem:[%s2186_s0 + $0x44] ss:$8 sps:$4 sm:$0xff]   ;;  %v1351_v34 = vld [vmem:[%s2186_s0 + $0x40] ss:$8 sps:$4 sm:$0xff]  }
   0xc   :  { %1187 = vmatprep.subr.bf16.mxu0 %v1315_v6  ;;  %1296 = vmatprep.subr.bf16.mxu1 %v1315_v6  ;;  %v1348_v31 = vld [vmem:[%s2186_s0 + $0xb0] ss:$8 sps:$4 sm:$0xff]   ;;  %v1352_v33 = vld [vmem:[%s2186_s0 + $0xc4] ss:$8 sps:$4 sm:$0xff]   ;;  %v1354_v35 = vld [vmem:[%s2186_s0 + $0xc0] ss:$8 sps:$4 sm:$0xff]  }
   0xd   :  { %v1355_v36 = vld [vmem:[%s2186_s0 + $0x54] ss:$8 sps:$4 sm:$0xff]   ;;  %v1357_v38 = vld [vmem:[%s2186_s0 + $0x50] ss:$8 sps:$4 sm:$0xff]   ;;  %v1361_v40 = vld [vmem:[%s2186_s0 + $0x64] ss:$8 sps:$4 sm:$0xff]  }
   0xe   :  { %v1358_v37 = vld [vmem:[%s2186_s0 + $0xd4] ss:$8 sps:$4 sm:$0xff]   ;;  %v1360_v39 = vld [vmem:[%s2186_s0 + $0xd0] ss:$8 sps:$4 sm:$0xff]   ;;  %v1364_v41 = vld [vmem:[%s2186_s0 + $0xe4] ss:$8 sps:$4 sm:$0xff]  }
   0xf   :  { %1188 = vmatpush3.bf16.msra.mxu0 %v1316_v7  ;;  %1304 = vmatpush3.bf16.msra.mxu1 %v1316_v7  ;;  %v1363_v42 = vld [vmem:[%s2186_s0 + $0x60] ss:$8 sps:$4 sm:$0xff]   ;;  %v1367_v44 = vld [vmem:[%s2186_s0 + $0x74] ss:$8 sps:$4 sm:$0xff]   ;;  %v1369_v46 = vld [vmem:[%s2186_s0 + $0x70] ss:$8 sps:$4 sm:$0xff]  }
  0x10   :  { %1189 = vmatprep.subr.bf16.mxu0 %v1317_v8  ;;  %1297 = vmatprep.subr.bf16.mxu1 %v1317_v8  ;;  %v1366_v43 = vld [vmem:[%s2186_s0 + $0xe0] ss:$8 sps:$4 sm:$0xff]   ;;  %v1370_v45 = vld [vmem:[%s2186_s0 + $0xf4] ss:$8 sps:$4 sm:$0xff]   ;;  %v1372_v47 = vld [vmem:[%s2186_s0 + $0xf0] ss:$8 sps:$4 sm:$0xff]  }
  0x11   :  { %v1670_v54 = vld [vmem:[%s2187_s2] ss:$0 sm:$0xff] }
  0x13   :  { %1190 = vmatpush3.bf16.msra.mxu0 %v1318_v9  ;;  %1305 = vmatpush3.bf16.msra.mxu1 %v1318_v9 }
  0x14   :  { %1191 = vmatprep.subr.bf16.mxu0 %v1319_v10  ;;  %1298 = vmatprep.subr.bf16.mxu1 %v1319_v10 }
  0x17   :  { %1192 = vmatpush3.bf16.msra.mxu0 %v1320_v13  ;;  %1306 = vmatpush3.bf16.msra.mxu1 %v1320_v13 }
  0x18   :  { %1193 = vmatprep.subr.bf16.mxu0 %v1321_v14  ;;  %1299 = vmatprep.subr.bf16.mxu1 %v1321_v14 }
  0x1b   :  { %1194 = vmatpush3.bf16.msra.mxu0 %v1322_v15  ;;  %1307 = vmatpush3.bf16.msra.mxu1 %v1322_v15 }
  0x1c   :  { %1195 = vmatprep.subr.bf16.mxu0 %v1323_v16  ;;  %1300 = vmatprep.subr.bf16.mxu1 %v1323_v16 }
  0x1f   :  { %1196 = vmatpush3.bf16.msra.mxu0 %v1324_v17  ;;  %1308 = vmatpush3.bf16.msra.mxu1 %v1324_v17 }
  0x22   :  { %441 = vmatmul.mubr.bf16.vlgmr.msra.gmra.mrb[0].mxu0 %v1325_v18  ;;  %505 = vmatmul.mubr.bf16.vlgmr.msra.gmra.mrb[0].mxu1 %v1328_v19 }
  0x23   :  { %448 = vmatprep.mubr.bf16.mxu0 %v1331_v20  ;;  %512 = vmatprep.mubr.bf16.mxu1 %v1334_v21 }
  0x2a   :  { %449 = vmatmul.mubr.bf16.gmra.mrb[4].mxu0 %v1333_v22  ;;  %513 = vmatmul.mubr.bf16.gmra.mrb[4].mxu1 %v1336_v23 }
  0x2b   :  { %456 = vmatprep.mubr.bf16.mxu0 %v1337_v24  ;;  %520 = vmatprep.mubr.bf16.mxu1 %v1340_v25 }
  0x32   :  { %457 = vmatmul.mubr.bf16.gmra.mrb[8].mxu0 %v1339_v26  ;;  %521 = vmatmul.mubr.bf16.gmra.mrb[8].mxu1 %v1342_v27 }
  0x33   :  { %464 = vmatprep.mubr.bf16.mxu0 %v1343_v28  ;;  %528 = vmatprep.mubr.bf16.mxu1 %v1346_v29 }
  0x3a   :  { %465 = vmatmul.mubr.bf16.gmra.mrb[12].mxu0 %v1345_v30  ;;  %529 = vmatmul.mubr.bf16.gmra.mrb[12].mxu1 %v1348_v31 }
  0x3b   :  { %472 = vmatprep.mubr.bf16.mxu0 %v1349_v32  ;;  %536 = vmatprep.mubr.bf16.mxu1 %v1352_v33 }
  0x42   :  { %473 = vmatmul.mubr.bf16.gmra.mrb[16].mxu0 %v1351_v34  ;;  %537 = vmatmul.mubr.bf16.gmra.mrb[16].mxu1 %v1354_v35 }
  0x43   :  { %480 = vmatprep.mubr.bf16.mxu0 %v1355_v36  ;;  %544 = vmatprep.mubr.bf16.mxu1 %v1358_v37 }
  0x4a   :  { %481 = vmatmul.mubr.bf16.gmra.mrb[20].mxu0 %v1357_v38  ;;  %545 = vmatmul.mubr.bf16.gmra.mrb[20].mxu1 %v1360_v39 }
  0x4b   :  { %488 = vmatprep.mubr.bf16.mxu0 %v1361_v40  ;;  %552 = vmatprep.mubr.bf16.mxu1 %v1364_v41 }
  0x52   :  { %489 = vmatmul.mubr.bf16.gmra.mrb[24].mxu0 %v1363_v42  ;;  %553 = vmatmul.mubr.bf16.gmra.mrb[24].mxu1 %v1366_v43 }
  0x53   :  { %496 = vmatprep.mubr.bf16.mxu0 %v1367_v44  ;;  %560 = vmatprep.mubr.bf16.mxu1 %v1370_v45 }
  0x5a   :  { %497 = vmatmul.mubr.bf16.gmra.mrb[28].mxu0 %v1369_v46  ;;  %561 = vmatmul.mubr.bf16.gmra.mrb[28].mxu1 %v1372_v47 }
  0xf5   :  { %v1197_v50 = vpop.f32.mrb[0].mxu0  ;;  %v1245_v51 = vpop.f32.mrb[0].mxu1 }
  0xf6   :  { %v1198_v52 = vpop.f32.mrb[1].mxu0  ;;  %v1246_v53 = vpop.f32.mrb[1].mxu1 }
  0xf7   :  { %v1199_v55 = vadd.f32 %v1198_v52, %v1197_v50  ;;  %v1247_v56 = vadd.f32 %v1246_v53, %v1245_v51  ;;  %v1200_v57 = vpop.f32.mrb[2].mxu0  ;;  %v1248_v58 = vpop.f32.mrb[2].mxu1 }
  0xf8   :  { %v1201_v59 = vpop.f32.mrb[3].mxu0  ;;  %v1249_v60 = vpop.f32.mrb[3].mxu1 }
  0xf9   :  { %v1202_v61 = vadd.f32 %v1201_v59, %v1200_v57  ;;  %v1250_v62 = vadd.f32 %v1249_v60, %v1248_v58  ;;  %v675_v63 = vadd.f32 %v1199_v55, %v1670_v54  ;;  %v691_v0 = vadd.f32 %v1247_v56, %v1670_v54 }
  0xfb   :  { %v1677_v1 = vsel %vm709_vm0, %v675_v63, -1e+30  ;;  %v692_v2 = vadd.f32 %v1250_v62, %v1670_v54  ;;  %v1687_v5 = vsel %vm709_vm0, %v691_v0, -1e+30  ;;  %v676_v12 = vadd.f32 %v1202_v61, %v1670_v54 }
  0xfc   :  { %742 = vmax.xlane.f32.xlu0 %v1677_v1 }
  0xfd   :  { %v1203_v3 = vpop.f32.mrb[4].mxu0  ;;  %v1683_v4 = vsel %vm709_vm0, %v692_v2, -1e+30  ;;  %v1251_v6 = vpop.f32.mrb[4].mxu1  ;;  %v1700_v21 = vsel %vm709_vm0, %v676_v12, -1e+30 }
  0xfe   :  { %776 = vmax.xlane.f32.xlu1 %v1683_v4  ;;  %v1204_v7 = vpop.f32.mrb[5].mxu0  ;;  %v1252_v8 = vpop.f32.mrb[5].mxu1 }
  0xff   :  { %v1205_v9 = vadd.f32 %v1204_v7, %v1203_v3  ;;  %v1206_v10 = vpop.f32.mrb[6].mxu0  ;;  %v1253_v11 = vadd.f32 %v1252_v8, %v1251_v6  ;;  %v1254_v13 = vpop.f32.mrb[6].mxu1 }
 0x100   :  { %774 = vmax.xlane.f32.xlu0 %v1687_v5  ;;  %v1207_v14 = vpop.f32.mrb[7].mxu0  ;;  %v1255_v15 = vpop.f32.mrb[7].mxu1 }
 0x101   :  { %v1208_v16 = vadd.f32 %v1207_v14, %v1206_v10  ;;  %v677_v17 = vadd.f32 %v1205_v9, %v1670_v54  ;;  %v1256_v18 = vadd.f32 %v1255_v15, %v1254_v13  ;;  %v693_v19 = vadd.f32 %v1253_v11, %v1670_v54 }
 0x103   :  { %v1696_v20 = vsel %vm709_vm0, %v677_v17, -1e+30  ;;  %v678_v22 = vadd.f32 %v1208_v16, %v1670_v54  ;;  %v694_v23 = vadd.f32 %v1256_v18, %v1670_v54  ;;  %v1712_v26 = vsel %vm709_vm0, %v693_v19, -1e+30 }
 0x104   :  { %746 = vmax.xlane.f32.xlu1 %v1696_v20  ;;  %744 = vmax.xlane.f32.xlu0 %v1700_v21 }
 0x105   :  { %v1209_v24 = vpop.f32.mrb[8].mxu0  ;;  %v1708_v25 = vsel %vm709_vm0, %v678_v22, -1e+30  ;;  %v1257_v27 = vpop.f32.mrb[8].mxu1  ;;  %v1718_v35 = vsel %vm709_vm0, %v694_v23, -1e+30 }
 0x106   :  { %v1210_v28 = vpop.f32.mrb[9].mxu0  ;;  %v1258_v29 = vpop.f32.mrb[9].mxu1 }
 0x107   :  { %v1211_v30 = vadd.f32 %v1210_v28, %v1209_v24  ;;  %v1212_v31 = vpop.f32.mrb[10].mxu0  ;;  %v1259_v32 = vadd.f32 %v1258_v29, %v1257_v27  ;;  %v1260_v33 = vpop.f32.mrb[10].mxu1 }
 0x108   :  { %748 = vmax.xlane.f32.xlu1 %v1708_v25  ;;  %778 = vmax.xlane.f32.xlu0 %v1712_v26  ;;  %v1213_v34 = vpop.f32.mrb[11].mxu0  ;;  %v1261_v36 = vpop.f32.mrb[11].mxu1 }
 0x109   :  { %v1214_v37 = vadd.f32 %v1213_v34, %v1212_v31  ;;  %v679_v38 = vadd.f32 %v1211_v30, %v1670_v54  ;;  %v1262_v39 = vadd.f32 %v1261_v36, %v1260_v33  ;;  %v695_v40 = vadd.f32 %v1259_v32, %v1670_v54 }
 0x10b   :  { %v1724_v41 = vsel %vm709_vm0, %v679_v38, -1e+30  ;;  %v680_v42 = vadd.f32 %v1214_v37, %v1670_v54  ;;  %v696_v43 = vadd.f32 %v1262_v39, %v1670_v54  ;;  %v1736_v46 = vsel %vm709_vm0, %v695_v40, -1e+30 }
 0x10c   :  { %780 = vmax.xlane.f32.xlu1 %v1718_v35  ;;  %750 = vmax.xlane.f32.xlu0 %v1724_v41 }
 0x10d   :  { %v1215_v44 = vpop.f32.mrb[12].mxu0  ;;  %v1732_v45 = vsel %vm709_vm0, %v680_v42, -1e+30  ;;  %v1263_v47 = vpop.f32.mrb[12].mxu1  ;;  %v1742_v57 = vsel %vm709_vm0, %v696_v43, -1e+30 }
 0x10e   :  { %v1216_v48 = vpop.f32.mrb[13].mxu0  ;;  %v1264_v50 = vpop.f32.mrb[13].mxu1 }
 0x10f   :  { %v1217_v51 = vadd.f32 %v1216_v48, %v1215_v44  ;;  %v1218_v52 = vpop.f32.mrb[14].mxu0  ;;  %v1265_v53 = vadd.f32 %v1264_v50, %v1263_v47  ;;  %v1266_v55 = vpop.f32.mrb[14].mxu1 }
 0x110   :  { %752 = vmax.xlane.f32.xlu1 %v1732_v45  ;;  %782 = vmax.xlane.f32.xlu0 %v1736_v46  ;;  %v1219_v56 = vpop.f32.mrb[15].mxu0  ;;  %v1267_v58 = vpop.f32.mrb[15].mxu1 }
 0x111   :  { %v1220_v59 = vadd.f32 %v1219_v56, %v1218_v52  ;;  %v681_v60 = vadd.f32 %v1217_v51, %v1670_v54  ;;  %v1268_v61 = vadd.f32 %v1267_v58, %v1266_v55  ;;  %v697_v62 = vadd.f32 %v1265_v53, %v1670_v54 }
 0x113   :  { %v1748_v63 = vsel %vm709_vm0, %v681_v60, -1e+30  ;;  %v682_v0 = vadd.f32 %v1220_v59, %v1670_v54  ;;  %v698_v2 = vadd.f32 %v1268_v61, %v1670_v54  ;;  %v1760_v7 = vsel %vm709_vm0, %v697_v62, -1e+30 }
 0x114   :  { %784 = vmax.xlane.f32.xlu1 %v1742_v57  ;;  %754 = vmax.xlane.f32.xlu0 %v1748_v63 }
 0x115   :  { %v1221_v3 = vpop.f32.mrb[16].mxu0  ;;  %v1756_v6 = vsel %vm709_vm0, %v682_v0, -1e+30  ;;  %v1269_v8 = vpop.f32.mrb[16].mxu1  ;;  %v1766_v16 = vsel %vm709_vm0, %v698_v2, -1e+30 }
 0x116   :  { %v1222_v9 = vpop.f32.mrb[17].mxu0  ;;  %v1270_v10 = vpop.f32.mrb[17].mxu1 }
 0x117   :  { %v1223_v11 = vadd.f32 %v1222_v9, %v1221_v3  ;;  %v1224_v12 = vpop.f32.mrb[18].mxu0  ;;  %v1271_v13 = vadd.f32 %v1270_v10, %v1269_v8  ;;  %v1272_v14 = vpop.f32.mrb[18].mxu1 }
 0x118   :  { %756 = vmax.xlane.f32.xlu1 %v1756_v6  ;;  %786 = vmax.xlane.f32.xlu0 %v1760_v7  ;;  %v1225_v15 = vpop.f32.mrb[19].mxu0  ;;  %v1273_v17 = vpop.f32.mrb[19].mxu1 }
 0x119   :  { %v1226_v18 = vadd.f32 %v1225_v15, %v1224_v12  ;;  %v683_v19 = vadd.f32 %v1223_v11, %v1670_v54  ;;  %v1274_v22 = vadd.f32 %v1273_v17, %v1272_v14  ;;  %v699_v23 = vadd.f32 %v1271_v13, %v1670_v54 }
 0x11b   :  { %v1772_v24 = vsel %vm709_vm0, %v683_v19, -1e+30  ;;  %v684_v27 = vadd.f32 %v1226_v18, %v1670_v54  ;;  %v700_v28 = vadd.f32 %v1274_v22, %v1670_v54  ;;  %v1784_v31 = vsel %vm709_vm0, %v699_v23, -1e+30 }
 0x11c   :  { %788 = vmax.xlane.f32.xlu1 %v1766_v16  ;;  %758 = vmax.xlane.f32.xlu0 %v1772_v24 }
 0x11d   :  { %v1227_v29 = vpop.f32.mrb[20].mxu0  ;;  %v1780_v30 = vsel %vm709_vm0, %v684_v27, -1e+30  ;;  %v1275_v32 = vpop.f32.mrb[20].mxu1  ;;  %v1790_v42 = vsel %vm709_vm0, %v700_v28, -1e+30 }
 0x11e   :  { %v1228_v33 = vpop.f32.mrb[21].mxu0  ;;  %v1276_v34 = vpop.f32.mrb[21].mxu1 }
 0x11f   :  { %v1229_v36 = vadd.f32 %v1228_v33, %v1227_v29  ;;  %v1230_v37 = vpop.f32.mrb[22].mxu0  ;;  %v1277_v38 = vadd.f32 %v1276_v34, %v1275_v32  ;;  %v1278_v39 = vpop.f32.mrb[22].mxu1 }
 0x120   :  { %760 = vmax.xlane.f32.xlu1 %v1780_v30  ;;  %790 = vmax.xlane.f32.xlu0 %v1784_v31  ;;  %v1231_v40 = vpop.f32.mrb[23].mxu0  ;;  %v1279_v43 = vpop.f32.mrb[23].mxu1 }
 0x121   :  { %v1232_v44 = vadd.f32 %v1231_v40, %v1230_v37  ;;  %v685_v47 = vadd.f32 %v1229_v36, %v1670_v54  ;;  %v1280_v48 = vadd.f32 %v1279_v43, %v1278_v39  ;;  %v701_v50 = vadd.f32 %v1277_v38, %v1670_v54 }
 0x123   :  { %v1796_v51 = vsel %vm709_vm0, %v685_v47, -1e+30  ;;  %v686_v52 = vadd.f32 %v1232_v44, %v1670_v54  ;;  %v702_v53 = vadd.f32 %v1280_v48, %v1670_v54  ;;  %v1808_v58 = vsel %vm709_vm0, %v701_v50, -1e+30 }
 0x124   :  { %792 = vmax.xlane.f32.xlu1 %v1790_v42  ;;  %762 = vmax.xlane.f32.xlu0 %v1796_v51 }
 0x125   :  { %v1233_v55 = vpop.f32.mrb[24].mxu0  ;;  %v1804_v56 = vsel %vm709_vm0, %v686_v52, -1e+30  ;;  %v1281_v59 = vpop.f32.mrb[24].mxu1  ;;  %v1814_v9 = vsel %vm709_vm0, %v702_v53, -1e+30 }
 0x126   :  { %v1234_v60 = vpop.f32.mrb[25].mxu0  ;;  %v1282_v61 = vpop.f32.mrb[25].mxu1 }
 0x127   :  { %v1235_v62 = vadd.f32 %v1234_v60, %v1233_v55  ;;  %v1236_v0 = vpop.f32.mrb[26].mxu0  ;;  %v1283_v2 = vadd.f32 %v1282_v61, %v1281_v59  ;;  %v1284_v3 = vpop.f32.mrb[26].mxu1 }
 0x128   :  { %764 = vmax.xlane.f32.xlu1 %v1804_v56  ;;  %794 = vmax.xlane.f32.xlu0 %v1808_v58  ;;  %v1237_v8 = vpop.f32.mrb[27].mxu0  ;;  %v1285_v10 = vpop.f32.mrb[27].mxu1 }
 0x129   :  { %v1238_v11 = vadd.f32 %v1237_v8, %v1236_v0  ;;  %v687_v12 = vadd.f32 %v1235_v62, %v1670_v54  ;;  %v1286_v13 = vadd.f32 %v1285_v10, %v1284_v3  ;;  %v703_v14 = vadd.f32 %v1283_v2, %v1670_v54 }
 0x12b   :  { %v1820_v15 = vsel %vm709_vm0, %v687_v12, -1e+30  ;;  %v688_v17 = vadd.f32 %v1238_v11, %v1670_v54  ;;  %v704_v18 = vadd.f32 %v1286_v13, %v1670_v54  ;;  %v1832_v23 = vsel %vm709_vm0, %v703_v14, -1e+30 }
 0x12c   :  { %796 = vmax.xlane.f32.xlu1 %v1814_v9  ;;  %766 = vmax.xlane.f32.xlu0 %v1820_v15 }
 0x12d   :  { %v1239_v19 = vpop.f32.mrb[28].mxu0  ;;  %v1828_v22 = vsel %vm709_vm0, %v688_v17, -1e+30  ;;  %v1287_v27 = vpop.f32.mrb[28].mxu1  ;;  %v1838_v38 = vsel %vm709_vm0, %v704_v18, -1e+30 }
 0x12e   :  { %v1240_v28 = vpop.f32.mrb[29].mxu0  ;;  %v1288_v29 = vpop.f32.mrb[29].mxu1 }
 0x12f   :  { %v1241_v32 = vadd.f32 %v1240_v28, %v1239_v19  ;;  %v1242_v33 = vpop.f32.mrb[30].mxu0  ;;  %v1289_v34 = vadd.f32 %v1288_v29, %v1287_v27  ;;  %v1290_v36 = vpop.f32.mrb[30].mxu1 }
 0x130   :  { %768 = vmax.xlane.f32.xlu1 %v1828_v22  ;;  %798 = vmax.xlane.f32.xlu0 %v1832_v23  ;;  %v1243_v37 = vpop.f32.mrb[31].mxu0  ;;  %v1291_v39 = vpop.f32.mrb[31].mxu1 }
 0x131   :  { %v1244_v40 = vadd.f32 %v1243_v37, %v1242_v33  ;;  %v689_v43 = vadd.f32 %v1241_v32, %v1670_v54  ;;  %v1292_v44 = vadd.f32 %v1291_v39, %v1290_v36  ;;  %v705_v47 = vadd.f32 %v1289_v34, %v1670_v54 }
 0x133   :  { %v1844_v48 = vsel %vm709_vm0, %v689_v43, -1e+30  ;;  %v690_v50 = vadd.f32 %v1244_v40, %v1670_v54  ;;  %v706_v52 = vadd.f32 %v1292_v44, %v1670_v54  ;;  %v1856_v55 = vsel %vm709_vm0, %v705_v47, -1e+30 }
 0x134   :  { %800 = vmax.xlane.f32.xlu1 %v1838_v38  ;;  %770 = vmax.xlane.f32.xlu0 %v1844_v48 }
 0x135   :  { %v1852_v53 = vsel %vm709_vm0, %v690_v50, -1e+30  ;;  %v1862_v59 = vsel %vm709_vm0, %v706_v52, -1e+30 }
 0x138   :  { %772 = vmax.xlane.f32.xlu1 %v1852_v53  ;;  %802 = vmax.xlane.f32.xlu0 %v1856_v55 }
 0x13c   :  { %804 = vmax.xlane.f32.xlu1 %v1862_v59 }
 0x189   :  { %v743_v54 = vpop.xlane.xlu0 %742 }
 0x18a   :  { %v1866_v60 = vsub.f32 %v1677_v1, %v743_v54 }
 0x18b   :  { %v777_v62 = vpop.xlane.xlu1 %776 }
 0x18c   :  { %v838_v61 = vmul.f32 1.442695, %v1866_v60  ;;  %v1874_v11 = vsub.f32 %v1683_v4, %v777_v62 }
 0x18d   :  { %v775_v0 = vpop.xlane.xlu0 %774 }
 0x18e   :  { %1373 = vpow2.f32 %v838_v61  ;;  %v1870_v2 = vsub.f32 %v1687_v5, %v775_v0  ;;  %v872_v18 = vmul.f32 1.442695, %v1874_v11 }
 0x190   :  { %v870_v3 = vmul.f32 1.442695, %v1870_v2 }
 0x191   :  { %v747_v8 = vpop.xlane.xlu1 %746  ;;  %v745_v10 = vpop.xlane.xlu0 %744 }
 0x192   :  { %1375 = vpow2.f32 %v870_v3  ;;  %v1877_v12 = vsub.f32 %v1696_v20, %v747_v8  ;;  %v1880_v1 = vsub.f32 %v1700_v21, %v745_v10 }
 0x194   :  { %v842_v13 = vmul.f32 1.442695, %v1877_v12  ;;  %v840_v14 = vmul.f32 1.442695, %v1880_v1 }
 0x195   :  { %v749_v5 = vpop.xlane.xlu1 %748  ;;  %v779_v17 = vpop.xlane.xlu0 %778 }
 0x196   :  { %1377 = vpow2.f32 %v842_v13  ;;  %v1886_v19 = vsub.f32 %v1708_v25, %v749_v5  ;;  %v1889_v4 = vsub.f32 %v1712_v26, %v779_v17 }
 0x197   :  { %1379 = vpow2.f32 %v840_v14 }
 0x198   :  { %v1374_v20 = vpop.eup %1373  ;;  %v874_v21 = vmul.f32 1.442695, %v1889_v4  ;;  %1381 = vpow2.f32 %v872_v18  ;;  %v844_v29 = vmul.f32 1.442695, %v1886_v19 }
 0x199   :  { %v781_v27 = vpop.xlane.xlu1 %780  ;;  %902 = vadd.xlane.f32.xlu0 %v1374_v20  ;;  %v751_v28 = vpop.xlane.xlu0 %750 }
 0x19a   :  { %v1894_v32 = vsub.f32 %v1718_v35, %v781_v27  ;;  %v1897_v33 = vsub.f32 %v1724_v41, %v751_v28  ;;  %1383 = vpow2.f32 %v874_v21 }
 0x19b   :  { %1385 = vpow2.f32 %v844_v29 }
 0x19c   :  { %v1376_v25 = vpop.eup %1375  ;;  %v846_v26 = vmul.f32 1.442695, %v1897_v33  ;;  %v876_v37 = vmul.f32 1.442695, %v1894_v32 }
 0x19d   :  { %v753_v34 = vpop.xlane.xlu1 %752  ;;  %934 = vadd.xlane.f32.xlu0 %v1376_v25  ;;  %v783_v36 = vpop.xlane.xlu0 %782 }
 0x19e   :  { %v1902_v39 = vsub.f32 %v1732_v45, %v753_v34  ;;  %v1905_v40 = vsub.f32 %v1736_v46, %v783_v36  ;;  %1387 = vpow2.f32 %v846_v26 }
 0x19f   :  { %1389 = vpow2.f32 %v876_v37 }
 0x1a0   :  { %v1378_v35 = vpop.eup %1377  ;;  %v878_v41 = vmul.f32 1.442695, %v1905_v40  ;;  %v848_v50 = vmul.f32 1.442695, %v1902_v39 }
 0x1a1   :  { %v1380_v43 = vpop.eup %1379  ;;  %v785_v44 = vpop.xlane.xlu1 %784  ;;  %906 = vadd.xlane.f32.xlu0 %v1378_v35 }
 0x1a2   :  { %v755_v47 = vpop.xlane.xlu0 %754  ;;  %v1910_v52 = vsub.f32 %v1742_v57, %v785_v44  ;;  %904 = vadd.xlane.f32.xlu1 %v1380_v43  ;;  %1391 = vpow2.f32 %v878_v41  ;;  %v1382_v46 = vpop.eup %1381 }
 0x1a3   :  { %v1913_v45 = vsub.f32 %v1748_v63, %v755_v47  ;;  %1393 = vpow2.f32 %v848_v50 }
 0x1a4   :  { %v1384_v61 = vpop.eup %1383  ;;  %v880_v3 = vmul.f32 1.442695, %v1910_v52 }
 0x1a5   :  { %v850_v54 = vmul.f32 1.442695, %v1913_v45  ;;  %v757_v62 = vpop.xlane.xlu1 %756  ;;  %938 = vadd.xlane.f32.xlu0 %v1384_v61  ;;  %v1386_v63 = vpop.eup %1385 }
 0x1a6   :  { %v787_v0 = vpop.xlane.xlu0 %786  ;;  %v1918_v8 = vsub.f32 %v1756_v6, %v757_v62  ;;  %936 = vadd.xlane.f32.xlu1 %v1382_v46 }
 0x1a7   :  { %v1921_v57 = vsub.f32 %v1760_v7, %v787_v0  ;;  %1395 = vpow2.f32 %v850_v54 }
 0x1a8   :  { %v1388_v13 = vpop.eup %1387  ;;  %1397 = vpow2.f32 %v880_v3  ;;  %v852_v17 = vmul.f32 1.442695, %v1918_v8 }
 0x1a9   :  { %v882_v10 = vmul.f32 1.442695, %v1921_v57  ;;  %v789_v14 = vpop.xlane.xlu1 %788  ;;  %910 = vadd.xlane.f32.xlu0 %v1388_v13  ;;  %v1390_v7 = vpop.eup %1389 }
 0x1aa   :  { %v759_v5 = vpop.xlane.xlu0 %758  ;;  %v1926_v18 = vsub.f32 %v1766_v16, %v789_v14  ;;  %908 = vadd.xlane.f32.xlu1 %v1386_v63 }
 0x1ab   :  { %v1929_v6 = vsub.f32 %v1772_v24, %v759_v5  ;;  %1399 = vpow2.f32 %v882_v10 }
 0x1ac   :  { %v1392_v21 = vpop.eup %1391  ;;  %1401 = vpow2.f32 %v852_v17  ;;  %v884_v29 = vmul.f32 1.442695, %v1926_v18 }
 0x1ad   :  { %v854_v20 = vmul.f32 1.442695, %v1929_v6  ;;  %v761_v27 = vpop.xlane.xlu1 %760  ;;  %942 = vadd.xlane.f32.xlu0 %v1392_v21  ;;  %v1394_v24 = vpop.eup %1393 }
 0x1ae   :  { %v791_v28 = vpop.xlane.xlu0 %790  ;;  %v1934_v25 = vsub.f32 %v1780_v30, %v761_v27  ;;  %940 = vadd.xlane.f32.xlu1 %v1390_v7 }
 0x1af   :  { %v1937_v16 = vsub.f32 %v1784_v31, %v791_v28  ;;  %1403 = vpow2.f32 %v854_v20 }
 0x1b0   :  { %1405 = vpow2.f32 %v884_v29  ;;  %v856_v35 = vmul.f32 1.442695, %v1934_v25 }
 0x1b1   :  { %v886_v26 = vmul.f32 1.442695, %v1937_v16  ;;  %v1396_v34 = vpop.eup %1395  ;;  %v793_v36 = vpop.xlane.xlu1 %792 }
 0x1b2   :  { %v763_v37 = vpop.xlane.xlu0 %762  ;;  %v1942_v41 = vsub.f32 %v1790_v42, %v793_v36  ;;  %912 = vadd.xlane.f32.xlu1 %v1394_v24  ;;  %914 = vadd.xlane.f32.xlu0 %v1396_v34  ;;  %v1398_v31 = vpop.eup %1397 }
 0x1b3   :  { %v1945_v30 = vsub.f32 %v1796_v51, %v763_v37  ;;  %1407 = vpow2.f32 %v886_v26 }
 0x1b4   :  { %1409 = vpow2.f32 %v856_v35  ;;  %v888_v46 = vmul.f32 1.442695, %v1942_v41 }
 0x1b5   :  { %v858_v43 = vmul.f32 1.442695, %v1945_v30  ;;  %v1400_v44 = vpop.eup %1399  ;;  %v765_v47 = vpop.xlane.xlu1 %764 }
 0x1b6   :  { %v795_v50 = vpop.xlane.xlu0 %794  ;;  %v1950_v54 = vsub.f32 %v1804_v56, %v765_v47  ;;  %944 = vadd.xlane.f32.xlu1 %v1398_v31  ;;  %946 = vadd.xlane.f32.xlu0 %v1400_v44  ;;  %v1402_v51 = vpop.eup %1401 }
 0x1b7   :  { %v1953_v42 = vsub.f32 %v1808_v58, %v795_v50  ;;  %1411 = vpow2.f32 %v858_v43 }
 0x1b8   :  { %1413 = vpow2.f32 %v888_v46  ;;  %v860_v63 = vmul.f32 1.442695, %v1950_v54 }
 0x1b9   :  { %v890_v61 = vmul.f32 1.442695, %v1953_v42  ;;  %v1404_v62 = vpop.eup %1403  ;;  %v797_v0 = vpop.xlane.xlu1 %796 }
 0x1ba   :  { %v767_v3 = vpop.xlane.xlu0 %766  ;;  %v1958_v10 = vsub.f32 %v1814_v9, %v797_v0  ;;  %916 = vadd.xlane.f32.xlu1 %v1402_v51  ;;  %918 = vadd.xlane.f32.xlu0 %v1404_v62  ;;  %v1406_v58 = vpop.eup %1405 }
 0x1bb   :  { %v1961_v56 = vsub.f32 %v1820_v15, %v767_v3  ;;  %1415 = vpow2.f32 %v890_v61 }
 0x1bc   :  { %1417 = vpow2.f32 %v860_v63  ;;  %v892_v7 = vmul.f32 1.442695, %v1958_v10 }
 0x1bd   :  { %v862_v13 = vmul.f32 1.442695, %v1961_v56  ;;  %v1408_v14 = vpop.eup %1407  ;;  %v769_v5 = vpop.xlane.xlu1 %768 }
 0x1be   :  { %v799_v17 = vpop.xlane.xlu0 %798  ;;  %v1966_v20 = vsub.f32 %v1828_v22, %v769_v5  ;;  %948 = vadd.xlane.f32.xlu1 %v1406_v58  ;;  %950 = vadd.xlane.f32.xlu0 %v1408_v14  ;;  %v1410_v15 = vpop.eup %1409 }
 0x1bf   :  { %v1969_v9 = vsub.f32 %v1832_v23, %v799_v17  ;;  %1419 = vpow2.f32 %v862_v13 }
 0x1c0   :  { %1421 = vpow2.f32 %v892_v7  ;;  %v864_v24 = vmul.f32 1.442695, %v1966_v20 }
 0x1c1   :  { %v894_v21 = vmul.f32 1.442695, %v1969_v9  ;;  %v1412_v27 = vpop.eup %1411  ;;  %v801_v28 = vpop.xlane.xlu1 %800 }
 0x1c2   :  { %v771_v29 = vpop.xlane.xlu0 %770  ;;  %v1974_v26 = vsub.f32 %v1838_v38, %v801_v28  ;;  %920 = vadd.xlane.f32.xlu1 %v1410_v15  ;;  %922 = vadd.xlane.f32.xlu0 %v1412_v27  ;;  %v1414_v23 = vpop.eup %1413 }
 0x1c3   :  { %v1977_v22 = vsub.f32 %v1844_v48, %v771_v29  ;;  %1423 = vpow2.f32 %v894_v21 }
 0x1c4   :  { %1425 = vpow2.f32 %v864_v24  ;;  %v896_v31 = vmul.f32 1.442695, %v1974_v26 }
 0x1c5   :  { %v866_v34 = vmul.f32 1.442695, %v1977_v22  ;;  %v1416_v36 = vpop.eup %1415  ;;  %v773_v37 = vpop.xlane.xlu1 %772 }
 0x1c6   :  { %v803_v35 = vpop.xlane.xlu0 %802  ;;  %952 = vadd.xlane.f32.xlu1 %v1414_v23  ;;  %954 = vadd.xlane.f32.xlu0 %v1416_v36  ;;  %v1985_v43 = vsub.f32 %v1852_v53, %v773_v37  ;;  %v1418_v48 = vpop.eup %1417 }
 0x1c7   :  { %v1982_v38 = vsub.f32 %v1856_v55, %v803_v35  ;;  %1427 = vpow2.f32 %v866_v34 }
 0x1c8   :  { %1429 = vpow2.f32 %v896_v31  ;;  %v868_v46 = vmul.f32 1.442695, %v1985_v43 }
 0x1c9   :  { %v898_v44 = vmul.f32 1.442695, %v1982_v38  ;;  %v1420_v47 = vpop.eup %1419  ;;  %v805_v50 = vpop.xlane.xlu1 %804 }
 0x1ca   :  { %924 = vadd.xlane.f32.xlu1 %v1418_v48  ;;  %926 = vadd.xlane.f32.xlu0 %v1420_v47  ;;  %v1990_v51 = vsub.f32 %v1862_v59, %v805_v50  ;;  %v1422_v55 = vpop.eup %1421 }
 0x1cb   :  { %1431 = vpow2.f32 %v898_v44 }
 0x1cc   :  { %1433 = vpow2.f32 %v868_v46  ;;  %v900_v53 = vmul.f32 1.442695, %v1990_v51 }
 0x1cd   :  { %v1424_v61 = vpop.eup %1423 }
 0x1ce   :  { %956 = vadd.xlane.f32.xlu1 %v1422_v55  ;;  %958 = vadd.xlane.f32.xlu0 %v1424_v61  ;;  %v1426_v62 = vpop.eup %1425  ;;  %1435 = vpow2.f32 %v900_v53 }
 0x1d1   :  { %v1428_v0 = vpop.eup %1427 }
 0x1d2   :  { %928 = vadd.xlane.f32.xlu1 %v1426_v62  ;;  %930 = vadd.xlane.f32.xlu0 %v1428_v0  ;;  %v1430_v3 = vpop.eup %1429 }
 0x1d5   :  { %v1432_v63 = vpop.eup %1431 }
 0x1d6   :  { %960 = vadd.xlane.f32.xlu1 %v1430_v3  ;;  %962 = vadd.xlane.f32.xlu0 %v1432_v63  ;;  %v1434_v58 = vpop.eup %1433 }
 0x1d8   :  { %v1436_v59 = vpop.eup %1435 }
 0x1da   :  { %932 = vadd.xlane.f32.xlu1 %v1434_v58 }
 0x1de   :  { %964 = vadd.xlane.f32.xlu1 %v1436_v59 }
 0x226   :  { %v903_v13 = vpop.xlane.xlu0 %902 }
 0x227   :  { %1437 = vlog2.f32 %v903_v13 }
 0x22a   :  { %v935_v14 = vpop.xlane.xlu0 %934 }
 0x22b   :  { %1439 = vlog2.f32 %v935_v14 }
 0x22e   :  { %v907_v5 = vpop.xlane.xlu0 %906 }
 0x22f   :  { %v905_v17 = vpop.xlane.xlu1 %904  ;;  %1441 = vlog2.f32 %v907_v5 }
 0x230   :  { %1443 = vlog2.f32 %v905_v17 }
 0x231   :  { %v1438_v7 = vpop.eup %1437 }
 0x232   :  { %v967_v15 = vmul.f32 0.6931472, %v1438_v7  ;;  %v939_v27 = vpop.xlane.xlu0 %938 }
 0x233   :  { %v937_v21 = vpop.xlane.xlu1 %936 }
 0x234   :  { %v1030_v28 = vsub.f32 %v1866_v60, %v967_v15  ;;  %1445 = vlog2.f32 %v937_v21 }
 0x235   :  { %v1440_v29 = vpop.eup %1439  ;;  %1447 = vlog2.f32 %v939_v27 }
 0x236   :  { %v1062_v24 = vsel %vm709_vm0, %v1030_v28, 0.0  ;;  %v999_v23 = vmul.f32 0.6931472, %v1440_v29  ;;  %v911_v36 = vpop.xlane.xlu0 %910 }
 0x237   :  { %1094 = vst [vmem:[%s2188_s3] sm:$0xff] %v1062_v24  ;;  %v909_v34 = vpop.xlane.xlu1 %908 }
 0x238   :  { %v1046_v37 = vsub.f32 %v1870_v2, %v999_v23  ;;  %1449 = vlog2.f32 %v909_v34 }
 0x239   :  { %v1442_v35 = vpop.eup %1441  ;;  %1451 = vlog2.f32 %v911_v36 }
 0x23a   :  { %v1444_v31 = vpop.eup %1443  ;;  %v1078_v60 = vsel %vm709_vm0, %v1046_v37, 0.0  ;;  %v971_v48 = vmul.f32 0.6931472, %v1442_v35  ;;  %v943_v50 = vpop.xlane.xlu0 %942 }
 0x23b   :  { %1110 = vst [vmem:[%s2188_s3 + $0x80] sm:$0xff] %v1078_v60  ;;  %v969_v44 = vmul.f32 0.6931472, %v1444_v31  ;;  %v941_v47 = vpop.xlane.xlu1 %940 }
 0x23c   :  { %v1032_v46 = vsub.f32 %v1877_v12, %v971_v48  ;;  %1453 = vlog2.f32 %v941_v47 }
 0x23d   :  { %v1031_v2 = vsub.f32 %v1880_v1, %v969_v44  ;;  %1455 = vlog2.f32 %v943_v50 }
 0x23e   :  { %v1446_v55 = vpop.eup %1445  ;;  %v1064_v61 = vsel %vm709_vm0, %v1032_v46, 0.0 }
 0x23f   :  { %v1448_v53 = vpop.eup %1447  ;;  %v1063_v62 = vsel %vm709_vm0, %v1031_v2, 0.0  ;;  %1096 = vst [vmem:[%s2188_s3 + $0x10] sm:$0xff] %v1064_v61  ;;  %v1001_v0 = vmul.f32 0.6931472, %v1446_v55  ;;  %v913_v3 = vpop.xlane.xlu1 %912 }
 0x240   :  { %v915_v63 = vpop.xlane.xlu0 %914  ;;  %1095 = vst [vmem:[%s2188_s3 + $0x8] sm:$0xff] %v1063_v62  ;;  %v1003_v12 = vmul.f32 0.6931472, %v1448_v53  ;;  %1457 = vlog2.f32 %v913_v3 }
 0x241   :  { %v1047_v1 = vsub.f32 %v1874_v11, %v1001_v0  ;;  %1459 = vlog2.f32 %v915_v63 }
 0x242   :  { %v1450_v58 = vpop.eup %1449  ;;  %v1048_v59 = vsub.f32 %v1889_v4, %v1003_v12 }
 0x243   :  { %v1452_v13 = vpop.eup %1451  ;;  %v1079_v14 = vsel %vm709_vm0, %v1047_v1, 0.0  ;;  %v973_v5 = vmul.f32 0.6931472, %v1450_v58  ;;  %v945_v17 = vpop.xlane.xlu1 %944 }
 0x244   :  { %v947_v7 = vpop.xlane.xlu0 %946  ;;  %1111 = vst [vmem:[%s2188_s3 + $0x88] sm:$0xff] %v1079_v14  ;;  %v1080_v15 = vsel %vm709_vm0, %v1048_v59, 0.0  ;;  %v975_v21 = vmul.f32 0.6931472, %v1452_v13  ;;  %1461 = vlog2.f32 %v945_v17 }
 0x245   :  { %1112 = vst [vmem:[%s2188_s3 + $0x90] sm:$0xff] %v1080_v15  ;;  %v1033_v11 = vsub.f32 %v1886_v19, %v973_v5  ;;  %1463 = vlog2.f32 %v947_v7 }
 0x246   :  { %v1454_v4 = vpop.eup %1453  ;;  %v1034_v27 = vsub.f32 %v1897_v33, %v975_v21 }
 0x247   :  { %v1456_v28 = vpop.eup %1455  ;;  %v1065_v29 = vsel %vm709_vm0, %v1033_v11, 0.0  ;;  %v1005_v24 = vmul.f32 0.6931472, %v1454_v4  ;;  %v917_v23 = vpop.xlane.xlu1 %916 }
 0x248   :  { %v919_v34 = vpop.xlane.xlu0 %918  ;;  %1097 = vst [vmem:[%s2188_s3 + $0x18] sm:$0xff] %v1065_v29  ;;  %v1066_v36 = vsel %vm709_vm0, %v1034_v27, 0.0  ;;  %v1007_v37 = vmul.f32 0.6931472, %v1456_v28  ;;  %1465 = vlog2.f32 %v917_v23 }
 0x249   :  { %1098 = vst [vmem:[%s2188_s3 + $0x20] sm:$0xff] %v1066_v36  ;;  %v1049_v19 = vsub.f32 %v1894_v32, %v1005_v24  ;;  %1467 = vlog2.f32 %v919_v34 }
 0x24a   :  { %v1458_v33 = vpop.eup %1457  ;;  %v1050_v35 = vsub.f32 %v1905_v40, %v1007_v37 }
 0x24b   :  { %v1460_v31 = vpop.eup %1459  ;;  %v1081_v60 = vsel %vm709_vm0, %v1049_v19, 0.0  ;;  %v977_v48 = vmul.f32 0.6931472, %v1458_v33  ;;  %v949_v44 = vpop.xlane.xlu1 %948 }
 0x24c   :  { %v951_v47 = vpop.xlane.xlu0 %950  ;;  %1113 = vst [vmem:[%s2188_s3 + $0x98] sm:$0xff] %v1081_v60  ;;  %v1082_v50 = vsel %vm709_vm0, %v1050_v35, 0.0  ;;  %v979_v46 = vmul.f32 0.6931472, %v1460_v31  ;;  %1469 = vlog2.f32 %v949_v44 }
 0x24d   :  { %1114 = vst [vmem:[%s2188_s3 + $0xa0] sm:$0xff] %v1082_v50  ;;  %v1035_v32 = vsub.f32 %v1902_v39, %v977_v48  ;;  %1471 = vlog2.f32 %v951_v47 }
 0x24e   :  { %v1462_v40 = vpop.eup %1461  ;;  %v1036_v2 = vsub.f32 %v1913_v45, %v979_v46 }
 0x24f   :  { %v1464_v55 = vpop.eup %1463  ;;  %v1067_v61 = vsel %vm709_vm0, %v1035_v32, 0.0  ;;  %v1009_v53 = vmul.f32 0.6931472, %v1462_v40  ;;  %v921_v62 = vpop.xlane.xlu1 %920 }
 0x250   :  { %v923_v0 = vpop.xlane.xlu0 %922  ;;  %1099 = vst [vmem:[%s2188_s3 + $0x28] sm:$0xff] %v1067_v61  ;;  %v1068_v3 = vsel %vm709_vm0, %v1036_v2, 0.0  ;;  %v1011_v63 = vmul.f32 0.6931472, %v1464_v55  ;;  %1473 = vlog2.f32 %v921_v62 }
 0x251   :  { %1100 = vst [vmem:[%s2188_s3 + $0x30] sm:$0xff] %v1068_v3  ;;  %v1051_v39 = vsub.f32 %v1910_v52, %v1009_v53  ;;  %1475 = vlog2.f32 %v923_v0 }
 0x252   :  { %v1466_v45 = vpop.eup %1465  ;;  %v1052_v12 = vsub.f32 %v1921_v57, %v1011_v63 }
 0x253   :  { %v1468_v1 = vpop.eup %1467  ;;  %v1083_v58 = vsel %vm709_vm0, %v1051_v39, 0.0  ;;  %v981_v59 = vmul.f32 0.6931472, %v1466_v45  ;;  %v953_v13 = vpop.xlane.xlu1 %952 }
 0x254   :  { %v955_v14 = vpop.xlane.xlu0 %954  ;;  %1115 = vst [vmem:[%s2188_s3 + $0xa8] sm:$0xff] %v1083_v58  ;;  %v1084_v5 = vsel %vm709_vm0, %v1052_v12, 0.0  ;;  %v983_v17 = vmul.f32 0.6931472, %v1468_v1  ;;  %1477 = vlog2.f32 %v953_v13 }
 0x255   :  { %1116 = vst [vmem:[%s2188_s3 + $0xb0] sm:$0xff] %v1084_v5  ;;  %v1037_v52 = vsub.f32 %v1918_v8, %v981_v59  ;;  %1479 = vlog2.f32 %v955_v14 }
 0x256   :  { %v1470_v57 = vpop.eup %1469  ;;  %v1038_v7 = vsub.f32 %v1929_v6, %v983_v17 }
 0x257   :  { %v1472_v15 = vpop.eup %1471  ;;  %v1069_v21 = vsel %vm709_vm0, %v1037_v52, 0.0  ;;  %v1013_v11 = vmul.f32 0.6931472, %v1470_v57  ;;  %v925_v4 = vpop.xlane.xlu1 %924 }
 0x258   :  { %v927_v27 = vpop.xlane.xlu0 %926  ;;  %1101 = vst [vmem:[%s2188_s3 + $0x38] sm:$0xff] %v1069_v21  ;;  %v1070_v28 = vsel %vm709_vm0, %v1038_v7, 0.0  ;;  %v1015_v29 = vmul.f32 0.6931472, %v1472_v15  ;;  %1481 = vlog2.f32 %v925_v4 }
 0x259   :  { %1102 = vst [vmem:[%s2188_s3 + $0x40] sm:$0xff] %v1070_v28  ;;  %v1053_v8 = vsub.f32 %v1926_v18, %v1013_v11  ;;  %1483 = vlog2.f32 %v927_v27 }
 0x25a   :  { %v1474_v6 = vpop.eup %1473  ;;  %v1054_v24 = vsub.f32 %v1937_v16, %v1015_v29 }
 0x25b   :  { %v1476_v23 = vpop.eup %1475  ;;  %v1085_v34 = vsel %vm709_vm0, %v1053_v8, 0.0  ;;  %v985_v36 = vmul.f32 0.6931472, %v1474_v6  ;;  %v957_v37 = vpop.xlane.xlu1 %956 }
 0x25c   :  { %v959_v19 = vpop.xlane.xlu0 %958  ;;  %1117 = vst [vmem:[%s2188_s3 + $0xb8] sm:$0xff] %v1085_v34  ;;  %v1086_v33 = vsel %vm709_vm0, %v1054_v24, 0.0  ;;  %v987_v35 = vmul.f32 0.6931472, %v1476_v23  ;;  %1485 = vlog2.f32 %v957_v37 }
 0x25d   :  { %1118 = vst [vmem:[%s2188_s3 + $0xc0] sm:$0xff] %v1086_v33  ;;  %v1039_v18 = vsub.f32 %v1934_v25, %v985_v36  ;;  %1487 = vlog2.f32 %v959_v19 }
 0x25e   :  { %v1478_v16 = vpop.eup %1477  ;;  %v1040_v31 = vsub.f32 %v1945_v30, %v987_v35 }
 0x25f   :  { %v1480_v60 = vpop.eup %1479  ;;  %v1071_v48 = vsel %vm709_vm0, %v1039_v18, 0.0  ;;  %v1017_v44 = vmul.f32 0.6931472, %v1478_v16  ;;  %v929_v47 = vpop.xlane.xlu1 %928 }
 0x260   :  { %v931_v50 = vpop.xlane.xlu0 %930  ;;  %1103 = vst [vmem:[%s2188_s3 + $0x48] sm:$0xff] %v1071_v48  ;;  %v1072_v46 = vsel %vm709_vm0, %v1040_v31, 0.0  ;;  %v1019_v32 = vmul.f32 0.6931472, %v1480_v60  ;;  %1489 = vlog2.f32 %v929_v47 }
 0x261   :  { %1104 = vst [vmem:[%s2188_s3 + $0x50] sm:$0xff] %v1072_v46  ;;  %v1055_v25 = vsub.f32 %v1942_v41, %v1017_v44  ;;  %1491 = vlog2.f32 %v931_v50 }
 0x262   :  { %v1482_v30 = vpop.eup %1481  ;;  %v1056_v40 = vsub.f32 %v1953_v42, %v1019_v32 }
 0x263   :  { %v1484_v2 = vpop.eup %1483  ;;  %v1087_v55 = vsel %vm709_vm0, %v1055_v25, 0.0  ;;  %v989_v61 = vmul.f32 0.6931472, %v1482_v30  ;;  %v961_v53 = vpop.xlane.xlu1 %960 }
 0x264   :  { %v963_v62 = vpop.xlane.xlu0 %962  ;;  %1119 = vst [vmem:[%s2188_s3 + $0xc8] sm:$0xff] %v1087_v55  ;;  %v1088_v0 = vsel %vm709_vm0, %v1056_v40, 0.0  ;;  %v991_v3 = vmul.f32 0.6931472, %v1484_v2  ;;  %1493 = vlog2.f32 %v961_v53 }
 0x265   :  { %1120 = vst [vmem:[%s2188_s3 + $0xd0] sm:$0xff] %v1088_v0  ;;  %v1041_v41 = vsub.f32 %v1950_v54, %v989_v61  ;;  %1495 = vlog2.f32 %v963_v62 }
 0x266   :  { %v1486_v42 = vpop.eup %1485  ;;  %v1042_v63 = vsub.f32 %v1961_v56, %v991_v3 }
 0x267   :  { %v1488_v39 = vpop.eup %1487  ;;  %v1073_v45 = vsel %vm709_vm0, %v1041_v41, 0.0  ;;  %v1021_v12 = vmul.f32 0.6931472, %v1486_v42  ;;  %v933_v1 = vpop.xlane.xlu1 %932 }
 0x268   :  { %1105 = vst [vmem:[%s2188_s3 + $0x58] sm:$0xff] %v1073_v45  ;;  %v1074_v58 = vsel %vm709_vm0, %v1042_v63, 0.0  ;;  %v1023_v59 = vmul.f32 0.6931472, %v1488_v39  ;;  %1497 = vlog2.f32 %v933_v1 }
 0x269   :  { %1106 = vst [vmem:[%s2188_s3 + $0x60] sm:$0xff] %v1074_v58  ;;  %v1057_v54 = vsub.f32 %v1958_v10, %v1021_v12 }
 0x26a   :  { %v1490_v56 = vpop.eup %1489  ;;  %v1058_v13 = vsub.f32 %v1969_v9, %v1023_v59 }
 0x26b   :  { %v1492_v14 = vpop.eup %1491  ;;  %v1089_v5 = vsel %vm709_vm0, %v1057_v54, 0.0  ;;  %v993_v17 = vmul.f32 0.6931472, %v1490_v56  ;;  %v965_v52 = vpop.xlane.xlu1 %964 }
 0x26c   :  { %1121 = vst [vmem:[%s2188_s3 + $0xd8] sm:$0xff] %v1089_v5  ;;  %v1090_v57 = vsel %vm709_vm0, %v1058_v13, 0.0  ;;  %v995_v7 = vmul.f32 0.6931472, %v1492_v14  ;;  %1499 = vlog2.f32 %v965_v52 }
 0x26d   :  { %1122 = vst [vmem:[%s2188_s3 + $0xe0] sm:$0xff] %v1090_v57  ;;  %v1043_v10 = vsub.f32 %v1966_v20, %v993_v17 }
 0x26e   :  { %v1494_v9 = vpop.eup %1493  ;;  %v1044_v15 = vsub.f32 %v1977_v22, %v995_v7 }
 0x26f   :  { %v1496_v21 = vpop.eup %1495  ;;  %v1075_v11 = vsel %vm709_vm0, %v1043_v10, 0.0  ;;  %v1025_v4 = vmul.f32 0.6931472, %v1494_v9 }
 0x270   :  { %1107 = vst [vmem:[%s2188_s3 + $0x68] sm:$0xff] %v1075_v11  ;;  %v1076_v27 = vsel %vm709_vm0, %v1044_v15, 0.0  ;;  %v1027_v28 = vmul.f32 0.6931472, %v1496_v21 }
 0x271   :  { %1108 = vst [vmem:[%s2188_s3 + $0x70] sm:$0xff] %v1076_v27  ;;  %v1059_v20 = vsub.f32 %v1974_v26, %v1025_v4 }
 0x272   :  { %v1498_v22 = vpop.eup %1497  ;;  %v1060_v29 = vsub.f32 %v1982_v38, %v1027_v28 }
 0x273   :  { %v1091_v8 = vsel %vm709_vm0, %v1059_v20, 0.0  ;;  %v997_v6 = vmul.f32 0.6931472, %v1498_v22 }
 0x274   :  { %1123 = vst [vmem:[%s2188_s3 + $0xe8] sm:$0xff] %v1091_v8  ;;  %v1092_v24 = vsel %vm709_vm0, %v1060_v29, 0.0 }
 0x275   :  { %1124 = vst [vmem:[%s2188_s3 + $0xf0] sm:$0xff] %v1092_v24  ;;  %v1045_v26 = vsub.f32 %v1985_v43, %v997_v6 }
 0x276   :  { %v1500_v23 = vpop.eup %1499 }
 0x277   :  { %v1077_v38 = vsel %vm709_vm0, %v1045_v26, 0.0  ;;  %v1029_v34 = vmul.f32 0.6931472, %v1500_v23 }
 0x278   :  { %1109 = vst [vmem:[%s2188_s3 + $0x78] sm:$0xff] %v1077_v38 }
 0x279   :  { %v1061_v36 = vsub.f32 %v1990_v51, %v1029_v34 }
 0x27b   :  { %v1093_v37 = vsel %vm709_vm0, %v1061_v36, 0.0 }
 0x27c   :  { %1125 = vst [vmem:[%s2188_s3 + $0xf8] sm:$0xff] %v1093_v37 }

</bundles_post_ra>
